<compile_context>
chip_gen: v5e
topology: v5e:2x2
jax: 0.10.0
libtpu: 0.0.40
codegen_flags: <defaults>
</compile_context>

<pallas_src>
import jax
import jax.numpy as jnp
import numpy as np
from jax.experimental import pallas as pl
from jax.experimental.pallas import tpu as pltpu

# ---- model hyper-parameters (match the PyTorch module) ----
CONTEXT_LENGTH = 94
INST_LENGTH = 39

OUT = 10      # `out`
CH1 = 16      # conv1 out channels
CK2 = 3       # conv2 kernel size
CH2 = 16      # conv2 out channels
CK3 = 3       # conv3 kernel size
CH3 = 16      # conv3 out channels
F1 = 32       # fc1 hidden size

L1 = CONTEXT_LENGTH - 1            # 93  (length after the conv1 loop)
L2 = L1 - CK2 + 1                  # 91
L3 = L2 - CK3 + 1                  # 89
F1_INPUT = CH3 * (CONTEXT_LENGTH - 1 - CK2 - CK3 + 2)   # ch3 * 89
assert F1_INPUT == CH3 * L3


# --------------------------------------------------------------------------
# Kernel: one batch tile (TB samples) per grid step, everything fused.
# --------------------------------------------------------------------------
def _cnn2p_kernel(x_ref, w1_ref, b1_ref, w2_ref, b2_ref, w3_ref, b3_ref,
                  wf1_ref, bf1_ref, wf2_ref, bf2_ref, out_ref):
    f32 = jnp.float32
    TB = out_ref.shape[1]                    # batch tile on lanes (multiple of 128)

    # ---- conv1:  y1[:, l*TB + b] = W1_tap1 @ x[:, (l+1)*TB + b]
    #                               + W1_tap0 @ x[:, b] + b1 ----
    t0 = jnp.dot(w1_ref[0], x_ref[:, :TB], preferred_element_type=f32) + b1_ref[...]   # (CH1, TB)
    t0_tiled = jnp.concatenate([t0] * L1, axis=1)                                      # (CH1, L1*TB)
    y1 = jnp.dot(w1_ref[1], x_ref[:, TB:], preferred_element_type=f32) + t0_tiled
    y1 = jnp.maximum(y1, 0.0)                                                          # (CH1, L1*TB)

    # ---- conv2: taps fused -> single (CH2, CH1*CK2) @ (CH1*CK2, L2*TB) matmul ----
    c2 = L2 * TB
    slab2 = jnp.concatenate([y1[:, k * TB:k * TB + c2] for k in range(CK2)], axis=0)   # (CH1*CK2, L2*TB)
    y2 = jnp.dot(w2_ref[...], slab2, preferred_element_type=f32) + b2_ref[...]
    y2 = jnp.maximum(y2, 0.0)                                                          # (CH2, L2*TB)

    # ---- conv3: same fused-tap trick ----
    c3 = L3 * TB
    slab3 = jnp.concatenate([y2[:, k * TB:k * TB + c3] for k in range(CK3)], axis=0)   # (CH2*CK3, L3*TB)
    y3 = jnp.dot(w3_ref[...], slab3, preferred_element_type=f32) + b3_ref[...]
    y3 = jnp.maximum(y3, 0.0)                                                          # (CH3, L3*TB)

    # ---- fc1: regroup lane tiles (CH3, L3*TB) -> (L3*CH3, TB), one GEMM ----
    # (all slices are lane-tile aligned, so this is a vreg regrouping, not a relayout)
    stacked = jnp.concatenate([y3[:, l * TB:(l + 1) * TB] for l in range(L3)], axis=0)  # (L3*CH3, TB)
    h = jnp.dot(wf1_ref[...], stacked, preferred_element_type=f32) + bf1_ref[...]
    h = jnp.maximum(h, 0.0)                                                             # (F1, TB)

    # ---- fc2 (lane-dense transposed output (OUT, TB)) ----
    out_ref[...] = jnp.dot(wf2_ref[...], h, preferred_element_type=f32) + bf2_ref[...]


# --------------------------------------------------------------------------
# Wrapper: batch padding + layout plumbing + pallas_call.
# --------------------------------------------------------------------------
def cnn2p_forward(x, kernel_params, *, block_batch=None):
    """x: (B, INST_LENGTH, CONTEXT_LENGTH) f32  ->  (B, OUT) f32."""
    (w1s, b1, w2f, b2, w3f, b3, wf1a, bf1, wf2, bf2) = kernel_params
    B = x.shape[0]
    TB = block_batch if block_batch is not None else (128 if B <= 128 else 256)
    assert TB % 128 == 0
    nb = pl.cdiv(B, TB)
    Bp = nb * TB
    if Bp != B:
        x = jnp.pad(x, ((0, Bp - B), (0, 0), (0, 0)))

    # (Bp, C, P) -> (C, nb*P*TB) with column order (block, position, batch-in-block)
    xp = x.reshape(nb, TB, INST_LENGTH, CONTEXT_LENGTH)
    xp = jnp.transpose(xp, (2, 0, 3, 1))
    xp = xp.reshape(INST_LENGTH, nb * CONTEXT_LENGTH * TB)

    xcols = CONTEXT_LENGTH * TB

    def full_spec(shape):
        return pl.BlockSpec(shape, lambda *_: (0,) * len(shape))

    in_specs = [
        pl.BlockSpec((INST_LENGTH, xcols), lambda i: (0, i)),     # x slab (per batch tile)
        full_spec((2, CH1, INST_LENGTH)),                         # conv1 taps [tap0, tap1]
        full_spec((CH1, 1)),                                      # b1
        full_spec((CH2, CK2 * CH1)),                              # conv2 weight, taps fused
        full_spec((CH2, 1)),                                      # b2
        full_spec((CH3, CK3 * CH2)),                              # conv3 weight, taps fused
        full_spec((CH3, 1)),                                      # b3
        full_spec((F1, L3 * CH3)),                                # fc1 weight, (l, c)-ordered cols
        full_spec((F1, 1)),                                       # bf1
        full_spec((OUT, F1)),                                     # fc2 weight
        full_spec((OUT, 1)),                                      # bf2
    ]

    out_t = pl.pallas_call(
        _cnn2p_kernel,
        out_shape=jax.ShapeDtypeStruct((OUT, Bp), jnp.float32),
        grid_spec=pltpu.PrefetchScalarGridSpec(
            num_scalar_prefetch=0,
            grid=(nb,),
            in_specs=in_specs,
            out_specs=pl.BlockSpec((OUT, TB), lambda i: (0, i)),
        ),
        compiler_params=pltpu.CompilerParams(
            dimension_semantics=("parallel",),        # megacore-shard the batch tiles
            vmem_limit_bytes=40 * 1024 * 1024,
        ),
    )(xp, w1s, b1, w2f, b2, w3f, b3, wf1a, bf1, wf2, bf2)

    return out_t.T[:B]                                            # (B, OUT)


# ---------------- parameter construction (deterministic, PyTorch-style init) ----------------
def init_params(key):
    def uniform(k, shape, fan_in):
        bound = 1.0 / np.sqrt(fan_in)
        return jax.random.uniform(k, shape, jnp.float32, -bound, bound)

    ks = jax.random.split(key, 10)
    # PyTorch-shaped parameters
    w1_t = uniform(ks[0], (CH1, INST_LENGTH, 2), INST_LENGTH * 2)
    b1_t = uniform(ks[1], (CH1,), INST_LENGTH * 2)
    w2_t = uniform(ks[2], (CH2, CH1, CK2), CH1 * CK2)
    b2_t = uniform(ks[3], (CH2,), CH1 * CK2)
    w3_t = uniform(ks[4], (CH3, CH2, CK3), CH2 * CK3)
    b3_t = uniform(ks[5], (CH3,), CH2 * CK3)
    wf1_t = uniform(ks[6], (F1, F1_INPUT), F1_INPUT)
    bf1_t = uniform(ks[7], (F1,), F1_INPUT)
    wf2_t = uniform(ks[8], (OUT, F1), F1)
    bf2_t = uniform(ks[9], (OUT,), F1)

    torch_params = (w1_t, b1_t, w2_t, b2_t, w3_t, b3_t, wf1_t, bf1_t, wf2_t, bf2_t)

    # Glue: repack into kernel-friendly layouts (done once, outside the kernel).
    w1s = jnp.transpose(w1_t, (2, 0, 1))                                  # (2, CH1, INST)  [tap0, tap1]
    b1 = b1_t.reshape(CH1, 1)
    # fused conv taps: column index = k*C_in + ci
    w2f = jnp.transpose(w2_t, (0, 2, 1)).reshape(CH2, CK2 * CH1)          # (CH2, CK2*CH1)
    b2 = b2_t.reshape(CH2, 1)
    w3f = jnp.transpose(w3_t, (0, 2, 1)).reshape(CH3, CK3 * CH2)          # (CH3, CK3*CH2)
    b3 = b3_t.reshape(CH3, 1)
    # fc1: kernel stacks y3 rows as (l*CH3 + c); torch flatten is (c*L3 + l)
    wf1a = jnp.transpose(wf1_t.reshape(F1, CH3, L3), (0, 2, 1)).reshape(F1, L3 * CH3)
    bf1 = bf1_t.reshape(F1, 1)
    wf2 = wf2_t                                                           # (OUT, F1)
    bf2 = bf2_t.reshape(OUT, 1)

    kernel_params = (w1s, b1, w2f, b2, w3f, b3, wf1a, bf1, wf2, bf2)
    return torch_params, kernel_params


# ---------------- pure-JAX reference (mirrors the PyTorch forward) ----------------
def reference_forward(x, torch_params):
    (w1, b1, w2, b2, w3, b3, wf1, bf1, wf2, bf2) = torch_params
    B = x.shape[0]
    # conv1 loop over pairs (x[:,:,0], x[:,:,i])
    y0 = jnp.einsum('ck,bk->bc', w1[:, :, 0], x[:, :, 0])          # (B, CH1)
    y1 = jnp.einsum('ck,bkj->bcj', w1[:, :, 1], x[:, :, 1:])       # (B, CH1, L1)
    y = jax.nn.relu(y0[:, :, None] + y1 + b1[None, :, None])
    dn = ('NCH', 'OIH', 'NCH')
    y = jax.nn.relu(jax.lax.conv_general_dilated(y, w2, (1,), 'VALID',
                                                 dimension_numbers=dn) + b2[None, :, None])
    y = jax.nn.relu(jax.lax.conv_general_dilated(y, w3, (1,), 'VALID',
                                                 dimension_numbers=dn) + b3[None, :, None])
    flat = y.reshape(B, F1_INPUT)
    h = jax.nn.relu(flat @ wf1.T + bf1)
    return h @ wf2.T + bf2


if __name__ == "__main__":
    key = jax.random.PRNGKey(0)
    kx, kp = jax.random.split(key)
    B = 2
    x = jax.random.normal(kx, (B, INST_LENGTH, CONTEXT_LENGTH), jnp.float32)

    torch_params, kernel_params = init_params(kp)

    fwd = jax.jit(lambda xx: cnn2p_forward(xx, kernel_params))
    out = jax.block_until_ready(fwd(x))

    ref = reference_forward(x, torch_params)
    np.testing.assert_allclose(np.asarray(out), np.asarray(ref), rtol=2e-4, atol=2e-4)

    print("KERNEL_OK")
</pallas_src>

<mosaic_0001>
module attributes {stable_mosaic.version = 11 : i64} {
  func.func @_cnn2p_kernel(%arg0: i32, %arg1: memref<39x12032xf32, #tpu.memory_space<vmem>>, %arg2: memref<2x16x39xf32, #tpu.memory_space<vmem>>, %arg3: memref<16x1xf32, #tpu.memory_space<vmem>>, %arg4: memref<16x48xf32, #tpu.memory_space<vmem>>, %arg5: memref<16x1xf32, #tpu.memory_space<vmem>>, %arg6: memref<16x48xf32, #tpu.memory_space<vmem>>, %arg7: memref<16x1xf32, #tpu.memory_space<vmem>>, %arg8: memref<32x1424xf32, #tpu.memory_space<vmem>>, %arg9: memref<32x1xf32, #tpu.memory_space<vmem>>, %arg10: memref<10x32xf32, #tpu.memory_space<vmem>>, %arg11: memref<10x1xf32, #tpu.memory_space<vmem>>, %arg12: memref<10x128xf32, #tpu.memory_space<vmem>>) attributes {dimension_semantics = [#tpu.dimension_semantics<parallel>], iteration_bounds = array<i64: 1>, scalar_prefetch = 0 : i64, scratch_operands = 0 : i64, tpu.core_type = #tpu.core_type<tc>, window_params = [{transform_indices = @transform_0, window_bounds = array<i64: 39, 12032>}, {pipeline_mode = #tpu.pipeline_mode<synchronous>, transform_indices = @transform_1, window_bounds = array<i64: 2, 16, 39>}, {pipeline_mode = #tpu.pipeline_mode<synchronous>, transform_indices = @transform_2, window_bounds = array<i64: 16, 1>}, {pipeline_mode = #tpu.pipeline_mode<synchronous>, transform_indices = @transform_3, window_bounds = array<i64: 16, 48>}, {pipeline_mode = #tpu.pipeline_mode<synchronous>, transform_indices = @transform_4, window_bounds = array<i64: 16, 1>}, {pipeline_mode = #tpu.pipeline_mode<synchronous>, transform_indices = @transform_5, window_bounds = array<i64: 16, 48>}, {pipeline_mode = #tpu.pipeline_mode<synchronous>, transform_indices = @transform_6, window_bounds = array<i64: 16, 1>}, {pipeline_mode = #tpu.pipeline_mode<synchronous>, transform_indices = @transform_7, window_bounds = array<i64: 32, 1424>}, {pipeline_mode = #tpu.pipeline_mode<synchronous>, transform_indices = @transform_8, window_bounds = array<i64: 32, 1>}, {pipeline_mode = #tpu.pipeline_mode<synchronous>, transform_indices = @transform_9, window_bounds = array<i64: 10, 32>}, {pipeline_mode = #tpu.pipeline_mode<synchronous>, transform_indices = @transform_10, window_bounds = array<i64: 10, 1>}, {transform_indices = @transform_11, window_bounds = array<i64: 10, 128>}]} {
    %c0 = arith.constant 0 : index
    %c0_0 = arith.constant 0 : index
    %c0_1 = arith.constant 0 : index
    %0 = vector.load %arg2[%c0, %c0_0, %c0_1] : memref<2x16x39xf32, #tpu.memory_space<vmem>>, vector<1x16x39xf32>
    %1 = vector.shape_cast %0 : vector<1x16x39xf32> to vector<16x39xf32>
    %c0_2 = arith.constant 0 : index
    %c0_3 = arith.constant 0 : index
    %2 = vector.load %arg1[%c0_2, %c0_3] : memref<39x12032xf32, #tpu.memory_space<vmem>>, vector<39x128xf32>
    %cst = arith.constant dense<0.000000e+00> : vector<16x128xf32>
    %3 = tpu.matmul %1, %2, %cst {dimension_numbers = #tpu.dot_dimension_numbers<[1], [0], [0], [1], [0, 0, 1, 1], [], []>} : vector<16x39xf32>, vector<39x128xf32>, vector<16x128xf32> -> vector<16x128xf32>
    %c0_4 = arith.constant 0 : index
    %c0_5 = arith.constant 0 : index
    %4 = vector.load %arg3[%c0_4, %c0_5] : memref<16x1xf32, #tpu.memory_space<vmem>>, vector<16x1xf32>
    %5 = vector.broadcast %4 : vector<16x1xf32> to vector<16x128xf32>
    %6 = arith.addf %3, %5 : vector<16x128xf32>
    %7 = tpu.concatenate %6, %6, %6, %6, %6, %6, %6, %6, %6, %6, %6, %6, %6, %6, %6, %6 in 1 : vector<16x128xf32>, vector<16x128xf32>, vector<16x128xf32>, vector<16x128xf32>, vector<16x128xf32>, vector<16x128xf32>, vector<16x128xf32>, vector<16x128xf32>, vector<16x128xf32>, vector<16x128xf32>, vector<16x128xf32>, vector<16x128xf32>, vector<16x128xf32>, vector<16x128xf32>, vector<16x128xf32>, vector<16x128xf32> -> vector<16x2048xf32>
    %8 = tpu.concatenate %6, %6, %6, %6, %6, %6, %6, %6, %6, %6, %6, %6, %6, %6, %6, %6 in 1 : vector<16x128xf32>, vector<16x128xf32>, vector<16x128xf32>, vector<16x128xf32>, vector<16x128xf32>, vector<16x128xf32>, vector<16x128xf32>, vector<16x128xf32>, vector<16x128xf32>, vector<16x128xf32>, vector<16x128xf32>, vector<16x128xf32>, vector<16x128xf32>, vector<16x128xf32>, vector<16x128xf32>, vector<16x128xf32> -> vector<16x2048xf32>
    %9 = tpu.concatenate %6, %6, %6, %6, %6, %6, %6, %6, %6, %6, %6, %6, %6, %6, %6, %6 in 1 : vector<16x128xf32>, vector<16x128xf32>, vector<16x128xf32>, vector<16x128xf32>, vector<16x128xf32>, vector<16x128xf32>, vector<16x128xf32>, vector<16x128xf32>, vector<16x128xf32>, vector<16x128xf32>, vector<16x128xf32>, vector<16x128xf32>, vector<16x128xf32>, vector<16x128xf32>, vector<16x128xf32>, vector<16x128xf32> -> vector<16x2048xf32>
    %10 = tpu.concatenate %6, %6, %6, %6, %6, %6, %6, %6, %6, %6, %6, %6, %6, %6, %6, %6 in 1 : vector<16x128xf32>, vector<16x128xf32>, vector<16x128xf32>, vector<16x128xf32>, vector<16x128xf32>, vector<16x128xf32>, vector<16x128xf32>, vector<16x128xf32>, vector<16x128xf32>, vector<16x128xf32>, vector<16x128xf32>, vector<16x128xf32>, vector<16x128xf32>, vector<16x128xf32>, vector<16x128xf32>, vector<16x128xf32> -> vector<16x2048xf32>
    %11 = tpu.concatenate %6, %6, %6, %6, %6, %6, %6, %6, %6, %6, %6, %6, %6, %6, %6, %6 in 1 : vector<16x128xf32>, vector<16x128xf32>, vector<16x128xf32>, vector<16x128xf32>, vector<16x128xf32>, vector<16x128xf32>, vector<16x128xf32>, vector<16x128xf32>, vector<16x128xf32>, vector<16x128xf32>, vector<16x128xf32>, vector<16x128xf32>, vector<16x128xf32>, vector<16x128xf32>, vector<16x128xf32>, vector<16x128xf32> -> vector<16x2048xf32>
    %12 = tpu.concatenate %6, %6, %6, %6, %6, %6, %6, %6, %6, %6, %6, %6, %6 in 1 : vector<16x128xf32>, vector<16x128xf32>, vector<16x128xf32>, vector<16x128xf32>, vector<16x128xf32>, vector<16x128xf32>, vector<16x128xf32>, vector<16x128xf32>, vector<16x128xf32>, vector<16x128xf32>, vector<16x128xf32>, vector<16x128xf32>, vector<16x128xf32> -> vector<16x1664xf32>
    %13 = tpu.concatenate %7, %8, %9, %10, %11, %12 in 1 : vector<16x2048xf32>, vector<16x2048xf32>, vector<16x2048xf32>, vector<16x2048xf32>, vector<16x2048xf32>, vector<16x1664xf32> -> vector<16x11904xf32>
    %c1 = arith.constant 1 : index
    %c0_6 = arith.constant 0 : index
    %c0_7 = arith.constant 0 : index
    %14 = vector.load %arg2[%c1, %c0_6, %c0_7] : memref<2x16x39xf32, #tpu.memory_space<vmem>>, vector<1x16x39xf32>
    %15 = vector.shape_cast %14 : vector<1x16x39xf32> to vector<16x39xf32>
    %c0_8 = arith.constant 0 : index
    %c128 = arith.constant 128 : index
    %16 = vector.load %arg1[%c0_8, %c128] : memref<39x12032xf32, #tpu.memory_space<vmem>>, vector<39x11904xf32>
    %cst_9 = arith.constant dense<0.000000e+00> : vector<16x11904xf32>
    %17 = tpu.matmul %15, %16, %cst_9 {dimension_numbers = #tpu.dot_dimension_numbers<[1], [0], [0], [1], [0, 0, 1, 1], [], []>} : vector<16x39xf32>, vector<39x11904xf32>, vector<16x11904xf32> -> vector<16x11904xf32>
    %18 = arith.addf %17, %13 : vector<16x11904xf32>
    %cst_10 = arith.constant 0.000000e+00 : f32
    %19 = vector.broadcast %cst_10 : f32 to vector<16x11904xf32>
    %20 = arith.maximumf %18, %19 : vector<16x11904xf32>
    %21 = vector.extract_strided_slice %20 {offsets = [0, 0], sizes = [16, 11648], strides = [1, 1]} : vector<16x11904xf32> to vector<16x11648xf32>
    %22 = vector.extract_strided_slice %20 {offsets = [0, 128], sizes = [16, 11648], strides = [1, 1]} : vector<16x11904xf32> to vector<16x11648xf32>
    %23 = vector.extract_strided_slice %20 {offsets = [0, 256], sizes = [16, 11648], strides = [1, 1]} : vector<16x11904xf32> to vector<16x11648xf32>
    %24 = tpu.concatenate %21, %22, %23 in 0 : vector<16x11648xf32>, vector<16x11648xf32>, vector<16x11648xf32> -> vector<48x11648xf32>
    %c0_11 = arith.constant 0 : index
    %c0_12 = arith.constant 0 : index
    %25 = vector.load %arg4[%c0_11, %c0_12] : memref<16x48xf32, #tpu.memory_space<vmem>>, vector<16x48xf32>
    %cst_13 = arith.constant dense<0.000000e+00> : vector<16x11648xf32>
    %26 = tpu.matmul %25, %24, %cst_13 {dimension_numbers = #tpu.dot_dimension_numbers<[1], [0], [0], [1], [0, 0, 1, 1], [], []>} : vector<16x48xf32>, vector<48x11648xf32>, vector<16x11648xf32> -> vector<16x11648xf32>
    %c0_14 = arith.constant 0 : index
    %c0_15 = arith.constant 0 : index
    %27 = vector.load %arg5[%c0_14, %c0_15] : memref<16x1xf32, #tpu.memory_space<vmem>>, vector<16x1xf32>
    %28 = vector.broadcast %27 : vector<16x1xf32> to vector<16x11648xf32>
    %29 = arith.addf %26, %28 : vector<16x11648xf32>
    %cst_16 = arith.constant 0.000000e+00 : f32
    %30 = vector.broadcast %cst_16 : f32 to vector<16x11648xf32>
    %31 = arith.maximumf %29, %30 : vector<16x11648xf32>
    %32 = vector.extract_strided_slice %31 {offsets = [0, 0], sizes = [16, 11392], strides = [1, 1]} : vector<16x11648xf32> to vector<16x11392xf32>
    %33 = vector.extract_strided_slice %31 {offsets = [0, 128], sizes = [16, 11392], strides = [1, 1]} : vector<16x11648xf32> to vector<16x11392xf32>
    %34 = vector.extract_strided_slice %31 {offsets = [0, 256], sizes = [16, 11392], strides = [1, 1]} : vector<16x11648xf32> to vector<16x11392xf32>
    %35 = tpu.concatenate %32, %33, %34 in 0 : vector<16x11392xf32>, vector<16x11392xf32>, vector<16x11392xf32> -> vector<48x11392xf32>
    %c0_17 = arith.constant 0 : index
    %c0_18 = arith.constant 0 : index
    %36 = vector.load %arg6[%c0_17, %c0_18] : memref<16x48xf32, #tpu.memory_space<vmem>>, vector<16x48xf32>
    %cst_19 = arith.constant dense<0.000000e+00> : vector<16x11392xf32>
    %37 = tpu.matmul %36, %35, %cst_19 {dimension_numbers = #tpu.dot_dimension_numbers<[1], [0], [0], [1], [0, 0, 1, 1], [], []>} : vector<16x48xf32>, vector<48x11392xf32>, vector<16x11392xf32> -> vector<16x11392xf32>
    %c0_20 = arith.constant 0 : index
    %c0_21 = arith.constant 0 : index
    %38 = vector.load %arg7[%c0_20, %c0_21] : memref<16x1xf32, #tpu.memory_space<vmem>>, vector<16x1xf32>
    %39 = vector.broadcast %38 : vector<16x1xf32> to vector<16x11392xf32>
    %40 = arith.addf %37, %39 : vector<16x11392xf32>
    %cst_22 = arith.constant 0.000000e+00 : f32
    %41 = vector.broadcast %cst_22 : f32 to vector<16x11392xf32>
    %42 = arith.maximumf %40, %41 : vector<16x11392xf32>
    %43 = vector.extract_strided_slice %42 {offsets = [0, 0], sizes = [16, 128], strides = [1, 1]} : vector<16x11392xf32> to vector<16x128xf32>
    %44 = vector.extract_strided_slice %42 {offsets = [0, 128], sizes = [16, 128], strides = [1, 1]} : vector<16x11392xf32> to vector<16x128xf32>
    %45 = vector.extract_strided_slice %42 {offsets = [0, 256], sizes = [16, 128], strides = [1, 1]} : vector<16x11392xf32> to vector<16x128xf32>
    %46 = vector.extract_strided_slice %42 {offsets = [0, 384], sizes = [16, 128], strides = [1, 1]} : vector<16x11392xf32> to vector<16x128xf32>
    %47 = vector.extract_strided_slice %42 {offsets = [0, 512], sizes = [16, 128], strides = [1, 1]} : vector<16x11392xf32> to vector<16x128xf32>
    %48 = vector.extract_strided_slice %42 {offsets = [0, 640], sizes = [16, 128], strides = [1, 1]} : vector<16x11392xf32> to vector<16x128xf32>
    %49 = vector.extract_strided_slice %42 {offsets = [0, 768], sizes = [16, 128], strides = [1, 1]} : vector<16x11392xf32> to vector<16x128xf32>
    %50 = vector.extract_strided_slice %42 {offsets = [0, 896], sizes = [16, 128], strides = [1, 1]} : vector<16x11392xf32> to vector<16x128xf32>
    %51 = vector.extract_strided_slice %42 {offsets = [0, 1024], sizes = [16, 128], strides = [1, 1]} : vector<16x11392xf32> to vector<16x128xf32>
    %52 = vector.extract_strided_slice %42 {offsets = [0, 1152], sizes = [16, 128], strides = [1, 1]} : vector<16x11392xf32> to vector<16x128xf32>
    %53 = vector.extract_strided_slice %42 {offsets = [0, 1280], sizes = [16, 128], strides = [1, 1]} : vector<16x11392xf32> to vector<16x128xf32>
    %54 = vector.extract_strided_slice %42 {offsets = [0, 1408], sizes = [16, 128], strides = [1, 1]} : vector<16x11392xf32> to vector<16x128xf32>
    %55 = vector.extract_strided_slice %42 {offsets = [0, 1536], sizes = [16, 128], strides = [1, 1]} : vector<16x11392xf32> to vector<16x128xf32>
    %56 = vector.extract_strided_slice %42 {offsets = [0, 1664], sizes = [16, 128], strides = [1, 1]} : vector<16x11392xf32> to vector<16x128xf32>
    %57 = vector.extract_strided_slice %42 {offsets = [0, 1792], sizes = [16, 128], strides = [1, 1]} : vector<16x11392xf32> to vector<16x128xf32>
    %58 = vector.extract_strided_slice %42 {offsets = [0, 1920], sizes = [16, 128], strides = [1, 1]} : vector<16x11392xf32> to vector<16x128xf32>
    %59 = vector.extract_strided_slice %42 {offsets = [0, 2048], sizes = [16, 128], strides = [1, 1]} : vector<16x11392xf32> to vector<16x128xf32>
    %60 = vector.extract_strided_slice %42 {offsets = [0, 2176], sizes = [16, 128], strides = [1, 1]} : vector<16x11392xf32> to vector<16x128xf32>
    %61 = vector.extract_strided_slice %42 {offsets = [0, 2304], sizes = [16, 128], strides = [1, 1]} : vector<16x11392xf32> to vector<16x128xf32>
    %62 = vector.extract_strided_slice %42 {offsets = [0, 2432], sizes = [16, 128], strides = [1, 1]} : vector<16x11392xf32> to vector<16x128xf32>
    %63 = vector.extract_strided_slice %42 {offsets = [0, 2560], sizes = [16, 128], strides = [1, 1]} : vector<16x11392xf32> to vector<16x128xf32>
    %64 = vector.extract_strided_slice %42 {offsets = [0, 2688], sizes = [16, 128], strides = [1, 1]} : vector<16x11392xf32> to vector<16x128xf32>
    %65 = vector.extract_strided_slice %42 {offsets = [0, 2816], sizes = [16, 128], strides = [1, 1]} : vector<16x11392xf32> to vector<16x128xf32>
    %66 = vector.extract_strided_slice %42 {offsets = [0, 2944], sizes = [16, 128], strides = [1, 1]} : vector<16x11392xf32> to vector<16x128xf32>
    %67 = vector.extract_strided_slice %42 {offsets = [0, 3072], sizes = [16, 128], strides = [1, 1]} : vector<16x11392xf32> to vector<16x128xf32>
    %68 = vector.extract_strided_slice %42 {offsets = [0, 3200], sizes = [16, 128], strides = [1, 1]} : vector<16x11392xf32> to vector<16x128xf32>
    %69 = vector.extract_strided_slice %42 {offsets = [0, 3328], sizes = [16, 128], strides = [1, 1]} : vector<16x11392xf32> to vector<16x128xf32>
    %70 = vector.extract_strided_slice %42 {offsets = [0, 3456], sizes = [16, 128], strides = [1, 1]} : vector<16x11392xf32> to vector<16x128xf32>
    %71 = vector.extract_strided_slice %42 {offsets = [0, 3584], sizes = [16, 128], strides = [1, 1]} : vector<16x11392xf32> to vector<16x128xf32>
    %72 = vector.extract_strided_slice %42 {offsets = [0, 3712], sizes = [16, 128], strides = [1, 1]} : vector<16x11392xf32> to vector<16x128xf32>
    %73 = vector.extract_strided_slice %42 {offsets = [0, 3840], sizes = [16, 128], strides = [1, 1]} : vector<16x11392xf32> to vector<16x128xf32>
    %74 = vector.extract_strided_slice %42 {offsets = [0, 3968], sizes = [16, 128], strides = [1, 1]} : vector<16x11392xf32> to vector<16x128xf32>
    %75 = vector.extract_strided_slice %42 {offsets = [0, 4096], sizes = [16, 128], strides = [1, 1]} : vector<16x11392xf32> to vector<16x128xf32>
    %76 = vector.extract_strided_slice %42 {offsets = [0, 4224], sizes = [16, 128], strides = [1, 1]} : vector<16x11392xf32> to vector<16x128xf32>
    %77 = vector.extract_strided_slice %42 {offsets = [0, 4352], sizes = [16, 128], strides = [1, 1]} : vector<16x11392xf32> to vector<16x128xf32>
    %78 = vector.extract_strided_slice %42 {offsets = [0, 4480], sizes = [16, 128], strides = [1, 1]} : vector<16x11392xf32> to vector<16x128xf32>
    %79 = vector.extract_strided_slice %42 {offsets = [0, 4608], sizes = [16, 128], strides = [1, 1]} : vector<16x11392xf32> to vector<16x128xf32>
    %80 = vector.extract_strided_slice %42 {offsets = [0, 4736], sizes = [16, 128], strides = [1, 1]} : vector<16x11392xf32> to vector<16x128xf32>
    %81 = vector.extract_strided_slice %42 {offsets = [0, 4864], sizes = [16, 128], strides = [1, 1]} : vector<16x11392xf32> to vector<16x128xf32>
    %82 = vector.extract_strided_slice %42 {offsets = [0, 4992], sizes = [16, 128], strides = [1, 1]} : vector<16x11392xf32> to vector<16x128xf32>
    %83 = vector.extract_strided_slice %42 {offsets = [0, 5120], sizes = [16, 128], strides = [1, 1]} : vector<16x11392xf32> to vector<16x128xf32>
    %84 = vector.extract_strided_slice %42 {offsets = [0, 5248], sizes = [16, 128], strides = [1, 1]} : vector<16x11392xf32> to vector<16x128xf32>
    %85 = vector.extract_strided_slice %42 {offsets = [0, 5376], sizes = [16, 128], strides = [1, 1]} : vector<16x11392xf32> to vector<16x128xf32>
    %86 = vector.extract_strided_slice %42 {offsets = [0, 5504], sizes = [16, 128], strides = [1, 1]} : vector<16x11392xf32> to vector<16x128xf32>
    %87 = vector.extract_strided_slice %42 {offsets = [0, 5632], sizes = [16, 128], strides = [1, 1]} : vector<16x11392xf32> to vector<16x128xf32>
    %88 = vector.extract_strided_slice %42 {offsets = [0, 5760], sizes = [16, 128], strides = [1, 1]} : vector<16x11392xf32> to vector<16x128xf32>
    %89 = vector.extract_strided_slice %42 {offsets = [0, 5888], sizes = [16, 128], strides = [1, 1]} : vector<16x11392xf32> to vector<16x128xf32>
    %90 = vector.extract_strided_slice %42 {offsets = [0, 6016], sizes = [16, 128], strides = [1, 1]} : vector<16x11392xf32> to vector<16x128xf32>
    %91 = vector.extract_strided_slice %42 {offsets = [0, 6144], sizes = [16, 128], strides = [1, 1]} : vector<16x11392xf32> to vector<16x128xf32>
    %92 = vector.extract_strided_slice %42 {offsets = [0, 6272], sizes = [16, 128], strides = [1, 1]} : vector<16x11392xf32> to vector<16x128xf32>
    %93 = vector.extract_strided_slice %42 {offsets = [0, 6400], sizes = [16, 128], strides = [1, 1]} : vector<16x11392xf32> to vector<16x128xf32>
    %94 = vector.extract_strided_slice %42 {offsets = [0, 6528], sizes = [16, 128], strides = [1, 1]} : vector<16x11392xf32> to vector<16x128xf32>
    %95 = vector.extract_strided_slice %42 {offsets = [0, 6656], sizes = [16, 128], strides = [1, 1]} : vector<16x11392xf32> to vector<16x128xf32>
    %96 = vector.extract_strided_slice %42 {offsets = [0, 6784], sizes = [16, 128], strides = [1, 1]} : vector<16x11392xf32> to vector<16x128xf32>
    %97 = vector.extract_strided_slice %42 {offsets = [0, 6912], sizes = [16, 128], strides = [1, 1]} : vector<16x11392xf32> to vector<16x128xf32>
    %98 = vector.extract_strided_slice %42 {offsets = [0, 7040], sizes = [16, 128], strides = [1, 1]} : vector<16x11392xf32> to vector<16x128xf32>
    %99 = vector.extract_strided_slice %42 {offsets = [0, 7168], sizes = [16, 128], strides = [1, 1]} : vector<16x11392xf32> to vector<16x128xf32>
    %100 = vector.extract_strided_slice %42 {offsets = [0, 7296], sizes = [16, 128], strides = [1, 1]} : vector<16x11392xf32> to vector<16x128xf32>
    %101 = vector.extract_strided_slice %42 {offsets = [0, 7424], sizes = [16, 128], strides = [1, 1]} : vector<16x11392xf32> to vector<16x128xf32>
    %102 = vector.extract_strided_slice %42 {offsets = [0, 7552], sizes = [16, 128], strides = [1, 1]} : vector<16x11392xf32> to vector<16x128xf32>
    %103 = vector.extract_strided_slice %42 {offsets = [0, 7680], sizes = [16, 128], strides = [1, 1]} : vector<16x11392xf32> to vector<16x128xf32>
    %104 = vector.extract_strided_slice %42 {offsets = [0, 7808], sizes = [16, 128], strides = [1, 1]} : vector<16x11392xf32> to vector<16x128xf32>
    %105 = vector.extract_strided_slice %42 {offsets = [0, 7936], sizes = [16, 128], strides = [1, 1]} : vector<16x11392xf32> to vector<16x128xf32>
    %106 = vector.extract_strided_slice %42 {offsets = [0, 8064], sizes = [16, 128], strides = [1, 1]} : vector<16x11392xf32> to vector<16x128xf32>
    %107 = vector.extract_strided_slice %42 {offsets = [0, 8192], sizes = [16, 128], strides = [1, 1]} : vector<16x11392xf32> to vector<16x128xf32>
    %108 = vector.extract_strided_slice %42 {offsets = [0, 8320], sizes = [16, 128], strides = [1, 1]} : vector<16x11392xf32> to vector<16x128xf32>
    %109 = vector.extract_strided_slice %42 {offsets = [0, 8448], sizes = [16, 128], strides = [1, 1]} : vector<16x11392xf32> to vector<16x128xf32>
    %110 = vector.extract_strided_slice %42 {offsets = [0, 8576], sizes = [16, 128], strides = [1, 1]} : vector<16x11392xf32> to vector<16x128xf32>
    %111 = vector.extract_strided_slice %42 {offsets = [0, 8704], sizes = [16, 128], strides = [1, 1]} : vector<16x11392xf32> to vector<16x128xf32>
    %112 = vector.extract_strided_slice %42 {offsets = [0, 8832], sizes = [16, 128], strides = [1, 1]} : vector<16x11392xf32> to vector<16x128xf32>
    %113 = vector.extract_strided_slice %42 {offsets = [0, 8960], sizes = [16, 128], strides = [1, 1]} : vector<16x11392xf32> to vector<16x128xf32>
    %114 = vector.extract_strided_slice %42 {offsets = [0, 9088], sizes = [16, 128], strides = [1, 1]} : vector<16x11392xf32> to vector<16x128xf32>
    %115 = vector.extract_strided_slice %42 {offsets = [0, 9216], sizes = [16, 128], strides = [1, 1]} : vector<16x11392xf32> to vector<16x128xf32>
    %116 = vector.extract_strided_slice %42 {offsets = [0, 9344], sizes = [16, 128], strides = [1, 1]} : vector<16x11392xf32> to vector<16x128xf32>
    %117 = vector.extract_strided_slice %42 {offsets = [0, 9472], sizes = [16, 128], strides = [1, 1]} : vector<16x11392xf32> to vector<16x128xf32>
    %118 = vector.extract_strided_slice %42 {offsets = [0, 9600], sizes = [16, 128], strides = [1, 1]} : vector<16x11392xf32> to vector<16x128xf32>
    %119 = vector.extract_strided_slice %42 {offsets = [0, 9728], sizes = [16, 128], strides = [1, 1]} : vector<16x11392xf32> to vector<16x128xf32>
    %120 = vector.extract_strided_slice %42 {offsets = [0, 9856], sizes = [16, 128], strides = [1, 1]} : vector<16x11392xf32> to vector<16x128xf32>
    %121 = vector.extract_strided_slice %42 {offsets = [0, 9984], sizes = [16, 128], strides = [1, 1]} : vector<16x11392xf32> to vector<16x128xf32>
    %122 = vector.extract_strided_slice %42 {offsets = [0, 10112], sizes = [16, 128], strides = [1, 1]} : vector<16x11392xf32> to vector<16x128xf32>
    %123 = vector.extract_strided_slice %42 {offsets = [0, 10240], sizes = [16, 128], strides = [1, 1]} : vector<16x11392xf32> to vector<16x128xf32>
    %124 = vector.extract_strided_slice %42 {offsets = [0, 10368], sizes = [16, 128], strides = [1, 1]} : vector<16x11392xf32> to vector<16x128xf32>
    %125 = vector.extract_strided_slice %42 {offsets = [0, 10496], sizes = [16, 128], strides = [1, 1]} : vector<16x11392xf32> to vector<16x128xf32>
    %126 = vector.extract_strided_slice %42 {offsets = [0, 10624], sizes = [16, 128], strides = [1, 1]} : vector<16x11392xf32> to vector<16x128xf32>
    %127 = vector.extract_strided_slice %42 {offsets = [0, 10752], sizes = [16, 128], strides = [1, 1]} : vector<16x11392xf32> to vector<16x128xf32>
    %128 = vector.extract_strided_slice %42 {offsets = [0, 10880], sizes = [16, 128], strides = [1, 1]} : vector<16x11392xf32> to vector<16x128xf32>
    %129 = vector.extract_strided_slice %42 {offsets = [0, 11008], sizes = [16, 128], strides = [1, 1]} : vector<16x11392xf32> to vector<16x128xf32>
    %130 = vector.extract_strided_slice %42 {offsets = [0, 11136], sizes = [16, 128], strides = [1, 1]} : vector<16x11392xf32> to vector<16x128xf32>
    %131 = vector.extract_strided_slice %42 {offsets = [0, 11264], sizes = [16, 128], strides = [1, 1]} : vector<16x11392xf32> to vector<16x128xf32>
    %132 = tpu.concatenate %43, %44, %45, %46, %47, %48, %49, %50, %51, %52, %53, %54, %55, %56, %57, %58 in 0 : vector<16x128xf32>, vector<16x128xf32>, vector<16x128xf32>, vector<16x128xf32>, vector<16x128xf32>, vector<16x128xf32>, vector<16x128xf32>, vector<16x128xf32>, vector<16x128xf32>, vector<16x128xf32>, vector<16x128xf32>, vector<16x128xf32>, vector<16x128xf32>, vector<16x128xf32>, vector<16x128xf32>, vector<16x128xf32> -> vector<256x128xf32>
    %133 = tpu.concatenate %59, %60, %61, %62, %63, %64, %65, %66, %67, %68, %69, %70, %71, %72, %73, %74 in 0 : vector<16x128xf32>, vector<16x128xf32>, vector<16x128xf32>, vector<16x128xf32>, vector<16x128xf32>, vector<16x128xf32>, vector<16x128xf32>, vector<16x128xf32>, vector<16x128xf32>, vector<16x128xf32>, vector<16x128xf32>, vector<16x128xf32>, vector<16x128xf32>, vector<16x128xf32>, vector<16x128xf32>, vector<16x128xf32> -> vector<256x128xf32>
    %134 = tpu.concatenate %75, %76, %77, %78, %79, %80, %81, %82, %83, %84, %85, %86, %87, %88, %89, %90 in 0 : vector<16x128xf32>, vector<16x128xf32>, vector<16x128xf32>, vector<16x128xf32>, vector<16x128xf32>, vector<16x128xf32>, vector<16x128xf32>, vector<16x128xf32>, vector<16x128xf32>, vector<16x128xf32>, vector<16x128xf32>, vector<16x128xf32>, vector<16x128xf32>, vector<16x128xf32>, vector<16x128xf32>, vector<16x128xf32> -> vector<256x128xf32>
    %135 = tpu.concatenate %91, %92, %93, %94, %95, %96, %97, %98, %99, %100, %101, %102, %103, %104, %105, %106 in 0 : vector<16x128xf32>, vector<16x128xf32>, vector<16x128xf32>, vector<16x128xf32>, vector<16x128xf32>, vector<16x128xf32>, vector<16x128xf32>, vector<16x128xf32>, vector<16x128xf32>, vector<16x128xf32>, vector<16x128xf32>, vector<16x128xf32>, vector<16x128xf32>, vector<16x128xf32>, vector<16x128xf32>, vector<16x128xf32> -> vector<256x128xf32>
    %136 = tpu.concatenate %107, %108, %109, %110, %111, %112, %113, %114, %115, %116, %117, %118, %119, %120, %121, %122 in 0 : vector<16x128xf32>, vector<16x128xf32>, vector<16x128xf32>, vector<16x128xf32>, vector<16x128xf32>, vector<16x128xf32>, vector<16x128xf32>, vector<16x128xf32>, vector<16x128xf32>, vector<16x128xf32>, vector<16x128xf32>, vector<16x128xf32>, vector<16x128xf32>, vector<16x128xf32>, vector<16x128xf32>, vector<16x128xf32> -> vector<256x128xf32>
    %137 = tpu.concatenate %123, %124, %125, %126, %127, %128, %129, %130, %131 in 0 : vector<16x128xf32>, vector<16x128xf32>, vector<16x128xf32>, vector<16x128xf32>, vector<16x128xf32>, vector<16x128xf32>, vector<16x128xf32>, vector<16x128xf32>, vector<16x128xf32> -> vector<144x128xf32>
    %138 = tpu.concatenate %132, %133, %134, %135, %136, %137 in 0 : vector<256x128xf32>, vector<256x128xf32>, vector<256x128xf32>, vector<256x128xf32>, vector<256x128xf32>, vector<144x128xf32> -> vector<1424x128xf32>
    %c0_23 = arith.constant 0 : index
    %c0_24 = arith.constant 0 : index
    %139 = vector.load %arg8[%c0_23, %c0_24] : memref<32x1424xf32, #tpu.memory_space<vmem>>, vector<32x1424xf32>
    %cst_25 = arith.constant dense<0.000000e+00> : vector<32x128xf32>
    %140 = tpu.matmul %139, %138, %cst_25 {dimension_numbers = #tpu.dot_dimension_numbers<[1], [0], [0], [1], [0, 0, 1, 1], [], []>} : vector<32x1424xf32>, vector<1424x128xf32>, vector<32x128xf32> -> vector<32x128xf32>
    %c0_26 = arith.constant 0 : index
    %c0_27 = arith.constant 0 : index
    %141 = vector.load %arg9[%c0_26, %c0_27] : memref<32x1xf32, #tpu.memory_space<vmem>>, vector<32x1xf32>
    %142 = vector.broadcast %141 : vector<32x1xf32> to vector<32x128xf32>
    %143 = arith.addf %140, %142 : vector<32x128xf32>
    %cst_28 = arith.constant 0.000000e+00 : f32
    %144 = vector.broadcast %cst_28 : f32 to vector<32x128xf32>
    %145 = arith.maximumf %143, %144 : vector<32x128xf32>
    %c0_29 = arith.constant 0 : index
    %c0_30 = arith.constant 0 : index
    %146 = vector.load %arg10[%c0_29, %c0_30] : memref<10x32xf32, #tpu.memory_space<vmem>>, vector<10x32xf32>
    %cst_31 = arith.constant dense<0.000000e+00> : vector<10x128xf32>
    %147 = tpu.matmul %146, %145, %cst_31 {dimension_numbers = #tpu.dot_dimension_numbers<[1], [0], [0], [1], [0, 0, 1, 1], [], []>} : vector<10x32xf32>, vector<32x128xf32>, vector<10x128xf32> -> vector<10x128xf32>
    %c0_32 = arith.constant 0 : index
    %c0_33 = arith.constant 0 : index
    %148 = vector.load %arg11[%c0_32, %c0_33] : memref<10x1xf32, #tpu.memory_space<vmem>>, vector<10x1xf32>
    %149 = vector.broadcast %148 : vector<10x1xf32> to vector<10x128xf32>
    %150 = arith.addf %147, %149 : vector<10x128xf32>
    %c0_34 = arith.constant 0 : index
    %c0_35 = arith.constant 0 : index
    %151 = vector.load %arg12[%c0_34, %c0_35] : memref<10x128xf32, #tpu.memory_space<vmem>>, vector<10x128xf32>
    tpu.vector_store %arg12[%c0_34, %c0_35], %150 {strides = array<i32>} : memref<10x128xf32, #tpu.memory_space<vmem>>, vector<10x128xf32>,
    return
  }
  func.func @transform_0(%arg0: i32) -> (i32, i32) {
    %c0_i32 = arith.constant 0 : i32
    %c0_i32_0 = arith.constant 0 : i32
    return %c0_i32, %arg0 : i32, i32
  }
  func.func @transform_1(%arg0: i32) -> (i32, i32, i32) {
    %c0_i32 = arith.constant 0 : i32
    %c0_i32_0 = arith.constant 0 : i32
    %c0_i32_1 = arith.constant 0 : i32
    %c0_i32_2 = arith.constant 0 : i32
    return %c0_i32, %c0_i32_0, %c0_i32_1 : i32, i32, i32
  }
  func.func @transform_2(%arg0: i32) -> (i32, i32) {
    %c0_i32 = arith.constant 0 : i32
    %c0_i32_0 = arith.constant 0 : i32
    %c0_i32_1 = arith.constant 0 : i32
    return %c0_i32, %c0_i32_0 : i32, i32
  }
  func.func @transform_3(%arg0: i32) -> (i32, i32) {
    %c0_i32 = arith.constant 0 : i32
    %c0_i32_0 = arith.constant 0 : i32
    %c0_i32_1 = arith.constant 0 : i32
    return %c0_i32, %c0_i32_0 : i32, i32
  }
  func.func @transform_4(%arg0: i32) -> (i32, i32) {
    %c0_i32 = arith.constant 0 : i32
    %c0_i32_0 = arith.constant 0 : i32
    %c0_i32_1 = arith.constant 0 : i32
    return %c0_i32, %c0_i32_0 : i32, i32
  }
  func.func @transform_5(%arg0: i32) -> (i32, i32) {
    %c0_i32 = arith.constant 0 : i32
    %c0_i32_0 = arith.constant 0 : i32
    %c0_i32_1 = arith.constant 0 : i32
    return %c0_i32, %c0_i32_0 : i32, i32
  }
  func.func @transform_6(%arg0: i32) -> (i32, i32) {
    %c0_i32 = arith.constant 0 : i32
    %c0_i32_0 = arith.constant 0 : i32
    %c0_i32_1 = arith.constant 0 : i32
    return %c0_i32, %c0_i32_0 : i32, i32
  }
  func.func @transform_7(%arg0: i32) -> (i32, i32) {
    %c0_i32 = arith.constant 0 : i32
    %c0_i32_0 = arith.constant 0 : i32
    %c0_i32_1 = arith.constant 0 : i32
    return %c0_i32, %c0_i32_0 : i32, i32
  }
  func.func @transform_8(%arg0: i32) -> (i32, i32) {
    %c0_i32 = arith.constant 0 : i32
    %c0_i32_0 = arith.constant 0 : i32
    %c0_i32_1 = arith.constant 0 : i32
    return %c0_i32, %c0_i32_0 : i32, i32
  }
  func.func @transform_9(%arg0: i32) -> (i32, i32) {
    %c0_i32 = arith.constant 0 : i32
    %c0_i32_0 = arith.constant 0 : i32
    %c0_i32_1 = arith.constant 0 : i32
    return %c0_i32, %c0_i32_0 : i32, i32
  }
  func.func @transform_10(%arg0: i32) -> (i32, i32) {
    %c0_i32 = arith.constant 0 : i32
    %c0_i32_0 = arith.constant 0 : i32
    %c0_i32_1 = arith.constant 0 : i32
    return %c0_i32, %c0_i32_0 : i32, i32
  }
  func.func @transform_11(%arg0: i32) -> (i32, i32) {
    %c0_i32 = arith.constant 0 : i32
    %c0_i32_0 = arith.constant 0 : i32
    return %c0_i32, %arg0 : i32, i32
  }
}

</mosaic_0001>

<bundles_post_ra>
// kernel: _lambda_.1
= control target key start
LH: loop header
LB: loop body
LE: loop exit
PB: predicated region body
PF: predicated region fallthrough
CT: control target
= control target key end

     0   :  { %vm64_vm0 = vcmask 1046528   ;;  %v8863_v3 = vmov 0   ;;  %vm57_vm1 = vcmask 318464   ;;  %vm3183_vm2 = vcmask 392192   ;;  %s14875_s0 = inlined_call_operand.vmem [shape: f32[39,12032], index: 0, kind: input, shape index: {}]   ;;  %s14876_s1 = inlined_call_operand.vmem [shape: f32[2,16,39], index: 1, kind: input, shape index: {}]   ;;  %s14877_s2 = inlined_call_operand.vmem [shape: f32[16,1], index: 2, kind: input, shape index: {}]   ;;  %s14878_s8 = inlined_call_operand.vmem [shape: f32[32,1], index: 8, kind: input, shape index: {}]   ;;  %s14879_s4 = inlined_call_operand.vmem [shape: f32[16,1], index: 4, kind: input, shape index: {}]   ;;  %s14880_s3 = inlined_call_operand.vmem [shape: f32[16,48], index: 3, kind: input, shape index: {}]   ;;  %s14881_s10 = inlined_call_operand.vmem [shape: f32[10,1], index: 10, kind: input, shape index: {}]   ;;  %s14882_s5 = inlined_call_operand.vmem [shape: f32[16,48], index: 5, kind: input, shape index: {}]   ;;  %s14883_s6 = inlined_call_operand.vmem [shape: f32[16,1], index: 6, kind: input, shape index: {}]   ;;  %s14884_s7 = inlined_call_operand.vmem [shape: f32[32,1424], index: 7, kind: input, shape index: {}]   ;;  %s14885_s9 = inlined_call_operand.vmem [shape: f32[10,32], index: 9, kind: input, shape index: {}]   ;;  %s14886_s11 = inlined_call_operand.vmem [shape: f32[10,128], index: 11, kind: output, shape index: {}]  }
   0x1   :  { %v44_v0 = vld [vmem:[%s14875_s0 + $0xbc0] sm:$0x7f]  ;;  %v466_v1 = vld [vmem:[%s14875_s0 + $0xbc8] sm:$0x7f]  ;;  %v467_v2 = vld [vmem:[%s14875_s0 + $0xbd0] sm:$0x7f]  ;;  %8848 = vset.pattern.permute.xlu0 %v8863_v3  ;;  %8849 = vset.pattern.permute.xlu1 %v8863_v3 }
   0x2   :  { %8197 = vmatpush.msk.msra.mxu0 %vm64_vm0, %v44_v0  ;;  %8202 = vmatpush.msk.msra.mxu1 %vm64_vm0, %v466_v1  ;;  %v468_v4 = vld [vmem:[%s14875_s0 + $0xbd8] sm:$0x7f]  ;;  %v43_v5 = vld [vmem:[%s14875_s0 + $0x8d0] sm:$0xff]  ;;  %v374_v7 = vld [vmem:[%s14875_s0 + $0x8e0] sm:$0xff]  ;;  %vm7782_vm3 = vcmask 130048   ;;  %vm8161_vm4 = vcmask 261120  }
   0x3   :  { %v373_v6 = vld [vmem:[%s14875_s0 + $0x8d8] sm:$0xff]  ;;  %8205 = vmatpush.msk.msra.mxu2 %vm64_vm0, %v467_v2  ;;  %8208 = vmatpush.msk.msra.mxu3 %vm64_vm0, %v468_v4  ;;  %v375_v8 = vld [vmem:[%s14875_s0 + $0x8e8] sm:$0xff]  ;;  %v42_v9 = vld [vmem:[%s14875_s0 + $0x5e0] sm:$0xff] }
   0x4   :  { %80 = vmatpush.msra.mxu0 %v43_v5  ;;  %856 = vmatpush.msra.mxu1 %v373_v6  ;;  %v280_v10 = vld [vmem:[%s14875_s0 + $0x5e8] sm:$0xff]  ;;  %v281_v11 = vld [vmem:[%s14875_s0 + $0x5f0] sm:$0xff]  ;;  %v282_v12 = vld [vmem:[%s14875_s0 + $0x5f8] sm:$0xff] }
   0x5   :  { %879 = vmatpush.msra.mxu2 %v374_v7  ;;  %902 = vmatpush.msra.mxu3 %v375_v8  ;;  %v41_v13 = vld [vmem:[%s14875_s0 + $0x2f0] sm:$0xff]  ;;  %v187_v14 = vld [vmem:[%s14875_s0 + $0x2f8] sm:$0xff]  ;;  %v188_v15 = vld [vmem:[%s14875_s0 + $0x300] sm:$0xff] }
   0x6   :  { %81 = vmatpush.msra.mxu0 %v42_v9  ;;  %857 = vmatpush.msra.mxu1 %v280_v10  ;;  %v189_v16 = vld [vmem:[%s14875_s0 + $0x308] sm:$0xff]  ;;  %v40_v17 = vld [vmem:[%s14875_s0] sm:$0xff]  ;;  %v95_v19 = vld [vmem:[%s14875_s0 + $0x10] sm:$0xff] }
   0x7   :  { %880 = vmatpush.msra.mxu2 %v281_v11  ;;  %903 = vmatpush.msra.mxu3 %v282_v12  ;;  %v94_v18 = vld [vmem:[%s14875_s0 + $0x8] sm:$0xff]  ;;  %v96_v20 = vld [vmem:[%s14875_s0 + $0x18] sm:$0xff]  ;;  %v38_v21 = vld [vmem:[%s14876_s1] sm:$0xff] }
   0x8   :  { %82 = vmatpush.msra.mxu0 %v41_v13  ;;  %858 = vmatpush.msra.mxu1 %v187_v14  ;;  %v8996_v22 = vld [vmem:[%s14876_s1 + $0x10] sm:$0xff]  ;;  %v46_v23 = vld [vmem:[%s14877_s2 + $0x8] sm:$0xff]  ;;  %v469_v24 = vld [vmem:[%s14875_s0 + $0xbe0] sm:$0x7f] }
   0x9   :  { %881 = vmatpush.msra.mxu2 %v188_v15  ;;  %904 = vmatpush.msra.mxu3 %v189_v16  ;;  %v470_v25 = vld [vmem:[%s14875_s0 + $0xbe8] sm:$0x7f]  ;;  %v471_v26 = vld [vmem:[%s14875_s0 + $0xbf0] sm:$0x7f]  ;;  %v472_v27 = vld [vmem:[%s14875_s0 + $0xbf8] sm:$0x7f] }
   0xa   :  { %83 = vmatpush.msra.mxu0 %v40_v17  ;;  %859 = vmatpush.msra.mxu1 %v94_v18  ;;  %v376_v28 = vld [vmem:[%s14875_s0 + $0x8f0] sm:$0xff]  ;;  %v377_v29 = vld [vmem:[%s14875_s0 + $0x8f8] sm:$0xff]  ;;  %v378_v30 = vld [vmem:[%s14875_s0 + $0x900] sm:$0xff] }
   0xb   :  { %882 = vmatpush.msra.mxu2 %v95_v19  ;;  %905 = vmatpush.msra.mxu3 %v96_v20  ;;  %v379_v31 = vld [vmem:[%s14875_s0 + $0x908] sm:$0xff]  ;;  %v283_v32 = vld [vmem:[%s14875_s0 + $0x600] sm:$0xff]  ;;  %v285_v34 = vld [vmem:[%s14875_s0 + $0x610] sm:$0xff] }
   0xc   :  { %8198 = vmatmul.msk.f32.vlgmr.msra.gmra.mxu0 %vm57_vm1, %v38_v21  ;;  %8203 = vmatmul.msk.f32.vlgmr.msra.gmra.mxu1 %vm57_vm1, %v8996_v22  ;;  %v284_v33 = vld [vmem:[%s14875_s0 + $0x608] sm:$0xff]  ;;  %v9048_v35 = vld [vmem:[%s14876_s1 + $0x18] sm:$0xff]  ;;  %v45_v37 = vld [vmem:[%s14877_s2] sm:$0xff] }
   0xd   :  { %8206 = vmatmul.msk.f32.vlgmr.msra.gmra.mxu2 %vm57_vm1, %v8996_v22  ;;  %8209 = vmatmul.msk.f32.vlgmr.msra.gmra.mxu3 %vm57_vm1, %v8996_v22  ;;  %v39_v36 = vld [vmem:[%s14876_s1 + $0x8] sm:$0xff]  ;;  %v286_v38 = vld [vmem:[%s14875_s0 + $0x618] sm:$0xff]  ;;  %v190_v39 = vld [vmem:[%s14875_s0 + $0x310] sm:$0xff] }
   0xe   :  { %54 = vperm.xlu0 %8848, %v46_v23   ;;  %8211 = vmatpush.msk.msrb.mxu0 %vm64_vm0, %v469_v24  ;;  %v191_v40 = vld [vmem:[%s14875_s0 + $0x318] sm:$0xff]  ;;  %v192_v41 = vld [vmem:[%s14875_s0 + $0x320] sm:$0xff]  ;;  %v193_v42 = vld [vmem:[%s14875_s0 + $0x328] sm:$0xff] }
   0xf   :  { %8214 = vmatpush.msk.msrb.mxu1 %vm64_vm0, %v470_v25  ;;  %8217 = vmatpush.msk.msrb.mxu2 %vm64_vm0, %v471_v26  ;;  %v97_v43 = vld [vmem:[%s14875_s0 + $0x20] sm:$0xff]  ;;  %v98_v44 = vld [vmem:[%s14875_s0 + $0x28] sm:$0xff]  ;;  %v99_v45 = vld [vmem:[%s14875_s0 + $0x30] sm:$0xff] }
  0x10   :  { %8220 = vmatpush.msk.msrb.mxu3 %vm64_vm0, %v472_v27  ;;  %925 = vmatpush.msrb.mxu0 %v376_v28  ;;  %v100_v46 = vld [vmem:[%s14875_s0 + $0x38] sm:$0xff]  ;;  %v473_v47 = vld [vmem:[%s14875_s0 + $0xc00] sm:$0x7f]  ;;  %v474_v48 = vld [vmem:[%s14875_s0 + $0xc08] sm:$0x7f] }
  0x11   :  { %948 = vmatpush.msrb.mxu1 %v377_v29  ;;  %971 = vmatpush.msrb.mxu2 %v378_v30  ;;  %v475_v49 = vld [vmem:[%s14875_s0 + $0xc10] sm:$0x7f]  ;;  %v476_v50 = vld [vmem:[%s14875_s0 + $0xc18] sm:$0x7f]  ;;  %v382_v53 = vld [vmem:[%s14875_s0 + $0x920] sm:$0xff] }
  0x12   :  { %994 = vmatpush.msrb.mxu3 %v379_v31  ;;  %926 = vmatpush.msrb.mxu0 %v283_v32  ;;  %v380_v51 = vld [vmem:[%s14875_s0 + $0x910] sm:$0xff]  ;;  %v381_v52 = vld [vmem:[%s14875_s0 + $0x918] sm:$0xff]  ;;  %v383_v54 = vld [vmem:[%s14875_s0 + $0x928] sm:$0xff] }
  0x13   :  { %949 = vmatpush.msrb.mxu1 %v284_v33  ;;  %972 = vmatpush.msrb.mxu2 %v285_v34  ;;  %v287_v55 = vld [vmem:[%s14875_s0 + $0x620] sm:$0xff]  ;;  %v288_v56 = vld [vmem:[%s14875_s0 + $0x628] sm:$0xff]  ;;  %v289_v57 = vld [vmem:[%s14875_s0 + $0x630] sm:$0xff] }
  0x14   :  { %8199 = vmatmul.msk.f32.gmra.mxu0 %vm57_vm1, %v39_v36  ;;  %8204 = vmatmul.msk.f32.gmra.mxu1 %vm57_vm1, %v9048_v35  ;;  %v290_v58 = vld [vmem:[%s14875_s0 + $0x638] sm:$0xff]  ;;  %v194_v59 = vld [vmem:[%s14875_s0 + $0x330] sm:$0xff]  ;;  %v196_v61 = vld [vmem:[%s14875_s0 + $0x340] sm:$0xff] }
  0x15   :  { %8207 = vmatmul.msk.f32.gmra.mxu2 %vm57_vm1, %v9048_v35  ;;  %8210 = vmatmul.msk.f32.gmra.mxu3 %vm57_vm1, %v9048_v35  ;;  %v195_v60 = vld [vmem:[%s14875_s0 + $0x338] sm:$0xff]  ;;  %v197_v62 = vld [vmem:[%s14875_s0 + $0x348] sm:$0xff]  ;;  %v101_v63 = vld [vmem:[%s14875_s0 + $0x40] sm:$0xff] }
  0x16   :  { %49 = vperm.xlu0 %8848, %v45_v37   ;;  %995 = vmatpush.msrb.mxu3 %v286_v38  ;;  %v102_v0 = vld [vmem:[%s14875_s0 + $0x48] sm:$0xff]  ;;  %v103_v1 = vld [vmem:[%s14875_s0 + $0x50] sm:$0xff]  ;;  %v104_v2 = vld [vmem:[%s14875_s0 + $0x58] sm:$0xff] }
  0x17   :  { %927 = vmatpush.msrb.mxu0 %v190_v39  ;;  %950 = vmatpush.msrb.mxu1 %v191_v40  ;;  %v477_v4 = vld [vmem:[%s14875_s0 + $0xc20] sm:$0x7f]  ;;  %v478_v5 = vld [vmem:[%s14875_s0 + $0xc28] sm:$0x7f]  ;;  %v479_v6 = vld [vmem:[%s14875_s0 + $0xc30] sm:$0x7f] }
  0x18   :  { %973 = vmatpush.msrb.mxu2 %v192_v41  ;;  %996 = vmatpush.msrb.mxu3 %v193_v42  ;;  %v480_v7 = vld [vmem:[%s14875_s0 + $0xc38] sm:$0x7f]  ;;  %v384_v8 = vld [vmem:[%s14875_s0 + $0x930] sm:$0xff]  ;;  %v386_v10 = vld [vmem:[%s14875_s0 + $0x940] sm:$0xff] }
  0x19   :  { %928 = vmatpush.msrb.mxu0 %v97_v43  ;;  %951 = vmatpush.msrb.mxu1 %v98_v44  ;;  %v385_v9 = vld [vmem:[%s14875_s0 + $0x938] sm:$0xff]  ;;  %v387_v11 = vld [vmem:[%s14875_s0 + $0x948] sm:$0xff]  ;;  %v291_v12 = vld [vmem:[%s14875_s0 + $0x640] sm:$0xff] }
  0x1a   :  { %974 = vmatpush.msrb.mxu2 %v99_v45  ;;  %997 = vmatpush.msrb.mxu3 %v100_v46  ;;  %v292_v13 = vld [vmem:[%s14875_s0 + $0x648] sm:$0xff]  ;;  %v293_v14 = vld [vmem:[%s14875_s0 + $0x650] sm:$0xff]  ;;  %v294_v15 = vld [vmem:[%s14875_s0 + $0x658] sm:$0xff] }
  0x1b   :  { %8223 = vmatpush.msk.msra.mxu0 %vm64_vm0, %v473_v47  ;;  %8226 = vmatpush.msk.msra.mxu1 %vm64_vm0, %v474_v48  ;;  %v198_v16 = vld [vmem:[%s14875_s0 + $0x350] sm:$0xff]  ;;  %v199_v17 = vld [vmem:[%s14875_s0 + $0x358] sm:$0xff]  ;;  %v200_v18 = vld [vmem:[%s14875_s0 + $0x360] sm:$0xff] }
  0x1c   :  { %8212 = vmatmul.msk.f32.vlgmr.msrb.gmra.mxu0 %vm57_vm1, %v8996_v22  ;;  %8215 = vmatmul.msk.f32.vlgmr.msrb.gmra.mxu1 %vm57_vm1, %v8996_v22  ;;  %v201_v19 = vld [vmem:[%s14875_s0 + $0x368] sm:$0xff]  ;;  %v105_v20 = vld [vmem:[%s14875_s0 + $0x60] sm:$0xff]  ;;  %v107_v23 = vld [vmem:[%s14875_s0 + $0x70] sm:$0xff] }
  0x1d   :  { %8218 = vmatmul.msk.f32.vlgmr.msrb.gmra.mxu2 %vm57_vm1, %v8996_v22  ;;  %8221 = vmatmul.msk.f32.vlgmr.msrb.gmra.mxu3 %vm57_vm1, %v8996_v22  ;;  %v106_v21 = vld [vmem:[%s14875_s0 + $0x68] sm:$0xff]  ;;  %v108_v24 = vld [vmem:[%s14875_s0 + $0x78] sm:$0xff]  ;;  %v481_v25 = vld [vmem:[%s14875_s0 + $0xc40] sm:$0x7f] }
  0x1e   :  { %8229 = vmatpush.msk.msra.mxu2 %vm64_vm0, %v475_v49  ;;  %8232 = vmatpush.msk.msra.mxu3 %vm64_vm0, %v476_v50  ;;  %v482_v26 = vld [vmem:[%s14875_s0 + $0xc48] sm:$0x7f]  ;;  %v483_v27 = vld [vmem:[%s14875_s0 + $0xc50] sm:$0x7f]  ;;  %v484_v28 = vld [vmem:[%s14875_s0 + $0xc58] sm:$0x7f] }
  0x1f   :  { %1017 = vmatpush.msra.mxu0 %v380_v51  ;;  %1040 = vmatpush.msra.mxu1 %v381_v52  ;;  %v388_v29 = vld [vmem:[%s14875_s0 + $0x950] sm:$0xff]  ;;  %v389_v30 = vld [vmem:[%s14875_s0 + $0x958] sm:$0xff]  ;;  %v390_v31 = vld [vmem:[%s14875_s0 + $0x960] sm:$0xff] }
  0x20   :  { %1063 = vmatpush.msra.mxu2 %v382_v53  ;;  %1086 = vmatpush.msra.mxu3 %v383_v54  ;;  %v391_v32 = vld [vmem:[%s14875_s0 + $0x968] sm:$0xff]  ;;  %v295_v33 = vld [vmem:[%s14875_s0 + $0x660] sm:$0xff]  ;;  %v297_v36 = vld [vmem:[%s14875_s0 + $0x670] sm:$0xff] }
  0x21   :  { %1018 = vmatpush.msra.mxu0 %v287_v55  ;;  %1041 = vmatpush.msra.mxu1 %v288_v56  ;;  %v296_v34 = vld [vmem:[%s14875_s0 + $0x668] sm:$0xff]  ;;  %v298_v37 = vld [vmem:[%s14875_s0 + $0x678] sm:$0xff]  ;;  %v202_v38 = vld [vmem:[%s14875_s0 + $0x370] sm:$0xff] }
  0x22   :  { %1064 = vmatpush.msra.mxu2 %v289_v57  ;;  %1087 = vmatpush.msra.mxu3 %v290_v58  ;;  %v203_v39 = vld [vmem:[%s14875_s0 + $0x378] sm:$0xff]  ;;  %v204_v40 = vld [vmem:[%s14875_s0 + $0x380] sm:$0xff]  ;;  %v205_v41 = vld [vmem:[%s14875_s0 + $0x388] sm:$0xff] }
  0x23   :  { %1019 = vmatpush.msra.mxu0 %v194_v59  ;;  %1042 = vmatpush.msra.mxu1 %v195_v60  ;;  %v109_v42 = vld [vmem:[%s14875_s0 + $0x80] sm:$0xff]  ;;  %v110_v43 = vld [vmem:[%s14875_s0 + $0x88] sm:$0xff]  ;;  %v111_v44 = vld [vmem:[%s14875_s0 + $0x90] sm:$0xff] }
  0x24   :  { %8213 = vmatmul.msk.f32.gmra.mxu0 %vm57_vm1, %v9048_v35  ;;  %8216 = vmatmul.msk.f32.gmra.mxu1 %vm57_vm1, %v9048_v35  ;;  %v112_v45 = vld [vmem:[%s14875_s0 + $0x98] sm:$0xff]  ;;  %v485_v46 = vld [vmem:[%s14875_s0 + $0xc60] sm:$0x7f]  ;;  %v486_v47 = vld [vmem:[%s14875_s0 + $0xc68] sm:$0x7f] }
  0x25   :  { %8219 = vmatmul.msk.f32.gmra.mxu2 %vm57_vm1, %v9048_v35  ;;  %8222 = vmatmul.msk.f32.gmra.mxu3 %vm57_vm1, %v9048_v35  ;;  %v487_v48 = vld [vmem:[%s14875_s0 + $0xc70] sm:$0x7f]  ;;  %v488_v49 = vld [vmem:[%s14875_s0 + $0xc78] sm:$0x7f]  ;;  %v394_v52 = vld [vmem:[%s14875_s0 + $0x980] sm:$0xff] }
  0x26   :  { %1065 = vmatpush.msra.mxu2 %v196_v61  ;;  %1088 = vmatpush.msra.mxu3 %v197_v62  ;;  %v392_v50 = vld [vmem:[%s14875_s0 + $0x970] sm:$0xff]  ;;  %v393_v51 = vld [vmem:[%s14875_s0 + $0x978] sm:$0xff]  ;;  %v395_v53 = vld [vmem:[%s14875_s0 + $0x988] sm:$0xff] }
  0x27   :  { %1020 = vmatpush.msra.mxu0 %v101_v63  ;;  %1043 = vmatpush.msra.mxu1 %v102_v0  ;;  %v299_v54 = vld [vmem:[%s14875_s0 + $0x680] sm:$0xff]  ;;  %v300_v55 = vld [vmem:[%s14875_s0 + $0x688] sm:$0xff]  ;;  %v301_v56 = vld [vmem:[%s14875_s0 + $0x690] sm:$0xff] }
  0x28   :  { %1066 = vmatpush.msra.mxu2 %v103_v1  ;;  %1089 = vmatpush.msra.mxu3 %v104_v2  ;;  %v302_v57 = vld [vmem:[%s14875_s0 + $0x698] sm:$0xff]  ;;  %v206_v58 = vld [vmem:[%s14875_s0 + $0x390] sm:$0xff]  ;;  %v208_v60 = vld [vmem:[%s14875_s0 + $0x3a0] sm:$0xff] }
  0x29   :  { %8235 = vmatpush.msk.msrb.mxu0 %vm64_vm0, %v477_v4  ;;  %8238 = vmatpush.msk.msrb.mxu1 %vm64_vm0, %v478_v5  ;;  %v207_v59 = vld [vmem:[%s14875_s0 + $0x398] sm:$0xff]  ;;  %v209_v61 = vld [vmem:[%s14875_s0 + $0x3a8] sm:$0xff]  ;;  %v113_v62 = vld [vmem:[%s14875_s0 + $0xa0] sm:$0xff] }
  0x2a   :  { %8241 = vmatpush.msk.msrb.mxu2 %vm64_vm0, %v479_v6  ;;  %8244 = vmatpush.msk.msrb.mxu3 %vm64_vm0, %v480_v7  ;;  %v114_v63 = vld [vmem:[%s14875_s0 + $0xa8] sm:$0xff]  ;;  %v115_v0 = vld [vmem:[%s14875_s0 + $0xb0] sm:$0xff]  ;;  %v116_v1 = vld [vmem:[%s14875_s0 + $0xb8] sm:$0xff] }
  0x2b   :  { %1109 = vmatpush.msrb.mxu0 %v384_v8  ;;  %1132 = vmatpush.msrb.mxu1 %v385_v9  ;;  %v489_v2 = vld [vmem:[%s14875_s0 + $0xc80] sm:$0x7f]  ;;  %v490_v4 = vld [vmem:[%s14875_s0 + $0xc88] sm:$0x7f]  ;;  %v491_v5 = vld [vmem:[%s14875_s0 + $0xc90] sm:$0x7f] }
  0x2c   :  { %8224 = vmatmul.msk.f32.vlgmr.msra.gmra.mxu0 %vm57_vm1, %v8996_v22  ;;  %8227 = vmatmul.msk.f32.vlgmr.msra.gmra.mxu1 %vm57_vm1, %v8996_v22  ;;  %v492_v6 = vld [vmem:[%s14875_s0 + $0xc98] sm:$0x7f]  ;;  %v396_v7 = vld [vmem:[%s14875_s0 + $0x990] sm:$0xff]  ;;  %v398_v9 = vld [vmem:[%s14875_s0 + $0x9a0] sm:$0xff] }
  0x2d   :  { %8230 = vmatmul.msk.f32.vlgmr.msra.gmra.mxu2 %vm57_vm1, %v8996_v22  ;;  %8233 = vmatmul.msk.f32.vlgmr.msra.gmra.mxu3 %vm57_vm1, %v8996_v22  ;;  %v397_v8 = vld [vmem:[%s14875_s0 + $0x998] sm:$0xff] }
  0x2e   :  { %1155 = vmatpush.msrb.mxu2 %v386_v10  ;;  %1178 = vmatpush.msrb.mxu3 %v387_v11  ;;  %v399_v10 = vld [vmem:[%s14875_s0 + $0x9a8] sm:$0xff]  ;;  %v303_v11 = vld [vmem:[%s14875_s0 + $0x6a0] sm:$0xff] }
  0x2f   :  { %1110 = vmatpush.msrb.mxu0 %v291_v12  ;;  %1133 = vmatpush.msrb.mxu1 %v292_v13  ;;  %v304_v12 = vld [vmem:[%s14875_s0 + $0x6a8] sm:$0xff]  ;;  %v305_v13 = vld [vmem:[%s14875_s0 + $0x6b0] sm:$0xff] }
  0x30   :  { %1156 = vmatpush.msrb.mxu2 %v293_v14  ;;  %1179 = vmatpush.msrb.mxu3 %v294_v15  ;;  %v306_v14 = vld [vmem:[%s14875_s0 + $0x6b8] sm:$0xff]  ;;  %v210_v15 = vld [vmem:[%s14875_s0 + $0x3b0] sm:$0xff] }
  0x31   :  { %1111 = vmatpush.msrb.mxu0 %v198_v16  ;;  %1134 = vmatpush.msrb.mxu1 %v199_v17  ;;  %v211_v16 = vld [vmem:[%s14875_s0 + $0x3b8] sm:$0xff]  ;;  %v212_v17 = vld [vmem:[%s14875_s0 + $0x3c0] sm:$0xff] }
  0x32   :  { %1157 = vmatpush.msrb.mxu2 %v200_v18  ;;  %1180 = vmatpush.msrb.mxu3 %v201_v19  ;;  %v213_v18 = vld [vmem:[%s14875_s0 + $0x3c8] sm:$0xff]  ;;  %v117_v19 = vld [vmem:[%s14875_s0 + $0xc0] sm:$0xff] }
  0x33   :  { %1112 = vmatpush.msrb.mxu0 %v105_v20  ;;  %1135 = vmatpush.msrb.mxu1 %v106_v21  ;;  %v118_v20 = vld [vmem:[%s14875_s0 + $0xc8] sm:$0xff]  ;;  %v119_v21 = vld [vmem:[%s14875_s0 + $0xd0] sm:$0xff] }
  0x34   :  { %8225 = vmatmul.msk.f32.gmra.mxu0 %vm57_vm1, %v9048_v35  ;;  %8228 = vmatmul.msk.f32.gmra.mxu1 %vm57_vm1, %v9048_v35 }
  0x35   :  { %8231 = vmatmul.msk.f32.gmra.mxu2 %vm57_vm1, %v9048_v35  ;;  %8234 = vmatmul.msk.f32.gmra.mxu3 %vm57_vm1, %v9048_v35 }
  0x36   :  { %1158 = vmatpush.msrb.mxu2 %v107_v23  ;;  %1181 = vmatpush.msrb.mxu3 %v108_v24  ;;  %v120_v23 = vld [vmem:[%s14875_s0 + $0xd8] sm:$0xff]  ;;  %v493_v24 = vld [vmem:[%s14875_s0 + $0xca0] sm:$0x7f] }
  0x37   :  { %8247 = vmatpush.msk.msra.mxu0 %vm64_vm0, %v481_v25  ;;  %8250 = vmatpush.msk.msra.mxu1 %vm64_vm0, %v482_v26  ;;  %v494_v25 = vld [vmem:[%s14875_s0 + $0xca8] sm:$0x7f]  ;;  %v495_v26 = vld [vmem:[%s14875_s0 + $0xcb0] sm:$0x7f] }
  0x38   :  { %8253 = vmatpush.msk.msra.mxu2 %vm64_vm0, %v483_v27  ;;  %8256 = vmatpush.msk.msra.mxu3 %vm64_vm0, %v484_v28  ;;  %v496_v27 = vld [vmem:[%s14875_s0 + $0xcb8] sm:$0x7f]  ;;  %v400_v28 = vld [vmem:[%s14875_s0 + $0x9b0] sm:$0xff] }
  0x39   :  { %1201 = vmatpush.msra.mxu0 %v388_v29  ;;  %1224 = vmatpush.msra.mxu1 %v389_v30  ;;  %v401_v29 = vld [vmem:[%s14875_s0 + $0x9b8] sm:$0xff]  ;;  %v402_v30 = vld [vmem:[%s14875_s0 + $0x9c0] sm:$0xff] }
  0x3a   :  { %1247 = vmatpush.msra.mxu2 %v390_v31  ;;  %1270 = vmatpush.msra.mxu3 %v391_v32  ;;  %v403_v31 = vld [vmem:[%s14875_s0 + $0x9c8] sm:$0xff]  ;;  %v307_v32 = vld [vmem:[%s14875_s0 + $0x6c0] sm:$0xff] }
  0x3b   :  { %1202 = vmatpush.msra.mxu0 %v295_v33  ;;  %1225 = vmatpush.msra.mxu1 %v296_v34  ;;  %v308_v33 = vld [vmem:[%s14875_s0 + $0x6c8] sm:$0xff]  ;;  %v309_v34 = vld [vmem:[%s14875_s0 + $0x6d0] sm:$0xff] }
  0x3c   :  { %8236 = vmatmul.msk.f32.vlgmr.msrb.gmra.mxu0 %vm57_vm1, %v8996_v22  ;;  %8239 = vmatmul.msk.f32.vlgmr.msrb.gmra.mxu1 %vm57_vm1, %v8996_v22 }
  0x3d   :  { %8242 = vmatmul.msk.f32.vlgmr.msrb.gmra.mxu2 %vm57_vm1, %v8996_v22  ;;  %8245 = vmatmul.msk.f32.vlgmr.msrb.gmra.mxu3 %vm57_vm1, %v8996_v22 }
  0x3e   :  { %1248 = vmatpush.msra.mxu2 %v297_v36  ;;  %1271 = vmatpush.msra.mxu3 %v298_v37  ;;  %v310_v36 = vld [vmem:[%s14875_s0 + $0x6d8] sm:$0xff]  ;;  %v214_v37 = vld [vmem:[%s14875_s0 + $0x3d0] sm:$0xff] }
  0x3f   :  { %1203 = vmatpush.msra.mxu0 %v202_v38  ;;  %1226 = vmatpush.msra.mxu1 %v203_v39  ;;  %v215_v38 = vld [vmem:[%s14875_s0 + $0x3d8] sm:$0xff]  ;;  %v216_v39 = vld [vmem:[%s14875_s0 + $0x3e0] sm:$0xff] }
  0x40   :  { %1249 = vmatpush.msra.mxu2 %v204_v40  ;;  %1272 = vmatpush.msra.mxu3 %v205_v41  ;;  %v217_v40 = vld [vmem:[%s14875_s0 + $0x3e8] sm:$0xff]  ;;  %v121_v41 = vld [vmem:[%s14875_s0 + $0xe0] sm:$0xff] }
  0x41   :  { %1204 = vmatpush.msra.mxu0 %v109_v42  ;;  %1227 = vmatpush.msra.mxu1 %v110_v43  ;;  %v122_v42 = vld [vmem:[%s14875_s0 + $0xe8] sm:$0xff]  ;;  %v123_v43 = vld [vmem:[%s14875_s0 + $0xf0] sm:$0xff] }
  0x42   :  { %1250 = vmatpush.msra.mxu2 %v111_v44  ;;  %1273 = vmatpush.msra.mxu3 %v112_v45  ;;  %v124_v44 = vld [vmem:[%s14875_s0 + $0xf8] sm:$0xff]  ;;  %v497_v45 = vld [vmem:[%s14875_s0 + $0xcc0] sm:$0x7f] }
  0x43   :  { %8259 = vmatpush.msk.msrb.mxu0 %vm64_vm0, %v485_v46  ;;  %8262 = vmatpush.msk.msrb.mxu1 %vm64_vm0, %v486_v47  ;;  %v498_v46 = vld [vmem:[%s14875_s0 + $0xcc8] sm:$0x7f]  ;;  %v499_v47 = vld [vmem:[%s14875_s0 + $0xcd0] sm:$0x7f] }
  0x44   :  { %8237 = vmatmul.msk.f32.gmra.mxu0 %vm57_vm1, %v9048_v35  ;;  %8240 = vmatmul.msk.f32.gmra.mxu1 %vm57_vm1, %v9048_v35 }
  0x45   :  { %8243 = vmatmul.msk.f32.gmra.mxu2 %vm57_vm1, %v9048_v35  ;;  %8246 = vmatmul.msk.f32.gmra.mxu3 %vm57_vm1, %v9048_v35 }
  0x46   :  { %8265 = vmatpush.msk.msrb.mxu2 %vm64_vm0, %v487_v48  ;;  %8268 = vmatpush.msk.msrb.mxu3 %vm64_vm0, %v488_v49  ;;  %v500_v48 = vld [vmem:[%s14875_s0 + $0xcd8] sm:$0x7f] }
  0x47   :  { %1293 = vmatpush.msrb.mxu0 %v392_v50  ;;  %1316 = vmatpush.msrb.mxu1 %v393_v51  ;;  %v405_v49 = vld [vmem:[%s14875_s0 + $0x9d8] sm:$0xff]  ;;  %v406_v50 = vld [vmem:[%s14875_s0 + $0x9e0] sm:$0xff]  ;;  %v407_v51 = vld [vmem:[%s14875_s0 + $0x9e8] sm:$0xff] }
  0x48   :  { %1339 = vmatpush.msrb.mxu2 %v394_v52  ;;  %1362 = vmatpush.msrb.mxu3 %v395_v53  ;;  %v311_v52 = vld [vmem:[%s14875_s0 + $0x6e0] sm:$0xff]  ;;  %v312_v53 = vld [vmem:[%s14875_s0 + $0x6e8] sm:$0xff] }
  0x49   :  { %1294 = vmatpush.msrb.mxu0 %v299_v54  ;;  %1317 = vmatpush.msrb.mxu1 %v300_v55  ;;  %v313_v54 = vld [vmem:[%s14875_s0 + $0x6f0] sm:$0xff]  ;;  %v314_v55 = vld [vmem:[%s14875_s0 + $0x6f8] sm:$0xff] }
  0x4a   :  { %1340 = vmatpush.msrb.mxu2 %v301_v56  ;;  %1363 = vmatpush.msrb.mxu3 %v302_v57  ;;  %v218_v56 = vld [vmem:[%s14875_s0 + $0x3f0] sm:$0xff]  ;;  %v219_v57 = vld [vmem:[%s14875_s0 + $0x3f8] sm:$0xff] }
  0x4b   :  { %1295 = vmatpush.msrb.mxu0 %v206_v58  ;;  %1318 = vmatpush.msrb.mxu1 %v207_v59  ;;  %v220_v58 = vld [vmem:[%s14875_s0 + $0x400] sm:$0xff]  ;;  %v221_v59 = vld [vmem:[%s14875_s0 + $0x408] sm:$0xff] }
  0x4c   :  { %8248 = vmatmul.msk.f32.vlgmr.msra.gmra.mxu0 %vm57_vm1, %v8996_v22  ;;  %8251 = vmatmul.msk.f32.vlgmr.msra.gmra.mxu1 %vm57_vm1, %v8996_v22 }
  0x4d   :  { %8254 = vmatmul.msk.f32.vlgmr.msra.gmra.mxu2 %vm57_vm1, %v8996_v22  ;;  %8257 = vmatmul.msk.f32.vlgmr.msra.gmra.mxu3 %vm57_vm1, %v8996_v22 }
  0x4e   :  { %1341 = vmatpush.msrb.mxu2 %v208_v60  ;;  %1364 = vmatpush.msrb.mxu3 %v209_v61  ;;  %v125_v60 = vld [vmem:[%s14875_s0 + $0x100] sm:$0xff]  ;;  %v126_v61 = vld [vmem:[%s14875_s0 + $0x108] sm:$0xff] }
  0x4f   :  { %1296 = vmatpush.msrb.mxu0 %v113_v62  ;;  %1319 = vmatpush.msrb.mxu1 %v114_v63  ;;  %v127_v62 = vld [vmem:[%s14875_s0 + $0x110] sm:$0xff]  ;;  %v128_v63 = vld [vmem:[%s14875_s0 + $0x118] sm:$0xff] }
  0x50   :  { %1342 = vmatpush.msrb.mxu2 %v115_v0  ;;  %1365 = vmatpush.msrb.mxu3 %v116_v1  ;;  %v501_v0 = vld [vmem:[%s14875_s0 + $0xce0] sm:$0x7f]  ;;  %v502_v1 = vld [vmem:[%s14875_s0 + $0xce8] sm:$0x7f] }
  0x51   :  { %8271 = vmatpush.msk.msra.mxu0 %vm64_vm0, %v489_v2  ;;  %8274 = vmatpush.msk.msra.mxu1 %vm64_vm0, %v490_v4  ;;  %v503_v2 = vld [vmem:[%s14875_s0 + $0xcf0] sm:$0x7f]  ;;  %v504_v4 = vld [vmem:[%s14875_s0 + $0xcf8] sm:$0x7f] }
  0x52   :  { %8277 = vmatpush.msk.msra.mxu2 %vm64_vm0, %v491_v5  ;;  %8280 = vmatpush.msk.msra.mxu3 %vm64_vm0, %v492_v6  ;;  %v408_v5 = vld [vmem:[%s14875_s0 + $0x9f0] sm:$0xff]  ;;  %v409_v6 = vld [vmem:[%s14875_s0 + $0x9f8] sm:$0xff] }
  0x53   :  { %1385 = vmatpush.msra.mxu0 %v396_v7  ;;  %1408 = vmatpush.msra.mxu1 %v397_v8  ;;  %v410_v7 = vld [vmem:[%s14875_s0 + $0xa00] sm:$0xff]  ;;  %v411_v8 = vld [vmem:[%s14875_s0 + $0xa08] sm:$0xff] }
  0x54   :  { %8249 = vmatmul.msk.f32.gmra.mxu0 %vm57_vm1, %v9048_v35  ;;  %8252 = vmatmul.msk.f32.gmra.mxu1 %vm57_vm1, %v9048_v35 }
  0x55   :  { %8255 = vmatmul.msk.f32.gmra.mxu2 %vm57_vm1, %v9048_v35  ;;  %8258 = vmatmul.msk.f32.gmra.mxu3 %vm57_vm1, %v9048_v35 }
  0x56   :  { %1431 = vmatpush.msra.mxu2 %v398_v9  ;;  %1454 = vmatpush.msra.mxu3 %v399_v10  ;;  %v315_v9 = vld [vmem:[%s14875_s0 + $0x700] sm:$0xff]  ;;  %v316_v10 = vld [vmem:[%s14875_s0 + $0x708] sm:$0xff] }
  0x57   :  { %1386 = vmatpush.msra.mxu0 %v303_v11  ;;  %1409 = vmatpush.msra.mxu1 %v304_v12  ;;  %v317_v11 = vld [vmem:[%s14875_s0 + $0x710] sm:$0xff]  ;;  %v318_v12 = vld [vmem:[%s14875_s0 + $0x718] sm:$0xff] }
  0x58   :  { %1432 = vmatpush.msra.mxu2 %v305_v13  ;;  %1455 = vmatpush.msra.mxu3 %v306_v14  ;;  %v222_v13 = vld [vmem:[%s14875_s0 + $0x410] sm:$0xff]  ;;  %v223_v14 = vld [vmem:[%s14875_s0 + $0x418] sm:$0xff] }
  0x59   :  { %1387 = vmatpush.msra.mxu0 %v210_v15  ;;  %1410 = vmatpush.msra.mxu1 %v211_v16  ;;  %v224_v15 = vld [vmem:[%s14875_s0 + $0x420] sm:$0xff]  ;;  %v225_v16 = vld [vmem:[%s14875_s0 + $0x428] sm:$0xff] }
  0x5a   :  { %1433 = vmatpush.msra.mxu2 %v212_v17  ;;  %1456 = vmatpush.msra.mxu3 %v213_v18  ;;  %v129_v17 = vld [vmem:[%s14875_s0 + $0x120] sm:$0xff]  ;;  %v130_v18 = vld [vmem:[%s14875_s0 + $0x128] sm:$0xff] }
  0x5b   :  { %1388 = vmatpush.msra.mxu0 %v117_v19  ;;  %1411 = vmatpush.msra.mxu1 %v118_v20  ;;  %v131_v19 = vld [vmem:[%s14875_s0 + $0x130] sm:$0xff]  ;;  %v132_v20 = vld [vmem:[%s14875_s0 + $0x138] sm:$0xff] }
  0x5c   :  { %8260 = vmatmul.msk.f32.vlgmr.msrb.gmra.mxu0 %vm57_vm1, %v8996_v22  ;;  %8263 = vmatmul.msk.f32.vlgmr.msrb.gmra.mxu1 %vm57_vm1, %v8996_v22 }
  0x5d   :  { %8266 = vmatmul.msk.f32.vlgmr.msrb.gmra.mxu2 %vm57_vm1, %v8996_v22  ;;  %8269 = vmatmul.msk.f32.vlgmr.msrb.gmra.mxu3 %vm57_vm1, %v8996_v22 }
  0x5e   :  { %1434 = vmatpush.msra.mxu2 %v119_v21  ;;  %1457 = vmatpush.msra.mxu3 %v120_v23 }
  0x5f   :  { %8283 = vmatpush.msk.msrb.mxu0 %vm64_vm0, %v493_v24  ;;  %8286 = vmatpush.msk.msrb.mxu1 %vm64_vm0, %v494_v25  ;;  %v505_v24 = vld [vmem:[%s14875_s0 + $0xd00] sm:$0x7f]  ;;  %v506_v25 = vld [vmem:[%s14875_s0 + $0xd08] sm:$0x7f] }
  0x60   :  { %8289 = vmatpush.msk.msrb.mxu2 %vm64_vm0, %v495_v26  ;;  %8292 = vmatpush.msk.msrb.mxu3 %vm64_vm0, %v496_v27  ;;  %v507_v26 = vld [vmem:[%s14875_s0 + $0xd10] sm:$0x7f]  ;;  %v508_v27 = vld [vmem:[%s14875_s0 + $0xd18] sm:$0x7f] }
  0x61   :  { %1477 = vmatpush.msrb.mxu0 %v400_v28  ;;  %1500 = vmatpush.msrb.mxu1 %v401_v29  ;;  %v412_v28 = vld [vmem:[%s14875_s0 + $0xa10] sm:$0xff]  ;;  %v413_v29 = vld [vmem:[%s14875_s0 + $0xa18] sm:$0xff] }
  0x62   :  { %1523 = vmatpush.msrb.mxu2 %v402_v30  ;;  %1546 = vmatpush.msrb.mxu3 %v403_v31  ;;  %v414_v30 = vld [vmem:[%s14875_s0 + $0xa20] sm:$0xff]  ;;  %v415_v31 = vld [vmem:[%s14875_s0 + $0xa28] sm:$0xff] }
  0x63   :  { %1478 = vmatpush.msrb.mxu0 %v307_v32  ;;  %1501 = vmatpush.msrb.mxu1 %v308_v33  ;;  %v319_v32 = vld [vmem:[%s14875_s0 + $0x720] sm:$0xff]  ;;  %v320_v33 = vld [vmem:[%s14875_s0 + $0x728] sm:$0xff] }
  0x64   :  { %8261 = vmatmul.msk.f32.gmra.mxu0 %vm57_vm1, %v9048_v35  ;;  %8264 = vmatmul.msk.f32.gmra.mxu1 %vm57_vm1, %v9048_v35 }
  0x65   :  { %8267 = vmatmul.msk.f32.gmra.mxu2 %vm57_vm1, %v9048_v35  ;;  %8270 = vmatmul.msk.f32.gmra.mxu3 %vm57_vm1, %v9048_v35 }
  0x66   :  { %1524 = vmatpush.msrb.mxu2 %v309_v34  ;;  %1547 = vmatpush.msrb.mxu3 %v310_v36 }
  0x67   :  { %1479 = vmatpush.msrb.mxu0 %v214_v37  ;;  %1502 = vmatpush.msrb.mxu1 %v215_v38  ;;  %v321_v37 = vld [vmem:[%s14875_s0 + $0x730] sm:$0xff]  ;;  %v322_v38 = vld [vmem:[%s14875_s0 + $0x738] sm:$0xff] }
  0x68   :  { %1525 = vmatpush.msrb.mxu2 %v216_v39  ;;  %1548 = vmatpush.msrb.mxu3 %v217_v40 }
  0x69   :  { %1480 = vmatpush.msrb.mxu0 %v121_v41  ;;  %1503 = vmatpush.msrb.mxu1 %v122_v42  ;;  %v226_v41 = vld [vmem:[%s14875_s0 + $0x430] sm:$0xff]  ;;  %v227_v42 = vld [vmem:[%s14875_s0 + $0x438] sm:$0xff] }
  0x6a   :  { %1526 = vmatpush.msrb.mxu2 %v123_v43  ;;  %1549 = vmatpush.msrb.mxu3 %v124_v44  ;;  %v228_v43 = vld [vmem:[%s14875_s0 + $0x440] sm:$0xff]  ;;  %v229_v44 = vld [vmem:[%s14875_s0 + $0x448] sm:$0xff] }
  0x6b   :  { %8850 = vset.pattern.permute.xlu2 %v8863_v3  ;;  %v404_v3 = vld [vmem:[%s14875_s0 + $0x9d0] sm:$0xff] }
  0x6c   :  { %8272 = vmatmul.msk.f32.vlgmr.msra.gmra.mxu0 %vm57_vm1, %v8996_v22  ;;  %8275 = vmatmul.msk.f32.vlgmr.msra.gmra.mxu1 %vm57_vm1, %v8996_v22 }
  0x6d   :  { %8278 = vmatmul.msk.f32.vlgmr.msra.gmra.mxu2 %vm57_vm1, %v8996_v22  ;;  %8281 = vmatmul.msk.f32.vlgmr.msra.gmra.mxu3 %vm57_vm1, %v8996_v22 }
  0x6e   :  { %8295 = vmatpush.msk.msra.mxu0 %vm64_vm0, %v497_v45  ;;  %8298 = vmatpush.msk.msra.mxu1 %vm64_vm0, %v498_v46  ;;  %v133_v45 = vld [vmem:[%s14875_s0 + $0x140] sm:$0xff]  ;;  %v134_v46 = vld [vmem:[%s14875_s0 + $0x148] sm:$0xff] }
  0x6f   :  { %8301 = vmatpush.msk.msra.mxu2 %vm64_vm0, %v499_v47  ;;  %8304 = vmatpush.msk.msra.mxu3 %vm64_vm0, %v500_v48  ;;  %v135_v47 = vld [vmem:[%s14875_s0 + $0x150] sm:$0xff]  ;;  %v136_v48 = vld [vmem:[%s14875_s0 + $0x158] sm:$0xff] }
  0x70   :  { %1569 = vmatpush.msra.mxu0 %v404_v3  ;;  %1592 = vmatpush.msra.mxu1 %v405_v49 }
  0x71   :  { %1615 = vmatpush.msra.mxu2 %v406_v50  ;;  %1638 = vmatpush.msra.mxu3 %v407_v51 }
  0x72   :  { %1570 = vmatpush.msra.mxu0 %v311_v52  ;;  %1593 = vmatpush.msra.mxu1 %v312_v53  ;;  %v509_v52 = vld [vmem:[%s14875_s0 + $0xd20] sm:$0x7f]  ;;  %v510_v53 = vld [vmem:[%s14875_s0 + $0xd28] sm:$0x7f] }
  0x73   :  { %1616 = vmatpush.msra.mxu2 %v313_v54  ;;  %1639 = vmatpush.msra.mxu3 %v314_v55  ;;  %v511_v54 = vld [vmem:[%s14875_s0 + $0xd30] sm:$0x7f]  ;;  %v512_v55 = vld [vmem:[%s14875_s0 + $0xd38] sm:$0x7f] }
  0x74   :  { %8273 = vmatmul.msk.f32.gmra.mxu0 %vm57_vm1, %v9048_v35  ;;  %8276 = vmatmul.msk.f32.gmra.mxu1 %vm57_vm1, %v9048_v35 }
  0x75   :  { %8279 = vmatmul.msk.f32.gmra.mxu2 %vm57_vm1, %v9048_v35  ;;  %8282 = vmatmul.msk.f32.gmra.mxu3 %vm57_vm1, %v9048_v35 }
  0x76   :  { %1571 = vmatpush.msra.mxu0 %v218_v56  ;;  %1594 = vmatpush.msra.mxu1 %v219_v57  ;;  %v416_v56 = vld [vmem:[%s14875_s0 + $0xa30] sm:$0xff]  ;;  %v417_v57 = vld [vmem:[%s14875_s0 + $0xa38] sm:$0xff] }
  0x77   :  { %1617 = vmatpush.msra.mxu2 %v220_v58  ;;  %1640 = vmatpush.msra.mxu3 %v221_v59  ;;  %v418_v58 = vld [vmem:[%s14875_s0 + $0xa40] sm:$0xff] }
  0x78   :  { %1572 = vmatpush.msra.mxu0 %v125_v60  ;;  %1595 = vmatpush.msra.mxu1 %v126_v61  ;;  %v323_v59 = vld [vmem:[%s14875_s0 + $0x740] sm:$0xff]  ;;  %v324_v60 = vld [vmem:[%s14875_s0 + $0x748] sm:$0xff] }
  0x79   :  { %1618 = vmatpush.msra.mxu2 %v127_v62  ;;  %1641 = vmatpush.msra.mxu3 %v128_v63  ;;  %v325_v63 = vld [vmem:[%s14875_s0 + $0x750] sm:$0xff] }
  0x7c   :  { %8284 = vmatmul.msk.f32.vlgmr.msrb.gmra.mxu0 %vm57_vm1, %v8996_v22  ;;  %8287 = vmatmul.msk.f32.vlgmr.msrb.gmra.mxu1 %vm57_vm1, %v8996_v22 }
  0x7d   :  { %8290 = vmatmul.msk.f32.vlgmr.msrb.gmra.mxu2 %vm57_vm1, %v8996_v22  ;;  %8293 = vmatmul.msk.f32.vlgmr.msrb.gmra.mxu3 %vm57_vm1, %v8996_v22 }
  0x7e   :  { %8307 = vmatpush.msk.msrb.mxu0 %vm64_vm0, %v501_v0  ;;  %8310 = vmatpush.msk.msrb.mxu1 %vm64_vm0, %v502_v1  ;;  %v326_v0 = vld [vmem:[%s14875_s0 + $0x758] sm:$0xff] }
  0x7f   :  { %8313 = vmatpush.msk.msrb.mxu2 %vm64_vm0, %v503_v2  ;;  %8316 = vmatpush.msk.msrb.mxu3 %vm64_vm0, %v504_v4  ;;  %v230_v4 = vld [vmem:[%s14875_s0 + $0x450] sm:$0xff] }
  0x80   :  { %1661 = vmatpush.msrb.mxu0 %v408_v5  ;;  %1684 = vmatpush.msrb.mxu1 %v409_v6  ;;  %v231_v5 = vld [vmem:[%s14875_s0 + $0x458] sm:$0xff]  ;;  %v232_v6 = vld [vmem:[%s14875_s0 + $0x460] sm:$0xff] }
  0x81   :  { %1707 = vmatpush.msrb.mxu2 %v410_v7  ;;  %1730 = vmatpush.msrb.mxu3 %v411_v8  ;;  %v233_v7 = vld [vmem:[%s14875_s0 + $0x468] sm:$0xff]  ;;  %v137_v8 = vld [vmem:[%s14875_s0 + $0x160] sm:$0xff] }
  0x82   :  { %1662 = vmatpush.msrb.mxu0 %v315_v9  ;;  %1685 = vmatpush.msrb.mxu1 %v316_v10  ;;  %v138_v9 = vld [vmem:[%s14875_s0 + $0x168] sm:$0xff]  ;;  %v139_v10 = vld [vmem:[%s14875_s0 + $0x170] sm:$0xff] }
  0x83   :  { %1708 = vmatpush.msrb.mxu2 %v317_v11  ;;  %1731 = vmatpush.msrb.mxu3 %v318_v12  ;;  %v140_v11 = vld [vmem:[%s14875_s0 + $0x178] sm:$0xff] }
  0x84   :  { %8285 = vmatmul.msk.f32.gmra.mxu0 %vm57_vm1, %v9048_v35  ;;  %8288 = vmatmul.msk.f32.gmra.mxu1 %vm57_vm1, %v9048_v35 }
  0x85   :  { %8291 = vmatmul.msk.f32.gmra.mxu2 %vm57_vm1, %v9048_v35  ;;  %8294 = vmatmul.msk.f32.gmra.mxu3 %vm57_vm1, %v9048_v35 }
  0x86   :  { %1663 = vmatpush.msrb.mxu0 %v222_v13  ;;  %1686 = vmatpush.msrb.mxu1 %v223_v14 }
  0x87   :  { %1709 = vmatpush.msrb.mxu2 %v224_v15  ;;  %1732 = vmatpush.msrb.mxu3 %v225_v16  ;;  %v513_v15 = vld [vmem:[%s14875_s0 + $0xd40] sm:$0x7f]  ;;  %v514_v16 = vld [vmem:[%s14875_s0 + $0xd48] sm:$0x7f] }
  0x88   :  { %1664 = vmatpush.msrb.mxu0 %v129_v17  ;;  %1687 = vmatpush.msrb.mxu1 %v130_v18  ;;  %v9920_v17 = vld [vmem:[%s14876_s1 + $0x10] sm:$0xff] }
  0x89   :  { %v9715_v21 = vpop.f32.mrf.mxu0  ;;  %v9717_v23 = vpop.f32.mrf.mxu1  ;;  %1710 = vmatpush.msrb.mxu2 %v131_v19  ;;  %1733 = vmatpush.msrb.mxu3 %v132_v20  ;;  %v515_v18 = vld [vmem:[%s14875_s0 + $0xd50] sm:$0x7f]  ;;  %v516_v19 = vld [vmem:[%s14875_s0 + $0xd58] sm:$0x7f] }
  0x8a   :  { %v420_v20 = vld [vmem:[%s14875_s0 + $0xa50] sm:$0xff] }
  0x8c   :  { %8296 = vmatmul.msk.f32.vlgmr.msra.gmra.mxu0 %vm57_vm1, %v8996_v22  ;;  %8299 = vmatmul.msk.f32.vlgmr.msra.gmra.mxu1 %vm57_vm1, %v8996_v22 }
  0x8d   :  { %8302 = vmatmul.msk.f32.vlgmr.msra.gmra.mxu2 %vm57_vm1, %v8996_v22  ;;  %8305 = vmatmul.msk.f32.vlgmr.msra.gmra.mxu3 %vm57_vm1, %v8996_v22 }
  0x8e   :  { %8319 = vmatpush.msk.msra.mxu0 %vm64_vm0, %v505_v24  ;;  %8322 = vmatpush.msk.msra.mxu1 %vm64_vm0, %v506_v25  ;;  %v421_v24 = vld [vmem:[%s14875_s0 + $0xa58] sm:$0xff]  ;;  %v422_v25 = vld [vmem:[%s14875_s0 + $0xa60] sm:$0xff] }
  0x8f   :  { %8325 = vmatpush.msk.msra.mxu2 %vm64_vm0, %v507_v26  ;;  %8328 = vmatpush.msk.msra.mxu3 %vm64_vm0, %v508_v27  ;;  %v423_v26 = vld [vmem:[%s14875_s0 + $0xa68] sm:$0xff]  ;;  %v327_v27 = vld [vmem:[%s14875_s0 + $0x760] sm:$0xff] }
  0x90   :  { %v9761_v34 = vpop.f32.mrf.mxu2  ;;  %v9763_v36 = vpop.f32.mrf.mxu3  ;;  %1753 = vmatpush.msra.mxu0 %v412_v28  ;;  %1776 = vmatpush.msra.mxu1 %v413_v29  ;;  %v328_v28 = vld [vmem:[%s14875_s0 + $0x768] sm:$0xff] }
  0x91   :  { %v9771_v39 = vpop.f32.mrf.mxu0  ;;  %v9773_v40 = vpop.f32.mrf.mxu1  ;;  %1799 = vmatpush.msra.mxu2 %v414_v30  ;;  %1822 = vmatpush.msra.mxu3 %v415_v31  ;;  %v329_v31 = vld [vmem:[%s14875_s0 + $0x770] sm:$0xff] }
  0x92   :  { %1754 = vmatpush.msra.mxu0 %v319_v32  ;;  %1777 = vmatpush.msra.mxu1 %v320_v33  ;;  %v330_v32 = vld [vmem:[%s14875_s0 + $0x778] sm:$0xff] }
  0x93   :  { %1800 = vmatpush.msra.mxu2 %v321_v37  ;;  %1823 = vmatpush.msra.mxu3 %v322_v38  ;;  %v234_v38 = vld [vmem:[%s14875_s0 + $0x470] sm:$0xff] }
  0x94   :  { %8297 = vmatmul.msk.f32.gmra.mxu0 %vm57_vm1, %v9048_v35  ;;  %8300 = vmatmul.msk.f32.gmra.mxu1 %vm57_vm1, %v9048_v35 }
  0x95   :  { %8303 = vmatmul.msk.f32.gmra.mxu2 %vm57_vm1, %v9048_v35  ;;  %8306 = vmatmul.msk.f32.gmra.mxu3 %vm57_vm1, %v9048_v35 }
  0x96   :  { %1755 = vmatpush.msra.mxu0 %v226_v41  ;;  %1778 = vmatpush.msra.mxu1 %v227_v42  ;;  %v235_v41 = vld [vmem:[%s14875_s0 + $0x478] sm:$0xff] }
  0x97   :  { %1801 = vmatpush.msra.mxu2 %v228_v43  ;;  %1824 = vmatpush.msra.mxu3 %v229_v44  ;;  %v9981_v42 = vld [vmem:[%s14876_s1 + $0x18] sm:$0xff]  ;;  %v236_v43 = vld [vmem:[%s14875_s0 + $0x480] sm:$0xff]  ;;  %v237_v44 = vld [vmem:[%s14875_s0 + $0x488] sm:$0xff] }
  0x98   :  { %v9807_v3 = vpop.f32.mrf.mxu2  ;;  %v9809_v49 = vpop.f32.mrf.mxu3  ;;  %1756 = vmatpush.msra.mxu0 %v133_v45  ;;  %1779 = vmatpush.msra.mxu1 %v134_v46  ;;  %v141_v45 = vld [vmem:[%s14875_s0 + $0x180] sm:$0xff]  ;;  %v142_v46 = vld [vmem:[%s14875_s0 + $0x188] sm:$0xff] }
  0x99   :  { %v9811_v50 = vpop.f32.mrf.mxu0  ;;  %v9813_v51 = vpop.f32.mrf.mxu1  ;;  %1802 = vmatpush.msra.mxu2 %v135_v47  ;;  %1825 = vmatpush.msra.mxu3 %v136_v48  ;;  %v143_v47 = vld [vmem:[%s14875_s0 + $0x190] sm:$0xff]  ;;  %v144_v48 = vld [vmem:[%s14875_s0 + $0x198] sm:$0xff] }
  0x9c   :  { %8308 = vmatmul.msk.f32.vlgmr.msrb.gmra.mxu0 %vm57_vm1, %v8996_v22  ;;  %8311 = vmatmul.msk.f32.vlgmr.msrb.gmra.mxu1 %vm57_vm1, %v8996_v22 }
  0x9d   :  { %8314 = vmatmul.msk.f32.vlgmr.msrb.gmra.mxu2 %vm57_vm1, %v8996_v22  ;;  %8317 = vmatmul.msk.f32.vlgmr.msrb.gmra.mxu3 %vm57_vm1, %v8996_v22  ;;  %v419_v22 = vld [vmem:[%s14875_s0 + $0xa48] sm:$0xff] }
  0x9e   :  { %8331 = vmatpush.msk.msrb.mxu0 %vm64_vm0, %v509_v52  ;;  %8334 = vmatpush.msk.msrb.mxu1 %vm64_vm0, %v510_v53 }
  0x9f   :  { %8337 = vmatpush.msk.msrb.mxu2 %vm64_vm0, %v511_v54  ;;  %8340 = vmatpush.msk.msrb.mxu3 %vm64_vm0, %v512_v55 }
  0xa0   :  { %v9857_v61 = vpop.f32.mrf.mxu2  ;;  %v9859_v62 = vpop.f32.mrf.mxu3  ;;  %1845 = vmatpush.msrb.mxu0 %v416_v56  ;;  %1868 = vmatpush.msrb.mxu1 %v417_v57  ;;  %v517_v56 = vld [vmem:[%s14875_s0 + $0xd60] sm:$0x7f]  ;;  %v518_v57 = vld [vmem:[%s14875_s0 + $0xd68] sm:$0x7f] }
  0xa1   :  { %v9867_v1 = vpop.f32.mrf.mxu0  ;;  %v9869_v2 = vpop.f32.mrf.mxu1  ;;  %1891 = vmatpush.msrb.mxu2 %v418_v58  ;;  %1914 = vmatpush.msrb.mxu3 %v419_v22  ;;  %v519_v58 = vld [vmem:[%s14875_s0 + $0xd70] sm:$0x7f]  ;;  %v520_v22 = vld [vmem:[%s14875_s0 + $0xd78] sm:$0x7f] }
  0xa2   :  { %1846 = vmatpush.msrb.mxu0 %v323_v59  ;;  %1869 = vmatpush.msrb.mxu1 %v324_v60  ;;  %v424_v59 = vld [vmem:[%s14875_s0 + $0xa70] sm:$0xff]  ;;  %v425_v60 = vld [vmem:[%s14875_s0 + $0xa78] sm:$0xff] }
  0xa3   :  { %1892 = vmatpush.msrb.mxu2 %v325_v63  ;;  %1915 = vmatpush.msrb.mxu3 %v326_v0  ;;  %v426_v63 = vld [vmem:[%s14875_s0 + $0xa80] sm:$0xff]  ;;  %v427_v0 = vld [vmem:[%s14875_s0 + $0xa88] sm:$0xff] }
  0xa4   :  { %8309 = vmatmul.msk.f32.gmra.mxu0 %vm57_vm1, %v9048_v35  ;;  %8312 = vmatmul.msk.f32.gmra.mxu1 %vm57_vm1, %v9048_v35 }
  0xa5   :  { %8315 = vmatmul.msk.f32.gmra.mxu2 %vm57_vm1, %v9048_v35  ;;  %8318 = vmatmul.msk.f32.gmra.mxu3 %vm57_vm1, %v9048_v35 }
  0xa6   :  { %1847 = vmatpush.msrb.mxu0 %v230_v4  ;;  %1870 = vmatpush.msrb.mxu1 %v231_v5  ;;  %v331_v4 = vld [vmem:[%s14875_s0 + $0x780] sm:$0xff]  ;;  %v332_v5 = vld [vmem:[%s14875_s0 + $0x788] sm:$0xff] }
  0xa7   :  { %1893 = vmatpush.msrb.mxu2 %v232_v6  ;;  %1916 = vmatpush.msrb.mxu3 %v233_v7 }
  0xa8   :  { %v9903_v35 = vpop.f32.mrf.mxu2  ;;  %v9905_v12 = vpop.f32.mrf.mxu3  ;;  %1848 = vmatpush.msrb.mxu0 %v137_v8  ;;  %1871 = vmatpush.msrb.mxu1 %v138_v9  ;;  %v333_v8 = vld [vmem:[%s14875_s0 + $0x790] sm:$0xff]  ;;  %v334_v9 = vld [vmem:[%s14875_s0 + $0x798] sm:$0xff] }
  0xa9   :  { %v9907_v13 = vpop.f32.mrf.mxu0  ;;  %v9909_v14 = vpop.f32.mrf.mxu1  ;;  %1894 = vmatpush.msrb.mxu2 %v139_v10  ;;  %1917 = vmatpush.msrb.mxu3 %v140_v11 }
  0xac   :  { %8320 = vmatmul.msk.f32.vlgmr.msra.gmra.mxu0 %vm57_vm1, %v9920_v17  ;;  %8323 = vmatmul.msk.f32.vlgmr.msra.gmra.mxu1 %vm57_vm1, %v9920_v17 }
  0xad   :  { %8326 = vmatmul.msk.f32.vlgmr.msra.gmra.mxu2 %vm57_vm1, %v9920_v17  ;;  %8329 = vmatmul.msk.f32.vlgmr.msra.gmra.mxu3 %vm57_vm1, %v9920_v17 }
  0xae   :  { %8343 = vmatpush.msk.msra.mxu0 %vm64_vm0, %v513_v15  ;;  %8346 = vmatpush.msk.msra.mxu1 %vm64_vm0, %v514_v16  ;;  %v238_v15 = vld [vmem:[%s14875_s0 + $0x490] sm:$0xff]  ;;  %v239_v16 = vld [vmem:[%s14875_s0 + $0x498] sm:$0xff] }
  0xaf   :  { %8349 = vmatpush.msk.msra.mxu2 %vm64_vm0, %v515_v18  ;;  %8352 = vmatpush.msk.msra.mxu3 %vm64_vm0, %v516_v19  ;;  %v240_v18 = vld [vmem:[%s14875_s0 + $0x4a0] sm:$0xff]  ;;  %v241_v19 = vld [vmem:[%s14875_s0 + $0x4a8] sm:$0xff] }
  0xb0   :  { %v9958_v29 = vpop.f32.mrf.mxu2  ;;  %v9960_v30 = vpop.f32.mrf.mxu3  ;;  %1937 = vmatpush.msra.mxu0 %v420_v20  ;;  %1960 = vmatpush.msra.mxu1 %v421_v24  ;;  %v145_v20 = vld [vmem:[%s14875_s0 + $0x1a0] sm:$0xff]  ;;  %v146_v24 = vld [vmem:[%s14875_s0 + $0x1a8] sm:$0xff] }
  0xb1   :  { %v9968_v33 = vpop.f32.mrf.mxu0  ;;  %v9970_v37 = vpop.f32.mrf.mxu1  ;;  %1983 = vmatpush.msra.mxu2 %v422_v25  ;;  %2006 = vmatpush.msra.mxu3 %v423_v26  ;;  %v147_v25 = vld [vmem:[%s14875_s0 + $0x1b0] sm:$0xff]  ;;  %v148_v26 = vld [vmem:[%s14875_s0 + $0x1b8] sm:$0xff] }
  0xb2   :  { %1938 = vmatpush.msra.mxu0 %v327_v27  ;;  %1961 = vmatpush.msra.mxu1 %v328_v28 }
  0xb3   :  { %1984 = vmatpush.msra.mxu2 %v329_v31  ;;  %2007 = vmatpush.msra.mxu3 %v330_v32 }
  0xb4   :  { %8321 = vmatmul.msk.f32.gmra.mxu0 %vm57_vm1, %v9981_v42  ;;  %8324 = vmatmul.msk.f32.gmra.mxu1 %vm57_vm1, %v9981_v42 }
  0xb5   :  { %8327 = vmatmul.msk.f32.gmra.mxu2 %vm57_vm1, %v9981_v42  ;;  %8330 = vmatmul.msk.f32.gmra.mxu3 %vm57_vm1, %v9981_v42 }
  0xb6   :  { %1939 = vmatpush.msra.mxu0 %v234_v38  ;;  %1962 = vmatpush.msra.mxu1 %v235_v41  ;;  %v521_v38 = vld [vmem:[%s14875_s0 + $0xd80] sm:$0x7f]  ;;  %v522_v41 = vld [vmem:[%s14875_s0 + $0xd88] sm:$0x7f] }
  0xb7   :  { %1985 = vmatpush.msra.mxu2 %v236_v43  ;;  %2008 = vmatpush.msra.mxu3 %v237_v44  ;;  %v523_v43 = vld [vmem:[%s14875_s0 + $0xd90] sm:$0x7f]  ;;  %v524_v44 = vld [vmem:[%s14875_s0 + $0xd98] sm:$0x7f] }
  0xb8   :  { %v10009_v52 = vpop.f32.mrf.mxu2  ;;  %v10011_v53 = vpop.f32.mrf.mxu3  ;;  %1940 = vmatpush.msra.mxu0 %v141_v45  ;;  %1963 = vmatpush.msra.mxu1 %v142_v46  ;;  %v428_v45 = vld [vmem:[%s14875_s0 + $0xa90] sm:$0xff]  ;;  %v429_v46 = vld [vmem:[%s14875_s0 + $0xa98] sm:$0xff] }
  0xb9   :  { %v10013_v54 = vpop.f32.mrf.mxu0  ;;  %v10015_v55 = vpop.f32.mrf.mxu1  ;;  %1986 = vmatpush.msra.mxu2 %v143_v47  ;;  %2009 = vmatpush.msra.mxu3 %v144_v48  ;;  %v430_v47 = vld [vmem:[%s14875_s0 + $0xaa0] sm:$0xff]  ;;  %v431_v48 = vld [vmem:[%s14875_s0 + $0xaa8] sm:$0xff] }
  0xbc   :  { %8332 = vmatmul.msk.f32.vlgmr.msrb.gmra.mxu0 %vm57_vm1, %v9920_v17  ;;  %8335 = vmatmul.msk.f32.vlgmr.msrb.gmra.mxu1 %vm57_vm1, %v9920_v17 }
  0xbd   :  { %8338 = vmatmul.msk.f32.vlgmr.msrb.gmra.mxu2 %vm57_vm1, %v9920_v17  ;;  %8341 = vmatmul.msk.f32.vlgmr.msrb.gmra.mxu3 %vm57_vm1, %v9920_v17 }
  0xbe   :  { %8355 = vmatpush.msk.msrb.mxu0 %vm64_vm0, %v517_v56  ;;  %8358 = vmatpush.msk.msrb.mxu1 %vm64_vm0, %v518_v57  ;;  %v335_v56 = vld [vmem:[%s14875_s0 + $0x7a0] sm:$0xff]  ;;  %v336_v57 = vld [vmem:[%s14875_s0 + $0x7a8] sm:$0xff] }
  0xbf   :  { %8361 = vmatpush.msk.msrb.mxu2 %vm64_vm0, %v519_v58  ;;  %8364 = vmatpush.msk.msrb.mxu3 %vm64_vm0, %v520_v22 }
  0xc0   :  { %v10059_v6 = vpop.f32.mrf.mxu2  ;;  %v10061_v7 = vpop.f32.mrf.mxu3  ;;  %2029 = vmatpush.msrb.mxu0 %v424_v59  ;;  %2052 = vmatpush.msrb.mxu1 %v425_v60  ;;  %v337_v59 = vld [vmem:[%s14875_s0 + $0x7b0] sm:$0xff]  ;;  %v338_v60 = vld [vmem:[%s14875_s0 + $0x7b8] sm:$0xff] }
  0xc1   :  { %v10069_v10 = vpop.f32.mrf.mxu0  ;;  %v10071_v11 = vpop.f32.mrf.mxu1  ;;  %2075 = vmatpush.msrb.mxu2 %v426_v63  ;;  %2098 = vmatpush.msrb.mxu3 %v427_v0 }
  0xc2   :  { %2030 = vmatpush.msrb.mxu0 %v331_v4  ;;  %2053 = vmatpush.msrb.mxu1 %v332_v5  ;;  %v242_v4 = vld [vmem:[%s14875_s0 + $0x4b0] sm:$0xff]  ;;  %v243_v5 = vld [vmem:[%s14875_s0 + $0x4b8] sm:$0xff] }
  0xc3   :  { %2076 = vmatpush.msrb.mxu2 %v333_v8  ;;  %2099 = vmatpush.msrb.mxu3 %v334_v9  ;;  %v244_v8 = vld [vmem:[%s14875_s0 + $0x4c0] sm:$0xff]  ;;  %v245_v9 = vld [vmem:[%s14875_s0 + $0x4c8] sm:$0xff] }
  0xc4   :  { %8333 = vmatmul.msk.f32.gmra.mxu0 %vm57_vm1, %v9981_v42  ;;  %8336 = vmatmul.msk.f32.gmra.mxu1 %vm57_vm1, %v9981_v42 }
  0xc5   :  { %8339 = vmatmul.msk.f32.gmra.mxu2 %vm57_vm1, %v9981_v42  ;;  %8342 = vmatmul.msk.f32.gmra.mxu3 %vm57_vm1, %v9981_v42 }
  0xc6   :  { %2031 = vmatpush.msrb.mxu0 %v238_v15  ;;  %2054 = vmatpush.msrb.mxu1 %v239_v16  ;;  %v149_v15 = vld [vmem:[%s14875_s0 + $0x1c0] sm:$0xff]  ;;  %v150_v16 = vld [vmem:[%s14875_s0 + $0x1c8] sm:$0xff] }
  0xc7   :  { %2077 = vmatpush.msrb.mxu2 %v240_v18  ;;  %2100 = vmatpush.msrb.mxu3 %v241_v19  ;;  %v151_v18 = vld [vmem:[%s14875_s0 + $0x1d0] sm:$0xff]  ;;  %v152_v19 = vld [vmem:[%s14875_s0 + $0x1d8] sm:$0xff] }
  0xc8   :  { %v10105_v27 = vpop.f32.mrf.mxu2  ;;  %v10107_v28 = vpop.f32.mrf.mxu3  ;;  %2032 = vmatpush.msrb.mxu0 %v145_v20  ;;  %2055 = vmatpush.msrb.mxu1 %v146_v24 }
  0xc9   :  { %v10109_v31 = vpop.f32.mrf.mxu0  ;;  %v10111_v32 = vpop.f32.mrf.mxu1  ;;  %2078 = vmatpush.msrb.mxu2 %v147_v25  ;;  %2101 = vmatpush.msrb.mxu3 %v148_v26  ;;  %v7761_v25 = vld [vmem:[%s14878_s8 + $0x18] sm:$0xff] }
  0xca   :  { %7779 = vperm.xlu0 %8848, %v7761_v25   ;;  %v249_v25 = vld [vmem:[%s14875_s0 + $0x4e8] sm:$0xff] }
  0xcc   :  { %8344 = vmatmul.msk.f32.vlgmr.msra.gmra.mxu0 %vm57_vm1, %v9920_v17  ;;  %8347 = vmatmul.msk.f32.vlgmr.msra.gmra.mxu1 %vm57_vm1, %v9920_v17 }
  0xcd   :  { %8350 = vmatmul.msk.f32.vlgmr.msra.gmra.mxu2 %vm57_vm1, %v9920_v17  ;;  %8353 = vmatmul.msk.f32.vlgmr.msra.gmra.mxu3 %vm57_vm1, %v9920_v17 }
  0xce   :  { %8367 = vmatpush.msk.msra.mxu0 %vm64_vm0, %v521_v38  ;;  %8370 = vmatpush.msk.msra.mxu1 %vm64_vm0, %v522_v41  ;;  %v525_v41 = vld [vmem:[%s14875_s0 + $0xda0] sm:$0x7f] }
  0xcf   :  { %8373 = vmatpush.msk.msra.mxu2 %vm64_vm0, %v523_v43  ;;  %8376 = vmatpush.msk.msra.mxu3 %vm64_vm0, %v524_v44  ;;  %v526_v43 = vld [vmem:[%s14875_s0 + $0xda8] sm:$0x7f]  ;;  %v527_v44 = vld [vmem:[%s14875_s0 + $0xdb0] sm:$0x7f] }
  0xd0   :  { %v10155_v58 = vpop.f32.mrf.mxu2  ;;  %v10157_v22 = vpop.f32.mrf.mxu3  ;;  %2121 = vmatpush.msra.mxu0 %v428_v45  ;;  %2144 = vmatpush.msra.mxu1 %v429_v46  ;;  %v528_v45 = vld [vmem:[%s14875_s0 + $0xdb8] sm:$0x7f]  ;;  %v432_v46 = vld [vmem:[%s14875_s0 + $0xab0] sm:$0xff] }
  0xd1   :  { %v10165_v63 = vpop.f32.mrf.mxu0  ;;  %v10167_v0 = vpop.f32.mrf.mxu1  ;;  %2167 = vmatpush.msra.mxu2 %v430_v47  ;;  %2190 = vmatpush.msra.mxu3 %v431_v48  ;;  %v433_v47 = vld [vmem:[%s14875_s0 + $0xab8] sm:$0xff]  ;;  %v434_v48 = vld [vmem:[%s14875_s0 + $0xac0] sm:$0xff] }
  0xd2   :  { %2122 = vmatpush.msra.mxu0 %v335_v56  ;;  %2145 = vmatpush.msra.mxu1 %v336_v57  ;;  %v435_v56 = vld [vmem:[%s14875_s0 + $0xac8] sm:$0xff]  ;;  %v339_v57 = vld [vmem:[%s14875_s0 + $0x7c0] sm:$0xff] }
  0xd3   :  { %2168 = vmatpush.msra.mxu2 %v337_v59  ;;  %2191 = vmatpush.msra.mxu3 %v338_v60  ;;  %v340_v59 = vld [vmem:[%s14875_s0 + $0x7c8] sm:$0xff] }
  0xd4   :  { %8345 = vmatmul.msk.f32.gmra.mxu0 %vm57_vm1, %v9981_v42  ;;  %8348 = vmatmul.msk.f32.gmra.mxu1 %vm57_vm1, %v9981_v42 }
  0xd5   :  { %8351 = vmatmul.msk.f32.gmra.mxu2 %vm57_vm1, %v9981_v42  ;;  %8354 = vmatmul.msk.f32.gmra.mxu3 %vm57_vm1, %v9981_v42 }
  0xd6   :  { %2123 = vmatpush.msra.mxu0 %v242_v4  ;;  %2146 = vmatpush.msra.mxu1 %v243_v5  ;;  %v341_v5 = vld [vmem:[%s14875_s0 + $0x7d0] sm:$0xff] }
  0xd7   :  { %2169 = vmatpush.msra.mxu2 %v244_v8  ;;  %2192 = vmatpush.msra.mxu3 %v245_v9  ;;  %v342_v8 = vld [vmem:[%s14875_s0 + $0x7d8] sm:$0xff] }
  0xd8   :  { %v10201_v20 = vpop.f32.mrf.mxu2  ;;  %v10203_v24 = vpop.f32.mrf.mxu3  ;;  %2124 = vmatpush.msra.mxu0 %v149_v15  ;;  %2147 = vmatpush.msra.mxu1 %v150_v16  ;;  %v246_v16 = vld [vmem:[%s14875_s0 + $0x4d0] sm:$0xff] }
  0xd9   :  { %v10208_v26 = vpop.f32.mrf.mxu0  ;;  %v10210_v38 = vpop.f32.mrf.mxu1  ;;  %2170 = vmatpush.msra.mxu2 %v151_v18  ;;  %2193 = vmatpush.msra.mxu3 %v152_v19  ;;  %v247_v18 = vld [vmem:[%s14875_s0 + $0x4d8] sm:$0xff]  ;;  %v248_v19 = vld [vmem:[%s14875_s0 + $0x4e0] sm:$0xff] }
  0xdc   :  { %8356 = vmatmul.msk.f32.vlgmr.msrb.gmra.mxu0 %vm57_vm1, %v9920_v17  ;;  %8359 = vmatmul.msk.f32.vlgmr.msrb.gmra.mxu1 %vm57_vm1, %v9920_v17 }
  0xdd   :  { %8362 = vmatmul.msk.f32.vlgmr.msrb.gmra.mxu2 %vm57_vm1, %v9920_v17  ;;  %8365 = vmatmul.msk.f32.vlgmr.msrb.gmra.mxu3 %vm57_vm1, %v9920_v17 }
  0xde   :  { %8379 = vmatpush.msk.msrb.mxu0 %vm64_vm0, %v525_v41  ;;  %8382 = vmatpush.msk.msrb.mxu1 %vm64_vm0, %v526_v43  ;;  %v153_v41 = vld [vmem:[%s14875_s0 + $0x1e0] sm:$0xff]  ;;  %v154_v43 = vld [vmem:[%s14875_s0 + $0x1e8] sm:$0xff] }
  0xdf   :  { %8385 = vmatpush.msk.msrb.mxu2 %vm64_vm0, %v527_v44  ;;  %8388 = vmatpush.msk.msrb.mxu3 %vm64_vm0, %v528_v45  ;;  %v155_v44 = vld [vmem:[%s14875_s0 + $0x1f0] sm:$0xff]  ;;  %v156_v45 = vld [vmem:[%s14875_s0 + $0x1f8] sm:$0xff] }
  0xe0   :  { %v10254_v60 = vpop.f32.mrf.mxu2  ;;  %v10256_v4 = vpop.f32.mrf.mxu3  ;;  %2213 = vmatpush.msrb.mxu0 %v432_v46  ;;  %2236 = vmatpush.msrb.mxu1 %v433_v47  ;;  %v7758_v46 = vld [vmem:[%s14878_s8] sm:$0xff] }
  0xe1   :  { %14889 = vst [vmem:[#allocation2_spill] sm:$0xff] %v10254_v60  ;;  %v10264_v9 = vpop.f32.mrf.mxu0  ;;  %v10266_v15 = vpop.f32.mrf.mxu1  ;;  %2259 = vmatpush.msrb.mxu2 %v434_v48  ;;  %2282 = vmatpush.msrb.mxu3 %v435_v56 }
  0xe2   :  { %14890 = vst [vmem:[#allocation3_spill] sm:$0xff] %v10256_v4  ;;  %2214 = vmatpush.msrb.mxu0 %v339_v57  ;;  %2237 = vmatpush.msrb.mxu1 %v340_v59  ;;  %v529_v59 = vld [vmem:[%s14875_s0 + $0xdc0] sm:$0x7f] }
  0xe3   :  { %2260 = vmatpush.msrb.mxu2 %v341_v5  ;;  %2283 = vmatpush.msrb.mxu3 %v342_v8  ;;  %v530_v5 = vld [vmem:[%s14875_s0 + $0xdc8] sm:$0x7f]  ;;  %v531_v8 = vld [vmem:[%s14875_s0 + $0xdd0] sm:$0x7f] }
  0xe4   :  { %8357 = vmatmul.msk.f32.gmra.mxu0 %vm57_vm1, %v9981_v42  ;;  %8360 = vmatmul.msk.f32.gmra.mxu1 %vm57_vm1, %v9981_v42 }
  0xe5   :  { %8363 = vmatmul.msk.f32.gmra.mxu2 %vm57_vm1, %v9981_v42  ;;  %8366 = vmatmul.msk.f32.gmra.mxu3 %vm57_vm1, %v9981_v42 }
  0xe6   :  { %2215 = vmatpush.msrb.mxu0 %v246_v16  ;;  %2238 = vmatpush.msrb.mxu1 %v247_v18  ;;  %v532_v16 = vld [vmem:[%s14875_s0 + $0xdd8] sm:$0x7f]  ;;  %v436_v18 = vld [vmem:[%s14875_s0 + $0xad0] sm:$0xff] }
  0xe7   :  { %2261 = vmatpush.msrb.mxu2 %v248_v19  ;;  %2284 = vmatpush.msrb.mxu3 %v249_v25  ;;  %v437_v19 = vld [vmem:[%s14875_s0 + $0xad8] sm:$0xff]  ;;  %v438_v25 = vld [vmem:[%s14875_s0 + $0xae0] sm:$0xff] }
  0xe8   :  { %v10303_v47 = vpop.f32.mrf.mxu2  ;;  %v10305_v48 = vpop.f32.mrf.mxu3  ;;  %2216 = vmatpush.msrb.mxu0 %v153_v41  ;;  %2239 = vmatpush.msrb.mxu1 %v154_v43  ;;  %v439_v41 = vld [vmem:[%s14875_s0 + $0xae8] sm:$0xff]  ;;  %v343_v43 = vld [vmem:[%s14875_s0 + $0x7e0] sm:$0xff] }
  0xe9   :  { %v10307_v56 = vpop.f32.mrf.mxu0  ;;  %v10309_v57 = vpop.f32.mrf.mxu1  ;;  %2262 = vmatpush.msrb.mxu2 %v155_v44  ;;  %2285 = vmatpush.msrb.mxu3 %v156_v45  ;;  %v344_v44 = vld [vmem:[%s14875_s0 + $0x7e8] sm:$0xff] }
  0xea   :  { %14891 = vst [vmem:[#allocation4_spill] sm:$0xff] %v10307_v56  ;;  %7764 = vperm.xlu0 %8848, %v7758_v46  }
  0xeb   :  { %14892 = vst [vmem:[#allocation5_spill] sm:$0xff] %v10309_v57 }
  0xec   :  { %8368 = vmatmul.msk.f32.vlgmr.msra.gmra.mxu0 %vm57_vm1, %v9920_v17  ;;  %8371 = vmatmul.msk.f32.vlgmr.msra.gmra.mxu1 %vm57_vm1, %v9920_v17 }
  0xed   :  { %8374 = vmatmul.msk.f32.vlgmr.msra.gmra.mxu2 %vm57_vm1, %v9920_v17  ;;  %8377 = vmatmul.msk.f32.vlgmr.msra.gmra.mxu3 %vm57_vm1, %v9920_v17 }
  0xee   :  { %8391 = vmatpush.msk.msra.mxu0 %vm64_vm0, %v529_v59  ;;  %8394 = vmatpush.msk.msra.mxu1 %vm64_vm0, %v530_v5  ;;  %v345_v59 = vld [vmem:[%s14875_s0 + $0x7f0] sm:$0xff]  ;;  %v346_v5 = vld [vmem:[%s14875_s0 + $0x7f8] sm:$0xff] }
  0xef   :  { %8397 = vmatpush.msk.msra.mxu2 %vm64_vm0, %v531_v8  ;;  %8400 = vmatpush.msk.msra.mxu3 %vm64_vm0, %v532_v16 }
  0xf0   :  { %v10353_v45 = vpop.f32.mrf.mxu2  ;;  %v10355_v46 = vpop.f32.mrf.mxu3  ;;  %2305 = vmatpush.msra.mxu0 %v436_v18  ;;  %2328 = vmatpush.msra.mxu1 %v437_v19  ;;  %v250_v18 = vld [vmem:[%s14875_s0 + $0x4f0] sm:$0xff]  ;;  %v251_v19 = vld [vmem:[%s14875_s0 + $0x4f8] sm:$0xff] }
  0xf1   :  { %14893 = vst [vmem:[#allocation6_spill] sm:$0xff] %v10353_v45  ;;  %v10363_v8 = vpop.f32.mrf.mxu0  ;;  %v10365_v16 = vpop.f32.mrf.mxu1  ;;  %2351 = vmatpush.msra.mxu2 %v438_v25  ;;  %2374 = vmatpush.msra.mxu3 %v439_v41  ;;  %v252_v25 = vld [vmem:[%s14875_s0 + $0x500] sm:$0xff]  ;;  %v253_v41 = vld [vmem:[%s14875_s0 + $0x508] sm:$0xff] }
  0xf2   :  { %14894 = vst [vmem:[#allocation7_spill] sm:$0xff] %v10355_v46  ;;  %2306 = vmatpush.msra.mxu0 %v343_v43  ;;  %2329 = vmatpush.msra.mxu1 %v344_v44  ;;  %v157_v43 = vld [vmem:[%s14875_s0 + $0x200] sm:$0xff]  ;;  %v158_v44 = vld [vmem:[%s14875_s0 + $0x208] sm:$0xff] }
  0xf3   :  { %14895 = vst [vmem:[#allocation8_spill] sm:$0xff] %v10365_v16  ;;  %2352 = vmatpush.msra.mxu2 %v345_v59  ;;  %2375 = vmatpush.msra.mxu3 %v346_v5  ;;  %v159_v59 = vld [vmem:[%s14875_s0 + $0x210] sm:$0xff]  ;;  %v160_v5 = vld [vmem:[%s14875_s0 + $0x218] sm:$0xff] }
  0xf4   :  { %8369 = vmatmul.msk.f32.gmra.mxu0 %vm57_vm1, %v9981_v42  ;;  %8372 = vmatmul.msk.f32.gmra.mxu1 %vm57_vm1, %v9981_v42 }
  0xf5   :  { %8375 = vmatmul.msk.f32.gmra.mxu2 %vm57_vm1, %v9981_v42  ;;  %8378 = vmatmul.msk.f32.gmra.mxu3 %vm57_vm1, %v9981_v42 }
  0xf6   :  { %2307 = vmatpush.msra.mxu0 %v250_v18  ;;  %2330 = vmatpush.msra.mxu1 %v251_v19  ;;  %v533_v19 = vld [vmem:[%s14875_s0 + $0xde0] sm:$0x7f] }
  0xf7   :  { %2353 = vmatpush.msra.mxu2 %v252_v25  ;;  %2376 = vmatpush.msra.mxu3 %v253_v41  ;;  %v534_v25 = vld [vmem:[%s14875_s0 + $0xde8] sm:$0x7f]  ;;  %v535_v41 = vld [vmem:[%s14875_s0 + $0xdf0] sm:$0x7f] }
  0xf8   :  { %v10399_v46 = vpop.f32.mrf.mxu2  ;;  %v10401_v45 = vpop.f32.mrf.mxu3  ;;  %2308 = vmatpush.msra.mxu0 %v157_v43  ;;  %2331 = vmatpush.msra.mxu1 %v158_v44  ;;  %v536_v43 = vld [vmem:[%s14875_s0 + $0xdf8] sm:$0x7f]  ;;  %v440_v44 = vld [vmem:[%s14875_s0 + $0xaf0] sm:$0xff] }
  0xf9   :  { %14896 = vst [vmem:[#allocation9_spill] sm:$0xff] %v10399_v46  ;;  %v10403_v57 = vpop.f32.mrf.mxu0  ;;  %v10405_v18 = vpop.f32.mrf.mxu1  ;;  %2354 = vmatpush.msra.mxu2 %v159_v59  ;;  %2377 = vmatpush.msra.mxu3 %v160_v5  ;;  %v441_v59 = vld [vmem:[%s14875_s0 + $0xaf8] sm:$0xff]  ;;  %v442_v5 = vld [vmem:[%s14875_s0 + $0xb00] sm:$0xff] }
  0xfa   :  { %14897 = vst [vmem:[#allocation10_spill] sm:$0xff] %v10401_v45 }
  0xfb   :  { %14898 = vst [vmem:[#allocation11_spill] sm:$0xff] %v10403_v57  ;;  %v347_v57 = vld [vmem:[%s14875_s0 + $0x800] sm:$0xff] }
  0xfc   :  { %14899 = vst [vmem:[#allocation12_spill] sm:$0xff] %v10405_v18  ;;  %8380 = vmatmul.msk.f32.vlgmr.msrb.gmra.mxu0 %vm57_vm1, %v9920_v17  ;;  %8383 = vmatmul.msk.f32.vlgmr.msrb.gmra.mxu1 %vm57_vm1, %v9920_v17  ;;  %v443_v18 = vld [vmem:[%s14875_s0 + $0xb08] sm:$0xff] }
  0xfd   :  { %8386 = vmatmul.msk.f32.vlgmr.msrb.gmra.mxu2 %vm57_vm1, %v9920_v17  ;;  %8389 = vmatmul.msk.f32.vlgmr.msrb.gmra.mxu3 %vm57_vm1, %v9920_v17 }
  0xfe   :  { %8403 = vmatpush.msk.msrb.mxu0 %vm64_vm0, %v533_v19  ;;  %8406 = vmatpush.msk.msrb.mxu1 %vm64_vm0, %v534_v25  ;;  %v348_v19 = vld [vmem:[%s14875_s0 + $0x808] sm:$0xff] }
  0xff   :  { %8409 = vmatpush.msk.msrb.mxu2 %vm64_vm0, %v535_v41  ;;  %8412 = vmatpush.msk.msrb.mxu3 %vm64_vm0, %v536_v43  ;;  %v349_v41 = vld [vmem:[%s14875_s0 + $0x810] sm:$0xff]  ;;  %v350_v43 = vld [vmem:[%s14875_s0 + $0x818] sm:$0xff] }
 0x100   :  { %v10449_v25 = vpop.f32.mrf.mxu2  ;;  %v10451_v45 = vpop.f32.mrf.mxu3  ;;  %2397 = vmatpush.msrb.mxu0 %v440_v44  ;;  %2420 = vmatpush.msrb.mxu1 %v441_v59  ;;  %v254_v44 = vld [vmem:[%s14875_s0 + $0x510] sm:$0xff]  ;;  %v255_v59 = vld [vmem:[%s14875_s0 + $0x518] sm:$0xff] }
 0x101   :  { %14900 = vst [vmem:[#allocation13_spill] sm:$0xff] %v10449_v25  ;;  %v10459_v46 = vpop.f32.mrf.mxu0  ;;  %v10461_v16 = vpop.f32.mrf.mxu1  ;;  %2443 = vmatpush.msrb.mxu2 %v442_v5  ;;  %2466 = vmatpush.msrb.mxu3 %v443_v18  ;;  %v257_v18 = vld [vmem:[%s14875_s0 + $0x528] sm:$0xff]  ;;  %v161_v5 = vld [vmem:[%s14875_s0 + $0x220] sm:$0xff] }
 0x102   :  { %14901 = vst [vmem:[#allocation14_spill] sm:$0xff] %v10451_v45  ;;  %2398 = vmatpush.msrb.mxu0 %v347_v57  ;;  %2421 = vmatpush.msrb.mxu1 %v348_v19  ;;  %v256_v57 = vld [vmem:[%s14875_s0 + $0x520] sm:$0xff]  ;;  %v162_v19 = vld [vmem:[%s14875_s0 + $0x228] sm:$0xff] }
 0x103   :  { %14902 = vst [vmem:[#allocation15_spill] sm:$0xff] %v10459_v46  ;;  %2444 = vmatpush.msrb.mxu2 %v349_v41  ;;  %2467 = vmatpush.msrb.mxu3 %v350_v43  ;;  %v163_v41 = vld [vmem:[%s14875_s0 + $0x230] sm:$0xff]  ;;  %v164_v43 = vld [vmem:[%s14875_s0 + $0x238] sm:$0xff] }
 0x104   :  { %14903 = vst [vmem:[#allocation16_spill] sm:$0xff] %v10461_v16  ;;  %8381 = vmatmul.msk.f32.gmra.mxu0 %vm57_vm1, %v9981_v42  ;;  %8384 = vmatmul.msk.f32.gmra.mxu1 %vm57_vm1, %v9981_v42 }
 0x105   :  { %8387 = vmatmul.msk.f32.gmra.mxu2 %vm57_vm1, %v9981_v42  ;;  %8390 = vmatmul.msk.f32.gmra.mxu3 %vm57_vm1, %v9981_v42 }
 0x106   :  { %2399 = vmatpush.msrb.mxu0 %v254_v44  ;;  %2422 = vmatpush.msrb.mxu1 %v255_v59  ;;  %v537_v59 = vld [vmem:[%s14875_s0 + $0xe00] sm:$0x7f] }
 0x107   :  { %2445 = vmatpush.msrb.mxu2 %v256_v57  ;;  %2468 = vmatpush.msrb.mxu3 %v257_v18  ;;  %v538_v57 = vld [vmem:[%s14875_s0 + $0xe08] sm:$0x7f]  ;;  %v539_v18 = vld [vmem:[%s14875_s0 + $0xe10] sm:$0x7f] }
 0x108   :  { %v10495_v45 = vpop.f32.mrf.mxu2  ;;  %v10497_v25 = vpop.f32.mrf.mxu3  ;;  %2400 = vmatpush.msrb.mxu0 %v161_v5  ;;  %2423 = vmatpush.msrb.mxu1 %v162_v19  ;;  %v540_v5 = vld [vmem:[%s14875_s0 + $0xe18] sm:$0x7f]  ;;  %v444_v19 = vld [vmem:[%s14875_s0 + $0xb10] sm:$0xff] }
 0x109   :  { %14904 = vst [vmem:[#allocation17_spill] sm:$0xff] %v10495_v45  ;;  %v10499_v16 = vpop.f32.mrf.mxu0  ;;  %v10501_v44 = vpop.f32.mrf.mxu1  ;;  %2446 = vmatpush.msrb.mxu2 %v163_v41  ;;  %2469 = vmatpush.msrb.mxu3 %v164_v43  ;;  %v445_v41 = vld [vmem:[%s14875_s0 + $0xb18] sm:$0xff]  ;;  %v446_v43 = vld [vmem:[%s14875_s0 + $0xb20] sm:$0xff] }
 0x10a   :  { %14905 = vst [vmem:[#allocation18_spill] sm:$0xff] %v10497_v25 }
 0x10b   :  { %14906 = vst [vmem:[#allocation19_spill] sm:$0xff] %v10499_v16  ;;  %v351_v16 = vld [vmem:[%s14875_s0 + $0x820] sm:$0xff] }
 0x10c   :  { %14907 = vst [vmem:[#allocation20_spill] sm:$0xff] %v10501_v44  ;;  %8392 = vmatmul.msk.f32.vlgmr.msra.gmra.mxu0 %vm57_vm1, %v9920_v17  ;;  %8395 = vmatmul.msk.f32.vlgmr.msra.gmra.mxu1 %vm57_vm1, %v9920_v17  ;;  %v447_v44 = vld [vmem:[%s14875_s0 + $0xb28] sm:$0xff] }
 0x10d   :  { %8398 = vmatmul.msk.f32.vlgmr.msra.gmra.mxu2 %vm57_vm1, %v9920_v17  ;;  %8401 = vmatmul.msk.f32.vlgmr.msra.gmra.mxu3 %vm57_vm1, %v9920_v17 }
 0x10e   :  { %8415 = vmatpush.msk.msra.mxu0 %vm64_vm0, %v537_v59  ;;  %8418 = vmatpush.msk.msra.mxu1 %vm64_vm0, %v538_v57  ;;  %v352_v59 = vld [vmem:[%s14875_s0 + $0x828] sm:$0xff] }
 0x10f   :  { %8421 = vmatpush.msk.msra.mxu2 %vm64_vm0, %v539_v18  ;;  %8424 = vmatpush.msk.msra.mxu3 %vm64_vm0, %v540_v5  ;;  %v353_v18 = vld [vmem:[%s14875_s0 + $0x830] sm:$0xff]  ;;  %v354_v5 = vld [vmem:[%s14875_s0 + $0x838] sm:$0xff] }
 0x110   :  { %v10545_v57 = vpop.f32.mrf.mxu2  ;;  %v10547_v25 = vpop.f32.mrf.mxu3  ;;  %2489 = vmatpush.msra.mxu0 %v444_v19  ;;  %2512 = vmatpush.msra.mxu1 %v445_v41  ;;  %v258_v19 = vld [vmem:[%s14875_s0 + $0x530] sm:$0xff]  ;;  %v259_v41 = vld [vmem:[%s14875_s0 + $0x538] sm:$0xff] }
 0x111   :  { %14908 = vst [vmem:[#allocation21_spill] sm:$0xff] %v10545_v57  ;;  %v10555_v45 = vpop.f32.mrf.mxu0  ;;  %v10557_v46 = vpop.f32.mrf.mxu1  ;;  %2535 = vmatpush.msra.mxu2 %v446_v43  ;;  %2558 = vmatpush.msra.mxu3 %v447_v44  ;;  %v261_v44 = vld [vmem:[%s14875_s0 + $0x548] sm:$0xff]  ;;  %v165_v43 = vld [vmem:[%s14875_s0 + $0x240] sm:$0xff] }
 0x112   :  { %14909 = vst [vmem:[#allocation22_spill] sm:$0xff] %v10547_v25  ;;  %2490 = vmatpush.msra.mxu0 %v351_v16  ;;  %2513 = vmatpush.msra.mxu1 %v352_v59  ;;  %v260_v16 = vld [vmem:[%s14875_s0 + $0x540] sm:$0xff]  ;;  %v166_v59 = vld [vmem:[%s14875_s0 + $0x248] sm:$0xff] }
 0x113   :  { %14910 = vst [vmem:[#allocation23_spill] sm:$0xff] %v10555_v45  ;;  %2536 = vmatpush.msra.mxu2 %v353_v18  ;;  %2559 = vmatpush.msra.mxu3 %v354_v5  ;;  %v167_v18 = vld [vmem:[%s14875_s0 + $0x250] sm:$0xff]  ;;  %v168_v5 = vld [vmem:[%s14875_s0 + $0x258] sm:$0xff] }
 0x114   :  { %14911 = vst [vmem:[#allocation24_spill] sm:$0xff] %v10557_v46  ;;  %8393 = vmatmul.msk.f32.gmra.mxu0 %vm57_vm1, %v9981_v42  ;;  %8396 = vmatmul.msk.f32.gmra.mxu1 %vm57_vm1, %v9981_v42 }
 0x115   :  { %8399 = vmatmul.msk.f32.gmra.mxu2 %vm57_vm1, %v9981_v42  ;;  %8402 = vmatmul.msk.f32.gmra.mxu3 %vm57_vm1, %v9981_v42 }
 0x116   :  { %2491 = vmatpush.msra.mxu0 %v258_v19  ;;  %2514 = vmatpush.msra.mxu1 %v259_v41  ;;  %v541_v41 = vld [vmem:[%s14875_s0 + $0xe20] sm:$0x7f] }
 0x117   :  { %2537 = vmatpush.msra.mxu2 %v260_v16  ;;  %2560 = vmatpush.msra.mxu3 %v261_v44  ;;  %v542_v16 = vld [vmem:[%s14875_s0 + $0xe28] sm:$0x7f]  ;;  %v543_v44 = vld [vmem:[%s14875_s0 + $0xe30] sm:$0x7f] }
 0x118   :  { %v10591_v25 = vpop.f32.mrf.mxu2  ;;  %v10593_v57 = vpop.f32.mrf.mxu3  ;;  %2492 = vmatpush.msra.mxu0 %v165_v43  ;;  %2515 = vmatpush.msra.mxu1 %v166_v59  ;;  %v544_v43 = vld [vmem:[%s14875_s0 + $0xe38] sm:$0x7f]  ;;  %v448_v59 = vld [vmem:[%s14875_s0 + $0xb30] sm:$0xff] }
 0x119   :  { %14912 = vst [vmem:[#allocation25_spill] sm:$0xff] %v10591_v25  ;;  %v10595_v46 = vpop.f32.mrf.mxu0  ;;  %v10597_v19 = vpop.f32.mrf.mxu1  ;;  %2538 = vmatpush.msra.mxu2 %v167_v18  ;;  %2561 = vmatpush.msra.mxu3 %v168_v5  ;;  %v449_v18 = vld [vmem:[%s14875_s0 + $0xb38] sm:$0xff]  ;;  %v450_v5 = vld [vmem:[%s14875_s0 + $0xb40] sm:$0xff] }
 0x11a   :  { %14913 = vst [vmem:[#allocation26_spill] sm:$0xff] %v10593_v57 }
 0x11b   :  { %14914 = vst [vmem:[#allocation27_spill] sm:$0xff] %v10595_v46  ;;  %v355_v46 = vld [vmem:[%s14875_s0 + $0x840] sm:$0xff] }
 0x11c   :  { %14915 = vst [vmem:[#allocation28_spill] sm:$0xff] %v10597_v19  ;;  %8404 = vmatmul.msk.f32.vlgmr.msrb.gmra.mxu0 %vm57_vm1, %v9920_v17  ;;  %8407 = vmatmul.msk.f32.vlgmr.msrb.gmra.mxu1 %vm57_vm1, %v9920_v17  ;;  %v451_v19 = vld [vmem:[%s14875_s0 + $0xb48] sm:$0xff] }
 0x11d   :  { %8410 = vmatmul.msk.f32.vlgmr.msrb.gmra.mxu2 %vm57_vm1, %v9920_v17  ;;  %8413 = vmatmul.msk.f32.vlgmr.msrb.gmra.mxu3 %vm57_vm1, %v9920_v17 }
 0x11e   :  { %8427 = vmatpush.msk.msrb.mxu0 %vm64_vm0, %v541_v41  ;;  %8430 = vmatpush.msk.msrb.mxu1 %vm64_vm0, %v542_v16  ;;  %v356_v41 = vld [vmem:[%s14875_s0 + $0x848] sm:$0xff] }
 0x11f   :  { %8433 = vmatpush.msk.msrb.mxu2 %vm64_vm0, %v543_v44  ;;  %8436 = vmatpush.msk.msrb.mxu3 %vm64_vm0, %v544_v43  ;;  %v357_v44 = vld [vmem:[%s14875_s0 + $0x850] sm:$0xff]  ;;  %v358_v43 = vld [vmem:[%s14875_s0 + $0x858] sm:$0xff] }
 0x120   :  { %v10641_v16 = vpop.f32.mrf.mxu2  ;;  %v10643_v57 = vpop.f32.mrf.mxu3  ;;  %2581 = vmatpush.msrb.mxu0 %v448_v59  ;;  %2604 = vmatpush.msrb.mxu1 %v449_v18  ;;  %v262_v59 = vld [vmem:[%s14875_s0 + $0x550] sm:$0xff]  ;;  %v263_v18 = vld [vmem:[%s14875_s0 + $0x558] sm:$0xff] }
 0x121   :  { %14916 = vst [vmem:[#allocation29_spill] sm:$0xff] %v10641_v16  ;;  %v10651_v25 = vpop.f32.mrf.mxu0  ;;  %v10653_v45 = vpop.f32.mrf.mxu1  ;;  %2627 = vmatpush.msrb.mxu2 %v450_v5  ;;  %2650 = vmatpush.msrb.mxu3 %v451_v19  ;;  %v265_v19 = vld [vmem:[%s14875_s0 + $0x568] sm:$0xff]  ;;  %v169_v5 = vld [vmem:[%s14875_s0 + $0x260] sm:$0xff] }
 0x122   :  { %14917 = vst [vmem:[#allocation30_spill] sm:$0xff] %v10643_v57  ;;  %2582 = vmatpush.msrb.mxu0 %v355_v46  ;;  %2605 = vmatpush.msrb.mxu1 %v356_v41  ;;  %v264_v46 = vld [vmem:[%s14875_s0 + $0x560] sm:$0xff]  ;;  %v170_v41 = vld [vmem:[%s14875_s0 + $0x268] sm:$0xff] }
 0x123   :  { %14918 = vst [vmem:[#allocation31_spill] sm:$0xff] %v10651_v25  ;;  %2628 = vmatpush.msrb.mxu2 %v357_v44  ;;  %2651 = vmatpush.msrb.mxu3 %v358_v43  ;;  %v171_v44 = vld [vmem:[%s14875_s0 + $0x270] sm:$0xff]  ;;  %v172_v43 = vld [vmem:[%s14875_s0 + $0x278] sm:$0xff] }
 0x124   :  { %14919 = vst [vmem:[#allocation32_spill] sm:$0xff] %v10653_v45  ;;  %8405 = vmatmul.msk.f32.gmra.mxu0 %vm57_vm1, %v9981_v42  ;;  %8408 = vmatmul.msk.f32.gmra.mxu1 %vm57_vm1, %v9981_v42 }
 0x125   :  { %8411 = vmatmul.msk.f32.gmra.mxu2 %vm57_vm1, %v9981_v42  ;;  %8414 = vmatmul.msk.f32.gmra.mxu3 %vm57_vm1, %v9981_v42 }
 0x126   :  { %2583 = vmatpush.msrb.mxu0 %v262_v59  ;;  %2606 = vmatpush.msrb.mxu1 %v263_v18  ;;  %v547_v18 = vld [vmem:[%s14875_s0 + $0xe50] sm:$0x7f] }
 0x127   :  { %2629 = vmatpush.msrb.mxu2 %v264_v46  ;;  %2652 = vmatpush.msrb.mxu3 %v265_v19  ;;  %v548_v46 = vld [vmem:[%s14875_s0 + $0xe58] sm:$0x7f]  ;;  %v545_v19 = vld [vmem:[%s14875_s0 + $0xe40] sm:$0x7f] }
 0x128   :  { %v10687_v57 = vpop.f32.mrf.mxu2  ;;  %v10689_v16 = vpop.f32.mrf.mxu3  ;;  %2584 = vmatpush.msrb.mxu0 %v169_v5  ;;  %2607 = vmatpush.msrb.mxu1 %v170_v41  ;;  %v546_v5 = vld [vmem:[%s14875_s0 + $0xe48] sm:$0x7f]  ;;  %v454_v41 = vld [vmem:[%s14875_s0 + $0xb60] sm:$0xff] }
 0x129   :  { %14920 = vst [vmem:[#allocation33_spill] sm:$0xff] %v10687_v57  ;;  %v10691_v45 = vpop.f32.mrf.mxu0  ;;  %v10693_v59 = vpop.f32.mrf.mxu1  ;;  %2630 = vmatpush.msrb.mxu2 %v171_v44  ;;  %2653 = vmatpush.msrb.mxu3 %v172_v43  ;;  %v455_v44 = vld [vmem:[%s14875_s0 + $0xb68] sm:$0xff]  ;;  %v452_v43 = vld [vmem:[%s14875_s0 + $0xb50] sm:$0xff] }
 0x12a   :  { %14921 = vst [vmem:[#allocation34_spill] sm:$0xff] %v10689_v16 }
 0x12b   :  { %14922 = vst [vmem:[#allocation35_spill] sm:$0xff] %v10691_v45  ;;  %v361_v45 = vld [vmem:[%s14875_s0 + $0x870] sm:$0xff] }
 0x12c   :  { %14923 = vst [vmem:[#allocation36_spill] sm:$0xff] %v10693_v59  ;;  %8416 = vmatmul.msk.f32.vlgmr.msra.gmra.mxu0 %vm57_vm1, %v9920_v17  ;;  %8419 = vmatmul.msk.f32.vlgmr.msra.gmra.mxu1 %vm57_vm1, %v9920_v17  ;;  %v453_v59 = vld [vmem:[%s14875_s0 + $0xb58] sm:$0xff] }
 0x12d   :  { %8422 = vmatmul.msk.f32.vlgmr.msra.gmra.mxu2 %vm57_vm1, %v9920_v17  ;;  %8425 = vmatmul.msk.f32.vlgmr.msra.gmra.mxu3 %vm57_vm1, %v9920_v17 }
 0x12e   :  { %8445 = vmatpush.msk.msra.mxu2 %vm64_vm0, %v547_v18  ;;  %8448 = vmatpush.msk.msra.mxu3 %vm64_vm0, %v548_v46  ;;  %v362_v18 = vld [vmem:[%s14875_s0 + $0x878] sm:$0xff] }
 0x12f   :  { %8439 = vmatpush.msk.msra.mxu0 %vm64_vm0, %v545_v19  ;;  %8442 = vmatpush.msk.msra.mxu1 %vm64_vm0, %v546_v5  ;;  %v359_v19 = vld [vmem:[%s14875_s0 + $0x860] sm:$0xff]  ;;  %v360_v5 = vld [vmem:[%s14875_s0 + $0x868] sm:$0xff] }
 0x130   :  { %v10737_v46 = vpop.f32.mrf.mxu2  ;;  %v10739_v16 = vpop.f32.mrf.mxu3  ;;  %2719 = vmatpush.msra.mxu2 %v454_v41  ;;  %2742 = vmatpush.msra.mxu3 %v455_v44  ;;  %v268_v41 = vld [vmem:[%s14875_s0 + $0x580] sm:$0xff]  ;;  %v269_v44 = vld [vmem:[%s14875_s0 + $0x588] sm:$0xff] }
 0x131   :  { %14924 = vst [vmem:[#allocation37_spill] sm:$0xff] %v10737_v46  ;;  %v10747_v57 = vpop.f32.mrf.mxu0  ;;  %v10749_v25 = vpop.f32.mrf.mxu1  ;;  %2673 = vmatpush.msra.mxu0 %v452_v43  ;;  %2696 = vmatpush.msra.mxu1 %v453_v59  ;;  %v267_v59 = vld [vmem:[%s14875_s0 + $0x578] sm:$0xff]  ;;  %v175_v43 = vld [vmem:[%s14875_s0 + $0x290] sm:$0xff] }
 0x132   :  { %14925 = vst [vmem:[#allocation38_spill] sm:$0xff] %v10739_v16  ;;  %2720 = vmatpush.msra.mxu2 %v361_v45  ;;  %2743 = vmatpush.msra.mxu3 %v362_v18  ;;  %v266_v45 = vld [vmem:[%s14875_s0 + $0x570] sm:$0xff]  ;;  %v176_v18 = vld [vmem:[%s14875_s0 + $0x298] sm:$0xff] }
 0x133   :  { %14926 = vst [vmem:[#allocation39_spill] sm:$0xff] %v10747_v57  ;;  %2674 = vmatpush.msra.mxu0 %v359_v19  ;;  %2697 = vmatpush.msra.mxu1 %v360_v5  ;;  %v173_v19 = vld [vmem:[%s14875_s0 + $0x280] sm:$0xff]  ;;  %v174_v5 = vld [vmem:[%s14875_s0 + $0x288] sm:$0xff] }
 0x134   :  { %14927 = vst [vmem:[#allocation40_spill] sm:$0xff] %v10749_v25  ;;  %8417 = vmatmul.msk.f32.gmra.mxu0 %vm57_vm1, %v9981_v42  ;;  %8420 = vmatmul.msk.f32.gmra.mxu1 %vm57_vm1, %v9981_v42  ;;  %v364_v57 = vld [vmem:[%s14875_s0 + $0x888] sm:$0xff] }
 0x135   :  { %8423 = vmatmul.msk.f32.gmra.mxu2 %vm57_vm1, %v9981_v42  ;;  %8426 = vmatmul.msk.f32.gmra.mxu3 %vm57_vm1, %v9981_v42 }
 0x136   :  { %2721 = vmatpush.msra.mxu2 %v268_v41  ;;  %2744 = vmatpush.msra.mxu3 %v269_v44  ;;  %v551_v44 = vld [vmem:[%s14875_s0 + $0xe70] sm:$0x7f] }
 0x137   :  { %2675 = vmatpush.msra.mxu0 %v266_v45  ;;  %2698 = vmatpush.msra.mxu1 %v267_v59  ;;  %v552_v45 = vld [vmem:[%s14875_s0 + $0xe78] sm:$0x7f]  ;;  %v549_v59 = vld [vmem:[%s14875_s0 + $0xe60] sm:$0x7f] }
 0x138   :  { %v10783_v16 = vpop.f32.mrf.mxu2  ;;  %v10785_v46 = vpop.f32.mrf.mxu3  ;;  %2722 = vmatpush.msra.mxu2 %v175_v43  ;;  %2745 = vmatpush.msra.mxu3 %v176_v18  ;;  %v550_v43 = vld [vmem:[%s14875_s0 + $0xe68] sm:$0x7f]  ;;  %v10810_v18 = vld [vmem:[%s14876_s1 + $0x10] sm:$0xff] }
 0x139   :  { %14928 = vst [vmem:[#allocation41_spill] sm:$0xff] %v10783_v16  ;;  %v10787_v25 = vpop.f32.mrf.mxu0  ;;  %v10789_v41 = vpop.f32.mrf.mxu1  ;;  %2676 = vmatpush.msra.mxu0 %v173_v19  ;;  %2699 = vmatpush.msra.mxu1 %v174_v5  ;;  %v459_v19 = vld [vmem:[%s14875_s0 + $0xb88] sm:$0xff]  ;;  %v456_v5 = vld [vmem:[%s14875_s0 + $0xb70] sm:$0xff]  ;;  %v363_v16 = vld [vmem:[%s14875_s0 + $0x880] sm:$0xff] }
 0x13a   :  { %14929 = vst [vmem:[#allocation42_spill] sm:$0xff] %v10785_v46  ;;  %v366_v46 = vld [vmem:[%s14875_s0 + $0x898] sm:$0xff] }
 0x13b   :  { %14930 = vst [vmem:[#allocation43_spill] sm:$0xff] %v10787_v25  ;;  %v365_v25 = vld [vmem:[%s14875_s0 + $0x890] sm:$0xff] }
 0x13c   :  { %14931 = vst [vmem:[#allocation44_spill] sm:$0xff] %v10789_v41  ;;  %8428 = vmatmul.msk.f32.vlgmr.msrb.gmra.mxu0 %vm57_vm1, %v9920_v17  ;;  %8431 = vmatmul.msk.f32.vlgmr.msrb.gmra.mxu1 %vm57_vm1, %v9920_v17  ;;  %v458_v17 = vld [vmem:[%s14875_s0 + $0xb80] sm:$0xff]  ;;  %v457_v41 = vld [vmem:[%s14875_s0 + $0xb78] sm:$0xff] }
 0x13d   :  { %8434 = vmatmul.msk.f32.vlgmr.msrb.gmra.mxu2 %vm57_vm1, %v10810_v18  ;;  %8437 = vmatmul.msk.f32.vlgmr.msrb.gmra.mxu3 %vm57_vm1, %v10810_v18 }
 0x13e   :  { %8457 = vmatpush.msk.msrb.mxu2 %vm64_vm0, %v551_v44  ;;  %8460 = vmatpush.msk.msrb.mxu3 %vm64_vm0, %v552_v45 }
 0x13f   :  { %8451 = vmatpush.msk.msrb.mxu0 %vm64_vm0, %v549_v59  ;;  %8454 = vmatpush.msk.msrb.mxu1 %vm64_vm0, %v550_v43  ;;  %v272_v59 = vld [vmem:[%s14875_s0 + $0x5a0] sm:$0xff]  ;;  %v273_v43 = vld [vmem:[%s14875_s0 + $0x5a8] sm:$0xff] }
 0x140   :  { %v10838_v44 = vpop.f32.mrf.mxu2  ;;  %v10840_v45 = vpop.f32.mrf.mxu3  ;;  %2811 = vmatpush.msrb.mxu2 %v458_v17  ;;  %2834 = vmatpush.msrb.mxu3 %v459_v19  ;;  %v178_v17 = vld [vmem:[%s14875_s0 + $0x2a8] sm:$0xff] }
 0x141   :  { %14932 = vst [vmem:[#allocation45_spill] sm:$0xff] %v10838_v44  ;;  %v10848_v56 = vpop.f32.mrf.mxu0  ;;  %v10850_v4 = vpop.f32.mrf.mxu1  ;;  %2765 = vmatpush.msrb.mxu0 %v456_v5  ;;  %2788 = vmatpush.msrb.mxu1 %v457_v41  ;;  %v10871_v41 = vld [vmem:[%s14876_s1 + $0x18] sm:$0xff]  ;;  %v555_v44 = vld [vmem:[%s14875_s0 + $0xe90] sm:$0x7f] }
 0x142   :  { %14933 = vst [vmem:[#allocation46_spill] sm:$0xff] %v10840_v45  ;;  %2812 = vmatpush.msrb.mxu2 %v365_v25  ;;  %2835 = vmatpush.msrb.mxu3 %v366_v46  ;;  %v270_v25 = vld [vmem:[%s14875_s0 + $0x590] sm:$0xff]  ;;  %v271_v46 = vld [vmem:[%s14875_s0 + $0x598] sm:$0xff] }
 0x143   :  { %14934 = vst [vmem:[#allocation47_spill] sm:$0xff] %v10848_v56  ;;  %2766 = vmatpush.msrb.mxu0 %v363_v16  ;;  %2789 = vmatpush.msrb.mxu1 %v364_v57  ;;  %v180_v57 = vld [vmem:[%s14875_s0 + $0x2b8] sm:$0xff]  ;;  %v177_v16 = vld [vmem:[%s14875_s0 + $0x2a0] sm:$0xff] }
 0x144   :  { %14935 = vst [vmem:[#allocation48_spill] sm:$0xff] %v10850_v4  ;;  %8429 = vmatmul.msk.f32.gmra.mxu0 %vm57_vm1, %v9981_v42  ;;  %8432 = vmatmul.msk.f32.gmra.mxu1 %vm57_vm1, %v9981_v42  ;;  %v179_v42 = vld [vmem:[%s14875_s0 + $0x2b0] sm:$0xff]  ;;  %v368_v4 = vld [vmem:[%s14875_s0 + $0x8a8] sm:$0xff] }
 0x145   :  { %8435 = vmatmul.msk.f32.gmra.mxu2 %vm57_vm1, %v10871_v41  ;;  %8438 = vmatmul.msk.f32.gmra.mxu3 %vm57_vm1, %v10871_v41 }
 0x146   :  { %2813 = vmatpush.msrb.mxu2 %v272_v59  ;;  %2836 = vmatpush.msrb.mxu3 %v273_v43  ;;  %v55_v43 = vpop.permute.xlu0 %54 }
 0x147   :  { %2767 = vmatpush.msrb.mxu0 %v270_v25  ;;  %2790 = vmatpush.msrb.mxu1 %v271_v46  ;;  %v556_v25 = vld [vmem:[%s14875_s0 + $0xe98] sm:$0x7f]  ;;  %v553_v46 = vld [vmem:[%s14875_s0 + $0xe80] sm:$0x7f] }
 0x148   :  { %v10889_v19 = vpop.f32.mrf.mxu2  ;;  %v10891_v5 = vpop.f32.mrf.mxu3  ;;  %2814 = vmatpush.msrb.mxu2 %v179_v42  ;;  %2837 = vmatpush.msrb.mxu3 %v180_v57  ;;  %v554_v42 = vld [vmem:[%s14875_s0 + $0xe88] sm:$0x7f]  ;;  %v462_v57 = vld [vmem:[%s14875_s0 + $0xba0] sm:$0xff] }
 0x149   :  { %14936 = vst [vmem:[#allocation49_spill] sm:$0xff] %v10889_v19  ;;  %v10893_v45 = vpop.f32.mrf.mxu0  ;;  %v10895_v59 = vpop.f32.mrf.mxu1  ;;  %2768 = vmatpush.msrb.mxu0 %v177_v16  ;;  %2791 = vmatpush.msrb.mxu1 %v178_v17  ;;  %v463_v16 = vld [vmem:[%s14875_s0 + $0xba8] sm:$0xff]  ;;  %v460_v17 = vld [vmem:[%s14875_s0 + $0xb90] sm:$0xff]  ;;  %v367_v19 = vld [vmem:[%s14875_s0 + $0x8a0] sm:$0xff] }
 0x14a   :  { %14937 = vst [vmem:[#allocation50_spill] sm:$0xff] %v10891_v5  ;;  %v370_v5 = vld [vmem:[%s14875_s0 + $0x8b8] sm:$0xff] }
 0x14b   :  { %14938 = vst [vmem:[#allocation51_spill] sm:$0xff] %v10893_v45  ;;  %v369_v45 = vld [vmem:[%s14875_s0 + $0x8b0] sm:$0xff] }
 0x14c   :  { %14939 = vst [vmem:[#allocation52_spill] sm:$0xff] %v10895_v59  ;;  %8440 = vmatmul.msk.f32.vlgmr.msra.gmra.mxu0 %vm57_vm1, %v10810_v18  ;;  %8443 = vmatmul.msk.f32.vlgmr.msra.gmra.mxu1 %vm57_vm1, %v10810_v18  ;;  %v461_v59 = vld [vmem:[%s14875_s0 + $0xb98] sm:$0xff] }
 0x14d   :  { %8446 = vmatmul.msk.f32.vlgmr.msra.gmra.mxu2 %vm57_vm1, %v10810_v18  ;;  %8449 = vmatmul.msk.f32.vlgmr.msra.gmra.mxu3 %vm57_vm1, %v10810_v18 }
 0x14e   :  { %8469 = vmatpush.msk.msra.mxu2 %vm64_vm0, %v555_v44  ;;  %8472 = vmatpush.msk.msra.mxu3 %vm64_vm0, %v556_v25 }
 0x14f   :  { %8463 = vmatpush.msk.msra.mxu0 %vm64_vm0, %v553_v46  ;;  %8466 = vmatpush.msk.msra.mxu1 %vm64_vm0, %v554_v42  ;;  %v276_v46 = vld [vmem:[%s14875_s0 + $0x5c0] sm:$0xff]  ;;  %v277_v42 = vld [vmem:[%s14875_s0 + $0x5c8] sm:$0xff] }
 0x150   :  { %v10939_v44 = vpop.f32.mrf.mxu2  ;;  %v10941_v25 = vpop.f32.mrf.mxu3  ;;  %2903 = vmatpush.msra.mxu2 %v462_v57  ;;  %2926 = vmatpush.msra.mxu3 %v463_v16  ;;  %v10980_v57 = vadd.f32 %v9771_v39, %v55_v43  ;;  %v181_v16 = vld [vmem:[%s14875_s0 + $0x2c0] sm:$0xff] }
 0x151   :  { %14940 = vst [vmem:[#allocation53_spill] sm:$0xff] %v10939_v44  ;;  %v10949_v56 = vpop.f32.mrf.mxu0  ;;  %v10951_v60 = vpop.f32.mrf.mxu1  ;;  %2857 = vmatpush.msra.mxu0 %v460_v17  ;;  %2880 = vmatpush.msra.mxu1 %v461_v59  ;;  %v182_v17 = vld [vmem:[%s14875_s0 + $0x2c8] sm:$0xff] }
 0x152   :  { %14941 = vst [vmem:[#allocation54_spill] sm:$0xff] %v10941_v25  ;;  %2904 = vmatpush.msra.mxu2 %v369_v45  ;;  %2927 = vmatpush.msra.mxu3 %v370_v5  ;;  %v274_v45 = vld [vmem:[%s14875_s0 + $0x5b0] sm:$0xff]  ;;  %v275_v5 = vld [vmem:[%s14875_s0 + $0x5b8] sm:$0xff]  ;;  %v50_v59 = vpop.permute.xlu0 %49  ;;  %v911_v44 = vadd.f32 %v9809_v49, %v10980_v57  ;;  %v934_v39 = vadd.f32 %v9867_v1, %v10980_v57 }
 0x153   :  { %14942 = vst [vmem:[#allocation55_spill] sm:$0xff] %v10951_v60  ;;  %2858 = vmatpush.msra.mxu0 %v367_v19  ;;  %2881 = vmatpush.msra.mxu1 %v368_v4  ;;  %v183_v4 = vld [vmem:[%s14875_s0 + $0x2d0] sm:$0xff]  ;;  %v184_v19 = vld [vmem:[%s14875_s0 + $0x2d8] sm:$0xff]  ;;  %v10989_v25 = vadd.f32 %v9715_v21, %v50_v59  ;;  %v888_v1 = vadd.f32 %v9807_v3, %v10980_v57 }
 0x154   :  { %8441 = vmatmul.msk.f32.gmra.mxu0 %vm57_vm1, %v10871_v41  ;;  %8444 = vmatmul.msk.f32.gmra.mxu1 %vm57_vm1, %v10871_v41 }
 0x155   :  { %8447 = vmatmul.msk.f32.gmra.mxu2 %vm57_vm1, %v10871_v41  ;;  %8450 = vmatmul.msk.f32.gmra.mxu3 %vm57_vm1, %v10871_v41  ;;  %v908_v21 = vadd.f32 %v9763_v36, %v10989_v25  ;;  %v931_v49 = vadd.f32 %v9811_v50, %v10989_v25  ;;  %v557_v36 = vld [vmem:[%s14875_s0 + $0xea0] sm:$0x7f]  ;;  %v558_v50 = vld [vmem:[%s14875_s0 + $0xea8] sm:$0x7f]  ;;  %v885_v3 = vadd.f32 %v9761_v34, %v10989_v25  ;;  %v3077_v34 = vmax.f32 %v888_v1, 0.0 }
 0x156   :  { %2905 = vmatpush.msra.mxu2 %v276_v46  ;;  %2928 = vmatpush.msra.mxu3 %v277_v42 }
 0x157   :  { %2859 = vmatpush.msra.mxu0 %v274_v45  ;;  %2882 = vmatpush.msra.mxu1 %v275_v5  ;;  %v11009_v45 = vmax.f32 %v911_v44, 0.0  ;;  %v11011_v5 = vmax.f32 %v934_v39, 0.0  ;;  %v11029_v44 = vmax.f32 %v908_v21, 0.0  ;;  %v11031_v59 = vmax.f32 %v931_v49, 0.0  ;;  %v371_v39 = vld [vmem:[%s14875_s0 + $0x8c0] sm:$0xff]  ;;  %v372_v21 = vld [vmem:[%s14875_s0 + $0x8c8] sm:$0xff] }
 0x158   :  { %v10995_v43 = vpop.f32.mrf.mxu2  ;;  %v10997_v46 = vpop.f32.mrf.mxu3  ;;  %2906 = vmatpush.msra.mxu2 %v183_v4  ;;  %2929 = vmatpush.msra.mxu3 %v184_v19  ;;  %v464_v4 = vld [vmem:[%s14875_s0 + $0xbb0] sm:$0xff]  ;;  %v465_v19 = vld [vmem:[%s14875_s0 + $0xbb8] sm:$0xff]  ;;  %v865_v49 = vadd.f32 %v9773_v40, %v10980_v57 }
 0x159   :  { %v10999_v42 = vpop.f32.mrf.mxu0  ;;  %v11001_v60 = vpop.f32.mrf.mxu1  ;;  %2860 = vmatpush.msra.mxu0 %v181_v16  ;;  %2883 = vmatpush.msra.mxu1 %v182_v17  ;;  %v278_v40 = vld [vmem:[%s14875_s0 + $0x5d0] sm:$0xff] }
 0x15a   :  { %14943 = vst [vmem:[#allocation56_spill] sm:$0xff] %v11001_v60  ;;  %v1003_v60 = vadd.f32 %v9905_v12, %v10980_v57 }
 0x15c   :  { %8452 = vmatmul.msk.f32.vlgmr.msrb.gmra.mxu0 %vm57_vm1, %v10810_v18  ;;  %8455 = vmatmul.msk.f32.vlgmr.msrb.gmra.mxu1 %vm57_vm1, %v10810_v18  ;;  %v11113_v12 = vmax.f32 %v1003_v60, 0.0 }
 0x15d   :  { %8458 = vmatmul.msk.f32.vlgmr.msrb.gmra.mxu2 %vm57_vm1, %v10810_v18  ;;  %8461 = vmatmul.msk.f32.vlgmr.msrb.gmra.mxu3 %vm57_vm1, %v10810_v18 }
 0x15e   :  { %3200 = vmatpush.msrb.mxu2 %v11009_v45  ;;  %3223 = vmatpush.msrb.mxu3 %v11011_v5 }
 0x15f   :  { %8475 = vmatpush.msk.msrb.mxu0 %vm64_vm0, %v557_v36  ;;  %8478 = vmatpush.msk.msrb.mxu1 %vm64_vm0, %v558_v50  ;;  %v2984_v50 = vmax.f32 %v885_v3, 0.0 }
 0x160   :  { %3201 = vmatpush.msrb.mxu2 %v11029_v44  ;;  %3224 = vmatpush.msrb.mxu3 %v11031_v59  ;;  %v11045_v16 = vpop.f32.mrf.mxu2  ;;  %v11047_v17 = vpop.f32.mrf.mxu3 }
 0x161   :  { %14944 = vst [vmem:[#allocation57_spill] sm:$0xff] %v11045_v16  ;;  %v11057_v1 = vpop.f32.mrf.mxu0  ;;  %v11059_v36 = vpop.f32.mrf.mxu1  ;;  %2949 = vmatpush.msrb.mxu0 %v464_v4  ;;  %2972 = vmatpush.msrb.mxu1 %v465_v19  ;;  %v3076_v16 = vmax.f32 %v865_v49, 0.0  ;;  %v185_v4 = vld [vmem:[%s14875_s0 + $0x2e0] sm:$0xff]  ;;  %v186_v19 = vld [vmem:[%s14875_s0 + $0x2e8] sm:$0xff]  ;;  %v957_v49 = vadd.f32 %v9869_v2, %v10980_v57  ;;  %v954_v2 = vadd.f32 %v9813_v51, %v10989_v25 }
 0x162   :  { %14945 = vst [vmem:[#allocation58_spill] sm:$0xff] %v11047_v17  ;;  %3202 = vmatpush.msrb.mxu2 %v3077_v34  ;;  %3225 = vmatpush.msrb.mxu3 %v11009_v45  ;;  %v862_v17 = vadd.f32 %v9717_v23, %v10989_v25  ;;  %v279_v23 = vld [vmem:[%s14875_s0 + $0x5d8] sm:$0xff] }
 0x163   :  { %2950 = vmatpush.msrb.mxu0 %v371_v39  ;;  %2973 = vmatpush.msrb.mxu1 %v372_v21 }
 0x164   :  { %3203 = vmatpush.msrb.mxu2 %v2984_v50  ;;  %3226 = vmatpush.msrb.mxu3 %v11029_v44  ;;  %v2983_v3 = vmax.f32 %v862_v17, 0.0 }
 0x165   :  { %8453 = vmatmul.msk.f32.gmra.mxu0 %vm57_vm1, %v10871_v41  ;;  %8456 = vmatmul.msk.f32.gmra.mxu1 %vm57_vm1, %v10871_v41 }
 0x166   :  { %8459 = vmatmul.msk.f32.gmra.mxu2 %vm57_vm1, %v10871_v41  ;;  %8462 = vmatmul.msk.f32.gmra.mxu3 %vm57_vm1, %v10871_v41 }
 0x167   :  { %3204 = vmatpush.msrb.mxu2 %v3076_v16  ;;  %3227 = vmatpush.msrb.mxu3 %v3077_v34  ;;  %v980_v34 = vadd.f32 %v9903_v35, %v10980_v57  ;;  %v977_v35 = vadd.f32 %v9857_v61, %v10989_v25  ;;  %v2987_v61 = vmax.f32 %v954_v2, 0.0 }
 0x168   :  { %v11085_v39 = vpop.f32.mrf.mxu2  ;;  %v11087_v21 = vpop.f32.mrf.mxu3  ;;  %2951 = vmatpush.msrb.mxu0 %v278_v40  ;;  %2974 = vmatpush.msrb.mxu1 %v279_v23  ;;  %v1023_v40 = vadd.f32 %v9907_v13, %v10989_v25  ;;  %v3080_v23 = vmax.f32 %v957_v49, 0.0 }
 0x169   :  { %14946 = vst [vmem:[#allocation59_spill] sm:$0xff] %v11087_v21  ;;  %3205 = vmatpush.msrb.mxu2 %v2983_v3  ;;  %3228 = vmatpush.msrb.mxu3 %v2984_v50  ;;  %v11093_v16 = vpop.f32.mrf.mxu0  ;;  %v11095_v17 = vpop.f32.mrf.mxu1  ;;  %v1026_v21 = vadd.f32 %v9968_v33, %v10980_v57  ;;  %v1000_v50 = vadd.f32 %v9859_v62, %v10989_v25  ;;  %v3081_v3 = vmax.f32 %v980_v34, 0.0  ;;  %v2988_v62 = vmax.f32 %v977_v35, 0.0 }
 0x16a   :  { %2952 = vmatpush.msrb.mxu0 %v185_v4  ;;  %2975 = vmatpush.msrb.mxu1 %v186_v19  ;;  %v11123_v33 = vmax.f32 %v1023_v40, 0.0  ;;  %v1049_v40 = vadd.f32 %v9970_v37, %v10980_v57  ;;  %v1069_v37 = vadd.f32 %v9958_v29, %v10989_v25 }
 0x16b   :  { %v11115_v51 = vmax.f32 %v1026_v21, 0.0  ;;  %v11121_v13 = vmax.f32 %v1000_v50, 0.0  ;;  %v3172_v50 = vld [vmem:[%s14879_s4 + $0x8] sm:$0xff] }
 0x16c   :  { %3180 = vperm.xlu1 %8849, %v3172_v50  }
 0x16d   :  { %8464 = vmatmul.msk.f32.vlgmr.msra.gmra.mxu0 %vm57_vm1, %v10810_v18  ;;  %8467 = vmatmul.msk.f32.vlgmr.msra.gmra.mxu1 %vm57_vm1, %v10810_v18 }
 0x16e   :  { %8470 = vmatmul.msk.f32.vlgmr.msra.gmra.mxu2 %vm57_vm1, %v10810_v18  ;;  %8473 = vmatmul.msk.f32.vlgmr.msra.gmra.mxu3 %vm57_vm1, %v10810_v18 }
 0x16f   :  { %3246 = vmatpush.msra.mxu0 %v3080_v23  ;;  %3269 = vmatpush.msra.mxu1 %v3081_v3 }
 0x170   :  { %3292 = vmatpush.msra.mxu2 %v11113_v12  ;;  %3315 = vmatpush.msra.mxu3 %v11115_v51  ;;  %v11127_v60 = vpop.f32.mrf.mxu2  ;;  %v11129_v4 = vpop.f32.mrf.mxu3 }
 0x171   :  { %14947 = vst [vmem:[#allocation60_spill] sm:$0xff] %v11129_v4  ;;  %3247 = vmatpush.msra.mxu0 %v2987_v61  ;;  %3270 = vmatpush.msra.mxu1 %v2988_v62  ;;  %v11131_v19 = vpop.f32.mrf.mxu0  ;;  %v11133_v21 = vpop.f32.mrf.mxu1  ;;  %v1072_v4 = vadd.f32 %v10009_v52, %v10980_v57  ;;  %v11179_v52 = vld [vmem:[%s14880_s3] sm:$0xff] }
 0x172   :  { %3293 = vmatpush.msra.mxu2 %v11121_v13  ;;  %3316 = vmatpush.msra.mxu3 %v11123_v33 }
 0x173   :  { %3248 = vmatpush.msra.mxu0 %v11011_v5  ;;  %3271 = vmatpush.msra.mxu1 %v3080_v23 }
 0x174   :  { %3294 = vmatpush.msra.mxu2 %v3081_v3  ;;  %3317 = vmatpush.msra.mxu3 %v11113_v12 }
 0x175   :  { %3249 = vmatpush.msra.mxu0 %v11031_v59  ;;  %3272 = vmatpush.msra.mxu1 %v2987_v61 }
 0x176   :  { %3295 = vmatpush.msra.mxu2 %v2988_v62  ;;  %3318 = vmatpush.msra.mxu3 %v11121_v13 }
 0x177   :  { %8465 = vmatmul.msk.f32.gmra.mxu0 %vm57_vm1, %v10871_v41  ;;  %8468 = vmatmul.msk.f32.gmra.mxu1 %vm57_vm1, %v10871_v41 }
 0x178   :  { %8471 = vmatmul.msk.f32.gmra.mxu2 %vm57_vm1, %v10871_v41  ;;  %8474 = vmatmul.msk.f32.gmra.mxu3 %vm57_vm1, %v10871_v41  ;;  %v11149_v49 = vpop.f32.mrf.mxu2  ;;  %v11151_v34 = vpop.f32.mrf.mxu3 }
 0x179   :  { %3250 = vmatpush.msra.mxu0 %v11009_v45  ;;  %3273 = vmatpush.msra.mxu1 %v11011_v5  ;;  %v11155_v2 = vpop.f32.mrf.mxu0  ;;  %v11157_v35 = vpop.f32.mrf.mxu1  ;;  %v1095_v45 = vadd.f32 %v10011_v53, %v10980_v57  ;;  %v1118_v5 = vadd.f32 %v10069_v10, %v10980_v57  ;;  %v1092_v53 = vadd.f32 %v9960_v30, %v10989_v25 }
 0x17a   :  { %3296 = vmatpush.msra.mxu2 %v3080_v23  ;;  %3319 = vmatpush.msra.mxu3 %v3081_v3  ;;  %v1046_v23 = vadd.f32 %v9909_v14, %v10989_v25  ;;  %v1115_v10 = vadd.f32 %v10013_v54, %v10989_v25 }
 0x17b   :  { %3251 = vmatpush.msra.mxu0 %v11029_v44  ;;  %3274 = vmatpush.msra.mxu1 %v11031_v59  ;;  %v3084_v44 = vmax.f32 %v1049_v40, 0.0  ;;  %v3085_v59 = vmax.f32 %v1072_v4, 0.0  ;;  %v11189_v14 = vmax.f32 %v1095_v45, 0.0  ;;  %v11191_v29 = vmax.f32 %v1118_v5, 0.0  ;;  %v11219_v40 = vld [vmem:[%s14880_s3 + $0x8] sm:$0xff] }
 0x17c   :  { %3297 = vmatpush.msra.mxu2 %v2987_v61  ;;  %3320 = vmatpush.msra.mxu3 %v2988_v62  ;;  %v2991_v3 = vmax.f32 %v1046_v23, 0.0  ;;  %v2992_v61 = vmax.f32 %v1069_v37, 0.0  ;;  %v11205_v4 = vmax.f32 %v1092_v53, 0.0  ;;  %v11207_v50 = vmax.f32 %v1115_v10, 0.0 }
 0x17d   :  { %v1141_v53 = vadd.f32 %v10071_v11, %v10980_v57  ;;  %v1164_v10 = vadd.f32 %v10105_v27, %v10980_v57  ;;  %v1161_v11 = vadd.f32 %v10059_v6, %v10989_v25  ;;  %v1184_v27 = vadd.f32 %v10061_v7, %v10989_v25 }
 0x17f   :  { %8476 = vmatmul.msk.f32.vlgmr.msrb.gmra.mxu0 %vm57_vm1, %v10810_v18  ;;  %8479 = vmatmul.msk.f32.vlgmr.msrb.gmra.mxu1 %vm57_vm1, %v10810_v18 }
 0x180   :  { %8481 = vmatmul.msk.f32.vlgmr.msrb.gmra.mxu2 %vm3183_vm2, %v11179_v52  ;;  %8483 = vmatmul.msk.f32.vlgmr.msrb.gmra.mxu3 %vm3183_vm2, %v11179_v52  ;;  %v11197_v30 = vpop.f32.mrf.mxu2  ;;  %v11199_v54 = vpop.f32.mrf.mxu3 }
 0x181   :  { %3338 = vmatpush.msrb.mxu0 %v3084_v44  ;;  %3361 = vmatpush.msrb.mxu1 %v3085_v59  ;;  %v11201_v62 = vpop.f32.mrf.mxu0  ;;  %v11203_v18 = vpop.f32.mrf.mxu1 }
 0x182   :  { %3384 = vmatpush.msrb.mxu2 %v11189_v14  ;;  %3407 = vmatpush.msrb.mxu3 %v11191_v29 }
 0x183   :  { %3339 = vmatpush.msrb.mxu0 %v2991_v3  ;;  %3362 = vmatpush.msrb.mxu1 %v2992_v61 }
 0x184   :  { %3385 = vmatpush.msrb.mxu2 %v11205_v4  ;;  %3408 = vmatpush.msrb.mxu3 %v11207_v50 }
 0x185   :  { %3340 = vmatpush.msrb.mxu0 %v11115_v51  ;;  %3363 = vmatpush.msrb.mxu1 %v3084_v44 }
 0x186   :  { %3386 = vmatpush.msrb.mxu2 %v3085_v59  ;;  %3409 = vmatpush.msrb.mxu3 %v11189_v14 }
 0x187   :  { %3341 = vmatpush.msrb.mxu0 %v11123_v33  ;;  %3364 = vmatpush.msrb.mxu1 %v2991_v3 }
 0x188   :  { %3387 = vmatpush.msrb.mxu2 %v2992_v61  ;;  %3410 = vmatpush.msrb.mxu3 %v11205_v4  ;;  %v11222_v45 = vpop.f32.mrf.mxu2  ;;  %v11224_v5 = vpop.f32.mrf.mxu3 }
 0x189   :  { %8477 = vmatmul.msk.f32.gmra.mxu0 %vm57_vm1, %v10871_v41  ;;  %8480 = vmatmul.msk.f32.gmra.mxu1 %vm57_vm1, %v10871_v41  ;;  %v11230_v23 = vpop.f32.mrf.mxu0  ;;  %v11232_v37 = vpop.f32.mrf.mxu1  ;;  %v3171_v41 = vld [vmem:[%s14879_s4] sm:$0xff] }
 0x18a   :  { %8482 = vmatmul.msk.f32.gmra.mxu2 %vm3183_vm2, %v11219_v40  ;;  %8484 = vmatmul.msk.f32.gmra.mxu3 %vm3183_vm2, %v11219_v40 }
 0x18b   :  { %3342 = vmatpush.msrb.mxu0 %v11113_v12  ;;  %3365 = vmatpush.msrb.mxu1 %v11115_v51  ;;  %v1187_v12 = vadd.f32 %v10107_v28, %v10980_v57  ;;  %v1210_v51 = vadd.f32 %v10165_v63, %v10980_v57  ;;  %v3088_v63 = vmax.f32 %v1141_v53, 0.0 }
 0x18c   :  { %3388 = vmatpush.msrb.mxu2 %v3084_v44  ;;  %3411 = vmatpush.msrb.mxu3 %v3085_v59  ;;  %v1138_v44 = vadd.f32 %v10015_v55, %v10989_v25  ;;  %v3089_v59 = vmax.f32 %v1164_v10, 0.0 }
 0x18d   :  { %3343 = vmatpush.msrb.mxu0 %v11121_v13  ;;  %3366 = vmatpush.msrb.mxu1 %v11123_v33  ;;  %v1207_v13 = vadd.f32 %v10109_v31, %v10989_v25  ;;  %v11273_v7 = vmax.f32 %v1187_v12, 0.0 }
 0x18e   :  { %3389 = vmatpush.msrb.mxu2 %v2991_v3  ;;  %3412 = vmatpush.msrb.mxu3 %v2992_v61  ;;  %v11275_v3 = vmax.f32 %v1210_v51, 0.0  ;;  %v2995_v31 = vmax.f32 %v1138_v44, 0.0  ;;  %v2996_v61 = vmax.f32 %v1161_v11, 0.0  ;;  %v1233_v11 = vadd.f32 %v10167_v0, %v10980_v57 }
 0x18f   :  { %3175 = vperm.xlu1 %8849, %v3171_v41   ;;  %v11281_v41 = vmax.f32 %v1184_v27, 0.0  ;;  %v11283_v53 = vmax.f32 %v1207_v13, 0.0  ;;  %v1256_v27 = vadd.f32 %v10201_v20, %v10980_v57  ;;  %v1279_v13 = vadd.f32 %v10203_v24, %v10980_v57 }
 0x190   :  { %v11261_v33 = vpop.f32.mrf.mxu2  ;;  %v11263_v28 = vpop.f32.mrf.mxu3  ;;  %v1230_v0 = vadd.f32 %v10111_v32, %v10989_v25  ;;  %v1253_v20 = vadd.f32 %v10155_v58, %v10989_v25  ;;  %v1276_v24 = vadd.f32 %v10157_v22, %v10989_v25 }
 0x191   :  { %8485 = vmatmul.msk.f32.vlgmr.msra.gmra.mxu0 %vm3183_vm2, %v11179_v52  ;;  %8487 = vmatmul.msk.f32.vlgmr.msra.gmra.mxu1 %vm3183_vm2, %v11179_v52  ;;  %v11269_v55 = vpop.f32.mrf.mxu0  ;;  %v11271_v6 = vpop.f32.mrf.mxu1  ;;  %v11341_v32 = vmax.f32 %v1279_v13, 0.0 }
 0x192   :  { %8489 = vmatmul.msk.f32.vlgmr.msra.gmra.mxu2 %vm3183_vm2, %v11179_v52  ;;  %8491 = vmatmul.msk.f32.vlgmr.msra.gmra.mxu3 %vm3183_vm2, %v11179_v52  ;;  %v2999_v22 = vmax.f32 %v1230_v0, 0.0 }
 0x193   :  { %3430 = vmatpush.msra.mxu0 %v3088_v63  ;;  %3453 = vmatpush.msra.mxu1 %v3089_v59 }
 0x194   :  { %3476 = vmatpush.msra.mxu2 %v11273_v7  ;;  %3499 = vmatpush.msra.mxu3 %v11275_v3 }
 0x195   :  { %3431 = vmatpush.msra.mxu0 %v2995_v31  ;;  %3454 = vmatpush.msra.mxu1 %v2996_v61 }
 0x196   :  { %3477 = vmatpush.msra.mxu2 %v11281_v41  ;;  %3500 = vmatpush.msra.mxu3 %v11283_v53 }
 0x197   :  { %3432 = vmatpush.msra.mxu0 %v11191_v29  ;;  %3455 = vmatpush.msra.mxu1 %v3088_v63 }
 0x198   :  { %3478 = vmatpush.msra.mxu2 %v3089_v59  ;;  %3501 = vmatpush.msra.mxu3 %v11273_v7  ;;  %v11291_v10 = vpop.f32.mrf.mxu2  ;;  %v11293_v12 = vpop.f32.mrf.mxu3 }
 0x199   :  { %3433 = vmatpush.msra.mxu0 %v11207_v50  ;;  %3456 = vmatpush.msra.mxu1 %v2995_v31  ;;  %v11296_v51 = vpop.f32.mrf.mxu0  ;;  %v11298_v44 = vpop.f32.mrf.mxu1 }
 0x19a   :  { %3479 = vmatpush.msra.mxu2 %v2996_v61  ;;  %3502 = vmatpush.msra.mxu3 %v11281_v41 }
 0x19b   :  { %8486 = vmatmul.msk.f32.gmra.mxu0 %vm3183_vm2, %v11219_v40  ;;  %8488 = vmatmul.msk.f32.gmra.mxu1 %vm3183_vm2, %v11219_v40 }
 0x19c   :  { %8490 = vmatmul.msk.f32.gmra.mxu2 %vm3183_vm2, %v11219_v40  ;;  %8492 = vmatmul.msk.f32.gmra.mxu3 %vm3183_vm2, %v11219_v40 }
 0x19d   :  { %3434 = vmatpush.msra.mxu0 %v11189_v14  ;;  %3457 = vmatpush.msra.mxu1 %v11191_v29  ;;  %v1302_v14 = vadd.f32 %v10264_v9, %v10980_v57  ;;  %v1299_v9 = vadd.f32 %v10208_v26, %v10989_v25  ;;  %v3000_v26 = vmax.f32 %v1253_v20, 0.0 }
 0x19e   :  { %3480 = vmatpush.msra.mxu2 %v3088_v63  ;;  %3503 = vmatpush.msra.mxu3 %v3089_v59  ;;  %v3092_v59 = vmax.f32 %v1233_v11, 0.0 }
 0x19f   :  { %3435 = vmatpush.msra.mxu0 %v11205_v4  ;;  %3458 = vmatpush.msra.mxu1 %v11207_v50  ;;  %v11343_v58 = vmax.f32 %v1302_v14, 0.0  ;;  %v11351_v11 = vmax.f32 %v1299_v9, 0.0  ;;  %v1325_v9 = vadd.f32 %v10266_v15, %v10980_v57  ;;  %v1322_v15 = vadd.f32 %v10210_v38, %v10989_v25 }
 0x1a0   :  { %3481 = vmatpush.msra.mxu2 %v2995_v31  ;;  %3504 = vmatpush.msra.mxu3 %v2996_v61  ;;  %v11321_v29 = vpop.f32.mrf.mxu2  ;;  %v11323_v63 = vpop.f32.mrf.mxu3  ;;  %v3093_v31 = vmax.f32 %v1256_v27, 0.0  ;;  %v11349_v61 = vmax.f32 %v1276_v24, 0.0 }
 0x1a1   :  { %14948 = vst [vmem:[#allocation61_spill] sm:$0xff] %v11323_v63  ;;  %v11329_v4 = vpop.f32.mrf.mxu0  ;;  %v11331_v50 = vpop.f32.mrf.mxu1 }
 0x1a3   :  { %8493 = vmatmul.msk.f32.vlgmr.msrb.gmra.mxu0 %vm3183_vm2, %v11179_v52  ;;  %8495 = vmatmul.msk.f32.vlgmr.msrb.gmra.mxu1 %vm3183_vm2, %v11179_v52 }
 0x1a4   :  { %8497 = vmatmul.msk.f32.vlgmr.msrb.gmra.mxu2 %vm3183_vm2, %v11179_v52  ;;  %8499 = vmatmul.msk.f32.vlgmr.msrb.gmra.mxu3 %vm3183_vm2, %v11179_v52 }
 0x1a5   :  { %3522 = vmatpush.msrb.mxu0 %v3092_v59  ;;  %3545 = vmatpush.msrb.mxu1 %v3093_v31 }
 0x1a6   :  { %3568 = vmatpush.msrb.mxu2 %v11341_v32  ;;  %3591 = vmatpush.msrb.mxu3 %v11343_v58 }
 0x1a7   :  { %3523 = vmatpush.msrb.mxu0 %v2999_v22  ;;  %3546 = vmatpush.msrb.mxu1 %v3000_v26 }
 0x1a8   :  { %3569 = vmatpush.msrb.mxu2 %v11349_v61  ;;  %3592 = vmatpush.msrb.mxu3 %v11351_v11  ;;  %v11357_v27 = vpop.f32.mrf.mxu2  ;;  %v11359_v13 = vpop.f32.mrf.mxu3 }
 0x1a9   :  { %3524 = vmatpush.msrb.mxu0 %v11275_v3  ;;  %3547 = vmatpush.msrb.mxu1 %v3092_v59  ;;  %v11362_v14 = vpop.f32.mrf.mxu0  ;;  %v11364_v0 = vpop.f32.mrf.mxu1 }
 0x1aa   :  { %14949 = vst [vmem:[#allocation62_spill] sm:$0xff] %v11362_v14  ;;  %3570 = vmatpush.msrb.mxu2 %v3093_v31  ;;  %3593 = vmatpush.msrb.mxu3 %v11341_v32 }
 0x1ab   :  { %14950 = vst [vmem:[#allocation63_spill] sm:$0xff] %v11364_v0  ;;  %3525 = vmatpush.msrb.mxu0 %v11283_v53  ;;  %3548 = vmatpush.msrb.mxu1 %v2999_v22  ;;  %v1348_v0 = vadd.f32 %v10303_v47, %v10980_v57  ;;  %v14954_v47 = vld [vmem:[#allocation2_spill] sm:$0xff] }
 0x1ac   :  { %3571 = vmatpush.msrb.mxu2 %v3000_v26  ;;  %3594 = vmatpush.msrb.mxu3 %v11349_v61 }
 0x1ad   :  { %8494 = vmatmul.msk.f32.gmra.mxu0 %vm3183_vm2, %v11219_v40  ;;  %8496 = vmatmul.msk.f32.gmra.mxu1 %vm3183_vm2, %v11219_v40  ;;  %v3097_v63 = vmax.f32 %v1348_v0, 0.0 }
 0x1ae   :  { %8498 = vmatmul.msk.f32.gmra.mxu2 %vm3183_vm2, %v11219_v40  ;;  %8500 = vmatmul.msk.f32.gmra.mxu3 %vm3183_vm2, %v11219_v40 }
 0x1af   :  { %3526 = vmatpush.msrb.mxu0 %v11273_v7  ;;  %3549 = vmatpush.msrb.mxu1 %v11275_v3  ;;  %v1371_v3 = vadd.f32 %v10305_v48, %v10980_v57 }
 0x1b0   :  { %3572 = vmatpush.msrb.mxu2 %v3092_v59  ;;  %3595 = vmatpush.msrb.mxu3 %v3093_v31  ;;  %v11379_v20 = vpop.f32.mrf.mxu2  ;;  %v11381_v24 = vpop.f32.mrf.mxu3  ;;  %v1394_v59 = vadd.f32 %v10363_v8, %v10980_v57  ;;  %v3003_v8 = vmax.f32 %v1322_v15, 0.0 }
 0x1b1   :  { %14951 = vst [vmem:[#allocation64_spill] sm:$0xff] %v11379_v20  ;;  %3527 = vmatpush.msrb.mxu0 %v11281_v41  ;;  %3550 = vmatpush.msrb.mxu1 %v11283_v53  ;;  %v11389_v14 = vpop.f32.mrf.mxu0  ;;  %v11391_v7 = vpop.f32.mrf.mxu1  ;;  %v1345_v41 = vadd.f32 %v14954_v47, %v10989_v25  ;;  %v14955_v53 = vld [vmem:[#allocation3_spill] sm:$0xff]  ;;  %v11409_v48 = vmax.f32 %v1371_v3, 0.0 }
 0x1b2   :  { %14952 = vst [vmem:[#allocation65_spill] sm:$0xff] %v11381_v24  ;;  %3573 = vmatpush.msrb.mxu2 %v2999_v22  ;;  %3596 = vmatpush.msrb.mxu3 %v3000_v26  ;;  %v1368_v31 = vadd.f32 %v14955_v53, %v10989_v25  ;;  %v14956_v24 = vld [vmem:[#allocation4_spill] sm:$0xff]  ;;  %v11411_v38 = vmax.f32 %v1394_v59, 0.0 }
 0x1b3   :  { %14953 = vst [vmem:[#allocation66_spill] sm:$0xff] %v11391_v7  ;;  %v1391_v20 = vadd.f32 %v14956_v24, %v10989_v25  ;;  %v3096_v7 = vmax.f32 %v1325_v9, 0.0  ;;  %v3004_v22 = vmax.f32 %v1345_v41, 0.0  ;;  %v14965_v53 = vld [vmem:[#allocation8_spill] sm:$0xff] }
 0x1b4   :  { %v11417_v26 = vmax.f32 %v1368_v31, 0.0  ;;  %v1417_v31 = vadd.f32 %v14965_v53, %v10980_v57  ;;  %v14970_v53 = vld [vmem:[#allocation6_spill] sm:$0xff] }
 0x1b5   :  { %8501 = vmatmul.msk.f32.vlgmr.msra.gmra.mxu0 %vm3183_vm2, %v11179_v52  ;;  %8503 = vmatmul.msk.f32.vlgmr.msra.gmra.mxu1 %vm3183_vm2, %v11179_v52  ;;  %v11419_v0 = vmax.f32 %v1391_v20, 0.0 }
 0x1b6   :  { %8505 = vmatmul.msk.f32.vlgmr.msra.gmra.mxu2 %vm3183_vm2, %v11179_v52  ;;  %8507 = vmatmul.msk.f32.vlgmr.msra.gmra.mxu3 %vm3183_vm2, %v11179_v52 }
 0x1b7   :  { %3614 = vmatpush.msra.mxu0 %v3096_v7  ;;  %3637 = vmatpush.msra.mxu1 %v3097_v63 }
 0x1b8   :  { %3660 = vmatpush.msra.mxu2 %v11409_v48  ;;  %3683 = vmatpush.msra.mxu3 %v11411_v38  ;;  %v11423_v24 = vpop.f32.mrf.mxu2  ;;  %v11425_v9 = vpop.f32.mrf.mxu3 }
 0x1b9   :  { %14957 = vst [vmem:[#allocation2_spill] sm:$0xff] %v11423_v24  ;;  %3615 = vmatpush.msra.mxu0 %v3003_v8  ;;  %3638 = vmatpush.msra.mxu1 %v3004_v22  ;;  %v11427_v3 = vpop.f32.mrf.mxu0  ;;  %v11429_v59 = vpop.f32.mrf.mxu1 }
 0x1ba   :  { %14958 = vst [vmem:[#allocation3_spill] sm:$0xff] %v11425_v9  ;;  %3661 = vmatpush.msra.mxu2 %v11417_v26  ;;  %3684 = vmatpush.msra.mxu3 %v11419_v0  ;;  %v3100_v9 = vmax.f32 %v1417_v31, 0.0 }
 0x1bb   :  { %14959 = vst [vmem:[#allocation4_spill] sm:$0xff] %v11427_v3  ;;  %3616 = vmatpush.msra.mxu0 %v11343_v58  ;;  %3639 = vmatpush.msra.mxu1 %v3096_v7 }
 0x1bc   :  { %14960 = vst [vmem:[#allocation67_spill] sm:$0xff] %v11429_v59  ;;  %3662 = vmatpush.msra.mxu2 %v3097_v63  ;;  %3685 = vmatpush.msra.mxu3 %v11409_v48  ;;  %v14966_v59 = vld [vmem:[#allocation9_spill] sm:$0xff] }
 0x1bd   :  { %3617 = vmatpush.msra.mxu0 %v11351_v11  ;;  %3640 = vmatpush.msra.mxu1 %v3003_v8  ;;  %v1440_v3 = vadd.f32 %v14966_v59, %v10980_v57  ;;  %v14971_v59 = vld [vmem:[#allocation7_spill] sm:$0xff] }
 0x1be   :  { %3663 = vmatpush.msra.mxu2 %v3004_v22  ;;  %3686 = vmatpush.msra.mxu3 %v11417_v26 }
 0x1bf   :  { %8502 = vmatmul.msk.f32.gmra.mxu0 %vm3183_vm2, %v11219_v40  ;;  %8504 = vmatmul.msk.f32.gmra.mxu1 %vm3183_vm2, %v11219_v40  ;;  %v3101_v24 = vmax.f32 %v1440_v3, 0.0 }
 0x1c0   :  { %8506 = vmatmul.msk.f32.gmra.mxu2 %vm3183_vm2, %v11219_v40  ;;  %8508 = vmatmul.msk.f32.gmra.mxu3 %vm3183_vm2, %v11219_v40  ;;  %v11445_v20 = vpop.f32.mrf.mxu2  ;;  %v11447_v15 = vpop.f32.mrf.mxu3 }
 0x1c1   :  { %14961 = vst [vmem:[#allocation68_spill] sm:$0xff] %v11445_v20  ;;  %3618 = vmatpush.msra.mxu0 %v11341_v32  ;;  %3641 = vmatpush.msra.mxu1 %v11343_v58  ;;  %v11451_v47 = vpop.f32.mrf.mxu0  ;;  %v11453_v41 = vpop.f32.mrf.mxu1  ;;  %v14967_v32 = vld [vmem:[#allocation10_spill] sm:$0xff]  ;;  %v14968_v58 = vld [vmem:[#allocation15_spill] sm:$0xff] }
 0x1c2   :  { %14962 = vst [vmem:[#allocation69_spill] sm:$0xff] %v11447_v15  ;;  %3664 = vmatpush.msra.mxu2 %v3096_v7  ;;  %3687 = vmatpush.msra.mxu3 %v3097_v63  ;;  %v1463_v15 = vadd.f32 %v14967_v32, %v10980_v57  ;;  %v1486_v20 = vadd.f32 %v14968_v58, %v10980_v57  ;;  %v14969_v63 = vld [vmem:[#allocation5_spill] sm:$0xff] }
 0x1c3   :  { %14963 = vst [vmem:[#allocation70_spill] sm:$0xff] %v11451_v47  ;;  %3619 = vmatpush.msra.mxu0 %v11349_v61  ;;  %3642 = vmatpush.msra.mxu1 %v11351_v11  ;;  %v1414_v7 = vadd.f32 %v14969_v63, %v10989_v25  ;;  %v1460_v47 = vadd.f32 %v14971_v59, %v10989_v25  ;;  %v14972_v61 = vld [vmem:[#allocation11_spill] sm:$0xff] }
 0x1c4   :  { %14964 = vst [vmem:[#allocation71_spill] sm:$0xff] %v11453_v41  ;;  %3665 = vmatpush.msra.mxu2 %v3003_v8  ;;  %3688 = vmatpush.msra.mxu3 %v3004_v22  ;;  %v1437_v41 = vadd.f32 %v14970_v53, %v10989_v25  ;;  %v1483_v11 = vadd.f32 %v14972_v61, %v10989_v25  ;;  %v11477_v8 = vmax.f32 %v1463_v15, 0.0  ;;  %v11479_v22 = vmax.f32 %v1486_v20, 0.0  ;;  %v14981_v61 = vld [vmem:[#allocation16_spill] sm:$0xff] }
 0x1c5   :  { %v3007_v3 = vmax.f32 %v1414_v7, 0.0  ;;  %v11493_v20 = vmax.f32 %v1460_v47, 0.0 }
 0x1c6   :  { %v3008_v58 = vmax.f32 %v1437_v41, 0.0  ;;  %v11495_v53 = vmax.f32 %v1483_v11, 0.0  ;;  %v1509_v11 = vadd.f32 %v14981_v61, %v10980_v57 }
 0x1c7   :  { %8509 = vmatmul.msk.f32.vlgmr.msrb.gmra.mxu0 %vm3183_vm2, %v11179_v52  ;;  %8511 = vmatmul.msk.f32.vlgmr.msrb.gmra.mxu1 %vm3183_vm2, %v11179_v52 }
 0x1c8   :  { %8513 = vmatmul.msk.f32.vlgmr.msrb.gmra.mxu2 %vm3183_vm2, %v11179_v52  ;;  %8515 = vmatmul.msk.f32.vlgmr.msrb.gmra.mxu3 %vm3183_vm2, %v11179_v52  ;;  %v11485_v32 = vpop.f32.mrf.mxu2  ;;  %v11487_v31 = vpop.f32.mrf.mxu3 }
 0x1c9   :  { %14973 = vst [vmem:[#allocation8_spill] sm:$0xff] %v11485_v32  ;;  %3706 = vmatpush.msrb.mxu0 %v3100_v9  ;;  %3729 = vmatpush.msrb.mxu1 %v3101_v24  ;;  %v11489_v63 = vpop.f32.mrf.mxu0  ;;  %v11491_v15 = vpop.f32.mrf.mxu1  ;;  %v3104_v32 = vmax.f32 %v1509_v11, 0.0 }
 0x1ca   :  { %14974 = vst [vmem:[#allocation9_spill] sm:$0xff] %v11487_v31  ;;  %3752 = vmatpush.msrb.mxu2 %v11477_v8  ;;  %3775 = vmatpush.msrb.mxu3 %v11479_v22 }
 0x1cb   :  { %14975 = vst [vmem:[#allocation10_spill] sm:$0xff] %v11489_v63  ;;  %3707 = vmatpush.msrb.mxu0 %v3007_v3  ;;  %3730 = vmatpush.msrb.mxu1 %v3008_v58  ;;  %v14984_v63 = vld [vmem:[#allocation23_spill] sm:$0xff] }
 0x1cc   :  { %14976 = vst [vmem:[#allocation15_spill] sm:$0xff] %v11491_v15  ;;  %3753 = vmatpush.msrb.mxu2 %v11493_v20  ;;  %3776 = vmatpush.msrb.mxu3 %v11495_v53  ;;  %v14983_v15 = vld [vmem:[#allocation18_spill] sm:$0xff] }
 0x1cd   :  { %3708 = vmatpush.msrb.mxu0 %v11411_v38  ;;  %3731 = vmatpush.msrb.mxu1 %v3100_v9 }
 0x1ce   :  { %3754 = vmatpush.msrb.mxu2 %v3101_v24  ;;  %3777 = vmatpush.msrb.mxu3 %v11477_v8 }
 0x1cf   :  { %3709 = vmatpush.msrb.mxu0 %v11419_v0  ;;  %3732 = vmatpush.msrb.mxu1 %v3007_v3 }
 0x1d0   :  { %3755 = vmatpush.msrb.mxu2 %v3008_v58  ;;  %3778 = vmatpush.msrb.mxu3 %v11493_v20  ;;  %v11505_v47 = vpop.f32.mrf.mxu2  ;;  %v11507_v41 = vpop.f32.mrf.mxu3 }
 0x1d1   :  { %14977 = vst [vmem:[#allocation5_spill] sm:$0xff] %v11505_v47  ;;  %8510 = vmatmul.msk.f32.gmra.mxu0 %vm3183_vm2, %v11219_v40  ;;  %8512 = vmatmul.msk.f32.gmra.mxu1 %vm3183_vm2, %v11219_v40  ;;  %v11513_v7 = vpop.f32.mrf.mxu0  ;;  %v11515_v59 = vpop.f32.mrf.mxu1 }
 0x1d2   :  { %14978 = vst [vmem:[#allocation6_spill] sm:$0xff] %v11507_v41  ;;  %8514 = vmatmul.msk.f32.gmra.mxu2 %vm3183_vm2, %v11219_v40  ;;  %8516 = vmatmul.msk.f32.gmra.mxu3 %vm3183_vm2, %v11219_v40  ;;  %v14982_v41 = vld [vmem:[#allocation17_spill] sm:$0xff] }
 0x1d3   :  { %14979 = vst [vmem:[#allocation7_spill] sm:$0xff] %v11513_v7  ;;  %3710 = vmatpush.msrb.mxu0 %v11409_v48  ;;  %3733 = vmatpush.msrb.mxu1 %v11411_v38  ;;  %v1532_v47 = vadd.f32 %v14982_v41, %v10980_v57  ;;  %v1578_v48 = vadd.f32 %v14984_v63, %v10980_v57  ;;  %v14985_v38 = vld [vmem:[#allocation12_spill] sm:$0xff]  ;;  %v14987_v41 = vld [vmem:[#allocation14_spill] sm:$0xff] }
 0x1d4   :  { %14980 = vst [vmem:[#allocation11_spill] sm:$0xff] %v11515_v59  ;;  %3756 = vmatpush.msrb.mxu2 %v3100_v9  ;;  %3779 = vmatpush.msrb.mxu3 %v3101_v24  ;;  %v1555_v59 = vadd.f32 %v14983_v15, %v10980_v57  ;;  %v1506_v24 = vadd.f32 %v14985_v38, %v10989_v25  ;;  %v14986_v9 = vld [vmem:[#allocation13_spill] sm:$0xff] }
 0x1d5   :  { %3711 = vmatpush.msrb.mxu0 %v11417_v26  ;;  %3734 = vmatpush.msrb.mxu1 %v11419_v0  ;;  %v1529_v61 = vadd.f32 %v14986_v9, %v10989_v25  ;;  %v1552_v7 = vadd.f32 %v14987_v41, %v10989_v25  ;;  %v14988_v26 = vld [vmem:[#allocation19_spill] sm:$0xff]  ;;  %v3105_v63 = vmax.f32 %v1532_v47, 0.0  ;;  %v11555_v9 = vmax.f32 %v1578_v48, 0.0 }
 0x1d6   :  { %3757 = vmatpush.msrb.mxu2 %v3007_v3  ;;  %3780 = vmatpush.msrb.mxu3 %v3008_v58  ;;  %v1575_v0 = vadd.f32 %v14988_v26, %v10989_v25  ;;  %v11553_v38 = vmax.f32 %v1555_v59, 0.0  ;;  %v3011_v47 = vmax.f32 %v1506_v24, 0.0 }
 0x1d7   :  { %v3012_v11 = vmax.f32 %v1529_v61, 0.0  ;;  %v11561_v41 = vmax.f32 %v1552_v7, 0.0  ;;  %v14997_v61 = vld [vmem:[#allocation24_spill] sm:$0xff] }
 0x1d8   :  { %v11541_v31 = vpop.f32.mrf.mxu2  ;;  %v11543_v15 = vpop.f32.mrf.mxu3  ;;  %v11563_v26 = vmax.f32 %v1575_v0, 0.0  ;;  %v1601_v0 = vadd.f32 %v14997_v61, %v10980_v57 }
 0x1d9   :  { %14989 = vst [vmem:[#allocation16_spill] sm:$0xff] %v11541_v31  ;;  %8517 = vmatmul.msk.f32.vlgmr.msra.gmra.mxu0 %vm3183_vm2, %v11179_v52  ;;  %8519 = vmatmul.msk.f32.vlgmr.msra.gmra.mxu1 %vm3183_vm2, %v11179_v52  ;;  %v11549_v3 = vpop.f32.mrf.mxu0  ;;  %v11551_v58 = vpop.f32.mrf.mxu1 }
 0x1da   :  { %14990 = vst [vmem:[#allocation17_spill] sm:$0xff] %v11543_v15  ;;  %8521 = vmatmul.msk.f32.vlgmr.msra.gmra.mxu2 %vm3183_vm2, %v11179_v52  ;;  %8523 = vmatmul.msk.f32.vlgmr.msra.gmra.mxu3 %vm3183_vm2, %v11179_v52 }
 0x1db   :  { %14991 = vst [vmem:[#allocation18_spill] sm:$0xff] %v11549_v3  ;;  %3798 = vmatpush.msra.mxu0 %v3104_v32  ;;  %3821 = vmatpush.msra.mxu1 %v3105_v63  ;;  %v15000_v3 = vld [vmem:[#allocation31_spill] sm:$0xff] }
 0x1dc   :  { %14992 = vst [vmem:[#allocation23_spill] sm:$0xff] %v11551_v58  ;;  %3844 = vmatpush.msra.mxu2 %v11553_v38  ;;  %3867 = vmatpush.msra.mxu3 %v11555_v9  ;;  %v14999_v58 = vld [vmem:[#allocation26_spill] sm:$0xff] }
 0x1dd   :  { %3799 = vmatpush.msra.mxu0 %v3011_v47  ;;  %3822 = vmatpush.msra.mxu1 %v3012_v11 }
 0x1de   :  { %3845 = vmatpush.msra.mxu2 %v11561_v41  ;;  %3868 = vmatpush.msra.mxu3 %v11563_v26 }
 0x1df   :  { %3800 = vmatpush.msra.mxu0 %v11479_v22  ;;  %3823 = vmatpush.msra.mxu1 %v3104_v32 }
 0x1e0   :  { %3846 = vmatpush.msra.mxu2 %v3105_v63  ;;  %3869 = vmatpush.msra.mxu3 %v11553_v38  ;;  %v11571_v7 = vpop.f32.mrf.mxu2  ;;  %v11573_v59 = vpop.f32.mrf.mxu3 }
 0x1e1   :  { %14993 = vst [vmem:[#allocation12_spill] sm:$0xff] %v11571_v7  ;;  %3801 = vmatpush.msra.mxu0 %v11495_v53  ;;  %3824 = vmatpush.msra.mxu1 %v3011_v47 }
 0x1e2   :  { %14994 = vst [vmem:[#allocation13_spill] sm:$0xff] %v11573_v59  ;;  %3847 = vmatpush.msra.mxu2 %v3012_v11  ;;  %3870 = vmatpush.msra.mxu3 %v11561_v41  ;;  %v11577_v48 = vpop.f32.mrf.mxu0  ;;  %v11579_v24 = vpop.f32.mrf.mxu1  ;;  %v14998_v59 = vld [vmem:[#allocation25_spill] sm:$0xff] }
 0x1e3   :  { %14995 = vst [vmem:[#allocation14_spill] sm:$0xff] %v11577_v48  ;;  %8518 = vmatmul.msk.f32.gmra.mxu0 %vm3183_vm2, %v11219_v40  ;;  %8520 = vmatmul.msk.f32.gmra.mxu1 %vm3183_vm2, %v11219_v40  ;;  %v1624_v7 = vadd.f32 %v14998_v59, %v10980_v57 }
 0x1e4   :  { %14996 = vst [vmem:[#allocation19_spill] sm:$0xff] %v11579_v24  ;;  %8522 = vmatmul.msk.f32.gmra.mxu2 %vm3183_vm2, %v11219_v40  ;;  %8524 = vmatmul.msk.f32.gmra.mxu3 %vm3183_vm2, %v11219_v40  ;;  %v1647_v24 = vadd.f32 %v14999_v58, %v10980_v57  ;;  %v15006_v58 = vld [vmem:[#allocation27_spill] sm:$0xff] }
 0x1e5   :  { %3802 = vmatpush.msra.mxu0 %v11477_v8  ;;  %3825 = vmatpush.msra.mxu1 %v11479_v22  ;;  %v1670_v8 = vadd.f32 %v15000_v3, %v10980_v57  ;;  %v15001_v22 = vld [vmem:[#allocation20_spill] sm:$0xff]  ;;  %v1667_v15 = vadd.f32 %v15006_v58, %v10989_v25 }
 0x1e6   :  { %3848 = vmatpush.msra.mxu2 %v3104_v32  ;;  %3871 = vmatpush.msra.mxu3 %v3105_v63  ;;  %v1598_v32 = vadd.f32 %v15001_v22, %v10989_v25  ;;  %v15002_v63 = vld [vmem:[#allocation21_spill] sm:$0xff]  ;;  %v11621_v22 = vmax.f32 %v1647_v24, 0.0 }
 0x1e7   :  { %3803 = vmatpush.msra.mxu0 %v11493_v20  ;;  %3826 = vmatpush.msra.mxu1 %v11495_v53  ;;  %v1621_v61 = vadd.f32 %v15002_v63, %v10989_v25  ;;  %v15005_v20 = vld [vmem:[#allocation22_spill] sm:$0xff]  ;;  %v11623_v63 = vmax.f32 %v1670_v8, 0.0 }
 0x1e8   :  { %3849 = vmatpush.msra.mxu2 %v3011_v47  ;;  %3872 = vmatpush.msra.mxu3 %v3012_v11  ;;  %v1644_v53 = vadd.f32 %v15005_v20, %v10989_v25  ;;  %v3108_v47 = vmax.f32 %v1601_v0, 0.0  ;;  %v3109_v11 = vmax.f32 %v1624_v7, 0.0  ;;  %v3015_v20 = vmax.f32 %v1598_v32, 0.0 }
 0x1e9   :  { %v11605_v48 = vpop.f32.mrf.mxu2  ;;  %v11607_v59 = vpop.f32.mrf.mxu3  ;;  %v3016_v58 = vmax.f32 %v1621_v61, 0.0  ;;  %v11631_v0 = vmax.f32 %v1667_v15, 0.0  ;;  %v15013_v61 = vld [vmem:[#allocation32_spill] sm:$0xff] }
 0x1ea   :  { %15003 = vst [vmem:[#allocation24_spill] sm:$0xff] %v11605_v48  ;;  %v11613_v31 = vpop.f32.mrf.mxu0  ;;  %v11615_v3 = vpop.f32.mrf.mxu1  ;;  %v11629_v7 = vmax.f32 %v1644_v53, 0.0  ;;  %v1693_v53 = vadd.f32 %v15013_v61, %v10980_v57 }
 0x1eb   :  { %15004 = vst [vmem:[#allocation25_spill] sm:$0xff] %v11607_v59  ;;  %8525 = vmatmul.msk.f32.vlgmr.msrb.gmra.mxu0 %vm3183_vm2, %v11179_v52  ;;  %8527 = vmatmul.msk.f32.vlgmr.msrb.gmra.mxu1 %vm3183_vm2, %v11179_v52 }
 0x1ec   :  { %15007 = vst [vmem:[#allocation26_spill] sm:$0xff] %v11613_v31  ;;  %8529 = vmatmul.msk.f32.vlgmr.msrb.gmra.mxu2 %vm3183_vm2, %v11179_v52  ;;  %8531 = vmatmul.msk.f32.vlgmr.msrb.gmra.mxu3 %vm3183_vm2, %v11179_v52  ;;  %v15016_v31 = vld [vmem:[#allocation39_spill] sm:$0xff] }
 0x1ed   :  { %15008 = vst [vmem:[#allocation31_spill] sm:$0xff] %v11615_v3  ;;  %3890 = vmatpush.msrb.mxu0 %v3108_v47  ;;  %3913 = vmatpush.msrb.mxu1 %v3109_v11  ;;  %v15015_v3 = vld [vmem:[#allocation34_spill] sm:$0xff] }
 0x1ee   :  { %3936 = vmatpush.msrb.mxu2 %v11621_v22  ;;  %3959 = vmatpush.msrb.mxu3 %v11623_v63 }
 0x1ef   :  { %3891 = vmatpush.msrb.mxu0 %v3015_v20  ;;  %3914 = vmatpush.msrb.mxu1 %v3016_v58 }
 0x1f0   :  { %3937 = vmatpush.msrb.mxu2 %v11629_v7  ;;  %3960 = vmatpush.msrb.mxu3 %v11631_v0 }
 0x1f1   :  { %3892 = vmatpush.msrb.mxu0 %v11555_v9  ;;  %3915 = vmatpush.msrb.mxu1 %v3108_v47  ;;  %v11638_v24 = vpop.f32.mrf.mxu2  ;;  %v11640_v8 = vpop.f32.mrf.mxu3 }
 0x1f2   :  { %15009 = vst [vmem:[#allocation20_spill] sm:$0xff] %v11638_v24  ;;  %3938 = vmatpush.msrb.mxu2 %v3109_v11  ;;  %3961 = vmatpush.msrb.mxu3 %v11621_v22 }
 0x1f3   :  { %15010 = vst [vmem:[#allocation21_spill] sm:$0xff] %v11640_v8  ;;  %3893 = vmatpush.msrb.mxu0 %v11563_v26  ;;  %3916 = vmatpush.msrb.mxu1 %v3015_v20  ;;  %v15014_v8 = vld [vmem:[#allocation33_spill] sm:$0xff] }
 0x1f4   :  { %3939 = vmatpush.msrb.mxu2 %v3016_v58  ;;  %3962 = vmatpush.msrb.mxu3 %v11629_v7  ;;  %v11645_v15 = vpop.f32.mrf.mxu0  ;;  %v11647_v32 = vpop.f32.mrf.mxu1  ;;  %v1716_v24 = vadd.f32 %v15014_v8, %v10980_v57 }
 0x1f5   :  { %15011 = vst [vmem:[#allocation22_spill] sm:$0xff] %v11645_v15  ;;  %8526 = vmatmul.msk.f32.gmra.mxu0 %vm3183_vm2, %v11219_v40  ;;  %8528 = vmatmul.msk.f32.gmra.mxu1 %vm3183_vm2, %v11219_v40 }
 0x1f6   :  { %15012 = vst [vmem:[#allocation27_spill] sm:$0xff] %v11647_v32  ;;  %8530 = vmatmul.msk.f32.gmra.mxu2 %vm3183_vm2, %v11219_v40  ;;  %8532 = vmatmul.msk.f32.gmra.mxu3 %vm3183_vm2, %v11219_v40  ;;  %v1739_v32 = vadd.f32 %v15015_v3, %v10980_v57  ;;  %v15022_v3 = vld [vmem:[#allocation35_spill] sm:$0xff] }
 0x1f7   :  { %3894 = vmatpush.msrb.mxu0 %v11553_v38  ;;  %3917 = vmatpush.msrb.mxu1 %v11555_v9  ;;  %v1762_v38 = vadd.f32 %v15016_v31, %v10980_v57  ;;  %v15017_v9 = vld [vmem:[#allocation28_spill] sm:$0xff]  ;;  %v1759_v59 = vadd.f32 %v15022_v3, %v10989_v25 }
 0x1f8   :  { %3940 = vmatpush.msrb.mxu2 %v3108_v47  ;;  %3963 = vmatpush.msrb.mxu3 %v3109_v11  ;;  %v1690_v47 = vadd.f32 %v15017_v9, %v10989_v25  ;;  %v15018_v11 = vld [vmem:[#allocation29_spill] sm:$0xff]  ;;  %v11689_v9 = vmax.f32 %v1739_v32, 0.0 }
 0x1f9   :  { %3895 = vmatpush.msrb.mxu0 %v11561_v41  ;;  %3918 = vmatpush.msrb.mxu1 %v11563_v26  ;;  %v1713_v61 = vadd.f32 %v15018_v11, %v10989_v25  ;;  %v15021_v41 = vld [vmem:[#allocation30_spill] sm:$0xff]  ;;  %v11691_v11 = vmax.f32 %v1762_v38, 0.0 }
 0x1fa   :  { %3941 = vmatpush.msrb.mxu2 %v3015_v20  ;;  %3964 = vmatpush.msrb.mxu3 %v3016_v58  ;;  %v1736_v26 = vadd.f32 %v15021_v41, %v10989_v25  ;;  %v3112_v20 = vmax.f32 %v1693_v53, 0.0  ;;  %v3113_v58 = vmax.f32 %v1716_v24, 0.0  ;;  %v3019_v41 = vmax.f32 %v1690_v47, 0.0 }
 0x1fb   :  { %v11673_v15 = vpop.f32.mrf.mxu2  ;;  %v11675_v8 = vpop.f32.mrf.mxu3  ;;  %v3020_v3 = vmax.f32 %v1713_v61, 0.0  ;;  %v11699_v53 = vmax.f32 %v1759_v59, 0.0  ;;  %v15029_v61 = vld [vmem:[#allocation40_spill] sm:$0xff] }
 0x1fc   :  { %15019 = vst [vmem:[#allocation32_spill] sm:$0xff] %v11673_v15  ;;  %v11681_v48 = vpop.f32.mrf.mxu0  ;;  %v11683_v31 = vpop.f32.mrf.mxu1  ;;  %v11697_v24 = vmax.f32 %v1736_v26, 0.0  ;;  %v1785_v26 = vadd.f32 %v15029_v61, %v10980_v57 }
 0x1fd   :  { %15020 = vst [vmem:[#allocation33_spill] sm:$0xff] %v11675_v8  ;;  %8533 = vmatmul.msk.f32.vlgmr.msra.gmra.mxu0 %vm3183_vm2, %v11179_v52  ;;  %8535 = vmatmul.msk.f32.vlgmr.msra.gmra.mxu1 %vm3183_vm2, %v11179_v52 }
 0x1fe   :  { %15023 = vst [vmem:[#allocation34_spill] sm:$0xff] %v11681_v48  ;;  %8537 = vmatmul.msk.f32.vlgmr.msra.gmra.mxu2 %vm3183_vm2, %v11179_v52  ;;  %8539 = vmatmul.msk.f32.vlgmr.msra.gmra.mxu3 %vm3183_vm2, %v11179_v52  ;;  %v15032_v48 = vld [vmem:[#allocation47_spill] sm:$0xff] }
 0x1ff   :  { %15024 = vst [vmem:[#allocation39_spill] sm:$0xff] %v11683_v31  ;;  %3982 = vmatpush.msra.mxu0 %v3112_v20  ;;  %4005 = vmatpush.msra.mxu1 %v3113_v58  ;;  %v15031_v31 = vld [vmem:[#allocation42_spill] sm:$0xff] }
 0x200   :  { %4028 = vmatpush.msra.mxu2 %v11689_v9  ;;  %4051 = vmatpush.msra.mxu3 %v11691_v11 }
 0x201   :  { %3983 = vmatpush.msra.mxu0 %v3019_v41  ;;  %4006 = vmatpush.msra.mxu1 %v3020_v3 }
 0x202   :  { %4029 = vmatpush.msra.mxu2 %v11697_v24  ;;  %4052 = vmatpush.msra.mxu3 %v11699_v53 }
 0x203   :  { %3984 = vmatpush.msra.mxu0 %v11623_v63  ;;  %4007 = vmatpush.msra.mxu1 %v3112_v20  ;;  %v11706_v32 = vpop.f32.mrf.mxu2  ;;  %v11708_v38 = vpop.f32.mrf.mxu3 }
 0x204   :  { %15025 = vst [vmem:[#allocation28_spill] sm:$0xff] %v11706_v32  ;;  %4030 = vmatpush.msra.mxu2 %v3113_v58  ;;  %4053 = vmatpush.msra.mxu3 %v11689_v9  ;;  %v15030_v32 = vld [vmem:[#allocation41_spill] sm:$0xff] }
 0x205   :  { %15026 = vst [vmem:[#allocation29_spill] sm:$0xff] %v11708_v38  ;;  %3985 = vmatpush.msra.mxu0 %v11631_v0  ;;  %4008 = vmatpush.msra.mxu1 %v3019_v41  ;;  %v1808_v38 = vadd.f32 %v15030_v32, %v10980_v57 }
 0x206   :  { %4031 = vmatpush.msra.mxu2 %v3020_v3  ;;  %4054 = vmatpush.msra.mxu3 %v11697_v24  ;;  %v11713_v59 = vpop.f32.mrf.mxu0  ;;  %v11715_v47 = vpop.f32.mrf.mxu1 }
 0x207   :  { %15027 = vst [vmem:[#allocation30_spill] sm:$0xff] %v11713_v59  ;;  %8534 = vmatmul.msk.f32.gmra.mxu0 %vm3183_vm2, %v11219_v40  ;;  %8536 = vmatmul.msk.f32.gmra.mxu1 %vm3183_vm2, %v11219_v40 }
 0x208   :  { %15028 = vst [vmem:[#allocation35_spill] sm:$0xff] %v11715_v47  ;;  %8538 = vmatmul.msk.f32.gmra.mxu2 %vm3183_vm2, %v11219_v40  ;;  %8540 = vmatmul.msk.f32.gmra.mxu3 %vm3183_vm2, %v11219_v40  ;;  %v1831_v47 = vadd.f32 %v15031_v31, %v10980_v57  ;;  %v15038_v31 = vld [vmem:[#allocation43_spill] sm:$0xff] }
 0x209   :  { %3986 = vmatpush.msra.mxu0 %v11621_v22  ;;  %4009 = vmatpush.msra.mxu1 %v11623_v63  ;;  %v1854_v22 = vadd.f32 %v15032_v48, %v10980_v57  ;;  %v15033_v63 = vld [vmem:[#allocation36_spill] sm:$0xff]  ;;  %v1851_v8 = vadd.f32 %v15038_v31, %v10989_v25 }
 0x20a   :  { %4032 = vmatpush.msra.mxu2 %v3112_v20  ;;  %4055 = vmatpush.msra.mxu3 %v3113_v58  ;;  %v1782_v20 = vadd.f32 %v15033_v63, %v10989_v25  ;;  %v15034_v58 = vld [vmem:[#allocation37_spill] sm:$0xff]  ;;  %v11757_v63 = vmax.f32 %v1831_v47, 0.0 }
 0x20b   :  { %3987 = vmatpush.msra.mxu0 %v11629_v7  ;;  %4010 = vmatpush.msra.mxu1 %v11631_v0  ;;  %v1805_v61 = vadd.f32 %v15034_v58, %v10989_v25  ;;  %v15037_v7 = vld [vmem:[#allocation38_spill] sm:$0xff]  ;;  %v11759_v58 = vmax.f32 %v1854_v22, 0.0 }
 0x20c   :  { %4033 = vmatpush.msra.mxu2 %v3019_v41  ;;  %4056 = vmatpush.msra.mxu3 %v3020_v3  ;;  %v1828_v0 = vadd.f32 %v15037_v7, %v10989_v25  ;;  %v3116_v41 = vmax.f32 %v1785_v26, 0.0  ;;  %v3117_v3 = vmax.f32 %v1808_v38, 0.0  ;;  %v3023_v7 = vmax.f32 %v1782_v20, 0.0  ;;  %v15042_v20 = vld [vmem:[#allocation48_spill] sm:$0xff] }
 0x20d   :  { %v11741_v59 = vpop.f32.mrf.mxu2  ;;  %v11743_v32 = vpop.f32.mrf.mxu3  ;;  %v3024_v31 = vmax.f32 %v1805_v61, 0.0  ;;  %v11767_v26 = vmax.f32 %v1851_v8, 0.0  ;;  %v1877_v61 = vadd.f32 %v15042_v20, %v10980_v57 }
 0x20e   :  { %15035 = vst [vmem:[#allocation40_spill] sm:$0xff] %v11741_v59  ;;  %v11749_v15 = vpop.f32.mrf.mxu0  ;;  %v11751_v48 = vpop.f32.mrf.mxu1  ;;  %v11765_v38 = vmax.f32 %v1828_v0, 0.0  ;;  %v15043_v0 = vld [vmem:[#allocation49_spill] sm:$0xff]  ;;  %v15044_v59 = vld [vmem:[#allocation50_spill] sm:$0xff] }
 0x20f   :  { %15036 = vst [vmem:[#allocation41_spill] sm:$0xff] %v11743_v32  ;;  %8541 = vmatmul.msk.f32.vlgmr.msrb.gmra.mxu0 %vm3183_vm2, %v11179_v52  ;;  %8543 = vmatmul.msk.f32.vlgmr.msrb.gmra.mxu1 %vm3183_vm2, %v11179_v52  ;;  %v1923_v32 = vadd.f32 %v15044_v59, %v10980_v57  ;;  %v15048_v59 = vld [vmem:[#allocation51_spill] sm:$0xff] }
 0x210   :  { %15039 = vst [vmem:[#allocation42_spill] sm:$0xff] %v11751_v48  ;;  %8545 = vmatmul.msk.f32.vlgmr.msrb.gmra.mxu2 %vm3183_vm2, %v11179_v52  ;;  %8547 = vmatmul.msk.f32.vlgmr.msrb.gmra.mxu3 %vm3183_vm2, %v11179_v52 }
 0x211   :  { %4074 = vmatpush.msrb.mxu0 %v3116_v41  ;;  %4097 = vmatpush.msrb.mxu1 %v3117_v3 }
 0x212   :  { %4120 = vmatpush.msrb.mxu2 %v11757_v63  ;;  %4143 = vmatpush.msrb.mxu3 %v11759_v58 }
 0x213   :  { %4075 = vmatpush.msrb.mxu0 %v3023_v7  ;;  %4098 = vmatpush.msrb.mxu1 %v3024_v31 }
 0x214   :  { %4121 = vmatpush.msrb.mxu2 %v11765_v38  ;;  %4144 = vmatpush.msrb.mxu3 %v11767_v26 }
 0x215   :  { %4076 = vmatpush.msrb.mxu0 %v11691_v11  ;;  %4099 = vmatpush.msrb.mxu1 %v3116_v41  ;;  %v11774_v52 = vpop.f32.mrf.mxu2  ;;  %v11776_v47 = vpop.f32.mrf.mxu3 }
 0x216   :  { %15040 = vst [vmem:[#allocation47_spill] sm:$0xff] %v11774_v52  ;;  %4122 = vmatpush.msrb.mxu2 %v3117_v3  ;;  %4145 = vmatpush.msrb.mxu3 %v11757_v63  ;;  %v1943_v52 = vadd.f32 %v15048_v59, %v10989_v25 }
 0x217   :  { %15041 = vst [vmem:[#allocation36_spill] sm:$0xff] %v11776_v47  ;;  %4077 = vmatpush.msrb.mxu0 %v11699_v53  ;;  %4100 = vmatpush.msrb.mxu1 %v3023_v7  ;;  %v1900_v47 = vadd.f32 %v15043_v0, %v10980_v57 }
 0x218   :  { %4123 = vmatpush.msrb.mxu2 %v3024_v31  ;;  %4146 = vmatpush.msrb.mxu3 %v11765_v38  ;;  %v11781_v8 = vpop.f32.mrf.mxu0  ;;  %v11783_v22 = vpop.f32.mrf.mxu1 }
 0x219   :  { %8542 = vmatmul.msk.f32.gmra.mxu0 %vm3183_vm2, %v11219_v40  ;;  %8544 = vmatmul.msk.f32.gmra.mxu1 %vm3183_vm2, %v11219_v40 }
 0x21a   :  { %8546 = vmatmul.msk.f32.gmra.mxu2 %vm3183_vm2, %v11219_v40  ;;  %8548 = vmatmul.msk.f32.gmra.mxu3 %vm3183_vm2, %v11219_v40  ;;  %v1946_v40 = vadd.f32 %v10949_v56, %v10980_v57 }
 0x21b   :  { %4078 = vmatpush.msrb.mxu0 %v11689_v9  ;;  %4101 = vmatpush.msrb.mxu1 %v11691_v11  ;;  %v15045_v9 = vld [vmem:[#allocation44_spill] sm:$0xff] }
 0x21c   :  { %4124 = vmatpush.msrb.mxu2 %v3116_v41  ;;  %4147 = vmatpush.msrb.mxu3 %v3117_v3  ;;  %v1874_v11 = vadd.f32 %v15045_v9, %v10989_v25  ;;  %v15046_v41 = vld [vmem:[#allocation45_spill] sm:$0xff]  ;;  %v11824_v9 = vld [vmem:[%s14880_s3] sm:$0xff] }
 0x21d   :  { %4079 = vmatpush.msrb.mxu0 %v11697_v24  ;;  %4102 = vmatpush.msrb.mxu1 %v11699_v53  ;;  %v1897_v3 = vadd.f32 %v15046_v41, %v10989_v25  ;;  %v15047_v24 = vld [vmem:[#allocation46_spill] sm:$0xff]  ;;  %v11830_v41 = vmax.f32 %v1923_v32, 0.0 }
 0x21e   :  { %4125 = vmatpush.msrb.mxu2 %v3023_v7  ;;  %4148 = vmatpush.msrb.mxu3 %v3024_v31  ;;  %v1920_v53 = vadd.f32 %v15047_v24, %v10989_v25  ;;  %v3120_v7 = vmax.f32 %v1877_v61, 0.0  ;;  %v3121_v31 = vmax.f32 %v1900_v47, 0.0  ;;  %v11832_v24 = vmax.f32 %v1946_v40, 0.0 }
 0x21f   :  { %v11809_v20 = vpop.f32.mrf.mxu2  ;;  %v11811_v0 = vpop.f32.mrf.mxu3  ;;  %v3027_v47 = vmax.f32 %v1874_v11, 0.0  ;;  %v3028_v61 = vmax.f32 %v1897_v3, 0.0  ;;  %v11861_v3 = vld [vmem:[%s14880_s3 + $0x8] sm:$0xff] }
 0x220   :  { %v11817_v48 = vpop.f32.mrf.mxu0  ;;  %v11819_v56 = vpop.f32.mrf.mxu1  ;;  %v11838_v59 = vmax.f32 %v1920_v53, 0.0  ;;  %v15055_v53 = vld [vmem:[#allocation55_spill] sm:$0xff] }
 0x221   :  { %15049 = vst [vmem:[#allocation37_spill] sm:$0xff] %v11817_v48  ;;  %8549 = vmatmul.msk.f32.vlgmr.msra.gmra.mxu0 %vm3183_vm2, %v11824_v9  ;;  %8551 = vmatmul.msk.f32.vlgmr.msra.gmra.mxu1 %vm3183_vm2, %v11824_v9  ;;  %v2015_v48 = vadd.f32 %v10997_v46, %v10980_v57  ;;  %v2035_v46 = vadd.f32 %v10999_v42, %v10989_v25 }
 0x222   :  { %15050 = vst [vmem:[#allocation38_spill] sm:$0xff] %v11819_v56  ;;  %8553 = vmatmul.msk.f32.vlgmr.msra.gmra.mxu2 %vm3183_vm2, %v11824_v9  ;;  %8555 = vmatmul.msk.f32.vlgmr.msra.gmra.mxu3 %vm3183_vm2, %v11824_v9  ;;  %v11840_v56 = vmax.f32 %v1943_v52, 0.0 }
 0x223   :  { %4166 = vmatpush.msra.mxu0 %v3120_v7  ;;  %4189 = vmatpush.msra.mxu1 %v3121_v31 }
 0x224   :  { %4212 = vmatpush.msra.mxu2 %v11830_v41  ;;  %4235 = vmatpush.msra.mxu3 %v11832_v24 }
 0x225   :  { %4167 = vmatpush.msra.mxu0 %v3027_v47  ;;  %4190 = vmatpush.msra.mxu1 %v3028_v61 }
 0x226   :  { %4213 = vmatpush.msra.mxu2 %v11838_v59  ;;  %4236 = vmatpush.msra.mxu3 %v11840_v56 }
 0x227   :  { %4168 = vmatpush.msra.mxu0 %v11759_v58  ;;  %4191 = vmatpush.msra.mxu1 %v3120_v7  ;;  %v11847_v32 = vpop.f32.mrf.mxu2  ;;  %v11849_v40 = vpop.f32.mrf.mxu3 }
 0x228   :  { %15051 = vst [vmem:[#allocation43_spill] sm:$0xff] %v11847_v32  ;;  %4214 = vmatpush.msra.mxu2 %v3121_v31  ;;  %4237 = vmatpush.msra.mxu3 %v11830_v41  ;;  %v1992_v32 = vadd.f32 %v10995_v43, %v10980_v57 }
 0x229   :  { %15052 = vst [vmem:[#allocation48_spill] sm:$0xff] %v11849_v40  ;;  %4169 = vmatpush.msra.mxu0 %v11767_v26  ;;  %4192 = vmatpush.msra.mxu1 %v3027_v47  ;;  %v1969_v40 = vadd.f32 %v15055_v53, %v10980_v57 }
 0x22a   :  { %4215 = vmatpush.msra.mxu2 %v3028_v61  ;;  %4238 = vmatpush.msra.mxu3 %v11838_v59  ;;  %v11854_v52 = vpop.f32.mrf.mxu0  ;;  %v11856_v11 = vpop.f32.mrf.mxu1 }
 0x22b   :  { %15053 = vst [vmem:[#allocation49_spill] sm:$0xff] %v11854_v52  ;;  %8550 = vmatmul.msk.f32.gmra.mxu0 %vm3183_vm2, %v11861_v3  ;;  %8552 = vmatmul.msk.f32.gmra.mxu1 %vm3183_vm2, %v11861_v3 }
 0x22c   :  { %15054 = vst [vmem:[#allocation50_spill] sm:$0xff] %v11856_v11  ;;  %8554 = vmatmul.msk.f32.gmra.mxu2 %vm3183_vm2, %v11861_v3  ;;  %8556 = vmatmul.msk.f32.gmra.mxu3 %vm3183_vm2, %v11861_v3 }
 0x22d   :  { %4170 = vmatpush.msra.mxu0 %v11757_v63  ;;  %4193 = vmatpush.msra.mxu1 %v11759_v58  ;;  %v2038_v63 = vadd.f32 %v11057_v1, %v10980_v57  ;;  %v15056_v58 = vld [vmem:[#allocation52_spill] sm:$0xff] }
 0x22e   :  { %4216 = vmatpush.msra.mxu2 %v3120_v7  ;;  %4239 = vmatpush.msra.mxu3 %v3121_v31  ;;  %v1966_v7 = vadd.f32 %v15056_v58, %v10989_v25  ;;  %v15057_v31 = vld [vmem:[#allocation53_spill] sm:$0xff]  ;;  %v11903_v58 = vmax.f32 %v2015_v48, 0.0 }
 0x22f   :  { %4171 = vmatpush.msra.mxu0 %v11765_v38  ;;  %4194 = vmatpush.msra.mxu1 %v11767_v26  ;;  %v1989_v53 = vadd.f32 %v15057_v31, %v10989_v25  ;;  %v15058_v38 = vld [vmem:[#allocation54_spill] sm:$0xff]  ;;  %v11905_v31 = vmax.f32 %v2038_v63, 0.0 }
 0x230   :  { %4217 = vmatpush.msra.mxu2 %v3027_v47  ;;  %4240 = vmatpush.msra.mxu3 %v3028_v61  ;;  %v2012_v26 = vadd.f32 %v15058_v38, %v10989_v25  ;;  %v3124_v47 = vmax.f32 %v1969_v40, 0.0  ;;  %v3125_v61 = vmax.f32 %v1992_v32, 0.0  ;;  %v3031_v42 = vmax.f32 %v1966_v7, 0.0 }
 0x231   :  { %v11887_v11 = vpop.f32.mrf.mxu2  ;;  %v11889_v43 = vpop.f32.mrf.mxu3  ;;  %v3032_v38 = vmax.f32 %v1989_v53, 0.0  ;;  %v11913_v40 = vmax.f32 %v2035_v46, 0.0  ;;  %v2084_v46 = vadd.f32 %v11085_v39, %v10980_v57 }
 0x232   :  { %v11895_v52 = vpop.f32.mrf.mxu0  ;;  %v11897_v1 = vpop.f32.mrf.mxu1  ;;  %v11911_v32 = vmax.f32 %v2012_v26, 0.0  ;;  %v2061_v26 = vadd.f32 %v11059_v36, %v10980_v57  ;;  %v15065_v36 = vld [vmem:[#allocation57_spill] sm:$0xff] }
 0x233   :  { %15059 = vst [vmem:[#allocation44_spill] sm:$0xff] %v11895_v52  ;;  %8557 = vmatmul.msk.f32.vlgmr.msrb.gmra.mxu0 %vm3183_vm2, %v11824_v9  ;;  %8559 = vmatmul.msk.f32.vlgmr.msrb.gmra.mxu1 %vm3183_vm2, %v11824_v9 }
 0x234   :  { %15060 = vst [vmem:[#allocation45_spill] sm:$0xff] %v11897_v1  ;;  %8561 = vmatmul.msk.f32.vlgmr.msrb.gmra.mxu2 %vm3183_vm2, %v11824_v9  ;;  %8563 = vmatmul.msk.f32.vlgmr.msrb.gmra.mxu3 %vm3183_vm2, %v11824_v9 }
 0x235   :  { %4258 = vmatpush.msrb.mxu0 %v3124_v47  ;;  %4281 = vmatpush.msrb.mxu1 %v3125_v61 }
 0x236   :  { %4304 = vmatpush.msrb.mxu2 %v11903_v58  ;;  %4327 = vmatpush.msrb.mxu3 %v11905_v31 }
 0x237   :  { %4259 = vmatpush.msrb.mxu0 %v3031_v42  ;;  %4282 = vmatpush.msrb.mxu1 %v3032_v38 }
 0x238   :  { %4305 = vmatpush.msrb.mxu2 %v11911_v32  ;;  %4328 = vmatpush.msrb.mxu3 %v11913_v40 }
 0x239   :  { %4260 = vmatpush.msrb.mxu0 %v11832_v24  ;;  %4283 = vmatpush.msrb.mxu1 %v3124_v47  ;;  %v11920_v48 = vpop.f32.mrf.mxu2  ;;  %v11922_v63 = vpop.f32.mrf.mxu3 }
 0x23a   :  { %15061 = vst [vmem:[#allocation46_spill] sm:$0xff] %v11920_v48  ;;  %4306 = vmatpush.msrb.mxu2 %v3125_v61  ;;  %4329 = vmatpush.msrb.mxu3 %v11903_v58 }
 0x23b   :  { %15062 = vst [vmem:[#allocation51_spill] sm:$0xff] %v11922_v63  ;;  %4261 = vmatpush.msrb.mxu0 %v11840_v56  ;;  %4284 = vmatpush.msrb.mxu1 %v3031_v42  ;;  %v15063_v63 = vld [vmem:[#allocation59_spill] sm:$0xff] }
 0x23c   :  { %4307 = vmatpush.msrb.mxu2 %v3032_v38  ;;  %4330 = vmatpush.msrb.mxu3 %v11911_v32  ;;  %v11927_v7 = vpop.f32.mrf.mxu0  ;;  %v11929_v53 = vpop.f32.mrf.mxu1  ;;  %v2107_v48 = vadd.f32 %v15063_v63, %v10980_v57  ;;  %v2127_v63 = vadd.f32 %v11093_v16, %v10989_v25 }
 0x23d   :  { %8558 = vmatmul.msk.f32.gmra.mxu0 %vm3183_vm2, %v11861_v3  ;;  %8560 = vmatmul.msk.f32.gmra.mxu1 %vm3183_vm2, %v11861_v3 }
 0x23e   :  { %8562 = vmatmul.msk.f32.gmra.mxu2 %vm3183_vm2, %v11861_v3  ;;  %8564 = vmatmul.msk.f32.gmra.mxu3 %vm3183_vm2, %v11861_v3 }
 0x23f   :  { %4262 = vmatpush.msrb.mxu0 %v11830_v41  ;;  %4285 = vmatpush.msrb.mxu1 %v11832_v24  ;;  %v2130_v41 = vadd.f32 %v11131_v19, %v10980_v57  ;;  %v15064_v24 = vld [vmem:[#allocation56_spill] sm:$0xff] }
 0x240   :  { %4308 = vmatpush.msrb.mxu2 %v3124_v47  ;;  %4331 = vmatpush.msrb.mxu3 %v3125_v61  ;;  %v2058_v47 = vadd.f32 %v15064_v24, %v10989_v25  ;;  %v2081_v61 = vadd.f32 %v15065_v36, %v10989_v25  ;;  %v11971_v24 = vmax.f32 %v2107_v48, 0.0 }
 0x241   :  { %4263 = vmatpush.msrb.mxu0 %v11838_v59  ;;  %4286 = vmatpush.msrb.mxu1 %v11840_v56  ;;  %v15066_v56 = vld [vmem:[#allocation58_spill] sm:$0xff]  ;;  %v11973_v36 = vmax.f32 %v2130_v41, 0.0 }
 0x242   :  { %4309 = vmatpush.msrb.mxu2 %v3031_v42  ;;  %4332 = vmatpush.msrb.mxu3 %v3032_v38  ;;  %v2104_v59 = vadd.f32 %v15066_v56, %v10989_v25  ;;  %v3128_v42 = vmax.f32 %v2061_v26, 0.0  ;;  %v3129_v38 = vmax.f32 %v2084_v46, 0.0  ;;  %v3035_v16 = vmax.f32 %v2058_v47, 0.0 }
 0x243   :  { %v11955_v1 = vpop.f32.mrf.mxu2  ;;  %v11957_v39 = vpop.f32.mrf.mxu3  ;;  %v3036_v56 = vmax.f32 %v2081_v61, 0.0  ;;  %v11981_v46 = vmax.f32 %v2127_v63, 0.0  ;;  %v2176_v63 = vadd.f32 %v11149_v49, %v10980_v57 }
 0x244   :  { %v11963_v52 = vpop.f32.mrf.mxu0  ;;  %v11965_v19 = vpop.f32.mrf.mxu1  ;;  %v11979_v26 = vmax.f32 %v2104_v59, 0.0  ;;  %v2153_v59 = vadd.f32 %v11133_v21, %v10980_v57  ;;  %v2173_v21 = vadd.f32 %v11127_v60, %v10989_v25 }
 0x245   :  { %8565 = vmatmul.msk.f32.vlgmr.msra.gmra.mxu0 %vm3183_vm2, %v11824_v9  ;;  %8567 = vmatmul.msk.f32.vlgmr.msra.gmra.mxu1 %vm3183_vm2, %v11824_v9 }
 0x246   :  { %8569 = vmatmul.msk.f32.vlgmr.msra.gmra.mxu2 %vm3183_vm2, %v11824_v9  ;;  %8571 = vmatmul.msk.f32.vlgmr.msra.gmra.mxu3 %vm3183_vm2, %v11824_v9 }
 0x247   :  { %4350 = vmatpush.msra.mxu0 %v3128_v42  ;;  %4373 = vmatpush.msra.mxu1 %v3129_v38 }
 0x248   :  { %4396 = vmatpush.msra.mxu2 %v11971_v24  ;;  %4419 = vmatpush.msra.mxu3 %v11973_v36 }
 0x249   :  { %4351 = vmatpush.msra.mxu0 %v3035_v16  ;;  %4374 = vmatpush.msra.mxu1 %v3036_v56 }
 0x24a   :  { %4397 = vmatpush.msra.mxu2 %v11979_v26  ;;  %4420 = vmatpush.msra.mxu3 %v11981_v46 }
 0x24b   :  { %4352 = vmatpush.msra.mxu0 %v11905_v31  ;;  %4375 = vmatpush.msra.mxu1 %v3128_v42  ;;  %v11988_v48 = vpop.f32.mrf.mxu2  ;;  %v11990_v41 = vpop.f32.mrf.mxu3 }
 0x24c   :  { %15067 = vst [vmem:[#allocation55_spill] sm:$0xff] %v11990_v41  ;;  %4398 = vmatpush.msra.mxu2 %v3129_v38  ;;  %4421 = vmatpush.msra.mxu3 %v11971_v24  ;;  %v2199_v41 = vadd.f32 %v11151_v34, %v10980_v57  ;;  %v2219_v34 = vadd.f32 %v11155_v2, %v10989_v25 }
 0x24d   :  { %4353 = vmatpush.msra.mxu0 %v11913_v40  ;;  %4376 = vmatpush.msra.mxu1 %v3035_v16 }
 0x24e   :  { %4399 = vmatpush.msra.mxu2 %v3036_v56  ;;  %4422 = vmatpush.msra.mxu3 %v11979_v26  ;;  %v11995_v47 = vpop.f32.mrf.mxu0  ;;  %v11997_v61 = vpop.f32.mrf.mxu1 }
 0x24f   :  { %8566 = vmatmul.msk.f32.gmra.mxu0 %vm3183_vm2, %v11861_v3  ;;  %8568 = vmatmul.msk.f32.gmra.mxu1 %vm3183_vm2, %v11861_v3 }
 0x250   :  { %8570 = vmatmul.msk.f32.gmra.mxu2 %vm3183_vm2, %v11861_v3  ;;  %8572 = vmatmul.msk.f32.gmra.mxu3 %vm3183_vm2, %v11861_v3 }
 0x251   :  { %4354 = vmatpush.msra.mxu0 %v11903_v58  ;;  %4377 = vmatpush.msra.mxu1 %v11905_v31  ;;  %v2222_v58 = vadd.f32 %v11201_v62, %v10980_v57  ;;  %v2150_v31 = vadd.f32 %v11095_v17, %v10989_v25  ;;  %v12039_v17 = vmax.f32 %v2199_v41, 0.0 }
 0x252   :  { %4400 = vmatpush.msra.mxu2 %v3128_v42  ;;  %4423 = vmatpush.msra.mxu3 %v3129_v38 }
 0x253   :  { %4355 = vmatpush.msra.mxu0 %v11911_v32  ;;  %4378 = vmatpush.msra.mxu1 %v11913_v40  ;;  %v15068_v32 = vld [vmem:[#allocation60_spill] sm:$0xff]  ;;  %v12041_v60 = vmax.f32 %v2222_v58, 0.0  ;;  %v3039_v2 = vmax.f32 %v2150_v31, 0.0 }
 0x254   :  { %4401 = vmatpush.msra.mxu2 %v3035_v16  ;;  %4424 = vmatpush.msra.mxu3 %v3036_v56  ;;  %v2196_v40 = vadd.f32 %v15068_v32, %v10989_v25  ;;  %v3132_v16 = vmax.f32 %v2153_v59, 0.0  ;;  %v3133_v56 = vmax.f32 %v2176_v63, 0.0  ;;  %v3040_v32 = vmax.f32 %v2173_v21, 0.0 }
 0x255   :  { %v12023_v42 = vpop.f32.mrf.mxu2  ;;  %v12025_v49 = vpop.f32.mrf.mxu3  ;;  %v12049_v63 = vmax.f32 %v2219_v34, 0.0  ;;  %v2268_v34 = vadd.f32 %v11222_v45, %v10980_v57 }
 0x256   :  { %v12031_v38 = vpop.f32.mrf.mxu0  ;;  %v12033_v62 = vpop.f32.mrf.mxu1  ;;  %v12047_v59 = vmax.f32 %v2196_v40, 0.0  ;;  %v2245_v40 = vadd.f32 %v11203_v18, %v10980_v57  ;;  %v2265_v18 = vadd.f32 %v11197_v30, %v10989_v25 }
 0x257   :  { %8573 = vmatmul.msk.f32.vlgmr.msrb.gmra.mxu0 %vm3183_vm2, %v11824_v9  ;;  %8575 = vmatmul.msk.f32.vlgmr.msrb.gmra.mxu1 %vm3183_vm2, %v11824_v9 }
 0x258   :  { %8577 = vmatmul.msk.f32.vlgmr.msrb.gmra.mxu2 %vm3183_vm2, %v11824_v9  ;;  %8579 = vmatmul.msk.f32.vlgmr.msrb.gmra.mxu3 %vm3183_vm2, %v11824_v9 }
 0x259   :  { %4442 = vmatpush.msrb.mxu0 %v3132_v16  ;;  %4465 = vmatpush.msrb.mxu1 %v3133_v56 }
 0x25a   :  { %4488 = vmatpush.msrb.mxu2 %v12039_v17  ;;  %4511 = vmatpush.msrb.mxu3 %v12041_v60 }
 0x25b   :  { %4443 = vmatpush.msrb.mxu0 %v3039_v2  ;;  %4466 = vmatpush.msrb.mxu1 %v3040_v32 }
 0x25c   :  { %4489 = vmatpush.msrb.mxu2 %v12047_v59  ;;  %4512 = vmatpush.msrb.mxu3 %v12049_v63 }
 0x25d   :  { %4444 = vmatpush.msrb.mxu0 %v11973_v36  ;;  %4467 = vmatpush.msrb.mxu1 %v3132_v16  ;;  %v12056_v41 = vpop.f32.mrf.mxu2  ;;  %v12058_v58 = vpop.f32.mrf.mxu3 }
 0x25e   :  { %15069 = vst [vmem:[#allocation52_spill] sm:$0xff] %v12058_v58  ;;  %4490 = vmatpush.msrb.mxu2 %v3133_v56  ;;  %4513 = vmatpush.msrb.mxu3 %v12039_v17  ;;  %v2291_v58 = vadd.f32 %v11224_v5, %v10980_v57  ;;  %v2311_v5 = vadd.f32 %v11230_v23, %v10989_v25  ;;  %v3044_v23 = vmax.f32 %v2265_v18, 0.0  ;;  %v7760_v18 = vld [vmem:[%s14878_s8 + $0x10] sm:$0xff] }
 0x25f   :  { %4445 = vmatpush.msrb.mxu0 %v11981_v46  ;;  %4468 = vmatpush.msrb.mxu1 %v3039_v2 }
 0x260   :  { %4491 = vmatpush.msrb.mxu2 %v3040_v32  ;;  %4514 = vmatpush.msrb.mxu3 %v12047_v59  ;;  %v12063_v31 = vpop.f32.mrf.mxu0  ;;  %v12065_v21 = vpop.f32.mrf.mxu1 }
 0x261   :  { %8574 = vmatmul.msk.f32.gmra.mxu0 %vm3183_vm2, %v11861_v3  ;;  %8576 = vmatmul.msk.f32.gmra.mxu1 %vm3183_vm2, %v11861_v3 }
 0x262   :  { %8578 = vmatmul.msk.f32.gmra.mxu2 %vm3183_vm2, %v11861_v3  ;;  %8580 = vmatmul.msk.f32.gmra.mxu3 %vm3183_vm2, %v11861_v3 }
 0x263   :  { %4446 = vmatpush.msrb.mxu0 %v11971_v24  ;;  %4469 = vmatpush.msrb.mxu1 %v11973_v36  ;;  %v2314_v24 = vadd.f32 %v11269_v55, %v10980_v57  ;;  %v2242_v36 = vadd.f32 %v11157_v35, %v10989_v25  ;;  %v12107_v35 = vmax.f32 %v2291_v58, 0.0 }
 0x264   :  { %4492 = vmatpush.msrb.mxu2 %v3132_v16  ;;  %4515 = vmatpush.msrb.mxu3 %v3133_v56  ;;  %v3136_v56 = vmax.f32 %v2245_v40, 0.0  ;;  %v12117_v40 = vmax.f32 %v2311_v5, 0.0  ;;  %v2360_v5 = vadd.f32 %v11291_v10, %v10980_v57 }
 0x265   :  { %4447 = vmatpush.msrb.mxu0 %v11979_v26  ;;  %4470 = vmatpush.msrb.mxu1 %v11981_v46  ;;  %v2288_v26 = vadd.f32 %v11199_v54, %v10989_v25  ;;  %v12109_v30 = vmax.f32 %v2314_v24, 0.0  ;;  %v3043_v54 = vmax.f32 %v2242_v36, 0.0 }
 0x266   :  { %4493 = vmatpush.msrb.mxu2 %v3039_v2  ;;  %4516 = vmatpush.msrb.mxu3 %v3040_v32  ;;  %v3137_v2 = vmax.f32 %v2268_v34, 0.0 }
 0x267   :  { %v12091_v16 = vpop.f32.mrf.mxu2  ;;  %v12093_v45 = vpop.f32.mrf.mxu3  ;;  %v12115_v32 = vmax.f32 %v2288_v26, 0.0  ;;  %v2337_v26 = vadd.f32 %v11271_v6, %v10980_v57  ;;  %v2357_v6 = vadd.f32 %v11261_v33, %v10989_v25  ;;  %7774 = vperm.xlu1 %8849, %v7760_v18  }
 0x268   :  { %v12099_v46 = vpop.f32.mrf.mxu0  ;;  %v12101_v55 = vpop.f32.mrf.mxu1 }
 0x269   :  { %8581 = vmatmul.msk.f32.vlgmr.msra.gmra.mxu0 %vm3183_vm2, %v11824_v9  ;;  %8583 = vmatmul.msk.f32.vlgmr.msra.gmra.mxu1 %vm3183_vm2, %v11824_v9 }
 0x26a   :  { %8585 = vmatmul.msk.f32.vlgmr.msra.gmra.mxu2 %vm3183_vm2, %v11824_v9  ;;  %8587 = vmatmul.msk.f32.vlgmr.msra.gmra.mxu3 %vm3183_vm2, %v11824_v9 }
 0x26b   :  { %4534 = vmatpush.msra.mxu0 %v3136_v56  ;;  %4557 = vmatpush.msra.mxu1 %v3137_v2 }
 0x26c   :  { %4580 = vmatpush.msra.mxu2 %v12107_v35  ;;  %4603 = vmatpush.msra.mxu3 %v12109_v30 }
 0x26d   :  { %4535 = vmatpush.msra.mxu0 %v3043_v54  ;;  %4558 = vmatpush.msra.mxu1 %v3044_v23 }
 0x26e   :  { %4581 = vmatpush.msra.mxu2 %v12115_v32  ;;  %4604 = vmatpush.msra.mxu3 %v12117_v40 }
 0x26f   :  { %4536 = vmatpush.msra.mxu0 %v12041_v60  ;;  %4559 = vmatpush.msra.mxu1 %v3136_v56  ;;  %v12124_v58 = vpop.f32.mrf.mxu2  ;;  %v12126_v34 = vpop.f32.mrf.mxu3 }
 0x270   :  { %4582 = vmatpush.msra.mxu2 %v3137_v2  ;;  %4605 = vmatpush.msra.mxu3 %v12107_v35 }
 0x271   :  { %4537 = vmatpush.msra.mxu0 %v12049_v63  ;;  %4560 = vmatpush.msra.mxu1 %v3043_v54 }
 0x272   :  { %4583 = vmatpush.msra.mxu2 %v3044_v23  ;;  %4606 = vmatpush.msra.mxu3 %v12115_v32  ;;  %v12131_v24 = vpop.f32.mrf.mxu0  ;;  %v12133_v36 = vpop.f32.mrf.mxu1 }
 0x273   :  { %8582 = vmatmul.msk.f32.gmra.mxu0 %vm3183_vm2, %v11861_v3  ;;  %8584 = vmatmul.msk.f32.gmra.mxu1 %vm3183_vm2, %v11861_v3 }
 0x274   :  { %8586 = vmatmul.msk.f32.gmra.mxu2 %vm3183_vm2, %v11861_v3  ;;  %8588 = vmatmul.msk.f32.gmra.mxu3 %vm3183_vm2, %v11861_v3 }
 0x275   :  { %4538 = vmatpush.msra.mxu0 %v12039_v17  ;;  %4561 = vmatpush.msra.mxu1 %v12041_v60  ;;  %v2383_v17 = vadd.f32 %v11293_v12, %v10980_v57  ;;  %v2406_v60 = vadd.f32 %v11329_v4, %v10980_v57  ;;  %v2403_v12 = vadd.f32 %v11296_v51, %v10989_v25  ;;  %v3048_v51 = vmax.f32 %v2357_v6, 0.0  ;;  %v8149_v6 = vld [vmem:[%s14881_s10] sm:$0xff] }
 0x276   :  { %4584 = vmatpush.msra.mxu2 %v3136_v56  ;;  %4607 = vmatpush.msra.mxu3 %v3137_v2  ;;  %v2334_v56 = vadd.f32 %v11232_v37, %v10989_v25  ;;  %v3141_v37 = vmax.f32 %v2360_v5, 0.0 }
 0x277   :  { %4539 = vmatpush.msra.mxu0 %v12047_v59  ;;  %4562 = vmatpush.msra.mxu1 %v12049_v63  ;;  %v2380_v59 = vadd.f32 %v11263_v28, %v10989_v25  ;;  %v12178_v33 = vmax.f32 %v2383_v17, 0.0 }
 0x278   :  { %4585 = vmatpush.msra.mxu2 %v3043_v54  ;;  %4608 = vmatpush.msra.mxu3 %v3044_v23  ;;  %v3140_v54 = vmax.f32 %v2337_v26, 0.0  ;;  %v12180_v23 = vmax.f32 %v2406_v60, 0.0  ;;  %v3047_v28 = vmax.f32 %v2334_v56, 0.0  ;;  %v12188_v26 = vmax.f32 %v2403_v12, 0.0 }
 0x279   :  { %v12162_v2 = vpop.f32.mrf.mxu2  ;;  %v12164_v10 = vpop.f32.mrf.mxu3  ;;  %v12186_v18 = vmax.f32 %v2380_v59, 0.0  ;;  %v2429_v59 = vadd.f32 %v11331_v50, %v10980_v57  ;;  %v2452_v12 = vadd.f32 %v11357_v27, %v10980_v57  ;;  %v2449_v50 = vadd.f32 %v11321_v29, %v10989_v25  ;;  %8153 = vperm.xlu1 %8849, %v8149_v6  }
 0x27a   :  { %v12170_v4 = vpop.f32.mrf.mxu0  ;;  %v12172_v63 = vpop.f32.mrf.mxu1 }
 0x27b   :  { %8589 = vmatmul.msk.f32.vlgmr.msrb.gmra.mxu0 %vm3183_vm2, %v11824_v9  ;;  %8591 = vmatmul.msk.f32.vlgmr.msrb.gmra.mxu1 %vm3183_vm2, %v11824_v9 }
 0x27c   :  { %8593 = vmatmul.msk.f32.vlgmr.msrb.gmra.mxu2 %vm3183_vm2, %v11824_v9  ;;  %8595 = vmatmul.msk.f32.vlgmr.msrb.gmra.mxu3 %vm3183_vm2, %v11824_v9 }
 0x27d   :  { %4626 = vmatpush.msrb.mxu0 %v3140_v54  ;;  %4649 = vmatpush.msrb.mxu1 %v3141_v37 }
 0x27e   :  { %4672 = vmatpush.msrb.mxu2 %v12178_v33  ;;  %4695 = vmatpush.msrb.mxu3 %v12180_v23 }
 0x27f   :  { %4627 = vmatpush.msrb.mxu0 %v3047_v28  ;;  %4650 = vmatpush.msrb.mxu1 %v3048_v51 }
 0x280   :  { %4673 = vmatpush.msrb.mxu2 %v12186_v18  ;;  %4696 = vmatpush.msrb.mxu3 %v12188_v26 }
 0x281   :  { %4628 = vmatpush.msrb.mxu0 %v12109_v30  ;;  %4651 = vmatpush.msrb.mxu1 %v3140_v54  ;;  %v12195_v5 = vpop.f32.mrf.mxu2  ;;  %v12197_v17 = vpop.f32.mrf.mxu3 }
 0x282   :  { %15070 = vst [vmem:[#allocation53_spill] sm:$0xff] %v12195_v5  ;;  %4674 = vmatpush.msrb.mxu2 %v3141_v37  ;;  %4697 = vmatpush.msrb.mxu3 %v12178_v33 }
 0x283   :  { %15071 = vst [vmem:[#allocation54_spill] sm:$0xff] %v12197_v17  ;;  %4629 = vmatpush.msrb.mxu0 %v12117_v40  ;;  %4652 = vmatpush.msrb.mxu1 %v3047_v28 }
 0x284   :  { %4675 = vmatpush.msrb.mxu2 %v3048_v51  ;;  %4698 = vmatpush.msrb.mxu3 %v12186_v18  ;;  %v12202_v60 = vpop.f32.mrf.mxu0  ;;  %v12204_v56 = vpop.f32.mrf.mxu1 }
 0x285   :  { %8590 = vmatmul.msk.f32.gmra.mxu0 %vm3183_vm2, %v11861_v3  ;;  %8592 = vmatmul.msk.f32.gmra.mxu1 %vm3183_vm2, %v11861_v3 }
 0x286   :  { %8594 = vmatmul.msk.f32.gmra.mxu2 %vm3183_vm2, %v11861_v3  ;;  %8596 = vmatmul.msk.f32.gmra.mxu3 %vm3183_vm2, %v11861_v3 }
 0x287   :  { %4630 = vmatpush.msrb.mxu0 %v12107_v35  ;;  %4653 = vmatpush.msrb.mxu1 %v12109_v30  ;;  %v2475_v35 = vadd.f32 %v11359_v13, %v10980_v57  ;;  %v2498_v30 = vadd.f32 %v11389_v14, %v10980_v57  ;;  %v15074_v13 = vld [vmem:[#allocation62_spill] sm:$0xff] }
 0x288   :  { %4676 = vmatpush.msrb.mxu2 %v3140_v54  ;;  %4699 = vmatpush.msrb.mxu3 %v3141_v37  ;;  %v2426_v54 = vadd.f32 %v11298_v44, %v10989_v25  ;;  %v2495_v17 = vadd.f32 %v15074_v13, %v10989_v25  ;;  %v3145_v44 = vmax.f32 %v2452_v12, 0.0  ;;  %v3052_v13 = vmax.f32 %v2449_v50, 0.0  ;;  %v15081_v50 = vld [vmem:[#allocation66_spill] sm:$0xff] }
 0x289   :  { %4631 = vmatpush.msrb.mxu0 %v12115_v32  ;;  %4654 = vmatpush.msrb.mxu1 %v12117_v40  ;;  %v15073_v40 = vld [vmem:[#allocation61_spill] sm:$0xff]  ;;  %v12249_v29 = vmax.f32 %v2475_v35, 0.0  ;;  %v12251_v6 = vmax.f32 %v2498_v30, 0.0 }
 0x28a   :  { %4677 = vmatpush.msrb.mxu2 %v3047_v28  ;;  %4700 = vmatpush.msrb.mxu3 %v3048_v51  ;;  %v2472_v37 = vadd.f32 %v15073_v40, %v10989_v25  ;;  %v3144_v51 = vmax.f32 %v2429_v59, 0.0  ;;  %v3051_v40 = vmax.f32 %v2426_v54, 0.0  ;;  %v12259_v12 = vmax.f32 %v2495_v17, 0.0 }
 0x28b   :  { %v12233_v27 = vpop.f32.mrf.mxu2  ;;  %v12235_v32 = vpop.f32.mrf.mxu3 }
 0x28c   :  { %15072 = vst [vmem:[#allocation59_spill] sm:$0xff] %v12235_v32  ;;  %v12241_v14 = vpop.f32.mrf.mxu0  ;;  %v12243_v28 = vpop.f32.mrf.mxu1  ;;  %v12257_v59 = vmax.f32 %v2472_v37, 0.0  ;;  %v2521_v37 = vadd.f32 %v15081_v50, %v10980_v57 }
 0x28d   :  { %15075 = vst [vmem:[#allocation56_spill] sm:$0xff] %v12241_v14  ;;  %8597 = vmatmul.msk.f32.vlgmr.msra.gmra.mxu0 %vm3183_vm2, %v11824_v9  ;;  %8599 = vmatmul.msk.f32.vlgmr.msra.gmra.mxu1 %vm3183_vm2, %v11824_v9 }
 0x28e   :  { %15076 = vst [vmem:[#allocation57_spill] sm:$0xff] %v12243_v28  ;;  %8601 = vmatmul.msk.f32.vlgmr.msra.gmra.mxu2 %vm3183_vm2, %v11824_v9  ;;  %8603 = vmatmul.msk.f32.vlgmr.msra.gmra.mxu3 %vm3183_vm2, %v11824_v9  ;;  %v15083_v28 = vld [vmem:[#allocation3_spill] sm:$0xff] }
 0x28f   :  { %4718 = vmatpush.msra.mxu0 %v3144_v51  ;;  %4741 = vmatpush.msra.mxu1 %v3145_v44  ;;  %v2567_v14 = vadd.f32 %v15083_v28, %v10980_v57  ;;  %v15090_v28 = vld [vmem:[#allocation4_spill] sm:$0xff] }
 0x290   :  { %4764 = vmatpush.msra.mxu2 %v12249_v29  ;;  %4787 = vmatpush.msra.mxu3 %v12251_v6  ;;  %v2587_v32 = vadd.f32 %v15090_v28, %v10989_v25 }
 0x291   :  { %4719 = vmatpush.msra.mxu0 %v3051_v40  ;;  %4742 = vmatpush.msra.mxu1 %v3052_v13 }
 0x292   :  { %4765 = vmatpush.msra.mxu2 %v12257_v59  ;;  %4788 = vmatpush.msra.mxu3 %v12259_v12 }
 0x293   :  { %4720 = vmatpush.msra.mxu0 %v12180_v23  ;;  %4743 = vmatpush.msra.mxu1 %v3144_v51  ;;  %v12266_v35 = vpop.f32.mrf.mxu2  ;;  %v12268_v30 = vpop.f32.mrf.mxu3 }
 0x294   :  { %15077 = vst [vmem:[#allocation58_spill] sm:$0xff] %v12266_v35  ;;  %4766 = vmatpush.msra.mxu2 %v3145_v44  ;;  %4789 = vmatpush.msra.mxu3 %v12249_v29 }
 0x295   :  { %15078 = vst [vmem:[#allocation60_spill] sm:$0xff] %v12268_v30  ;;  %4721 = vmatpush.msra.mxu0 %v12188_v26  ;;  %4744 = vmatpush.msra.mxu1 %v3051_v40  ;;  %v15082_v30 = vld [vmem:[#allocation2_spill] sm:$0xff] }
 0x296   :  { %4767 = vmatpush.msra.mxu2 %v3052_v13  ;;  %4790 = vmatpush.msra.mxu3 %v12257_v59  ;;  %v12273_v17 = vpop.f32.mrf.mxu0  ;;  %v12275_v54 = vpop.f32.mrf.mxu1  ;;  %v2544_v35 = vadd.f32 %v15082_v30, %v10980_v57 }
 0x297   :  { %15079 = vst [vmem:[#allocation61_spill] sm:$0xff] %v12273_v17  ;;  %8598 = vmatmul.msk.f32.gmra.mxu0 %vm3183_vm2, %v11861_v3  ;;  %8600 = vmatmul.msk.f32.gmra.mxu1 %vm3183_vm2, %v11861_v3 }
 0x298   :  { %15080 = vst [vmem:[#allocation62_spill] sm:$0xff] %v12275_v54  ;;  %8602 = vmatmul.msk.f32.gmra.mxu2 %vm3183_vm2, %v11861_v3  ;;  %8604 = vmatmul.msk.f32.gmra.mxu3 %vm3183_vm2, %v11861_v3  ;;  %v15084_v54 = vld [vmem:[#allocation70_spill] sm:$0xff] }
 0x299   :  { %4722 = vmatpush.msra.mxu0 %v12178_v33  ;;  %4745 = vmatpush.msra.mxu1 %v12180_v23  ;;  %v2590_v33 = vadd.f32 %v15084_v54, %v10980_v57  ;;  %v15085_v23 = vld [vmem:[#allocation63_spill] sm:$0xff]  ;;  %v3149_v54 = vmax.f32 %v2544_v35, 0.0 }
 0x29a   :  { %4768 = vmatpush.msra.mxu2 %v3144_v51  ;;  %4791 = vmatpush.msra.mxu3 %v3145_v44  ;;  %v2518_v51 = vadd.f32 %v15085_v23, %v10989_v25  ;;  %v15086_v44 = vld [vmem:[#allocation64_spill] sm:$0xff]  ;;  %v12317_v23 = vmax.f32 %v2567_v14, 0.0 }
 0x29b   :  { %4723 = vmatpush.msra.mxu0 %v12186_v18  ;;  %4746 = vmatpush.msra.mxu1 %v12188_v26  ;;  %v2541_v50 = vadd.f32 %v15086_v44, %v10989_v25  ;;  %v15089_v18 = vld [vmem:[#allocation65_spill] sm:$0xff]  ;;  %v12319_v44 = vmax.f32 %v2590_v33, 0.0 }
 0x29c   :  { %4769 = vmatpush.msra.mxu2 %v3051_v40  ;;  %4792 = vmatpush.msra.mxu3 %v3052_v13  ;;  %v2564_v26 = vadd.f32 %v15089_v18, %v10989_v25  ;;  %v3148_v13 = vmax.f32 %v2521_v37, 0.0  ;;  %v3055_v18 = vmax.f32 %v2518_v51, 0.0  ;;  %v12327_v37 = vmax.f32 %v2587_v32, 0.0 }
 0x29d   :  { %v12301_v17 = vpop.f32.mrf.mxu2  ;;  %v12303_v30 = vpop.f32.mrf.mxu3  ;;  %v3056_v28 = vmax.f32 %v2541_v50, 0.0  ;;  %v15097_v50 = vld [vmem:[#allocation71_spill] sm:$0xff] }
 0x29e   :  { %15087 = vst [vmem:[#allocation66_spill] sm:$0xff] %v12301_v17  ;;  %v12309_v5 = vpop.f32.mrf.mxu0  ;;  %v12311_v40 = vpop.f32.mrf.mxu1  ;;  %v12325_v35 = vmax.f32 %v2564_v26, 0.0  ;;  %v2613_v26 = vadd.f32 %v15097_v50, %v10980_v57 }
 0x29f   :  { %15088 = vst [vmem:[#allocation2_spill] sm:$0xff] %v12303_v30  ;;  %8605 = vmatmul.msk.f32.vlgmr.msrb.gmra.mxu0 %vm3183_vm2, %v11824_v9  ;;  %8607 = vmatmul.msk.f32.vlgmr.msrb.gmra.mxu1 %vm3183_vm2, %v11824_v9 }
 0x2a0   :  { %15091 = vst [vmem:[#allocation3_spill] sm:$0xff] %v12309_v5  ;;  %8609 = vmatmul.msk.f32.vlgmr.msrb.gmra.mxu2 %vm3183_vm2, %v11824_v9  ;;  %8611 = vmatmul.msk.f32.vlgmr.msrb.gmra.mxu3 %vm3183_vm2, %v11824_v9 }
 0x2a1   :  { %15092 = vst [vmem:[#allocation70_spill] sm:$0xff] %v12311_v40  ;;  %4810 = vmatpush.msrb.mxu0 %v3148_v13  ;;  %4833 = vmatpush.msrb.mxu1 %v3149_v54  ;;  %v15099_v40 = vld [vmem:[#allocation9_spill] sm:$0xff] }
 0x2a2   :  { %4856 = vmatpush.msrb.mxu2 %v12317_v23  ;;  %4879 = vmatpush.msrb.mxu3 %v12319_v44  ;;  %v2659_v5 = vadd.f32 %v15099_v40, %v10980_v57  ;;  %v15106_v40 = vld [vmem:[#allocation10_spill] sm:$0xff] }
 0x2a3   :  { %4811 = vmatpush.msrb.mxu0 %v3055_v18  ;;  %4834 = vmatpush.msrb.mxu1 %v3056_v28  ;;  %v2679_v30 = vadd.f32 %v15106_v40, %v10989_v25 }
 0x2a4   :  { %4857 = vmatpush.msrb.mxu2 %v12325_v35  ;;  %4880 = vmatpush.msrb.mxu3 %v12327_v37 }
 0x2a5   :  { %4812 = vmatpush.msrb.mxu0 %v12251_v6  ;;  %4835 = vmatpush.msrb.mxu1 %v3148_v13  ;;  %v12334_v14 = vpop.f32.mrf.mxu2  ;;  %v12336_v33 = vpop.f32.mrf.mxu3 }
 0x2a6   :  { %15093 = vst [vmem:[#allocation63_spill] sm:$0xff] %v12334_v14  ;;  %4858 = vmatpush.msrb.mxu2 %v3149_v54  ;;  %4881 = vmatpush.msrb.mxu3 %v12317_v23 }
 0x2a7   :  { %15094 = vst [vmem:[#allocation64_spill] sm:$0xff] %v12336_v33  ;;  %4813 = vmatpush.msrb.mxu0 %v12259_v12  ;;  %4836 = vmatpush.msrb.mxu1 %v3055_v18  ;;  %v15098_v33 = vld [vmem:[#allocation8_spill] sm:$0xff] }
 0x2a8   :  { %4859 = vmatpush.msrb.mxu2 %v3056_v28  ;;  %4882 = vmatpush.msrb.mxu3 %v12325_v35  ;;  %v12341_v32 = vpop.f32.mrf.mxu0  ;;  %v12343_v51 = vpop.f32.mrf.mxu1  ;;  %v2636_v14 = vadd.f32 %v15098_v33, %v10980_v57 }
 0x2a9   :  { %15095 = vst [vmem:[#allocation65_spill] sm:$0xff] %v12341_v32  ;;  %8606 = vmatmul.msk.f32.gmra.mxu0 %vm3183_vm2, %v11861_v3  ;;  %8608 = vmatmul.msk.f32.gmra.mxu1 %vm3183_vm2, %v11861_v3 }
 0x2aa   :  { %15096 = vst [vmem:[#allocation4_spill] sm:$0xff] %v12343_v51  ;;  %8610 = vmatmul.msk.f32.gmra.mxu2 %vm3183_vm2, %v11861_v3  ;;  %8612 = vmatmul.msk.f32.gmra.mxu3 %vm3183_vm2, %v11861_v3  ;;  %v15100_v51 = vld [vmem:[#allocation7_spill] sm:$0xff] }
 0x2ab   :  { %4814 = vmatpush.msrb.mxu0 %v12249_v29  ;;  %4837 = vmatpush.msrb.mxu1 %v12251_v6  ;;  %v2682_v29 = vadd.f32 %v15100_v51, %v10980_v57  ;;  %v15101_v6 = vld [vmem:[#allocation67_spill] sm:$0xff]  ;;  %v3153_v51 = vmax.f32 %v2636_v14, 0.0 }
 0x2ac   :  { %4860 = vmatpush.msrb.mxu2 %v3148_v13  ;;  %4883 = vmatpush.msrb.mxu3 %v3149_v54  ;;  %v2610_v13 = vadd.f32 %v15101_v6, %v10989_v25  ;;  %v15102_v54 = vld [vmem:[#allocation68_spill] sm:$0xff]  ;;  %v12385_v6 = vmax.f32 %v2659_v5, 0.0 }
 0x2ad   :  { %4815 = vmatpush.msrb.mxu0 %v12257_v59  ;;  %4838 = vmatpush.msrb.mxu1 %v12259_v12  ;;  %v2633_v50 = vadd.f32 %v15102_v54, %v10989_v25  ;;  %v15105_v59 = vld [vmem:[#allocation69_spill] sm:$0xff]  ;;  %v12387_v54 = vmax.f32 %v2682_v29, 0.0 }
 0x2ae   :  { %4861 = vmatpush.msrb.mxu2 %v3055_v18  ;;  %4884 = vmatpush.msrb.mxu3 %v3056_v28  ;;  %v2656_v12 = vadd.f32 %v15105_v59, %v10989_v25  ;;  %v3152_v28 = vmax.f32 %v2613_v26, 0.0  ;;  %v3059_v59 = vmax.f32 %v2610_v13, 0.0  ;;  %v12395_v26 = vmax.f32 %v2679_v30, 0.0 }
 0x2af   :  { %v12369_v32 = vpop.f32.mrf.mxu2  ;;  %v12371_v33 = vpop.f32.mrf.mxu3  ;;  %v3060_v40 = vmax.f32 %v2633_v50, 0.0  ;;  %v15113_v50 = vld [vmem:[#allocation11_spill] sm:$0xff] }
 0x2b0   :  { %15103 = vst [vmem:[#allocation71_spill] sm:$0xff] %v12369_v32  ;;  %v12377_v17 = vpop.f32.mrf.mxu0  ;;  %v12379_v18 = vpop.f32.mrf.mxu1  ;;  %v12393_v14 = vmax.f32 %v2656_v12, 0.0  ;;  %v2705_v12 = vadd.f32 %v15113_v50, %v10980_v57 }
 0x2b1   :  { %15104 = vst [vmem:[#allocation8_spill] sm:$0xff] %v12371_v33  ;;  %8613 = vmatmul.msk.f32.vlgmr.msra.gmra.mxu0 %vm3183_vm2, %v11824_v9  ;;  %8615 = vmatmul.msk.f32.vlgmr.msra.gmra.mxu1 %vm3183_vm2, %v11824_v9 }
 0x2b2   :  { %15107 = vst [vmem:[#allocation9_spill] sm:$0xff] %v12377_v17  ;;  %8617 = vmatmul.msk.f32.vlgmr.msra.gmra.mxu2 %vm3183_vm2, %v11824_v9  ;;  %8619 = vmatmul.msk.f32.vlgmr.msra.gmra.mxu3 %vm3183_vm2, %v11824_v9 }
 0x2b3   :  { %15108 = vst [vmem:[#allocation7_spill] sm:$0xff] %v12379_v18  ;;  %4902 = vmatpush.msra.mxu0 %v3152_v28  ;;  %4925 = vmatpush.msra.mxu1 %v3153_v51  ;;  %v15115_v18 = vld [vmem:[#allocation17_spill] sm:$0xff] }
 0x2b4   :  { %4948 = vmatpush.msra.mxu2 %v12385_v6  ;;  %4971 = vmatpush.msra.mxu3 %v12387_v54  ;;  %v2751_v17 = vadd.f32 %v15115_v18, %v10980_v57  ;;  %v15122_v18 = vld [vmem:[#allocation18_spill] sm:$0xff] }
 0x2b5   :  { %4903 = vmatpush.msra.mxu0 %v3059_v59  ;;  %4926 = vmatpush.msra.mxu1 %v3060_v40  ;;  %v2771_v33 = vadd.f32 %v15122_v18, %v10989_v25  ;;  %v15129_v18 = vld [vmem:[#allocation19_spill] sm:$0xff] }
 0x2b6   :  { %4949 = vmatpush.msra.mxu2 %v12393_v14  ;;  %4972 = vmatpush.msra.mxu3 %v12395_v26 }
 0x2b7   :  { %4904 = vmatpush.msra.mxu0 %v12319_v44  ;;  %4927 = vmatpush.msra.mxu1 %v3152_v28  ;;  %v12402_v5 = vpop.f32.mrf.mxu2  ;;  %v12404_v29 = vpop.f32.mrf.mxu3 }
 0x2b8   :  { %15109 = vst [vmem:[#allocation67_spill] sm:$0xff] %v12402_v5  ;;  %4950 = vmatpush.msra.mxu2 %v3153_v51  ;;  %4973 = vmatpush.msra.mxu3 %v12385_v6 }
 0x2b9   :  { %15110 = vst [vmem:[#allocation68_spill] sm:$0xff] %v12404_v29  ;;  %4905 = vmatpush.msra.mxu0 %v12327_v37  ;;  %4928 = vmatpush.msra.mxu1 %v3059_v59  ;;  %v15114_v29 = vld [vmem:[#allocation16_spill] sm:$0xff] }
 0x2ba   :  { %4951 = vmatpush.msra.mxu2 %v3060_v40  ;;  %4974 = vmatpush.msra.mxu3 %v12393_v14  ;;  %v12409_v30 = vpop.f32.mrf.mxu0  ;;  %v12411_v13 = vpop.f32.mrf.mxu1  ;;  %v2728_v5 = vadd.f32 %v15114_v29, %v10980_v57 }
 0x2bb   :  { %15111 = vst [vmem:[#allocation69_spill] sm:$0xff] %v12409_v30  ;;  %8614 = vmatmul.msk.f32.gmra.mxu0 %vm3183_vm2, %v11861_v3  ;;  %8616 = vmatmul.msk.f32.gmra.mxu1 %vm3183_vm2, %v11861_v3 }
 0x2bc   :  { %15112 = vst [vmem:[#allocation10_spill] sm:$0xff] %v12411_v13  ;;  %8618 = vmatmul.msk.f32.gmra.mxu2 %vm3183_vm2, %v11861_v3  ;;  %8620 = vmatmul.msk.f32.gmra.mxu3 %vm3183_vm2, %v11861_v3  ;;  %v15116_v13 = vld [vmem:[#allocation14_spill] sm:$0xff] }
 0x2bd   :  { %4906 = vmatpush.msra.mxu0 %v12317_v23  ;;  %4929 = vmatpush.msra.mxu1 %v12319_v44  ;;  %v2774_v23 = vadd.f32 %v15116_v13, %v10980_v57  ;;  %v15117_v44 = vld [vmem:[#allocation15_spill] sm:$0xff]  ;;  %v3157_v13 = vmax.f32 %v2728_v5, 0.0 }
 0x2be   :  { %4952 = vmatpush.msra.mxu2 %v3152_v28  ;;  %4975 = vmatpush.msra.mxu3 %v3153_v51  ;;  %v2702_v28 = vadd.f32 %v15117_v44, %v10989_v25  ;;  %v15118_v51 = vld [vmem:[#allocation5_spill] sm:$0xff]  ;;  %v12453_v44 = vmax.f32 %v2751_v17, 0.0  ;;  %v12468_v17 = vmax.f32 %v2771_v33, 0.0 }
 0x2bf   :  { %4907 = vmatpush.msra.mxu0 %v12325_v35  ;;  %4930 = vmatpush.msra.mxu1 %v12327_v37  ;;  %v2725_v50 = vadd.f32 %v15118_v51, %v10989_v25  ;;  %v15121_v35 = vld [vmem:[#allocation6_spill] sm:$0xff]  ;;  %v12455_v51 = vmax.f32 %v2774_v23, 0.0 }
 0x2c0   :  { %4953 = vmatpush.msra.mxu2 %v3059_v59  ;;  %4976 = vmatpush.msra.mxu3 %v3060_v40  ;;  %v2748_v37 = vadd.f32 %v15121_v35, %v10989_v25  ;;  %v3156_v40 = vmax.f32 %v2705_v12, 0.0  ;;  %v12460_v35 = vld [vmem:[%s14880_s3] sm:$0xff]  ;;  %v3063_v5 = vmax.f32 %v2702_v28, 0.0 }
 0x2c1   :  { %v12437_v30 = vpop.f32.mrf.mxu2  ;;  %v12439_v29 = vpop.f32.mrf.mxu3  ;;  %v3064_v12 = vmax.f32 %v2725_v50, 0.0 }
 0x2c2   :  { %15119 = vst [vmem:[#allocation11_spill] sm:$0xff] %v12437_v30  ;;  %v12445_v32 = vpop.f32.mrf.mxu0  ;;  %v12447_v59 = vpop.f32.mrf.mxu1 }
 0x2c3   :  { %15120 = vst [vmem:[#allocation16_spill] sm:$0xff] %v12439_v29  ;;  %8621 = vmatmul.msk.f32.vlgmr.msrb.gmra.mxu0 %vm3183_vm2, %v11824_v9  ;;  %8623 = vmatmul.msk.f32.vlgmr.msrb.gmra.mxu1 %vm3183_vm2, %v11824_v9  ;;  %v12466_v9 = vmax.f32 %v2748_v37, 0.0  ;;  %v12495_v37 = vld [vmem:[%s14880_s3 + $0x8] sm:$0xff] }
 0x2c4   :  { %15123 = vst [vmem:[#allocation17_spill] sm:$0xff] %v12445_v32  ;;  %8625 = vmatmul.msk.f32.vlgmr.msrb.gmra.mxu2 %vm3183_vm2, %v12460_v35  ;;  %8627 = vmatmul.msk.f32.vlgmr.msrb.gmra.mxu3 %vm3183_vm2, %v12460_v35 }
 0x2c5   :  { %15124 = vst [vmem:[#allocation14_spill] sm:$0xff] %v12447_v59  ;;  %4994 = vmatpush.msrb.mxu0 %v3156_v40  ;;  %5017 = vmatpush.msrb.mxu1 %v3157_v13  ;;  %v15131_v59 = vld [vmem:[#allocation25_spill] sm:$0xff] }
 0x2c6   :  { %5040 = vmatpush.msrb.mxu2 %v12453_v44  ;;  %5063 = vmatpush.msrb.mxu3 %v12455_v51  ;;  %v2843_v32 = vadd.f32 %v15131_v59, %v10980_v57  ;;  %v15137_v59 = vld [vmem:[#allocation26_spill] sm:$0xff] }
 0x2c7   :  { %4995 = vmatpush.msrb.mxu0 %v3063_v5  ;;  %5018 = vmatpush.msrb.mxu1 %v3064_v12  ;;  %v2863_v29 = vadd.f32 %v15137_v59, %v10989_v25 }
 0x2c8   :  { %5041 = vmatpush.msrb.mxu2 %v12466_v9  ;;  %5064 = vmatpush.msrb.mxu3 %v12468_v17 }
 0x2c9   :  { %4996 = vmatpush.msrb.mxu0 %v12387_v54  ;;  %5019 = vmatpush.msrb.mxu1 %v3156_v40  ;;  %v12475_v23 = vpop.f32.mrf.mxu2  ;;  %v12477_v28 = vpop.f32.mrf.mxu3 }
 0x2ca   :  { %15125 = vst [vmem:[#allocation15_spill] sm:$0xff] %v12475_v23  ;;  %5042 = vmatpush.msrb.mxu2 %v3157_v13  ;;  %5065 = vmatpush.msrb.mxu3 %v12453_v44  ;;  %v15130_v23 = vld [vmem:[#allocation24_spill] sm:$0xff] }
 0x2cb   :  { %15126 = vst [vmem:[#allocation5_spill] sm:$0xff] %v12477_v28  ;;  %4997 = vmatpush.msrb.mxu0 %v12395_v26  ;;  %5020 = vmatpush.msrb.mxu1 %v3063_v5  ;;  %v2797_v28 = vadd.f32 %v15129_v18, %v10980_v57 }
 0x2cc   :  { %5043 = vmatpush.msrb.mxu2 %v3064_v12  ;;  %5066 = vmatpush.msrb.mxu3 %v12466_v9  ;;  %v12482_v33 = vpop.f32.mrf.mxu0  ;;  %v12484_v50 = vpop.f32.mrf.mxu1 }
 0x2cd   :  { %15127 = vst [vmem:[#allocation6_spill] sm:$0xff] %v12482_v33  ;;  %8622 = vmatmul.msk.f32.gmra.mxu0 %vm3183_vm2, %v11861_v3  ;;  %8624 = vmatmul.msk.f32.gmra.mxu1 %vm3183_vm2, %v11861_v3 }
 0x2ce   :  { %15128 = vst [vmem:[#allocation18_spill] sm:$0xff] %v12484_v50  ;;  %8626 = vmatmul.msk.f32.gmra.mxu2 %vm3183_vm2, %v11861_v3  ;;  %8628 = vmatmul.msk.f32.gmra.mxu3 %vm3183_vm2, %v12495_v37  ;;  %v2820_v3 = vadd.f32 %v15130_v23, %v10980_v57  ;;  %v15132_v50 = vld [vmem:[#allocation22_spill] sm:$0xff] }
 0x2cf   :  { %4998 = vmatpush.msrb.mxu0 %v12385_v6  ;;  %5021 = vmatpush.msrb.mxu1 %v12387_v54  ;;  %v2866_v6 = vadd.f32 %v15132_v50, %v10980_v57  ;;  %v15133_v54 = vld [vmem:[#allocation23_spill] sm:$0xff] }
 0x2d0   :  { %5044 = vmatpush.msrb.mxu2 %v3156_v40  ;;  %5067 = vmatpush.msrb.mxu3 %v3157_v13  ;;  %v2794_v40 = vadd.f32 %v15133_v54, %v10989_v25  ;;  %v15134_v13 = vld [vmem:[#allocation12_spill] sm:$0xff]  ;;  %v3161_v50 = vmax.f32 %v2820_v3, 0.0  ;;  %v12531_v54 = vmax.f32 %v2843_v32, 0.0  ;;  %v12541_v3 = vmax.f32 %v2863_v29, 0.0 }
 0x2d1   :  { %4999 = vmatpush.msrb.mxu0 %v12393_v14  ;;  %5022 = vmatpush.msrb.mxu1 %v12395_v26  ;;  %v2817_v18 = vadd.f32 %v15134_v13, %v10989_v25  ;;  %v15136_v14 = vld [vmem:[#allocation13_spill] sm:$0xff]  ;;  %v12533_v13 = vmax.f32 %v2866_v6, 0.0 }
 0x2d2   :  { %5045 = vmatpush.msrb.mxu2 %v3063_v5  ;;  %5068 = vmatpush.msrb.mxu3 %v3064_v12  ;;  %v2840_v26 = vadd.f32 %v15136_v14, %v10989_v25  ;;  %v3160_v12 = vmax.f32 %v2797_v28, 0.0  ;;  %v3067_v14 = vmax.f32 %v2794_v40, 0.0 }
 0x2d3   :  { %v12515_v33 = vpop.f32.mrf.mxu2  ;;  %v12517_v23 = vpop.f32.mrf.mxu3  ;;  %v3068_v59 = vmax.f32 %v2817_v18, 0.0  ;;  %v15144_v18 = vld [vmem:[#allocation27_spill] sm:$0xff] }
 0x2d4   :  { %15135 = vst [vmem:[#allocation19_spill] sm:$0xff] %v12517_v23  ;;  %v12523_v30 = vpop.f32.mrf.mxu0  ;;  %v12525_v5 = vpop.f32.mrf.mxu1  ;;  %v12539_v28 = vmax.f32 %v2840_v26, 0.0  ;;  %v2889_v26 = vadd.f32 %v15144_v18, %v10980_v57 }
 0x2d5   :  { %15138 = vst [vmem:[#allocation24_spill] sm:$0xff] %v12523_v30  ;;  %8629 = vmatmul.msk.f32.vlgmr.msra.gmra.mxu0 %vm3183_vm2, %v12460_v35  ;;  %8631 = vmatmul.msk.f32.vlgmr.msra.gmra.mxu1 %vm3183_vm2, %v12460_v35 }
 0x2d6   :  { %15139 = vst [vmem:[#allocation25_spill] sm:$0xff] %v12525_v5  ;;  %8633 = vmatmul.msk.f32.vlgmr.msra.gmra.mxu2 %vm3183_vm2, %v12460_v35  ;;  %8635 = vmatmul.msk.f32.vlgmr.msra.gmra.mxu3 %vm3183_vm2, %v12460_v35  ;;  %v15146_v5 = vld [vmem:[#allocation33_spill] sm:$0xff] }
 0x2d7   :  { %5086 = vmatpush.msra.mxu0 %v3160_v12  ;;  %5109 = vmatpush.msra.mxu1 %v3161_v50  ;;  %v2935_v30 = vadd.f32 %v15146_v5, %v10980_v57  ;;  %v15151_v5 = vld [vmem:[#allocation34_spill] sm:$0xff] }
 0x2d8   :  { %5132 = vmatpush.msra.mxu2 %v12531_v54  ;;  %5155 = vmatpush.msra.mxu3 %v12533_v13  ;;  %v12593_v23 = vadd.f32 %v15151_v5, %v10989_v25 }
 0x2d9   :  { %5087 = vmatpush.msra.mxu0 %v3067_v14  ;;  %5110 = vmatpush.msra.mxu1 %v3068_v59 }
 0x2da   :  { %5133 = vmatpush.msra.mxu2 %v12539_v28  ;;  %5156 = vmatpush.msra.mxu3 %v12541_v3 }
 0x2db   :  { %5088 = vmatpush.msra.mxu0 %v12455_v51  ;;  %5111 = vmatpush.msra.mxu1 %v3160_v12  ;;  %v12548_v32 = vpop.f32.mrf.mxu2  ;;  %v12550_v6 = vpop.f32.mrf.mxu3 }
 0x2dc   :  { %15140 = vst [vmem:[#allocation22_spill] sm:$0xff] %v12548_v32  ;;  %5134 = vmatpush.msra.mxu2 %v3161_v50  ;;  %5157 = vmatpush.msra.mxu3 %v12531_v54 }
 0x2dd   :  { %15141 = vst [vmem:[#allocation23_spill] sm:$0xff] %v12550_v6  ;;  %5089 = vmatpush.msra.mxu0 %v12468_v17  ;;  %5112 = vmatpush.msra.mxu1 %v3067_v14  ;;  %v15145_v6 = vld [vmem:[#allocation32_spill] sm:$0xff] }
 0x2de   :  { %5135 = vmatpush.msra.mxu2 %v3068_v59  ;;  %5158 = vmatpush.msra.mxu3 %v12539_v28  ;;  %v12555_v29 = vpop.f32.mrf.mxu0  ;;  %v12557_v40 = vpop.f32.mrf.mxu1  ;;  %v2912_v32 = vadd.f32 %v15145_v6, %v10980_v57 }
 0x2df   :  { %15142 = vst [vmem:[#allocation12_spill] sm:$0xff] %v12555_v29  ;;  %8630 = vmatmul.msk.f32.gmra.mxu0 %vm3183_vm2, %v12495_v37  ;;  %8632 = vmatmul.msk.f32.gmra.mxu1 %vm3183_vm2, %v12495_v37 }
 0x2e0   :  { %15143 = vst [vmem:[#allocation13_spill] sm:$0xff] %v12557_v40  ;;  %8634 = vmatmul.msk.f32.gmra.mxu2 %vm3183_vm2, %v12495_v37  ;;  %8636 = vmatmul.msk.f32.gmra.mxu3 %vm3183_vm2, %v12495_v37  ;;  %v15147_v40 = vld [vmem:[#allocation30_spill] sm:$0xff] }
 0x2e1   :  { %5090 = vmatpush.msra.mxu0 %v12453_v44  ;;  %5113 = vmatpush.msra.mxu1 %v12455_v51  ;;  %v12579_v44 = vadd.f32 %v15147_v40, %v10980_v57  ;;  %v15148_v51 = vld [vmem:[#allocation31_spill] sm:$0xff] }
 0x2e2   :  { %5136 = vmatpush.msra.mxu2 %v3160_v12  ;;  %5159 = vmatpush.msra.mxu3 %v3161_v50  ;;  %v2886_v12 = vadd.f32 %v15148_v51, %v10989_v25  ;;  %v15149_v50 = vld [vmem:[#allocation20_spill] sm:$0xff]  ;;  %v3165_v51 = vmax.f32 %v2912_v32, 0.0 }
 0x2e3   :  { %5091 = vmatpush.msra.mxu0 %v12466_v9  ;;  %5114 = vmatpush.msra.mxu1 %v12468_v17  ;;  %v2909_v18 = vadd.f32 %v15149_v50, %v10989_v25  ;;  %v15150_v17 = vld [vmem:[#allocation21_spill] sm:$0xff]  ;;  %v12603_v50 = vmax.f32 %v2935_v30, 0.0 }
 0x2e4   :  { %5137 = vmatpush.msra.mxu2 %v3067_v14  ;;  %5160 = vmatpush.msra.mxu3 %v3068_v59  ;;  %v2932_v29 = vadd.f32 %v15150_v17, %v10989_v25  ;;  %v3164_v59 = vmax.f32 %v2889_v26, 0.0  ;;  %v14888_v17 = vmax.f32 %v12579_v44, 0.0  ;;  %v3071_v5 = vmax.f32 %v2886_v12, 0.0 }
 0x2e5   :  { %v12585_v6 = vpop.f32.mrf.mxu2  ;;  %v12587_v9 = vpop.f32.mrf.mxu3  ;;  %v14887_v26 = vmax.f32 %v12593_v23, 0.0 }
 0x2e6   :  { %v12595_v40 = vpop.f32.mrf.mxu0  ;;  %v12597_v14 = vpop.f32.mrf.mxu1  ;;  %v12610_v32 = vmax.f32 %v2932_v29, 0.0 }
 0x2e7   :  { %15152 = vst [vmem:[#allocation26_spill] sm:$0xff] %v12595_v40  ;;  %8637 = vmatmul.msk.f32.vlgmr.msrb.gmra.mxu0 %vm3183_vm2, %v12460_v35  ;;  %8639 = vmatmul.msk.f32.vlgmr.msrb.gmra.mxu1 %vm3183_vm2, %v12460_v35  ;;  %v12613_v40 = vpop.permute.xlu1 %3180 }
 0x2e8   :  { %15153 = vst [vmem:[#allocation27_spill] sm:$0xff] %v12597_v14  ;;  %8641 = vmatmul.msk.f32.vlgmr.msrb.gmra.mxu2 %vm3183_vm2, %v12460_v35  ;;  %8643 = vmatmul.msk.f32.vlgmr.msrb.gmra.mxu3 %vm3183_vm2, %v12460_v35  ;;  %v3072_v14 = vmax.f32 %v2909_v18, 0.0 }
 0x2e9   :  { %5178 = vmatpush.msrb.mxu0 %v3164_v59  ;;  %5201 = vmatpush.msrb.mxu1 %v3165_v51 }
 0x2ea   :  { %5224 = vmatpush.msrb.mxu2 %v12603_v50  ;;  %5247 = vmatpush.msrb.mxu3 %v14888_v17  ;;  %v15158_v17 = vld [vmem:[#allocation35_spill] sm:$0xff] }
 0x2eb   :  { %5179 = vmatpush.msrb.mxu0 %v3071_v5  ;;  %5202 = vmatpush.msrb.mxu1 %v3072_v14 }
 0x2ec   :  { %5225 = vmatpush.msrb.mxu2 %v12610_v32  ;;  %5248 = vmatpush.msrb.mxu3 %v14887_v26 }
 0x2ed   :  { %5180 = vmatpush.msrb.mxu0 %v12533_v13  ;;  %5203 = vmatpush.msrb.mxu1 %v3164_v59  ;;  %v12622_v30 = vpop.f32.mrf.mxu2  ;;  %v12624_v29 = vpop.f32.mrf.mxu3 }
 0x2ee   :  { %15154 = vst [vmem:[#allocation32_spill] sm:$0xff] %v12622_v30  ;;  %5226 = vmatpush.msrb.mxu2 %v3165_v51  ;;  %5249 = vmatpush.msrb.mxu3 %v12603_v50  ;;  %v3257_v30 = vadd.f32 %v11781_v8, %v12613_v40 }
 0x2ef   :  { %15155 = vst [vmem:[#allocation33_spill] sm:$0xff] %v12624_v29  ;;  %5181 = vmatpush.msrb.mxu0 %v12541_v3  ;;  %5204 = vmatpush.msrb.mxu1 %v3071_v5  ;;  %v12643_v26 = vpop.permute.xlu1 %3175  ;;  %v2981_v29 = vadd.f32 %v15158_v17, %v10980_v57 }
 0x2f0   :  { %5227 = vmatpush.msrb.mxu2 %v3072_v14  ;;  %5250 = vmatpush.msrb.mxu3 %v12610_v32  ;;  %v12629_v12 = vpop.f32.mrf.mxu0  ;;  %v12631_v18 = vpop.f32.mrf.mxu1  ;;  %v3254_v57 = vadd.f32 %v11749_v15, %v12643_v26 }
 0x2f1   :  { %15156 = vst [vmem:[#allocation30_spill] sm:$0xff] %v12629_v12  ;;  %8638 = vmatmul.msk.f32.gmra.mxu0 %vm3183_vm2, %v12495_v37  ;;  %8640 = vmatmul.msk.f32.gmra.mxu1 %vm3183_vm2, %v12495_v37 }
 0x2f2   :  { %15157 = vst [vmem:[#allocation31_spill] sm:$0xff] %v12631_v18  ;;  %8642 = vmatmul.msk.f32.gmra.mxu2 %vm3183_vm2, %v12495_v37  ;;  %8644 = vmatmul.msk.f32.gmra.mxu3 %vm3183_vm2, %v12495_v37  ;;  %v3280_v18 = vadd.f32 %v11783_v22, %v12613_v40  ;;  %v15161_v22 = vld [vmem:[#allocation47_spill] sm:$0xff] }
 0x2f3   :  { %5182 = vmatpush.msrb.mxu0 %v12531_v54  ;;  %5205 = vmatpush.msrb.mxu1 %v12533_v13  ;;  %v3303_v54 = vadd.f32 %v11809_v20, %v12613_v40  ;;  %v15159_v13 = vld [vmem:[#allocation39_spill] sm:$0xff]  ;;  %v3300_v17 = vadd.f32 %v15161_v22, %v12643_v26  ;;  %v5285_v22 = vmax.f32 %v3254_v57, 0.0  ;;  %v15167_v57 = vmax.f32 %v12579_v44, 0.0 }
 0x2f4   :  { %5228 = vmatpush.msrb.mxu2 %v3164_v59  ;;  %5251 = vmatpush.msrb.mxu3 %v3165_v51  ;;  %v2978_v59 = vadd.f32 %v15159_v13, %v10989_v25  ;;  %v15164_v25 = vld [vmem:[#allocation41_spill] sm:$0xff]  ;;  %v5376_v13 = vmax.f32 %v3257_v30, 0.0  ;;  %v12677_v15 = vmax.f32 %v3280_v18, 0.0 }
 0x2f5   :  { %5183 = vmatpush.msrb.mxu0 %v12539_v28  ;;  %5206 = vmatpush.msrb.mxu1 %v12541_v3  ;;  %v15160_v28 = vld [vmem:[#allocation42_spill] sm:$0xff]  ;;  %v15165_v30 = vld [vmem:[#allocation29_spill] sm:$0xff] }
 0x2f6   :  { %5229 = vmatpush.msrb.mxu2 %v3071_v5  ;;  %5252 = vmatpush.msrb.mxu3 %v3072_v14  ;;  %v3277_v3 = vadd.f32 %v15160_v28, %v12643_v26  ;;  %v3168_v14 = vmax.f32 %v2981_v29, 0.0  ;;  %v3234_v5 = vadd.f32 %v15164_v25, %v12613_v40  ;;  %v12679_v28 = vmax.f32 %v3303_v54, 0.0  ;;  %v15166_v54 = vld [vmem:[#allocation40_spill] sm:$0xff] }
 0x2f7   :  { %v12659_v51 = vpop.f32.mrf.mxu2  ;;  %v12661_v8 = vpop.f32.mrf.mxu3  ;;  %v3075_v29 = vmax.f32 %v2978_v59, 0.0  ;;  %v3231_v25 = vadd.f32 %v15165_v30, %v12643_v26  ;;  %v3211_v59 = vadd.f32 %v15166_v54, %v12613_v40 }
 0x2f8   :  { %v12667_v12 = vpop.f32.mrf.mxu0  ;;  %v12669_v20 = vpop.f32.mrf.mxu1  ;;  %v5375_v18 = vmax.f32 %v3234_v5, 0.0  ;;  %v15170_v5 = vmax.f32 %v12593_v23, 0.0 }
 0x2f9   :  { %15162 = vst [vmem:[#allocation20_spill] sm:$0xff] %v12667_v12  ;;  %8645 = vmatmul.msk.f32.vlgmr.msra.gmra.mxu0 %vm3183_vm2, %v12460_v35  ;;  %8647 = vmatmul.msk.f32.vlgmr.msra.gmra.mxu1 %vm3183_vm2, %v12460_v35  ;;  %v12689_v12 = vmax.f32 %v3300_v17, 0.0  ;;  %v5374_v54 = vmax.f32 %v3211_v59, 0.0  ;;  %v3326_v59 = vadd.f32 %v11811_v0, %v12613_v40 }
 0x2fa   :  { %15163 = vst [vmem:[#allocation21_spill] sm:$0xff] %v12669_v20  ;;  %8649 = vmatmul.msk.f32.vlgmr.msra.gmra.mxu2 %vm3183_vm2, %v12460_v35  ;;  %8651 = vmatmul.msk.f32.vlgmr.msra.gmra.mxu3 %vm3183_vm2, %v12460_v35  ;;  %v12687_v20 = vmax.f32 %v3277_v3, 0.0  ;;  %v5284_v3 = vmax.f32 %v3231_v25, 0.0 }
 0x2fb   :  { %5270 = vmatpush.msra.mxu0 %v3168_v14  ;;  %5495 = vmatpush.msra.mxu1 %v5376_v13 }
 0x2fc   :  { %5518 = vmatpush.msra.mxu2 %v12677_v15  ;;  %5541 = vmatpush.msra.mxu3 %v12679_v28 }
 0x2fd   :  { %5271 = vmatpush.msra.mxu0 %v3075_v29  ;;  %5496 = vmatpush.msra.mxu1 %v5285_v22  ;;  %v15171_v29 = vld [vmem:[#allocation28_spill] sm:$0xff] }
 0x2fe   :  { %5519 = vmatpush.msra.mxu2 %v12687_v20  ;;  %5542 = vmatpush.msra.mxu3 %v12689_v12  ;;  %v3208_v30 = vadd.f32 %v15171_v29, %v12643_v26  ;;  %v15174_v29 = vld [vmem:[#allocation50_spill] sm:$0xff] }
 0x2ff   :  { %5272 = vmatpush.msra.mxu0 %v15167_v57  ;;  %5497 = vmatpush.msra.mxu1 %v5375_v18  ;;  %v12699_v17 = vpop.f32.mrf.mxu2  ;;  %v12701_v14 = vpop.f32.mrf.mxu3  ;;  %v15173_v57 = vld [vmem:[#allocation49_spill] sm:$0xff] }
 0x300   :  { %15168 = vst [vmem:[#allocation34_spill] sm:$0xff] %v12699_v17  ;;  %5520 = vmatpush.msra.mxu2 %v5376_v13  ;;  %5543 = vmatpush.msra.mxu3 %v12677_v15  ;;  %v5283_v23 = vmax.f32 %v3208_v30, 0.0  ;;  %v3395_v17 = vadd.f32 %v11887_v11, %v12613_v40 }
 0x301   :  { %15169 = vst [vmem:[#allocation35_spill] sm:$0xff] %v12701_v14  ;;  %5273 = vmatpush.msra.mxu0 %v15170_v5  ;;  %5498 = vmatpush.msra.mxu1 %v5284_v3  ;;  %v3349_v5 = vadd.f32 %v15173_v57, %v12613_v40  ;;  %v3372_v14 = vadd.f32 %v15174_v29, %v12613_v40  ;;  %v15178_v57 = vld [vmem:[#allocation43_spill] sm:$0xff] }
 0x302   :  { %5521 = vmatpush.msra.mxu2 %v5285_v22  ;;  %5544 = vmatpush.msra.mxu3 %v12687_v20  ;;  %v12709_v44 = vpop.f32.mrf.mxu0  ;;  %v12711_v25 = vpop.f32.mrf.mxu1  ;;  %v3392_v29 = vadd.f32 %v15178_v57, %v12643_v26 }
 0x303   :  { %15172 = vst [vmem:[#allocation39_spill] sm:$0xff] %v12711_v25  ;;  %8646 = vmatmul.msk.f32.gmra.mxu0 %vm3183_vm2, %v12495_v37  ;;  %8648 = vmatmul.msk.f32.gmra.mxu1 %vm3183_vm2, %v12495_v37 }
 0x304   :  { %8650 = vmatmul.msk.f32.gmra.mxu2 %vm3183_vm2, %v12495_v37  ;;  %8652 = vmatmul.msk.f32.gmra.mxu3 %vm3183_vm2, %v12495_v37 }
 0x305   :  { %5274 = vmatpush.msra.mxu0 %v12603_v50  ;;  %5499 = vmatpush.msra.mxu1 %v5374_v54  ;;  %v15175_v50 = vld [vmem:[#allocation36_spill] sm:$0xff] }
 0x306   :  { %5522 = vmatpush.msra.mxu2 %v5375_v18  ;;  %5545 = vmatpush.msra.mxu3 %v5376_v13  ;;  %v3323_v13 = vadd.f32 %v15175_v50, %v12643_v26  ;;  %v15176_v18 = vld [vmem:[#allocation37_spill] sm:$0xff]  ;;  %v12751_v50 = vmax.f32 %v3372_v14, 0.0 }
 0x307   :  { %5275 = vmatpush.msra.mxu0 %v12610_v32  ;;  %5500 = vmatpush.msra.mxu1 %v5283_v23  ;;  %v3346_v0 = vadd.f32 %v15176_v18, %v12643_v26  ;;  %v15177_v32 = vld [vmem:[#allocation38_spill] sm:$0xff]  ;;  %v12753_v18 = vmax.f32 %v3395_v17, 0.0 }
 0x308   :  { %5523 = vmatpush.msra.mxu2 %v5284_v3  ;;  %5546 = vmatpush.msra.mxu3 %v5285_v22  ;;  %v3369_v23 = vadd.f32 %v15177_v32, %v12643_v26  ;;  %v5379_v22 = vmax.f32 %v3326_v59, 0.0  ;;  %v5380_v3 = vmax.f32 %v3349_v5, 0.0  ;;  %v5288_v32 = vmax.f32 %v3323_v13, 0.0 }
 0x309   :  { %v12735_v30 = vpop.f32.mrf.mxu2  ;;  %v12737_v54 = vpop.f32.mrf.mxu3  ;;  %v5289_v57 = vmax.f32 %v3346_v0, 0.0  ;;  %v12761_v5 = vmax.f32 %v3392_v29, 0.0  ;;  %v3441_v29 = vadd.f32 %v11927_v7, %v12613_v40 }
 0x30a   :  { %v12743_v25 = vpop.f32.mrf.mxu0  ;;  %v12745_v11 = vpop.f32.mrf.mxu1  ;;  %v12759_v59 = vmax.f32 %v3369_v23, 0.0  ;;  %v3418_v23 = vadd.f32 %v11889_v43, %v12613_v40  ;;  %v15184_v43 = vld [vmem:[#allocation48_spill] sm:$0xff] }
 0x30b   :  { %15179 = vst [vmem:[#allocation42_spill] sm:$0xff] %v12743_v25  ;;  %8653 = vmatmul.msk.f32.vlgmr.msrb.gmra.mxu0 %vm3183_vm2, %v12460_v35  ;;  %8655 = vmatmul.msk.f32.vlgmr.msrb.gmra.mxu1 %vm3183_vm2, %v12460_v35  ;;  %v3415_v7 = vadd.f32 %v15184_v43, %v12643_v26 }
 0x30c   :  { %15180 = vst [vmem:[#allocation47_spill] sm:$0xff] %v12745_v11  ;;  %8657 = vmatmul.msk.f32.vlgmr.msrb.gmra.mxu2 %vm3183_vm2, %v12460_v35  ;;  %8659 = vmatmul.msk.f32.vlgmr.msrb.gmra.mxu3 %vm3183_vm2, %v12460_v35  ;;  %v5383_v25 = vmax.f32 %v3418_v23, 0.0 }
 0x30d   :  { %5564 = vmatpush.msrb.mxu0 %v5379_v22  ;;  %5587 = vmatpush.msrb.mxu1 %v5380_v3 }
 0x30e   :  { %5610 = vmatpush.msrb.mxu2 %v12751_v50  ;;  %5633 = vmatpush.msrb.mxu3 %v12753_v18 }
 0x30f   :  { %5565 = vmatpush.msrb.mxu0 %v5288_v32  ;;  %5588 = vmatpush.msrb.mxu1 %v5289_v57 }
 0x310   :  { %5611 = vmatpush.msrb.mxu2 %v12759_v59  ;;  %5634 = vmatpush.msrb.mxu3 %v12761_v5 }
 0x311   :  { %5566 = vmatpush.msrb.mxu0 %v12679_v28  ;;  %5589 = vmatpush.msrb.mxu1 %v5379_v22  ;;  %v12768_v17 = vpop.f32.mrf.mxu2  ;;  %v12770_v14 = vpop.f32.mrf.mxu3 }
 0x312   :  { %15181 = vst [vmem:[#allocation41_spill] sm:$0xff] %v12768_v17  ;;  %5612 = vmatpush.msrb.mxu2 %v5380_v3  ;;  %5635 = vmatpush.msrb.mxu3 %v12751_v50 }
 0x313   :  { %15182 = vst [vmem:[#allocation29_spill] sm:$0xff] %v12770_v14  ;;  %5567 = vmatpush.msrb.mxu0 %v12689_v12  ;;  %5590 = vmatpush.msrb.mxu1 %v5288_v32  ;;  %v3464_v14 = vadd.f32 %v11929_v53, %v12613_v40  ;;  %v15186_v53 = vld [vmem:[#allocation45_spill] sm:$0xff] }
 0x314   :  { %5613 = vmatpush.msrb.mxu2 %v5289_v57  ;;  %5636 = vmatpush.msrb.mxu3 %v12759_v59  ;;  %v12775_v13 = vpop.f32.mrf.mxu0  ;;  %v12777_v0 = vpop.f32.mrf.mxu1 }
 0x315   :  { %15183 = vst [vmem:[#allocation40_spill] sm:$0xff] %v12777_v0  ;;  %8654 = vmatmul.msk.f32.gmra.mxu0 %vm3183_vm2, %v12495_v37  ;;  %8656 = vmatmul.msk.f32.gmra.mxu1 %vm3183_vm2, %v12495_v37  ;;  %v5384_v0 = vmax.f32 %v3441_v29, 0.0  ;;  %v12824_v43 = vmax.f32 %v3464_v14, 0.0 }
 0x316   :  { %8658 = vmatmul.msk.f32.gmra.mxu2 %vm3183_vm2, %v12495_v37  ;;  %8660 = vmatmul.msk.f32.gmra.mxu3 %vm3183_vm2, %v12495_v37 }
 0x317   :  { %5568 = vmatpush.msrb.mxu0 %v12677_v15  ;;  %5591 = vmatpush.msrb.mxu1 %v12679_v28  ;;  %v3487_v15 = vadd.f32 %v11955_v1, %v12613_v40  ;;  %v12802_v28 = vld [vmem:[%s14882_s5] sm:$0xff]  ;;  %v3461_v1 = vadd.f32 %v15186_v53, %v12643_v26  ;;  %v5292_v53 = vmax.f32 %v3415_v7, 0.0 }
 0x318   :  { %5614 = vmatpush.msrb.mxu2 %v5379_v22  ;;  %5637 = vmatpush.msrb.mxu3 %v5380_v3 }
 0x319   :  { %5569 = vmatpush.msrb.mxu0 %v12687_v20  ;;  %5592 = vmatpush.msrb.mxu1 %v12689_v12  ;;  %v15185_v20 = vld [vmem:[#allocation44_spill] sm:$0xff]  ;;  %v12832_v23 = vmax.f32 %v3461_v1, 0.0  ;;  %v3510_v1 = vadd.f32 %v11957_v39, %v12613_v40  ;;  %v3530_v39 = vadd.f32 %v11963_v52, %v12643_v26 }
 0x31a   :  { %5615 = vmatpush.msrb.mxu2 %v5288_v32  ;;  %5638 = vmatpush.msrb.mxu3 %v5289_v57  ;;  %v3438_v22 = vadd.f32 %v15185_v20, %v12643_v26  ;;  %v15187_v32 = vld [vmem:[#allocation46_spill] sm:$0xff]  ;;  %v12826_v20 = vmax.f32 %v3487_v15, 0.0  ;;  %v12849_v15 = vld [vmem:[%s14882_s5 + $0x8] sm:$0xff] }
 0x31b   :  { %v12808_v12 = vpop.f32.mrf.mxu2  ;;  %v12810_v3 = vpop.f32.mrf.mxu3  ;;  %v3484_v57 = vadd.f32 %v15187_v32, %v12643_v26 }
 0x31c   :  { %v12816_v17 = vpop.f32.mrf.mxu0  ;;  %v12818_v11 = vpop.f32.mrf.mxu1  ;;  %v5293_v32 = vmax.f32 %v3438_v22, 0.0 }
 0x31d   :  { %8661 = vmatmul.msk.f32.vlgmr.msra.gmra.mxu0 %vm3183_vm2, %v12460_v35  ;;  %8663 = vmatmul.msk.f32.vlgmr.msra.gmra.mxu1 %vm3183_vm2, %v12802_v28  ;;  %v12834_v35 = vmax.f32 %v3484_v57, 0.0  ;;  %v3556_v57 = vadd.f32 %v11997_v61, %v12613_v40  ;;  %v3576_v61 = vadd.f32 %v11988_v48, %v12643_v26  ;;  %v5297_v48 = vmax.f32 %v3530_v39, 0.0 }
 0x31e   :  { %8665 = vmatmul.msk.f32.vlgmr.msra.gmra.mxu2 %vm3183_vm2, %v12802_v28  ;;  %8667 = vmatmul.msk.f32.vlgmr.msra.gmra.mxu3 %vm3183_vm2, %v12802_v28 }
 0x31f   :  { %5656 = vmatpush.msra.mxu0 %v5383_v25  ;;  %5679 = vmatpush.msra.mxu1 %v5384_v0  ;;  %v12897_v52 = vmax.f32 %v3556_v57, 0.0 }
 0x320   :  { %5702 = vmatpush.msra.mxu2 %v12824_v43  ;;  %5725 = vmatpush.msra.mxu3 %v12826_v20 }
 0x321   :  { %5657 = vmatpush.msra.mxu0 %v5292_v53  ;;  %5680 = vmatpush.msra.mxu1 %v5293_v32 }
 0x322   :  { %5703 = vmatpush.msra.mxu2 %v12832_v23  ;;  %5726 = vmatpush.msra.mxu3 %v12834_v35 }
 0x323   :  { %5658 = vmatpush.msra.mxu0 %v12753_v18  ;;  %5681 = vmatpush.msra.mxu1 %v5383_v25  ;;  %v12841_v14 = vpop.f32.mrf.mxu2  ;;  %v12843_v29 = vpop.f32.mrf.mxu3 }
 0x324   :  { %5704 = vmatpush.msra.mxu2 %v5384_v0  ;;  %5727 = vmatpush.msra.mxu3 %v12824_v43 }
 0x325   :  { %5659 = vmatpush.msra.mxu0 %v12761_v5  ;;  %5682 = vmatpush.msra.mxu1 %v5292_v53 }
 0x326   :  { %5705 = vmatpush.msra.mxu2 %v5293_v32  ;;  %5728 = vmatpush.msra.mxu3 %v12832_v23  ;;  %v12853_v7 = vpop.f32.mrf.mxu0  ;;  %v12855_v22 = vpop.f32.mrf.mxu1 }
 0x327   :  { %8662 = vmatmul.msk.f32.gmra.mxu0 %vm3183_vm2, %v12495_v37  ;;  %8664 = vmatmul.msk.f32.gmra.mxu1 %vm3183_vm2, %v12849_v15  ;;  %v3533_v37 = vadd.f32 %v11995_v47, %v12613_v40 }
 0x328   :  { %8666 = vmatmul.msk.f32.gmra.mxu2 %vm3183_vm2, %v12849_v15  ;;  %8668 = vmatmul.msk.f32.gmra.mxu3 %vm3183_vm2, %v12849_v15 }
 0x329   :  { %5660 = vmatpush.msra.mxu0 %v12751_v50  ;;  %5683 = vmatpush.msra.mxu1 %v12753_v18  ;;  %v3579_v50 = vadd.f32 %v12023_v42, %v12613_v40 }
 0x32a   :  { %5706 = vmatpush.msra.mxu2 %v5383_v25  ;;  %5729 = vmatpush.msra.mxu3 %v5384_v0  ;;  %v15188_v25 = vld [vmem:[#allocation51_spill] sm:$0xff] }
 0x32b   :  { %5661 = vmatpush.msra.mxu0 %v12759_v59  ;;  %5684 = vmatpush.msra.mxu1 %v12761_v5  ;;  %v3507_v18 = vadd.f32 %v15188_v25, %v12643_v26  ;;  %v3553_v59 = vadd.f32 %v11965_v19, %v12643_v26  ;;  %v12899_v25 = vmax.f32 %v3579_v50, 0.0 }
 0x32c   :  { %5707 = vmatpush.msra.mxu2 %v5292_v53  ;;  %5730 = vmatpush.msra.mxu3 %v5293_v32  ;;  %v5387_v53 = vmax.f32 %v3510_v1, 0.0  ;;  %v5388_v32 = vmax.f32 %v3533_v37, 0.0  ;;  %v12907_v37 = vmax.f32 %v3576_v61, 0.0  ;;  %v3602_v61 = vadd.f32 %v12025_v49, %v12613_v40 }
 0x32d   :  { %v12881_v0 = vpop.f32.mrf.mxu2  ;;  %v12883_v47 = vpop.f32.mrf.mxu3  ;;  %v5296_v19 = vmax.f32 %v3507_v18, 0.0  ;;  %v12905_v1 = vmax.f32 %v3553_v59, 0.0  ;;  %v5468_v59 = vld [vmem:[%s14883_s6 + $0x8] sm:$0xff]  ;;  %v3622_v49 = vadd.f32 %v12031_v38, %v12643_v26 }
 0x32e   :  { %v12889_v5 = vpop.f32.mrf.mxu0  ;;  %v12891_v42 = vpop.f32.mrf.mxu1  ;;  %5476 = vperm.xlu2 %8850, %v5468_v59  }
 0x32f   :  { %8669 = vmatmul.msk.f32.vlgmr.msrb.gmra.mxu0 %vm3183_vm2, %v12802_v28  ;;  %8671 = vmatmul.msk.f32.vlgmr.msrb.gmra.mxu1 %vm3183_vm2, %v12802_v28 }
 0x330   :  { %8673 = vmatmul.msk.f32.vlgmr.msrb.gmra.mxu2 %vm3183_vm2, %v12802_v28  ;;  %8675 = vmatmul.msk.f32.vlgmr.msrb.gmra.mxu3 %vm3183_vm2, %v12802_v28 }
 0x331   :  { %5748 = vmatpush.msrb.mxu0 %v5387_v53  ;;  %5771 = vmatpush.msrb.mxu1 %v5388_v32 }
 0x332   :  { %5794 = vmatpush.msrb.mxu2 %v12897_v52  ;;  %5817 = vmatpush.msrb.mxu3 %v12899_v25 }
 0x333   :  { %5749 = vmatpush.msrb.mxu0 %v5296_v19  ;;  %5772 = vmatpush.msrb.mxu1 %v5297_v48 }
 0x334   :  { %5795 = vmatpush.msrb.mxu2 %v12905_v1  ;;  %5818 = vmatpush.msrb.mxu3 %v12907_v37 }
 0x335   :  { %5750 = vmatpush.msrb.mxu0 %v12826_v20  ;;  %5773 = vmatpush.msrb.mxu1 %v5387_v53  ;;  %v12914_v57 = vpop.f32.mrf.mxu2  ;;  %v12916_v50 = vpop.f32.mrf.mxu3 }
 0x336   :  { %15189 = vst [vmem:[#allocation28_spill] sm:$0xff] %v12916_v50  ;;  %5796 = vmatpush.msrb.mxu2 %v5388_v32  ;;  %5819 = vmatpush.msrb.mxu3 %v12897_v52  ;;  %v3625_v50 = vadd.f32 %v12063_v31, %v12613_v40 }
 0x337   :  { %5751 = vmatpush.msrb.mxu0 %v12834_v35  ;;  %5774 = vmatpush.msrb.mxu1 %v5296_v19 }
 0x338   :  { %5797 = vmatpush.msrb.mxu2 %v5297_v48  ;;  %5820 = vmatpush.msrb.mxu3 %v12905_v1  ;;  %v12921_v18 = vpop.f32.mrf.mxu0  ;;  %v12923_v39 = vpop.f32.mrf.mxu1 }
 0x339   :  { %8670 = vmatmul.msk.f32.gmra.mxu0 %vm3183_vm2, %v12849_v15  ;;  %8672 = vmatmul.msk.f32.gmra.mxu1 %vm3183_vm2, %v12849_v15 }
 0x33a   :  { %8674 = vmatmul.msk.f32.gmra.mxu2 %vm3183_vm2, %v12849_v15  ;;  %8676 = vmatmul.msk.f32.gmra.mxu3 %vm3183_vm2, %v12849_v15 }
 0x33b   :  { %5752 = vmatpush.msrb.mxu0 %v12824_v43  ;;  %5775 = vmatpush.msrb.mxu1 %v12826_v20  ;;  %v3648_v43 = vadd.f32 %v12065_v21, %v12613_v40  ;;  %v3671_v20 = vadd.f32 %v12091_v16, %v12613_v40  ;;  %v3668_v21 = vadd.f32 %v12056_v41, %v12643_v26  ;;  %v5301_v41 = vmax.f32 %v3622_v49, 0.0 }
 0x33c   :  { %5798 = vmatpush.msrb.mxu2 %v5387_v53  ;;  %5821 = vmatpush.msrb.mxu3 %v5388_v32  ;;  %v15190_v53 = vld [vmem:[#allocation55_spill] sm:$0xff] }
 0x33d   :  { %5753 = vmatpush.msrb.mxu0 %v12832_v23  ;;  %5776 = vmatpush.msrb.mxu1 %v12834_v35  ;;  %v3599_v32 = vadd.f32 %v15190_v53, %v12643_v26  ;;  %v3645_v35 = vadd.f32 %v12033_v62, %v12643_v26  ;;  %v5392_v53 = vmax.f32 %v3625_v50, 0.0  ;;  %v12968_v38 = vmax.f32 %v3648_v43, 0.0 }
 0x33e   :  { %5799 = vmatpush.msrb.mxu2 %v5296_v19  ;;  %5822 = vmatpush.msrb.mxu3 %v5297_v48  ;;  %v5391_v48 = vmax.f32 %v3602_v61, 0.0  ;;  %v12970_v59 = vmax.f32 %v3671_v20, 0.0  ;;  %v12978_v61 = vmax.f32 %v3668_v21, 0.0  ;;  %v3694_v21 = vadd.f32 %v12093_v45, %v12613_v40 }
 0x33f   :  { %v12952_v31 = vpop.f32.mrf.mxu2  ;;  %v12954_v23 = vpop.f32.mrf.mxu3  ;;  %v5300_v62 = vmax.f32 %v3599_v32, 0.0  ;;  %v12976_v50 = vmax.f32 %v3645_v35, 0.0  ;;  %v5467_v35 = vld [vmem:[%s14883_s6] sm:$0xff]  ;;  %v3714_v45 = vadd.f32 %v12099_v46, %v12643_v26 }
 0x340   :  { %v12960_v16 = vpop.f32.mrf.mxu0  ;;  %v12962_v19 = vpop.f32.mrf.mxu1  ;;  %5471 = vperm.xlu2 %8850, %v5467_v35  }
 0x341   :  { %8677 = vmatmul.msk.f32.vlgmr.msra.gmra.mxu0 %vm3183_vm2, %v12802_v28  ;;  %8679 = vmatmul.msk.f32.vlgmr.msra.gmra.mxu1 %vm3183_vm2, %v12802_v28 }
 0x342   :  { %8681 = vmatmul.msk.f32.vlgmr.msra.gmra.mxu2 %vm3183_vm2, %v12802_v28  ;;  %8683 = vmatmul.msk.f32.vlgmr.msra.gmra.mxu3 %vm3183_vm2, %v12802_v28 }
 0x343   :  { %5840 = vmatpush.msra.mxu0 %v5391_v48  ;;  %5863 = vmatpush.msra.mxu1 %v5392_v53 }
 0x344   :  { %5886 = vmatpush.msra.mxu2 %v12968_v38  ;;  %5909 = vmatpush.msra.mxu3 %v12970_v59 }
 0x345   :  { %5841 = vmatpush.msra.mxu0 %v5300_v62  ;;  %5864 = vmatpush.msra.mxu1 %v5301_v41 }
 0x346   :  { %5887 = vmatpush.msra.mxu2 %v12976_v50  ;;  %5910 = vmatpush.msra.mxu3 %v12978_v61 }
 0x347   :  { %5842 = vmatpush.msra.mxu0 %v12899_v25  ;;  %5865 = vmatpush.msra.mxu1 %v5391_v48  ;;  %v12985_v43 = vpop.f32.mrf.mxu2  ;;  %v12987_v20 = vpop.f32.mrf.mxu3 }
 0x348   :  { %15191 = vst [vmem:[#allocation49_spill] sm:$0xff] %v12987_v20  ;;  %5888 = vmatpush.msra.mxu2 %v5392_v53  ;;  %5911 = vmatpush.msra.mxu3 %v12968_v38  ;;  %v3717_v20 = vadd.f32 %v12131_v24, %v12613_v40 }
 0x349   :  { %5843 = vmatpush.msra.mxu0 %v12907_v37  ;;  %5866 = vmatpush.msra.mxu1 %v5300_v62 }
 0x34a   :  { %5889 = vmatpush.msra.mxu2 %v5301_v41  ;;  %5912 = vmatpush.msra.mxu3 %v12976_v50  ;;  %v12992_v32 = vpop.f32.mrf.mxu0  ;;  %v12994_v49 = vpop.f32.mrf.mxu1 }
 0x34b   :  { %8678 = vmatmul.msk.f32.gmra.mxu0 %vm3183_vm2, %v12849_v15  ;;  %8680 = vmatmul.msk.f32.gmra.mxu1 %vm3183_vm2, %v12849_v15 }
 0x34c   :  { %8682 = vmatmul.msk.f32.gmra.mxu2 %vm3183_vm2, %v12849_v15  ;;  %8684 = vmatmul.msk.f32.gmra.mxu3 %vm3183_vm2, %v12849_v15 }
 0x34d   :  { %5844 = vmatpush.msra.mxu0 %v12897_v52  ;;  %5867 = vmatpush.msra.mxu1 %v12899_v25  ;;  %v3740_v52 = vadd.f32 %v12133_v36, %v12613_v40  ;;  %v3763_v25 = vadd.f32 %v12162_v2, %v12613_v40  ;;  %v3760_v36 = vadd.f32 %v12124_v58, %v12643_v26  ;;  %v5305_v58 = vmax.f32 %v3714_v45, 0.0 }
 0x34e   :  { %5890 = vmatpush.msra.mxu2 %v5391_v48  ;;  %5913 = vmatpush.msra.mxu3 %v5392_v53  ;;  %v15192_v48 = vld [vmem:[#allocation52_spill] sm:$0xff] }
 0x34f   :  { %5845 = vmatpush.msra.mxu0 %v12905_v1  ;;  %5868 = vmatpush.msra.mxu1 %v12907_v37  ;;  %v3691_v53 = vadd.f32 %v15192_v48, %v12643_v26  ;;  %v3737_v37 = vadd.f32 %v12101_v55, %v12643_v26  ;;  %v5396_v48 = vmax.f32 %v3717_v20, 0.0  ;;  %v13039_v46 = vmax.f32 %v3740_v52, 0.0 }
 0x350   :  { %5891 = vmatpush.msra.mxu2 %v5300_v62  ;;  %5914 = vmatpush.msra.mxu3 %v5301_v41  ;;  %v5395_v41 = vmax.f32 %v3694_v21, 0.0  ;;  %v13041_v35 = vmax.f32 %v3763_v25, 0.0  ;;  %v13049_v21 = vmax.f32 %v3760_v36, 0.0  ;;  %v3809_v36 = vadd.f32 %v12202_v60, %v12613_v40 }
 0x351   :  { %v13023_v24 = vpop.f32.mrf.mxu2  ;;  %v13025_v1 = vpop.f32.mrf.mxu3  ;;  %v5304_v55 = vmax.f32 %v3691_v53, 0.0  ;;  %v13047_v20 = vmax.f32 %v3737_v37, 0.0  ;;  %v3786_v37 = vadd.f32 %v12164_v10, %v12613_v40  ;;  %v3806_v10 = vadd.f32 %v12170_v4, %v12643_v26 }
 0x352   :  { %v13031_v2 = vpop.f32.mrf.mxu0  ;;  %v13033_v62 = vpop.f32.mrf.mxu1 }
 0x353   :  { %8685 = vmatmul.msk.f32.vlgmr.msrb.gmra.mxu0 %vm3183_vm2, %v12802_v28  ;;  %8687 = vmatmul.msk.f32.vlgmr.msrb.gmra.mxu1 %vm3183_vm2, %v12802_v28 }
 0x354   :  { %8689 = vmatmul.msk.f32.vlgmr.msrb.gmra.mxu2 %vm3183_vm2, %v12802_v28  ;;  %8691 = vmatmul.msk.f32.vlgmr.msrb.gmra.mxu3 %vm3183_vm2, %v12802_v28 }
 0x355   :  { %5932 = vmatpush.msrb.mxu0 %v5395_v41  ;;  %5955 = vmatpush.msrb.mxu1 %v5396_v48 }
 0x356   :  { %5978 = vmatpush.msrb.mxu2 %v13039_v46  ;;  %6001 = vmatpush.msrb.mxu3 %v13041_v35 }
 0x357   :  { %5933 = vmatpush.msrb.mxu0 %v5304_v55  ;;  %5956 = vmatpush.msrb.mxu1 %v5305_v58 }
 0x358   :  { %5979 = vmatpush.msrb.mxu2 %v13047_v20  ;;  %6002 = vmatpush.msrb.mxu3 %v13049_v21 }
 0x359   :  { %5934 = vmatpush.msrb.mxu0 %v12970_v59  ;;  %5957 = vmatpush.msrb.mxu1 %v5395_v41  ;;  %v13056_v52 = vpop.f32.mrf.mxu2  ;;  %v13058_v25 = vpop.f32.mrf.mxu3 }
 0x35a   :  { %15193 = vst [vmem:[#allocation50_spill] sm:$0xff] %v13056_v52  ;;  %5980 = vmatpush.msrb.mxu2 %v5396_v48  ;;  %6003 = vmatpush.msrb.mxu3 %v13039_v46 }
 0x35b   :  { %15194 = vst [vmem:[#allocation36_spill] sm:$0xff] %v13058_v25  ;;  %5935 = vmatpush.msrb.mxu0 %v12978_v61  ;;  %5958 = vmatpush.msrb.mxu1 %v5304_v55  ;;  %v3832_v25 = vadd.f32 %v12204_v56, %v12613_v40  ;;  %v15196_v56 = vld [vmem:[#allocation53_spill] sm:$0xff] }
 0x35c   :  { %5981 = vmatpush.msrb.mxu2 %v5305_v58  ;;  %6004 = vmatpush.msrb.mxu3 %v13047_v20  ;;  %v13063_v53 = vpop.f32.mrf.mxu0  ;;  %v13065_v45 = vpop.f32.mrf.mxu1 }
 0x35d   :  { %8686 = vmatmul.msk.f32.gmra.mxu0 %vm3183_vm2, %v12849_v15  ;;  %8688 = vmatmul.msk.f32.gmra.mxu1 %vm3183_vm2, %v12849_v15 }
 0x35e   :  { %8690 = vmatmul.msk.f32.gmra.mxu2 %vm3183_vm2, %v12849_v15  ;;  %8692 = vmatmul.msk.f32.gmra.mxu3 %vm3183_vm2, %v12849_v15 }
 0x35f   :  { %5936 = vmatpush.msrb.mxu0 %v12968_v38  ;;  %5959 = vmatpush.msrb.mxu1 %v12970_v59  ;;  %v3855_v38 = vadd.f32 %v12233_v27, %v12613_v40  ;;  %v3783_v59 = vadd.f32 %v12126_v34, %v12643_v26  ;;  %v13107_v34 = vmax.f32 %v3832_v25, 0.0 }
 0x360   :  { %5982 = vmatpush.msrb.mxu2 %v5395_v41  ;;  %6005 = vmatpush.msrb.mxu3 %v5396_v48 }
 0x361   :  { %5937 = vmatpush.msrb.mxu0 %v12976_v50  ;;  %5960 = vmatpush.msrb.mxu1 %v12978_v61  ;;  %v3829_v50 = vadd.f32 %v12172_v63, %v12643_v26  ;;  %v3852_v61 = vadd.f32 %v15196_v56, %v12643_v26  ;;  %v13109_v4 = vmax.f32 %v3855_v38, 0.0  ;;  %v5308_v63 = vmax.f32 %v3783_v59, 0.0 }
 0x362   :  { %5983 = vmatpush.msrb.mxu2 %v5304_v55  ;;  %6006 = vmatpush.msrb.mxu3 %v5305_v58  ;;  %v5399_v55 = vmax.f32 %v3786_v37, 0.0  ;;  %v5400_v58 = vmax.f32 %v3809_v36, 0.0  ;;  %v5309_v56 = vmax.f32 %v3806_v10, 0.0 }
 0x363   :  { %v13091_v41 = vpop.f32.mrf.mxu2  ;;  %v13093_v60 = vpop.f32.mrf.mxu3  ;;  %v13115_v37 = vmax.f32 %v3829_v50, 0.0  ;;  %v13117_v36 = vmax.f32 %v3852_v61, 0.0  ;;  %v15203_v50 = vld [vmem:[#allocation59_spill] sm:$0xff] }
 0x364   :  { %15195 = vst [vmem:[#allocation37_spill] sm:$0xff] %v13093_v60  ;;  %v13099_v48 = vpop.f32.mrf.mxu0  ;;  %v13101_v27 = vpop.f32.mrf.mxu1  ;;  %v3878_v61 = vadd.f32 %v15203_v50, %v12613_v40 }
 0x365   :  { %15197 = vst [vmem:[#allocation38_spill] sm:$0xff] %v13099_v48  ;;  %8693 = vmatmul.msk.f32.vlgmr.msra.gmra.mxu0 %vm3183_vm2, %v12802_v28  ;;  %8695 = vmatmul.msk.f32.vlgmr.msra.gmra.mxu1 %vm3183_vm2, %v12802_v28 }
 0x366   :  { %15198 = vst [vmem:[#allocation43_spill] sm:$0xff] %v13101_v27  ;;  %8697 = vmatmul.msk.f32.vlgmr.msra.gmra.mxu2 %vm3183_vm2, %v12802_v28  ;;  %8699 = vmatmul.msk.f32.vlgmr.msra.gmra.mxu3 %vm3183_vm2, %v12802_v28  ;;  %v15205_v27 = vld [vmem:[#allocation62_spill] sm:$0xff] }
 0x367   :  { %6024 = vmatpush.msra.mxu0 %v5399_v55  ;;  %6047 = vmatpush.msra.mxu1 %v5400_v58  ;;  %v3924_v48 = vadd.f32 %v15205_v27, %v12613_v40  ;;  %v15212_v27 = vld [vmem:[#allocation58_spill] sm:$0xff] }
 0x368   :  { %6070 = vmatpush.msra.mxu2 %v13107_v34  ;;  %6093 = vmatpush.msra.mxu3 %v13109_v4  ;;  %v3944_v60 = vadd.f32 %v15212_v27, %v12643_v26 }
 0x369   :  { %6025 = vmatpush.msra.mxu0 %v5308_v63  ;;  %6048 = vmatpush.msra.mxu1 %v5309_v56 }
 0x36a   :  { %6071 = vmatpush.msra.mxu2 %v13115_v37  ;;  %6094 = vmatpush.msra.mxu3 %v13117_v36 }
 0x36b   :  { %6026 = vmatpush.msra.mxu0 %v13041_v35  ;;  %6049 = vmatpush.msra.mxu1 %v5399_v55  ;;  %v13124_v25 = vpop.f32.mrf.mxu2  ;;  %v13126_v38 = vpop.f32.mrf.mxu3 }
 0x36c   :  { %15199 = vst [vmem:[#allocation48_spill] sm:$0xff] %v13124_v25  ;;  %6072 = vmatpush.msra.mxu2 %v5400_v58  ;;  %6095 = vmatpush.msra.mxu3 %v13107_v34 }
 0x36d   :  { %15200 = vst [vmem:[#allocation44_spill] sm:$0xff] %v13126_v38  ;;  %6027 = vmatpush.msra.mxu0 %v13049_v21  ;;  %6050 = vmatpush.msra.mxu1 %v5308_v63  ;;  %v15204_v38 = vld [vmem:[#allocation61_spill] sm:$0xff] }
 0x36e   :  { %6073 = vmatpush.msra.mxu2 %v5309_v56  ;;  %6096 = vmatpush.msra.mxu3 %v13115_v37  ;;  %v13131_v59 = vpop.f32.mrf.mxu0  ;;  %v13133_v10 = vpop.f32.mrf.mxu1  ;;  %v3901_v25 = vadd.f32 %v15204_v38, %v12613_v40 }
 0x36f   :  { %15201 = vst [vmem:[#allocation45_spill] sm:$0xff] %v13131_v59  ;;  %8694 = vmatmul.msk.f32.gmra.mxu0 %vm3183_vm2, %v12849_v15  ;;  %8696 = vmatmul.msk.f32.gmra.mxu1 %vm3183_vm2, %v12849_v15 }
 0x370   :  { %15202 = vst [vmem:[#allocation46_spill] sm:$0xff] %v13133_v10  ;;  %8698 = vmatmul.msk.f32.gmra.mxu2 %vm3183_vm2, %v12849_v15  ;;  %8700 = vmatmul.msk.f32.gmra.mxu3 %vm3183_vm2, %v12849_v15  ;;  %v15206_v10 = vld [vmem:[#allocation66_spill] sm:$0xff] }
 0x371   :  { %6028 = vmatpush.msra.mxu0 %v13039_v46  ;;  %6051 = vmatpush.msra.mxu1 %v13041_v35  ;;  %v3947_v46 = vadd.f32 %v15206_v10, %v12613_v40  ;;  %v15207_v35 = vld [vmem:[#allocation54_spill] sm:$0xff]  ;;  %v5404_v10 = vmax.f32 %v3901_v25, 0.0 }
 0x372   :  { %6074 = vmatpush.msra.mxu2 %v5399_v55  ;;  %6097 = vmatpush.msra.mxu3 %v5400_v58  ;;  %v3875_v55 = vadd.f32 %v15207_v35, %v12643_v26  ;;  %v15208_v58 = vld [vmem:[#allocation56_spill] sm:$0xff]  ;;  %v13175_v35 = vmax.f32 %v3924_v48, 0.0 }
 0x373   :  { %6029 = vmatpush.msra.mxu0 %v13047_v20  ;;  %6052 = vmatpush.msra.mxu1 %v13049_v21  ;;  %v3898_v50 = vadd.f32 %v15208_v58, %v12643_v26  ;;  %v15211_v20 = vld [vmem:[#allocation57_spill] sm:$0xff]  ;;  %v13177_v58 = vmax.f32 %v3947_v46, 0.0 }
 0x374   :  { %6075 = vmatpush.msra.mxu2 %v5308_v63  ;;  %6098 = vmatpush.msra.mxu3 %v5309_v56  ;;  %v3921_v21 = vadd.f32 %v15211_v20, %v12643_v26  ;;  %v5403_v56 = vmax.f32 %v3878_v61, 0.0  ;;  %v5312_v20 = vmax.f32 %v3875_v55, 0.0  ;;  %v13185_v61 = vmax.f32 %v3944_v60, 0.0 }
 0x375   :  { %v13159_v59 = vpop.f32.mrf.mxu2  ;;  %v13161_v38 = vpop.f32.mrf.mxu3  ;;  %v5313_v27 = vmax.f32 %v3898_v50, 0.0  ;;  %v15219_v50 = vld [vmem:[#allocation2_spill] sm:$0xff] }
 0x376   :  { %15209 = vst [vmem:[#allocation51_spill] sm:$0xff] %v13159_v59  ;;  %v13167_v52 = vpop.f32.mrf.mxu0  ;;  %v13169_v63 = vpop.f32.mrf.mxu1  ;;  %v13183_v25 = vmax.f32 %v3921_v21, 0.0  ;;  %v3970_v21 = vadd.f32 %v15219_v50, %v12613_v40 }
 0x377   :  { %15210 = vst [vmem:[#allocation55_spill] sm:$0xff] %v13161_v38  ;;  %8701 = vmatmul.msk.f32.vlgmr.msrb.gmra.mxu0 %vm3183_vm2, %v12802_v28  ;;  %8703 = vmatmul.msk.f32.vlgmr.msrb.gmra.mxu1 %vm3183_vm2, %v12802_v28 }
 0x378   :  { %15213 = vst [vmem:[#allocation52_spill] sm:$0xff] %v13167_v52  ;;  %8705 = vmatmul.msk.f32.vlgmr.msrb.gmra.mxu2 %vm3183_vm2, %v12802_v28  ;;  %8707 = vmatmul.msk.f32.vlgmr.msrb.gmra.mxu3 %vm3183_vm2, %v12802_v28 }
 0x379   :  { %15214 = vst [vmem:[#allocation53_spill] sm:$0xff] %v13169_v63  ;;  %6116 = vmatpush.msrb.mxu0 %v5403_v56  ;;  %6139 = vmatpush.msrb.mxu1 %v5404_v10  ;;  %v15221_v63 = vld [vmem:[#allocation4_spill] sm:$0xff] }
 0x37a   :  { %6162 = vmatpush.msrb.mxu2 %v13175_v35  ;;  %6185 = vmatpush.msrb.mxu3 %v13177_v58  ;;  %v4016_v52 = vadd.f32 %v15221_v63, %v12613_v40  ;;  %v15228_v63 = vld [vmem:[#allocation63_spill] sm:$0xff] }
 0x37b   :  { %6117 = vmatpush.msrb.mxu0 %v5312_v20  ;;  %6140 = vmatpush.msrb.mxu1 %v5313_v27  ;;  %v4036_v38 = vadd.f32 %v15228_v63, %v12643_v26 }
 0x37c   :  { %6163 = vmatpush.msrb.mxu2 %v13183_v25  ;;  %6186 = vmatpush.msrb.mxu3 %v13185_v61 }
 0x37d   :  { %6118 = vmatpush.msrb.mxu0 %v13109_v4  ;;  %6141 = vmatpush.msrb.mxu1 %v5403_v56  ;;  %v13192_v48 = vpop.f32.mrf.mxu2  ;;  %v13194_v46 = vpop.f32.mrf.mxu3 }
 0x37e   :  { %15215 = vst [vmem:[#allocation59_spill] sm:$0xff] %v13192_v48  ;;  %6164 = vmatpush.msrb.mxu2 %v5404_v10  ;;  %6187 = vmatpush.msrb.mxu3 %v13175_v35 }
 0x37f   :  { %15216 = vst [vmem:[#allocation61_spill] sm:$0xff] %v13194_v46  ;;  %6119 = vmatpush.msrb.mxu0 %v13117_v36  ;;  %6142 = vmatpush.msrb.mxu1 %v5312_v20  ;;  %v15220_v46 = vld [vmem:[#allocation65_spill] sm:$0xff] }
 0x380   :  { %6165 = vmatpush.msrb.mxu2 %v5313_v27  ;;  %6188 = vmatpush.msrb.mxu3 %v13183_v25  ;;  %v13199_v60 = vpop.f32.mrf.mxu0  ;;  %v13201_v55 = vpop.f32.mrf.mxu1  ;;  %v3993_v48 = vadd.f32 %v15220_v46, %v12613_v40 }
 0x381   :  { %15217 = vst [vmem:[#allocation62_spill] sm:$0xff] %v13199_v60  ;;  %8702 = vmatmul.msk.f32.gmra.mxu0 %vm3183_vm2, %v12849_v15  ;;  %8704 = vmatmul.msk.f32.gmra.mxu1 %vm3183_vm2, %v12849_v15 }
 0x382   :  { %15218 = vst [vmem:[#allocation66_spill] sm:$0xff] %v13201_v55  ;;  %8706 = vmatmul.msk.f32.gmra.mxu2 %vm3183_vm2, %v12849_v15  ;;  %8708 = vmatmul.msk.f32.gmra.mxu3 %vm3183_vm2, %v12849_v15  ;;  %v15222_v55 = vld [vmem:[#allocation71_spill] sm:$0xff] }
 0x383   :  { %6120 = vmatpush.msrb.mxu0 %v13107_v34  ;;  %6143 = vmatpush.msrb.mxu1 %v13109_v4  ;;  %v4039_v34 = vadd.f32 %v15222_v55, %v12613_v40  ;;  %v15223_v4 = vld [vmem:[#allocation60_spill] sm:$0xff]  ;;  %v5408_v55 = vmax.f32 %v3993_v48, 0.0 }
 0x384   :  { %6166 = vmatpush.msrb.mxu2 %v5403_v56  ;;  %6189 = vmatpush.msrb.mxu3 %v5404_v10  ;;  %v3967_v56 = vadd.f32 %v15223_v4, %v12643_v26  ;;  %v15224_v10 = vld [vmem:[#allocation3_spill] sm:$0xff]  ;;  %v13243_v4 = vmax.f32 %v4016_v52, 0.0 }
 0x385   :  { %6121 = vmatpush.msrb.mxu0 %v13115_v37  ;;  %6144 = vmatpush.msrb.mxu1 %v13117_v36  ;;  %v3990_v50 = vadd.f32 %v15224_v10, %v12643_v26  ;;  %v15227_v37 = vld [vmem:[#allocation70_spill] sm:$0xff]  ;;  %v13245_v10 = vmax.f32 %v4039_v34, 0.0 }
 0x386   :  { %6167 = vmatpush.msrb.mxu2 %v5312_v20  ;;  %6190 = vmatpush.msrb.mxu3 %v5313_v27  ;;  %v4013_v36 = vadd.f32 %v15227_v37, %v12643_v26  ;;  %v5407_v27 = vmax.f32 %v3970_v21, 0.0  ;;  %v5316_v37 = vmax.f32 %v3967_v56, 0.0  ;;  %v13253_v21 = vmax.f32 %v4036_v38, 0.0 }
 0x387   :  { %v13227_v60 = vpop.f32.mrf.mxu2  ;;  %v13229_v46 = vpop.f32.mrf.mxu3  ;;  %v5317_v63 = vmax.f32 %v3990_v50, 0.0  ;;  %v15235_v50 = vld [vmem:[#allocation8_spill] sm:$0xff] }
 0x388   :  { %15225 = vst [vmem:[#allocation54_spill] sm:$0xff] %v13227_v60  ;;  %v13235_v59 = vpop.f32.mrf.mxu0  ;;  %v13237_v20 = vpop.f32.mrf.mxu1  ;;  %v13251_v48 = vmax.f32 %v4013_v36, 0.0  ;;  %v4062_v36 = vadd.f32 %v15235_v50, %v12613_v40 }
 0x389   :  { %15226 = vst [vmem:[#allocation56_spill] sm:$0xff] %v13229_v46  ;;  %8709 = vmatmul.msk.f32.vlgmr.msra.gmra.mxu0 %vm3183_vm2, %v12802_v28  ;;  %8711 = vmatmul.msk.f32.vlgmr.msra.gmra.mxu1 %vm3183_vm2, %v12802_v28 }
 0x38a   :  { %15229 = vst [vmem:[#allocation57_spill] sm:$0xff] %v13235_v59  ;;  %8713 = vmatmul.msk.f32.vlgmr.msra.gmra.mxu2 %vm3183_vm2, %v12802_v28  ;;  %8715 = vmatmul.msk.f32.vlgmr.msra.gmra.mxu3 %vm3183_vm2, %v12802_v28 }
 0x38b   :  { %15230 = vst [vmem:[#allocation58_spill] sm:$0xff] %v13237_v20  ;;  %6208 = vmatpush.msra.mxu0 %v5407_v27  ;;  %6231 = vmatpush.msra.mxu1 %v5408_v55  ;;  %v15237_v20 = vld [vmem:[#allocation10_spill] sm:$0xff] }
 0x38c   :  { %6254 = vmatpush.msra.mxu2 %v13243_v4  ;;  %6277 = vmatpush.msra.mxu3 %v13245_v10  ;;  %v4108_v59 = vadd.f32 %v15237_v20, %v12613_v40  ;;  %v15243_v20 = vld [vmem:[#allocation67_spill] sm:$0xff] }
 0x38d   :  { %6209 = vmatpush.msra.mxu0 %v5316_v37  ;;  %6232 = vmatpush.msra.mxu1 %v5317_v63  ;;  %v4128_v46 = vadd.f32 %v15243_v20, %v12643_v26 }
 0x38e   :  { %6255 = vmatpush.msra.mxu2 %v13251_v48  ;;  %6278 = vmatpush.msra.mxu3 %v13253_v21 }
 0x38f   :  { %6210 = vmatpush.msra.mxu0 %v13177_v58  ;;  %6233 = vmatpush.msra.mxu1 %v5407_v27  ;;  %v13260_v52 = vpop.f32.mrf.mxu2  ;;  %v13262_v34 = vpop.f32.mrf.mxu3 }
 0x390   :  { %15231 = vst [vmem:[#allocation2_spill] sm:$0xff] %v13260_v52  ;;  %6256 = vmatpush.msra.mxu2 %v5408_v55  ;;  %6279 = vmatpush.msra.mxu3 %v13243_v4 }
 0x391   :  { %15232 = vst [vmem:[#allocation65_spill] sm:$0xff] %v13262_v34  ;;  %6211 = vmatpush.msra.mxu0 %v13185_v61  ;;  %6234 = vmatpush.msra.mxu1 %v5316_v37  ;;  %v15236_v34 = vld [vmem:[#allocation69_spill] sm:$0xff] }
 0x392   :  { %6257 = vmatpush.msra.mxu2 %v5317_v63  ;;  %6280 = vmatpush.msra.mxu3 %v13251_v48  ;;  %v13267_v38 = vpop.f32.mrf.mxu0  ;;  %v13269_v56 = vpop.f32.mrf.mxu1  ;;  %v4085_v52 = vadd.f32 %v15236_v34, %v12613_v40 }
 0x393   :  { %15233 = vst [vmem:[#allocation4_spill] sm:$0xff] %v13267_v38  ;;  %8710 = vmatmul.msk.f32.gmra.mxu0 %vm3183_vm2, %v12849_v15  ;;  %8712 = vmatmul.msk.f32.gmra.mxu1 %vm3183_vm2, %v12849_v15 }
 0x394   :  { %15234 = vst [vmem:[#allocation71_spill] sm:$0xff] %v13269_v56  ;;  %8714 = vmatmul.msk.f32.gmra.mxu2 %vm3183_vm2, %v12849_v15  ;;  %8716 = vmatmul.msk.f32.gmra.mxu3 %vm3183_vm2, %v12849_v15  ;;  %v15238_v56 = vld [vmem:[#allocation11_spill] sm:$0xff] }
 0x395   :  { %6212 = vmatpush.msra.mxu0 %v13175_v35  ;;  %6235 = vmatpush.msra.mxu1 %v13177_v58  ;;  %v4131_v35 = vadd.f32 %v15238_v56, %v12613_v40  ;;  %v15239_v58 = vld [vmem:[#allocation64_spill] sm:$0xff]  ;;  %v5412_v56 = vmax.f32 %v4085_v52, 0.0 }
 0x396   :  { %6258 = vmatpush.msra.mxu2 %v5407_v27  ;;  %6281 = vmatpush.msra.mxu3 %v5408_v55  ;;  %v4059_v27 = vadd.f32 %v15239_v58, %v12643_v26  ;;  %v15240_v55 = vld [vmem:[#allocation9_spill] sm:$0xff]  ;;  %v13311_v58 = vmax.f32 %v4108_v59, 0.0 }
 0x397   :  { %6213 = vmatpush.msra.mxu0 %v13183_v25  ;;  %6236 = vmatpush.msra.mxu1 %v13185_v61  ;;  %v4082_v50 = vadd.f32 %v15240_v55, %v12643_v26  ;;  %v15242_v25 = vld [vmem:[#allocation7_spill] sm:$0xff]  ;;  %v13313_v55 = vmax.f32 %v4131_v35, 0.0 }
 0x398   :  { %6259 = vmatpush.msra.mxu2 %v5316_v37  ;;  %6282 = vmatpush.msra.mxu3 %v5317_v63  ;;  %v4105_v61 = vadd.f32 %v15242_v25, %v12643_v26  ;;  %v5411_v63 = vmax.f32 %v4062_v36, 0.0  ;;  %v5320_v25 = vmax.f32 %v4059_v27, 0.0  ;;  %v13321_v36 = vmax.f32 %v4128_v46, 0.0 }
 0x399   :  { %v13295_v38 = vpop.f32.mrf.mxu2  ;;  %v13297_v34 = vpop.f32.mrf.mxu3  ;;  %v5321_v20 = vmax.f32 %v4082_v50, 0.0  ;;  %v15250_v50 = vld [vmem:[#allocation16_spill] sm:$0xff] }
 0x39a   :  { %15241 = vst [vmem:[#allocation60_spill] sm:$0xff] %v13297_v34  ;;  %v13303_v60 = vpop.f32.mrf.mxu0  ;;  %v13305_v37 = vpop.f32.mrf.mxu1  ;;  %v13319_v52 = vmax.f32 %v4105_v61, 0.0  ;;  %v4154_v61 = vadd.f32 %v15250_v50, %v12613_v40 }
 0x39b   :  { %15244 = vst [vmem:[#allocation3_spill] sm:$0xff] %v13303_v60  ;;  %8717 = vmatmul.msk.f32.vlgmr.msrb.gmra.mxu0 %vm3183_vm2, %v12802_v28  ;;  %8719 = vmatmul.msk.f32.vlgmr.msrb.gmra.mxu1 %vm3183_vm2, %v12802_v28 }
 0x39c   :  { %15245 = vst [vmem:[#allocation70_spill] sm:$0xff] %v13305_v37  ;;  %8721 = vmatmul.msk.f32.vlgmr.msrb.gmra.mxu2 %vm3183_vm2, %v12802_v28  ;;  %8723 = vmatmul.msk.f32.vlgmr.msrb.gmra.mxu3 %vm3183_vm2, %v12802_v28  ;;  %v15251_v37 = vld [vmem:[#allocation6_spill] sm:$0xff] }
 0x39d   :  { %6300 = vmatpush.msrb.mxu0 %v5411_v63  ;;  %6323 = vmatpush.msrb.mxu1 %v5412_v56 }
 0x39e   :  { %6346 = vmatpush.msrb.mxu2 %v13311_v58  ;;  %6369 = vmatpush.msrb.mxu3 %v13313_v55 }
 0x39f   :  { %6301 = vmatpush.msrb.mxu0 %v5320_v25  ;;  %6324 = vmatpush.msrb.mxu1 %v5321_v20 }
 0x3a0   :  { %6347 = vmatpush.msrb.mxu2 %v13319_v52  ;;  %6370 = vmatpush.msrb.mxu3 %v13321_v36 }
 0x3a1   :  { %6302 = vmatpush.msrb.mxu0 %v13245_v10  ;;  %6325 = vmatpush.msrb.mxu1 %v5411_v63  ;;  %v13328_v59 = vpop.f32.mrf.mxu2  ;;  %v13330_v35 = vpop.f32.mrf.mxu3 }
 0x3a2   :  { %15246 = vst [vmem:[#allocation63_spill] sm:$0xff] %v13328_v59  ;;  %6348 = vmatpush.msrb.mxu2 %v5412_v56  ;;  %6371 = vmatpush.msrb.mxu3 %v13311_v58  ;;  %v15252_v59 = vld [vmem:[#allocation18_spill] sm:$0xff] }
 0x3a3   :  { %15247 = vst [vmem:[#allocation8_spill] sm:$0xff] %v13330_v35  ;;  %6303 = vmatpush.msrb.mxu0 %v13253_v21  ;;  %6326 = vmatpush.msrb.mxu1 %v5320_v25  ;;  %v4200_v35 = vadd.f32 %v15252_v59, %v12613_v40  ;;  %v15258_v59 = vld [vmem:[#allocation15_spill] sm:$0xff] }
 0x3a4   :  { %6349 = vmatpush.msrb.mxu2 %v5321_v20  ;;  %6372 = vmatpush.msrb.mxu3 %v13319_v52  ;;  %v13335_v46 = vpop.f32.mrf.mxu0  ;;  %v13337_v27 = vpop.f32.mrf.mxu1 }
 0x3a5   :  { %15248 = vst [vmem:[#allocation69_spill] sm:$0xff] %v13335_v46  ;;  %8718 = vmatmul.msk.f32.gmra.mxu0 %vm3183_vm2, %v12849_v15  ;;  %8720 = vmatmul.msk.f32.gmra.mxu1 %vm3183_vm2, %v12849_v15  ;;  %v4220_v46 = vadd.f32 %v15258_v59, %v12643_v26 }
 0x3a6   :  { %15249 = vst [vmem:[#allocation10_spill] sm:$0xff] %v13337_v27  ;;  %8722 = vmatmul.msk.f32.gmra.mxu2 %vm3183_vm2, %v12849_v15  ;;  %8724 = vmatmul.msk.f32.gmra.mxu3 %vm3183_vm2, %v12849_v15  ;;  %v4177_v27 = vadd.f32 %v15251_v37, %v12613_v40 }
 0x3a7   :  { %6304 = vmatpush.msrb.mxu0 %v13243_v4  ;;  %6327 = vmatpush.msrb.mxu1 %v13245_v10  ;;  %v4223_v4 = vadd.f32 %v12515_v33, %v12613_v40  ;;  %v15253_v10 = vld [vmem:[#allocation68_spill] sm:$0xff]  ;;  %v5415_v33 = vmax.f32 %v4154_v61, 0.0  ;;  %v13389_v59 = vmax.f32 %v4220_v46, 0.0 }
 0x3a8   :  { %6350 = vmatpush.msrb.mxu2 %v5411_v63  ;;  %6373 = vmatpush.msrb.mxu3 %v5412_v56  ;;  %v4151_v63 = vadd.f32 %v15253_v10, %v12643_v26  ;;  %v15254_v56 = vld [vmem:[#allocation17_spill] sm:$0xff]  ;;  %v13379_v10 = vmax.f32 %v4200_v35, 0.0 }
 0x3a9   :  { %6305 = vmatpush.msrb.mxu0 %v13251_v48  ;;  %6328 = vmatpush.msrb.mxu1 %v13253_v21  ;;  %v4174_v50 = vadd.f32 %v15254_v56, %v12643_v26  ;;  %v15257_v48 = vld [vmem:[#allocation14_spill] sm:$0xff]  ;;  %v13381_v56 = vmax.f32 %v4223_v4, 0.0 }
 0x3aa   :  { %6351 = vmatpush.msrb.mxu2 %v5320_v25  ;;  %6374 = vmatpush.msrb.mxu3 %v5321_v20  ;;  %v4197_v21 = vadd.f32 %v15257_v48, %v12643_v26  ;;  %v5416_v25 = vmax.f32 %v4177_v27, 0.0  ;;  %v5324_v61 = vmax.f32 %v4151_v63, 0.0  ;;  %v15265_v63 = vld [vmem:[#allocation19_spill] sm:$0xff] }
 0x3ab   :  { %v13363_v60 = vpop.f32.mrf.mxu2  ;;  %v13365_v37 = vpop.f32.mrf.mxu3  ;;  %v5325_v27 = vmax.f32 %v4174_v50, 0.0  ;;  %v4246_v50 = vadd.f32 %v15265_v63, %v12613_v40 }
 0x3ac   :  { %15255 = vst [vmem:[#allocation11_spill] sm:$0xff] %v13363_v60  ;;  %v13371_v34 = vpop.f32.mrf.mxu0  ;;  %v13377_v20 = vpop.f32.mrf.mxu1  ;;  %v13387_v48 = vmax.f32 %v4197_v21, 0.0  ;;  %v15266_v21 = vld [vmem:[#allocation12_spill] sm:$0xff] }
 0x3ad   :  { %15256 = vst [vmem:[#allocation64_spill] sm:$0xff] %v13365_v37  ;;  %8725 = vmatmul.msk.f32.vlgmr.msra.gmra.mxu0 %vm3183_vm2, %v12802_v28  ;;  %8727 = vmatmul.msk.f32.vlgmr.msra.gmra.mxu1 %vm3183_vm2, %v12802_v28  ;;  %v4269_v60 = vadd.f32 %v15266_v21, %v12613_v40  ;;  %v15267_v37 = vld [vmem:[#allocation13_spill] sm:$0xff] }
 0x3ae   :  { %15259 = vst [vmem:[#allocation9_spill] sm:$0xff] %v13371_v34  ;;  %8729 = vmatmul.msk.f32.vlgmr.msra.gmra.mxu2 %vm3183_vm2, %v12802_v28  ;;  %8731 = vmatmul.msk.f32.vlgmr.msra.gmra.mxu3 %vm3183_vm2, %v12802_v28  ;;  %v4292_v34 = vadd.f32 %v15267_v37, %v12613_v40  ;;  %v15272_v37 = vld [vmem:[#allocation22_spill] sm:$0xff] }
 0x3af   :  { %15260 = vst [vmem:[#allocation7_spill] sm:$0xff] %v13377_v20  ;;  %6392 = vmatpush.msra.mxu0 %v5415_v33  ;;  %6415 = vmatpush.msra.mxu1 %v5416_v25 }
 0x3b0   :  { %6438 = vmatpush.msra.mxu2 %v13379_v10  ;;  %6461 = vmatpush.msra.mxu3 %v13381_v56 }
 0x3b1   :  { %6393 = vmatpush.msra.mxu0 %v5324_v61  ;;  %6416 = vmatpush.msra.mxu1 %v5325_v27 }
 0x3b2   :  { %6439 = vmatpush.msra.mxu2 %v13387_v48  ;;  %6462 = vmatpush.msra.mxu3 %v13389_v59 }
 0x3b3   :  { %6394 = vmatpush.msra.mxu0 %v13313_v55  ;;  %6417 = vmatpush.msra.mxu1 %v5415_v33  ;;  %v13396_v28 = vpop.f32.mrf.mxu2  ;;  %v13398_v35 = vpop.f32.mrf.mxu3 }
 0x3b4   :  { %15261 = vst [vmem:[#allocation67_spill] sm:$0xff] %v13396_v28  ;;  %6440 = vmatpush.msra.mxu2 %v5416_v25  ;;  %6463 = vmatpush.msra.mxu3 %v13379_v10 }
 0x3b5   :  { %15262 = vst [vmem:[#allocation16_spill] sm:$0xff] %v13398_v35  ;;  %6395 = vmatpush.msra.mxu0 %v13321_v36  ;;  %6418 = vmatpush.msra.mxu1 %v5324_v61 }
 0x3b6   :  { %6441 = vmatpush.msra.mxu2 %v5325_v27  ;;  %6464 = vmatpush.msra.mxu3 %v13387_v48  ;;  %v13403_v46 = vpop.f32.mrf.mxu0  ;;  %v13405_v4 = vpop.f32.mrf.mxu1 }
 0x3b7   :  { %15263 = vst [vmem:[#allocation6_spill] sm:$0xff] %v13403_v46  ;;  %8726 = vmatmul.msk.f32.gmra.mxu0 %vm3183_vm2, %v12849_v15  ;;  %8728 = vmatmul.msk.f32.gmra.mxu1 %vm3183_vm2, %v12849_v15  ;;  %v4312_v46 = vadd.f32 %v15272_v37, %v12643_v26 }
 0x3b8   :  { %15264 = vst [vmem:[#allocation18_spill] sm:$0xff] %v13405_v4  ;;  %8730 = vmatmul.msk.f32.gmra.mxu2 %vm3183_vm2, %v12849_v15  ;;  %8732 = vmatmul.msk.f32.gmra.mxu3 %vm3183_vm2, %v12849_v15  ;;  %v4315_v15 = vadd.f32 %v12585_v6, %v12613_v40 }
 0x3b9   :  { %6396 = vmatpush.msra.mxu0 %v13311_v58  ;;  %6419 = vmatpush.msra.mxu1 %v13313_v55  ;;  %v15268_v58 = vld [vmem:[#allocation5_spill] sm:$0xff] }
 0x3ba   :  { %6442 = vmatpush.msra.mxu2 %v5415_v33  ;;  %6465 = vmatpush.msra.mxu3 %v5416_v25  ;;  %v4243_v55 = vadd.f32 %v15268_v58, %v12643_v26  ;;  %v15269_v33 = vld [vmem:[#allocation24_spill] sm:$0xff]  ;;  %v13446_v58 = vld [vmem:[%s14882_s5] sm:$0xff] }
 0x3bb   :  { %6397 = vmatpush.msra.mxu0 %v13319_v52  ;;  %6420 = vmatpush.msra.mxu1 %v13321_v36  ;;  %v4266_v25 = vadd.f32 %v15269_v33, %v12643_v26  ;;  %v15271_v52 = vld [vmem:[#allocation25_spill] sm:$0xff]  ;;  %v13452_v33 = vmax.f32 %v4292_v34, 0.0 }
 0x3bc   :  { %6443 = vmatpush.msra.mxu2 %v5324_v61  ;;  %6466 = vmatpush.msra.mxu3 %v5325_v27  ;;  %v4289_v36 = vadd.f32 %v15271_v52, %v12643_v26  ;;  %v5419_v61 = vmax.f32 %v4246_v50, 0.0  ;;  %v5420_v27 = vmax.f32 %v4269_v60, 0.0  ;;  %v13454_v52 = vmax.f32 %v4315_v15, 0.0 }
 0x3bd   :  { %v13431_v63 = vpop.f32.mrf.mxu2  ;;  %v13433_v21 = vpop.f32.mrf.mxu3  ;;  %v5328_v60 = vmax.f32 %v4243_v55, 0.0  ;;  %v5329_v50 = vmax.f32 %v4266_v25, 0.0  ;;  %v13483_v25 = vld [vmem:[%s14882_s5 + $0x8] sm:$0xff] }
 0x3be   :  { %15270 = vst [vmem:[#allocation68_spill] sm:$0xff] %v13431_v63  ;;  %v13439_v20 = vpop.f32.mrf.mxu0  ;;  %v13441_v6 = vpop.f32.mrf.mxu1  ;;  %v13460_v37 = vmax.f32 %v4289_v36, 0.0  ;;  %v4338_v36 = vadd.f32 %v12587_v9, %v12613_v40  ;;  %v15280_v9 = vld [vmem:[#allocation26_spill] sm:$0xff] }
 0x3bf   :  { %15273 = vst [vmem:[#allocation17_spill] sm:$0xff] %v13441_v6  ;;  %8733 = vmatmul.msk.f32.vlgmr.msrb.gmra.mxu0 %vm3183_vm2, %v13446_v58  ;;  %8735 = vmatmul.msk.f32.vlgmr.msrb.gmra.mxu1 %vm3183_vm2, %v13446_v58  ;;  %v13462_v6 = vmax.f32 %v4312_v46, 0.0 }
 0x3c0   :  { %8737 = vmatmul.msk.f32.vlgmr.msrb.gmra.mxu2 %vm3183_vm2, %v13446_v58  ;;  %8739 = vmatmul.msk.f32.vlgmr.msrb.gmra.mxu3 %vm3183_vm2, %v13446_v58 }
 0x3c1   :  { %6484 = vmatpush.msrb.mxu0 %v5419_v61  ;;  %6507 = vmatpush.msrb.mxu1 %v5420_v27 }
 0x3c2   :  { %6530 = vmatpush.msrb.mxu2 %v13452_v33  ;;  %6553 = vmatpush.msrb.mxu3 %v13454_v52 }
 0x3c3   :  { %6485 = vmatpush.msrb.mxu0 %v5328_v60  ;;  %6508 = vmatpush.msrb.mxu1 %v5329_v50 }
 0x3c4   :  { %6531 = vmatpush.msrb.mxu2 %v13460_v37  ;;  %6554 = vmatpush.msrb.mxu3 %v13462_v6 }
 0x3c5   :  { %6486 = vmatpush.msrb.mxu0 %v13381_v56  ;;  %6509 = vmatpush.msrb.mxu1 %v5419_v61  ;;  %v13469_v34 = vpop.f32.mrf.mxu2  ;;  %v13471_v15 = vpop.f32.mrf.mxu3 }
 0x3c6   :  { %15274 = vst [vmem:[#allocation14_spill] sm:$0xff] %v13469_v34  ;;  %6532 = vmatpush.msrb.mxu2 %v5420_v27  ;;  %6555 = vmatpush.msrb.mxu3 %v13452_v33 }
 0x3c7   :  { %15275 = vst [vmem:[#allocation15_spill] sm:$0xff] %v13471_v15  ;;  %6487 = vmatpush.msrb.mxu0 %v13389_v59  ;;  %6510 = vmatpush.msrb.mxu1 %v5328_v60  ;;  %v15278_v15 = vld [vmem:[#allocation31_spill] sm:$0xff] }
 0x3c8   :  { %6533 = vmatpush.msrb.mxu2 %v5329_v50  ;;  %6556 = vmatpush.msrb.mxu3 %v13460_v37  ;;  %v13476_v46 = vpop.f32.mrf.mxu0  ;;  %v13478_v55 = vpop.f32.mrf.mxu1  ;;  %v4384_v4 = vadd.f32 %v15278_v15, %v12613_v40  ;;  %v15284_v15 = vld [vmem:[#allocation32_spill] sm:$0xff] }
 0x3c9   :  { %15276 = vst [vmem:[#allocation19_spill] sm:$0xff] %v13478_v55  ;;  %8734 = vmatmul.msk.f32.gmra.mxu0 %vm3183_vm2, %v13483_v25  ;;  %8736 = vmatmul.msk.f32.gmra.mxu1 %vm3183_vm2, %v13483_v25  ;;  %v15277_v55 = vld [vmem:[#allocation30_spill] sm:$0xff]  ;;  %v4404_v63 = vadd.f32 %v15284_v15, %v12643_v26 }
 0x3ca   :  { %8738 = vmatmul.msk.f32.gmra.mxu2 %vm3183_vm2, %v13483_v25  ;;  %8740 = vmatmul.msk.f32.gmra.mxu3 %vm3183_vm2, %v13483_v25  ;;  %v4361_v34 = vadd.f32 %v15277_v55, %v12613_v40 }
 0x3cb   :  { %6488 = vmatpush.msrb.mxu0 %v13379_v10  ;;  %6511 = vmatpush.msrb.mxu1 %v13381_v56  ;;  %v4407_v10 = vadd.f32 %v12659_v51, %v12613_v40  ;;  %v15279_v56 = vld [vmem:[#allocation23_spill] sm:$0xff] }
 0x3cc   :  { %6534 = vmatpush.msrb.mxu2 %v5419_v61  ;;  %6557 = vmatpush.msrb.mxu3 %v5420_v27  ;;  %v4335_v61 = vadd.f32 %v15279_v56, %v12643_v26  ;;  %v4358_v27 = vadd.f32 %v15280_v9, %v12643_v26  ;;  %v13525_v56 = vmax.f32 %v4384_v4, 0.0 }
 0x3cd   :  { %6489 = vmatpush.msrb.mxu0 %v13387_v48  ;;  %6512 = vmatpush.msrb.mxu1 %v13389_v59  ;;  %v15283_v48 = vld [vmem:[#allocation27_spill] sm:$0xff]  ;;  %v13527_v9 = vmax.f32 %v4407_v10, 0.0 }
 0x3ce   :  { %6535 = vmatpush.msrb.mxu2 %v5328_v60  ;;  %6558 = vmatpush.msrb.mxu3 %v5329_v50  ;;  %v4381_v59 = vadd.f32 %v15283_v48, %v12643_v26  ;;  %v5423_v60 = vmax.f32 %v4338_v36, 0.0  ;;  %v5424_v50 = vmax.f32 %v4361_v34, 0.0  ;;  %v5332_v48 = vmax.f32 %v4335_v61, 0.0 }
 0x3cf   :  { %v13509_v28 = vpop.f32.mrf.mxu2  ;;  %v13511_v55 = vpop.f32.mrf.mxu3  ;;  %v5333_v15 = vmax.f32 %v4358_v27, 0.0  ;;  %v13535_v36 = vmax.f32 %v4404_v63, 0.0  ;;  %v4430_v27 = vadd.f32 %v12661_v8, %v12613_v40  ;;  %v15291_v8 = vld [vmem:[#allocation20_spill] sm:$0xff] }
 0x3d0   :  { %15281 = vst [vmem:[#allocation12_spill] sm:$0xff] %v13509_v28  ;;  %v13517_v35 = vpop.f32.mrf.mxu0  ;;  %v13519_v51 = vpop.f32.mrf.mxu1  ;;  %v13533_v34 = vmax.f32 %v4381_v59, 0.0  ;;  %v4453_v59 = vadd.f32 %v12709_v44, %v12613_v40  ;;  %v15289_v28 = vld [vmem:[#allocation39_spill] sm:$0xff] }
 0x3d1   :  { %15282 = vst [vmem:[#allocation13_spill] sm:$0xff] %v13511_v55  ;;  %8741 = vmatmul.msk.f32.vlgmr.msra.gmra.mxu0 %vm3183_vm2, %v13446_v58  ;;  %8743 = vmatmul.msk.f32.vlgmr.msra.gmra.mxu1 %vm3183_vm2, %v13446_v58  ;;  %v4476_v55 = vadd.f32 %v15289_v28, %v12613_v40  ;;  %v15293_v28 = vld [vmem:[#allocation34_spill] sm:$0xff] }
 0x3d2   :  { %15285 = vst [vmem:[#allocation5_spill] sm:$0xff] %v13517_v35  ;;  %8745 = vmatmul.msk.f32.vlgmr.msra.gmra.mxu2 %vm3183_vm2, %v13446_v58  ;;  %8747 = vmatmul.msk.f32.vlgmr.msra.gmra.mxu3 %vm3183_vm2, %v13446_v58 }
 0x3d3   :  { %15286 = vst [vmem:[#allocation24_spill] sm:$0xff] %v13519_v51  ;;  %6576 = vmatpush.msra.mxu0 %v5423_v60  ;;  %6599 = vmatpush.msra.mxu1 %v5424_v50 }
 0x3d4   :  { %6622 = vmatpush.msra.mxu2 %v13525_v56  ;;  %6645 = vmatpush.msra.mxu3 %v13527_v9 }
 0x3d5   :  { %6577 = vmatpush.msra.mxu0 %v5332_v48  ;;  %6600 = vmatpush.msra.mxu1 %v5333_v15 }
 0x3d6   :  { %6623 = vmatpush.msra.mxu2 %v13533_v34  ;;  %6646 = vmatpush.msra.mxu3 %v13535_v36 }
 0x3d7   :  { %6578 = vmatpush.msra.mxu0 %v13454_v52  ;;  %6601 = vmatpush.msra.mxu1 %v5423_v60  ;;  %v13542_v4 = vpop.f32.mrf.mxu2  ;;  %v13544_v10 = vpop.f32.mrf.mxu3 }
 0x3d8   :  { %6624 = vmatpush.msra.mxu2 %v5424_v50  ;;  %6647 = vmatpush.msra.mxu3 %v13525_v56 }
 0x3d9   :  { %6579 = vmatpush.msra.mxu0 %v13462_v6  ;;  %6602 = vmatpush.msra.mxu1 %v5332_v48 }
 0x3da   :  { %6625 = vmatpush.msra.mxu2 %v5333_v15  ;;  %6648 = vmatpush.msra.mxu3 %v13533_v34  ;;  %v13549_v63 = vpop.f32.mrf.mxu0  ;;  %v13551_v61 = vpop.f32.mrf.mxu1 }
 0x3db   :  { %15287 = vst [vmem:[#allocation25_spill] sm:$0xff] %v13549_v63  ;;  %8742 = vmatmul.msk.f32.gmra.mxu0 %vm3183_vm2, %v13483_v25  ;;  %8744 = vmatmul.msk.f32.gmra.mxu1 %vm3183_vm2, %v13483_v25  ;;  %v4496_v63 = vadd.f32 %v15293_v28, %v12643_v26 }
 0x3dc   :  { %15288 = vst [vmem:[#allocation22_spill] sm:$0xff] %v13551_v61  ;;  %8746 = vmatmul.msk.f32.gmra.mxu2 %vm3183_vm2, %v13483_v25  ;;  %8748 = vmatmul.msk.f32.gmra.mxu3 %vm3183_vm2, %v13483_v25 }
 0x3dd   :  { %6580 = vmatpush.msra.mxu0 %v13452_v33  ;;  %6603 = vmatpush.msra.mxu1 %v13454_v52  ;;  %v4499_v33 = vadd.f32 %v12735_v30, %v12613_v40  ;;  %v15290_v52 = vld [vmem:[#allocation33_spill] sm:$0xff] }
 0x3de   :  { %6626 = vmatpush.msra.mxu2 %v5423_v60  ;;  %6649 = vmatpush.msra.mxu3 %v5424_v50  ;;  %v4427_v60 = vadd.f32 %v15290_v52, %v12643_v26  ;;  %v4450_v50 = vadd.f32 %v15291_v8, %v12643_v26  ;;  %v13593_v52 = vmax.f32 %v4476_v55, 0.0 }
 0x3df   :  { %6581 = vmatpush.msra.mxu0 %v13460_v37  ;;  %6604 = vmatpush.msra.mxu1 %v13462_v6  ;;  %v15292_v6 = vld [vmem:[#allocation21_spill] sm:$0xff]  ;;  %v13595_v8 = vmax.f32 %v4499_v33, 0.0 }
 0x3e0   :  { %6627 = vmatpush.msra.mxu2 %v5332_v48  ;;  %6650 = vmatpush.msra.mxu3 %v5333_v15  ;;  %v4473_v37 = vadd.f32 %v15292_v6, %v12643_v26  ;;  %v5427_v48 = vmax.f32 %v4430_v27, 0.0  ;;  %v5428_v15 = vmax.f32 %v4453_v59, 0.0  ;;  %v5336_v6 = vmax.f32 %v4427_v60, 0.0 }
 0x3e1   :  { %v13577_v35 = vpop.f32.mrf.mxu2  ;;  %v13579_v44 = vpop.f32.mrf.mxu3  ;;  %v5337_v28 = vmax.f32 %v4450_v50, 0.0  ;;  %v13603_v59 = vmax.f32 %v4496_v63, 0.0  ;;  %v4522_v50 = vadd.f32 %v12737_v54, %v12613_v40  ;;  %v15300_v54 = vld [vmem:[#allocation42_spill] sm:$0xff] }
 0x3e2   :  { %v13585_v51 = vpop.f32.mrf.mxu0  ;;  %v13587_v30 = vpop.f32.mrf.mxu1  ;;  %v13601_v27 = vmax.f32 %v4473_v37, 0.0  ;;  %v4545_v37 = vadd.f32 %v12775_v13, %v12613_v40 }
 0x3e3   :  { %15294 = vst [vmem:[#allocation30_spill] sm:$0xff] %v13587_v30  ;;  %8749 = vmatmul.msk.f32.vlgmr.msrb.gmra.mxu0 %vm3183_vm2, %v13446_v58  ;;  %8751 = vmatmul.msk.f32.vlgmr.msrb.gmra.mxu1 %vm3183_vm2, %v13446_v58  ;;  %v15298_v30 = vld [vmem:[#allocation40_spill] sm:$0xff] }
 0x3e4   :  { %8753 = vmatmul.msk.f32.vlgmr.msrb.gmra.mxu2 %vm3183_vm2, %v13446_v58  ;;  %8755 = vmatmul.msk.f32.vlgmr.msrb.gmra.mxu3 %vm3183_vm2, %v13446_v58 }
 0x3e5   :  { %6668 = vmatpush.msrb.mxu0 %v5427_v48  ;;  %6691 = vmatpush.msrb.mxu1 %v5428_v15 }
 0x3e6   :  { %6714 = vmatpush.msrb.mxu2 %v13593_v52  ;;  %6737 = vmatpush.msrb.mxu3 %v13595_v8 }
 0x3e7   :  { %6669 = vmatpush.msrb.mxu0 %v5336_v6  ;;  %6692 = vmatpush.msrb.mxu1 %v5337_v28 }
 0x3e8   :  { %6715 = vmatpush.msrb.mxu2 %v13601_v27  ;;  %6738 = vmatpush.msrb.mxu3 %v13603_v59 }
 0x3e9   :  { %6670 = vmatpush.msrb.mxu0 %v13527_v9  ;;  %6693 = vmatpush.msrb.mxu1 %v5427_v48  ;;  %v13610_v55 = vpop.f32.mrf.mxu2  ;;  %v13612_v33 = vpop.f32.mrf.mxu3 }
 0x3ea   :  { %15295 = vst [vmem:[#allocation31_spill] sm:$0xff] %v13610_v55  ;;  %6716 = vmatpush.msrb.mxu2 %v5428_v15  ;;  %6739 = vmatpush.msrb.mxu3 %v13593_v52 }
 0x3eb   :  { %15296 = vst [vmem:[#allocation23_spill] sm:$0xff] %v13612_v33  ;;  %6671 = vmatpush.msrb.mxu0 %v13535_v36  ;;  %6694 = vmatpush.msrb.mxu1 %v5336_v6 }
 0x3ec   :  { %6717 = vmatpush.msrb.mxu2 %v5337_v28  ;;  %6740 = vmatpush.msrb.mxu3 %v13601_v27  ;;  %v13617_v63 = vpop.f32.mrf.mxu0  ;;  %v13619_v60 = vpop.f32.mrf.mxu1 }
 0x3ed   :  { %15297 = vst [vmem:[#allocation26_spill] sm:$0xff] %v13619_v60  ;;  %8750 = vmatmul.msk.f32.gmra.mxu0 %vm3183_vm2, %v13483_v25  ;;  %8752 = vmatmul.msk.f32.gmra.mxu1 %vm3183_vm2, %v13483_v25  ;;  %v4568_v60 = vadd.f32 %v15298_v30, %v12613_v40  ;;  %v15303_v30 = vld [vmem:[#allocation41_spill] sm:$0xff] }
 0x3ee   :  { %8754 = vmatmul.msk.f32.gmra.mxu2 %vm3183_vm2, %v13483_v25  ;;  %8756 = vmatmul.msk.f32.gmra.mxu3 %vm3183_vm2, %v13483_v25  ;;  %v4588_v33 = vadd.f32 %v15303_v30, %v12643_v26 }
 0x3ef   :  { %6672 = vmatpush.msrb.mxu0 %v13525_v56  ;;  %6695 = vmatpush.msrb.mxu1 %v13527_v9  ;;  %v4591_v56 = vadd.f32 %v12808_v12, %v12613_v40  ;;  %v15299_v9 = vld [vmem:[#allocation35_spill] sm:$0xff] }
 0x3f0   :  { %6718 = vmatpush.msrb.mxu2 %v5427_v48  ;;  %6741 = vmatpush.msrb.mxu3 %v5428_v15  ;;  %v4519_v48 = vadd.f32 %v15299_v9, %v12643_v26  ;;  %v4542_v15 = vadd.f32 %v15300_v54, %v12643_v26  ;;  %v13661_v9 = vmax.f32 %v4568_v60, 0.0 }
 0x3f1   :  { %6673 = vmatpush.msrb.mxu0 %v13533_v34  ;;  %6696 = vmatpush.msrb.mxu1 %v13535_v36  ;;  %v15302_v34 = vld [vmem:[#allocation47_spill] sm:$0xff]  ;;  %v13663_v54 = vmax.f32 %v4591_v56, 0.0 }
 0x3f2   :  { %6719 = vmatpush.msrb.mxu2 %v5336_v6  ;;  %6742 = vmatpush.msrb.mxu3 %v5337_v28  ;;  %v4565_v36 = vadd.f32 %v15302_v34, %v12643_v26  ;;  %v5431_v6 = vmax.f32 %v4522_v50, 0.0  ;;  %v5432_v28 = vmax.f32 %v4545_v37, 0.0  ;;  %v5340_v34 = vmax.f32 %v4519_v48, 0.0 }
 0x3f3   :  { %v13645_v55 = vpop.f32.mrf.mxu2  ;;  %v13647_v13 = vpop.f32.mrf.mxu3  ;;  %v5341_v30 = vmax.f32 %v4542_v15, 0.0  ;;  %v13671_v37 = vmax.f32 %v4588_v33, 0.0  ;;  %v4614_v15 = vadd.f32 %v12810_v3, %v12613_v40  ;;  %v4634_v3 = vadd.f32 %v12816_v17, %v12643_v26 }
 0x3f4   :  { %15301 = vst [vmem:[#allocation27_spill] sm:$0xff] %v13645_v55  ;;  %v13653_v61 = vpop.f32.mrf.mxu0  ;;  %v13655_v12 = vpop.f32.mrf.mxu1  ;;  %v13669_v50 = vmax.f32 %v4565_v36, 0.0  ;;  %v4637_v36 = vadd.f32 %v12853_v7, %v12613_v40  ;;  %v4660_v55 = vadd.f32 %v12855_v22, %v12613_v40  ;;  %v4680_v22 = vadd.f32 %v12841_v14, %v12643_v26 }
 0x3f5   :  { %8757 = vmatmul.msk.f32.vlgmr.msra.gmra.mxu0 %vm3183_vm2, %v13446_v58  ;;  %8759 = vmatmul.msk.f32.vlgmr.msra.gmra.mxu1 %vm3183_vm2, %v13446_v58  ;;  %v5345_v14 = vmax.f32 %v4634_v3, 0.0 }
 0x3f6   :  { %8761 = vmatmul.msk.f32.vlgmr.msra.gmra.mxu2 %vm3183_vm2, %v13446_v58  ;;  %8763 = vmatmul.msk.f32.vlgmr.msra.gmra.mxu3 %vm3183_vm2, %v13446_v58  ;;  %v13729_v17 = vmax.f32 %v4660_v55, 0.0 }
 0x3f7   :  { %6760 = vmatpush.msra.mxu0 %v5431_v6  ;;  %6783 = vmatpush.msra.mxu1 %v5432_v28 }
 0x3f8   :  { %6806 = vmatpush.msra.mxu2 %v13661_v9  ;;  %6829 = vmatpush.msra.mxu3 %v13663_v54 }
 0x3f9   :  { %6761 = vmatpush.msra.mxu0 %v5340_v34  ;;  %6784 = vmatpush.msra.mxu1 %v5341_v30 }
 0x3fa   :  { %6807 = vmatpush.msra.mxu2 %v13669_v50  ;;  %6830 = vmatpush.msra.mxu3 %v13671_v37 }
 0x3fb   :  { %6762 = vmatpush.msra.mxu0 %v13595_v8  ;;  %6785 = vmatpush.msra.mxu1 %v5431_v6  ;;  %v13678_v60 = vpop.f32.mrf.mxu2  ;;  %v13680_v56 = vpop.f32.mrf.mxu3 }
 0x3fc   :  { %6808 = vmatpush.msra.mxu2 %v5432_v28  ;;  %6831 = vmatpush.msra.mxu3 %v13661_v9 }
 0x3fd   :  { %6763 = vmatpush.msra.mxu0 %v13603_v59  ;;  %6786 = vmatpush.msra.mxu1 %v5340_v34 }
 0x3fe   :  { %6809 = vmatpush.msra.mxu2 %v5341_v30  ;;  %6832 = vmatpush.msra.mxu3 %v13669_v50  ;;  %v13685_v33 = vpop.f32.mrf.mxu0  ;;  %v13687_v48 = vpop.f32.mrf.mxu1 }
 0x3ff   :  { %8758 = vmatmul.msk.f32.gmra.mxu0 %vm3183_vm2, %v13483_v25  ;;  %8760 = vmatmul.msk.f32.gmra.mxu1 %vm3183_vm2, %v13483_v25 }
 0x400   :  { %8762 = vmatmul.msk.f32.gmra.mxu2 %vm3183_vm2, %v13483_v25  ;;  %8764 = vmatmul.msk.f32.gmra.mxu3 %vm3183_vm2, %v13483_v25 }
 0x401   :  { %6764 = vmatpush.msra.mxu0 %v13593_v52  ;;  %6787 = vmatpush.msra.mxu1 %v13595_v8  ;;  %v4683_v52 = vadd.f32 %v12881_v0, %v12613_v40  ;;  %v15304_v8 = vld [vmem:[#allocation29_spill] sm:$0xff] }
 0x402   :  { %6810 = vmatpush.msra.mxu2 %v5431_v6  ;;  %6833 = vmatpush.msra.mxu3 %v5432_v28  ;;  %v4611_v6 = vadd.f32 %v15304_v8, %v12643_v26 }
 0x403   :  { %6765 = vmatpush.msra.mxu0 %v13601_v27  ;;  %6788 = vmatpush.msra.mxu1 %v13603_v59  ;;  %v4657_v27 = vadd.f32 %v12818_v11, %v12643_v26  ;;  %v13731_v8 = vmax.f32 %v4683_v52, 0.0 }
 0x404   :  { %6811 = vmatpush.msra.mxu2 %v5340_v34  ;;  %6834 = vmatpush.msra.mxu3 %v5341_v30  ;;  %v5435_v34 = vmax.f32 %v4614_v15, 0.0  ;;  %v5436_v30 = vmax.f32 %v4637_v36, 0.0  ;;  %v5344_v11 = vmax.f32 %v4611_v6, 0.0  ;;  %v13739_v36 = vmax.f32 %v4680_v22, 0.0 }
 0x405   :  { %v13713_v28 = vpop.f32.mrf.mxu2  ;;  %v13715_v7 = vpop.f32.mrf.mxu3  ;;  %v13737_v15 = vmax.f32 %v4657_v27, 0.0  ;;  %v4706_v27 = vadd.f32 %v12883_v47, %v12613_v40  ;;  %v4729_v22 = vadd.f32 %v12921_v18, %v12613_v40  ;;  %v4726_v47 = vadd.f32 %v12889_v5, %v12643_v26 }
 0x406   :  { %v13721_v59 = vpop.f32.mrf.mxu0  ;;  %v13723_v0 = vpop.f32.mrf.mxu1 }
 0x407   :  { %15305 = vst [vmem:[#allocation32_spill] sm:$0xff] %v13723_v0  ;;  %8765 = vmatmul.msk.f32.vlgmr.msrb.gmra.mxu0 %vm3183_vm2, %v13446_v58  ;;  %8767 = vmatmul.msk.f32.vlgmr.msrb.gmra.mxu1 %vm3183_vm2, %v13446_v58  ;;  %v4752_v0 = vadd.f32 %v12923_v39, %v12613_v40  ;;  %v4772_v39 = vadd.f32 %v12914_v57, %v12643_v26  ;;  %v5349_v57 = vmax.f32 %v4726_v47, 0.0 }
 0x408   :  { %8769 = vmatmul.msk.f32.vlgmr.msrb.gmra.mxu2 %vm3183_vm2, %v13446_v58  ;;  %8771 = vmatmul.msk.f32.vlgmr.msrb.gmra.mxu3 %vm3183_vm2, %v13446_v58  ;;  %v4798_v47 = vadd.f32 %v12954_v23, %v12613_v40  ;;  %v4818_v23 = vadd.f32 %v12960_v16, %v12643_v26 }
 0x409   :  { %6852 = vmatpush.msrb.mxu0 %v5435_v34  ;;  %6875 = vmatpush.msrb.mxu1 %v5436_v30 }
 0x40a   :  { %6898 = vmatpush.msrb.mxu2 %v13729_v17  ;;  %6921 = vmatpush.msrb.mxu3 %v13731_v8 }
 0x40b   :  { %6853 = vmatpush.msrb.mxu0 %v5344_v11  ;;  %6876 = vmatpush.msrb.mxu1 %v5345_v14 }
 0x40c   :  { %6899 = vmatpush.msrb.mxu2 %v13737_v15  ;;  %6922 = vmatpush.msrb.mxu3 %v13739_v36 }
 0x40d   :  { %6854 = vmatpush.msrb.mxu0 %v13663_v54  ;;  %6877 = vmatpush.msrb.mxu1 %v5435_v34  ;;  %v13746_v55 = vpop.f32.mrf.mxu2  ;;  %v13748_v52 = vpop.f32.mrf.mxu3 }
 0x40e   :  { %15306 = vst [vmem:[#allocation39_spill] sm:$0xff] %v13746_v55  ;;  %6900 = vmatpush.msrb.mxu2 %v5436_v30  ;;  %6923 = vmatpush.msrb.mxu3 %v13729_v17 }
 0x40f   :  { %6855 = vmatpush.msrb.mxu0 %v13671_v37  ;;  %6878 = vmatpush.msrb.mxu1 %v5344_v11 }
 0x410   :  { %6901 = vmatpush.msrb.mxu2 %v5345_v14  ;;  %6924 = vmatpush.msrb.mxu3 %v13737_v15  ;;  %v13753_v6 = vpop.f32.mrf.mxu0  ;;  %v13755_v3 = vpop.f32.mrf.mxu1 }
 0x411   :  { %15307 = vst [vmem:[#allocation33_spill] sm:$0xff] %v13755_v3  ;;  %8766 = vmatmul.msk.f32.gmra.mxu0 %vm3183_vm2, %v13483_v25  ;;  %8768 = vmatmul.msk.f32.gmra.mxu1 %vm3183_vm2, %v13483_v25 }
 0x412   :  { %8770 = vmatmul.msk.f32.gmra.mxu2 %vm3183_vm2, %v13483_v25  ;;  %8772 = vmatmul.msk.f32.gmra.mxu3 %vm3183_vm2, %v13483_v25 }
 0x413   :  { %6856 = vmatpush.msrb.mxu0 %v13661_v9  ;;  %6879 = vmatpush.msrb.mxu1 %v13663_v54  ;;  %v4775_v9 = vadd.f32 %v12952_v31, %v12613_v40  ;;  %v4703_v54 = vadd.f32 %v12843_v29, %v12643_v26  ;;  %v13797_v29 = vmax.f32 %v4752_v0, 0.0 }
 0x414   :  { %6902 = vmatpush.msrb.mxu2 %v5435_v34  ;;  %6925 = vmatpush.msrb.mxu3 %v5436_v30  ;;  %v5439_v30 = vmax.f32 %v4706_v27, 0.0  ;;  %v13807_v27 = vmax.f32 %v4772_v39, 0.0  ;;  %v4844_v39 = vadd.f32 %v12994_v49, %v12613_v40  ;;  %v4864_v49 = vadd.f32 %v12985_v43, %v12643_v26 }
 0x415   :  { %6857 = vmatpush.msrb.mxu0 %v13669_v50  ;;  %6880 = vmatpush.msrb.mxu1 %v13671_v37  ;;  %v4749_v50 = vadd.f32 %v12891_v42, %v12643_v26  ;;  %v13799_v5 = vmax.f32 %v4775_v9, 0.0  ;;  %v5348_v42 = vmax.f32 %v4703_v54, 0.0  ;;  %v5353_v43 = vmax.f32 %v4818_v23, 0.0 }
 0x416   :  { %6903 = vmatpush.msrb.mxu2 %v5344_v11  ;;  %6926 = vmatpush.msrb.mxu3 %v5345_v14  ;;  %v5440_v11 = vmax.f32 %v4729_v22, 0.0  ;;  %v13865_v16 = vmax.f32 %v4844_v39, 0.0 }
 0x417   :  { %v13781_v34 = vpop.f32.mrf.mxu2  ;;  %v13783_v18 = vpop.f32.mrf.mxu3  ;;  %v13805_v14 = vmax.f32 %v4749_v50, 0.0  ;;  %v4821_v50 = vadd.f32 %v12992_v32, %v12613_v40 }
 0x418   :  { %15308 = vst [vmem:[#allocation20_spill] sm:$0xff] %v13781_v34  ;;  %v13789_v37 = vpop.f32.mrf.mxu0  ;;  %v13791_v31 = vpop.f32.mrf.mxu1 }
 0x419   :  { %8773 = vmatmul.msk.f32.vlgmr.msra.gmra.mxu0 %vm3183_vm2, %v13446_v58  ;;  %8775 = vmatmul.msk.f32.vlgmr.msra.gmra.mxu1 %vm3183_vm2, %v13446_v58 }
 0x41a   :  { %8777 = vmatmul.msk.f32.vlgmr.msra.gmra.mxu2 %vm3183_vm2, %v13446_v58  ;;  %8779 = vmatmul.msk.f32.vlgmr.msra.gmra.mxu3 %vm3183_vm2, %v13446_v58 }
 0x41b   :  { %6944 = vmatpush.msra.mxu0 %v5439_v30  ;;  %6967 = vmatpush.msra.mxu1 %v5440_v11 }
 0x41c   :  { %6990 = vmatpush.msra.mxu2 %v13797_v29  ;;  %7013 = vmatpush.msra.mxu3 %v13799_v5 }
 0x41d   :  { %6945 = vmatpush.msra.mxu0 %v5348_v42  ;;  %6968 = vmatpush.msra.mxu1 %v5349_v57 }
 0x41e   :  { %6991 = vmatpush.msra.mxu2 %v13805_v14  ;;  %7014 = vmatpush.msra.mxu3 %v13807_v27 }
 0x41f   :  { %6946 = vmatpush.msra.mxu0 %v13731_v8  ;;  %6969 = vmatpush.msra.mxu1 %v5439_v30  ;;  %v13814_v0 = vpop.f32.mrf.mxu2  ;;  %v13816_v22 = vpop.f32.mrf.mxu3 }
 0x420   :  { %6992 = vmatpush.msra.mxu2 %v5440_v11  ;;  %7015 = vmatpush.msra.mxu3 %v13797_v29 }
 0x421   :  { %6947 = vmatpush.msra.mxu0 %v13739_v36  ;;  %6970 = vmatpush.msra.mxu1 %v5348_v42 }
 0x422   :  { %6993 = vmatpush.msra.mxu2 %v5349_v57  ;;  %7016 = vmatpush.msra.mxu3 %v13805_v14  ;;  %v13821_v9 = vpop.f32.mrf.mxu0  ;;  %v13823_v54 = vpop.f32.mrf.mxu1 }
 0x423   :  { %8774 = vmatmul.msk.f32.gmra.mxu0 %vm3183_vm2, %v13483_v25  ;;  %8776 = vmatmul.msk.f32.gmra.mxu1 %vm3183_vm2, %v13483_v25 }
 0x424   :  { %8778 = vmatmul.msk.f32.gmra.mxu2 %vm3183_vm2, %v13483_v25  ;;  %8780 = vmatmul.msk.f32.gmra.mxu3 %vm3183_vm2, %v13483_v25 }
 0x425   :  { %6948 = vmatpush.msra.mxu0 %v13729_v17  ;;  %6971 = vmatpush.msra.mxu1 %v13731_v8  ;;  %v4867_v17 = vadd.f32 %v13023_v24, %v12613_v40  ;;  %v15309_v8 = vld [vmem:[#allocation28_spill] sm:$0xff] }
 0x426   :  { %6994 = vmatpush.msra.mxu2 %v5439_v30  ;;  %7017 = vmatpush.msra.mxu3 %v5440_v11  ;;  %v4795_v30 = vadd.f32 %v15309_v8, %v12643_v26 }
 0x427   :  { %6949 = vmatpush.msra.mxu0 %v13737_v15  ;;  %6972 = vmatpush.msra.mxu1 %v13739_v36  ;;  %v4841_v15 = vadd.f32 %v12962_v19, %v12643_v26  ;;  %v13867_v8 = vmax.f32 %v4867_v17, 0.0 }
 0x428   :  { %6995 = vmatpush.msra.mxu2 %v5348_v42  ;;  %7018 = vmatpush.msra.mxu3 %v5349_v57  ;;  %v5443_v42 = vmax.f32 %v4798_v47, 0.0  ;;  %v5444_v57 = vmax.f32 %v4821_v50, 0.0  ;;  %v5352_v19 = vmax.f32 %v4795_v30, 0.0  ;;  %v13875_v50 = vmax.f32 %v4864_v49, 0.0 }
 0x429   :  { %v13849_v11 = vpop.f32.mrf.mxu2  ;;  %v13851_v32 = vpop.f32.mrf.mxu3  ;;  %v13873_v47 = vmax.f32 %v4841_v15, 0.0  ;;  %v4890_v15 = vadd.f32 %v13025_v1, %v12613_v40  ;;  %v4913_v49 = vadd.f32 %v13063_v53, %v12613_v40  ;;  %v4910_v1 = vadd.f32 %v13031_v2, %v12643_v26 }
 0x42a   :  { %v13857_v36 = vpop.f32.mrf.mxu0  ;;  %v13859_v24 = vpop.f32.mrf.mxu1 }
 0x42b   :  { %15310 = vst [vmem:[#allocation21_spill] sm:$0xff] %v13859_v24  ;;  %8781 = vmatmul.msk.f32.vlgmr.msrb.gmra.mxu0 %vm3183_vm2, %v13446_v58  ;;  %8783 = vmatmul.msk.f32.vlgmr.msrb.gmra.mxu1 %vm3183_vm2, %v13446_v58  ;;  %v4936_v24 = vadd.f32 %v13065_v45, %v12613_v40  ;;  %v15317_v45 = vld [vmem:[#allocation50_spill] sm:$0xff] }
 0x42c   :  { %8785 = vmatmul.msk.f32.vlgmr.msrb.gmra.mxu2 %vm3183_vm2, %v13446_v58  ;;  %8787 = vmatmul.msk.f32.vlgmr.msrb.gmra.mxu3 %vm3183_vm2, %v13446_v58 }
 0x42d   :  { %7036 = vmatpush.msrb.mxu0 %v5443_v42  ;;  %7059 = vmatpush.msrb.mxu1 %v5444_v57  ;;  %v13933_v2 = vmax.f32 %v4936_v24, 0.0 }
 0x42e   :  { %7082 = vmatpush.msrb.mxu2 %v13865_v16  ;;  %7105 = vmatpush.msrb.mxu3 %v13867_v8 }
 0x42f   :  { %7037 = vmatpush.msrb.mxu0 %v5352_v19  ;;  %7060 = vmatpush.msrb.mxu1 %v5353_v43 }
 0x430   :  { %7083 = vmatpush.msrb.mxu2 %v13873_v47  ;;  %7106 = vmatpush.msrb.mxu3 %v13875_v50 }
 0x431   :  { %7038 = vmatpush.msrb.mxu0 %v13799_v5  ;;  %7061 = vmatpush.msrb.mxu1 %v5443_v42  ;;  %v13882_v39 = vpop.f32.mrf.mxu2  ;;  %v13884_v17 = vpop.f32.mrf.mxu3 }
 0x432   :  { %15311 = vst [vmem:[#allocation34_spill] sm:$0xff] %v13882_v39  ;;  %7084 = vmatpush.msrb.mxu2 %v5444_v57  ;;  %7107 = vmatpush.msrb.mxu3 %v13865_v16  ;;  %v15324_v39 = vld [vmem:[#allocation45_spill] sm:$0xff] }
 0x433   :  { %15312 = vst [vmem:[#allocation40_spill] sm:$0xff] %v13884_v17  ;;  %7039 = vmatpush.msrb.mxu0 %v13807_v27  ;;  %7062 = vmatpush.msrb.mxu1 %v5352_v19  ;;  %v15325_v17 = vld [vmem:[#allocation46_spill] sm:$0xff] }
 0x434   :  { %7085 = vmatpush.msrb.mxu2 %v5353_v43  ;;  %7108 = vmatpush.msrb.mxu3 %v13873_v47  ;;  %v13889_v30 = vpop.f32.mrf.mxu0  ;;  %v13891_v23 = vpop.f32.mrf.mxu1 }
 0x435   :  { %15313 = vst [vmem:[#allocation35_spill] sm:$0xff] %v13891_v23  ;;  %8782 = vmatmul.msk.f32.gmra.mxu0 %vm3183_vm2, %v13483_v25  ;;  %8784 = vmatmul.msk.f32.gmra.mxu1 %vm3183_vm2, %v13483_v25 }
 0x436   :  { %8786 = vmatmul.msk.f32.gmra.mxu2 %vm3183_vm2, %v13483_v25  ;;  %8788 = vmatmul.msk.f32.gmra.mxu3 %vm3183_vm2, %v13483_v25 }
 0x437   :  { %7040 = vmatpush.msrb.mxu0 %v13797_v29  ;;  %7063 = vmatpush.msrb.mxu1 %v13799_v5  ;;  %v4959_v29 = vadd.f32 %v13091_v41, %v12613_v40  ;;  %v15314_v5 = vld [vmem:[#allocation49_spill] sm:$0xff] }
 0x438   :  { %7086 = vmatpush.msrb.mxu2 %v5443_v42  ;;  %7109 = vmatpush.msrb.mxu3 %v5444_v57  ;;  %v4887_v42 = vadd.f32 %v15314_v5, %v12643_v26 }
 0x439   :  { %7041 = vmatpush.msrb.mxu0 %v13805_v14  ;;  %7064 = vmatpush.msrb.mxu1 %v13807_v27  ;;  %v4933_v14 = vadd.f32 %v13033_v62, %v12643_v26  ;;  %v4956_v27 = vadd.f32 %v15317_v45, %v12643_v26  ;;  %v13935_v5 = vmax.f32 %v4959_v29, 0.0  ;;  %v5357_v45 = vmax.f32 %v4910_v1, 0.0 }
 0x43a   :  { %7087 = vmatpush.msrb.mxu2 %v5352_v19  ;;  %7110 = vmatpush.msrb.mxu3 %v5353_v43  ;;  %v5447_v19 = vmax.f32 %v4890_v15, 0.0  ;;  %v5448_v43 = vmax.f32 %v4913_v49, 0.0  ;;  %v5356_v62 = vmax.f32 %v4887_v42, 0.0 }
 0x43b   :  { %v13917_v57 = vpop.f32.mrf.mxu2  ;;  %v13919_v53 = vpop.f32.mrf.mxu3  ;;  %v13941_v15 = vmax.f32 %v4933_v14, 0.0  ;;  %v13943_v49 = vmax.f32 %v4956_v27, 0.0  ;;  %v15323_v14 = vld [vmem:[#allocation37_spill] sm:$0xff] }
 0x43c   :  { %15315 = vst [vmem:[#allocation42_spill] sm:$0xff] %v13917_v57  ;;  %v13925_v23 = vpop.f32.mrf.mxu0  ;;  %v13927_v41 = vpop.f32.mrf.mxu1  ;;  %v4982_v27 = vadd.f32 %v15323_v14, %v12613_v40  ;;  %v5005_v57 = vadd.f32 %v15324_v39, %v12613_v40 }
 0x43d   :  { %15316 = vst [vmem:[#allocation47_spill] sm:$0xff] %v13919_v53  ;;  %8789 = vmatmul.msk.f32.vlgmr.msra.gmra.mxu0 %vm3183_vm2, %v13446_v58  ;;  %8791 = vmatmul.msk.f32.vlgmr.msra.gmra.mxu1 %vm3183_vm2, %v13446_v58  ;;  %v5028_v53 = vadd.f32 %v15325_v17, %v12613_v40  ;;  %v15330_v17 = vld [vmem:[#allocation48_spill] sm:$0xff] }
 0x43e   :  { %15318 = vst [vmem:[#allocation41_spill] sm:$0xff] %v13925_v23  ;;  %8793 = vmatmul.msk.f32.vlgmr.msra.gmra.mxu2 %vm3183_vm2, %v13446_v58  ;;  %8795 = vmatmul.msk.f32.vlgmr.msra.gmra.mxu3 %vm3183_vm2, %v13446_v58  ;;  %v15326_v23 = vld [vmem:[#allocation51_spill] sm:$0xff] }
 0x43f   :  { %15319 = vst [vmem:[#allocation29_spill] sm:$0xff] %v13927_v41  ;;  %7128 = vmatpush.msra.mxu0 %v5447_v19  ;;  %7151 = vmatpush.msra.mxu1 %v5448_v43  ;;  %v5048_v41 = vadd.f32 %v15330_v17, %v12643_v26 }
 0x440   :  { %7174 = vmatpush.msra.mxu2 %v13933_v2  ;;  %7197 = vmatpush.msra.mxu3 %v13935_v5 }
 0x441   :  { %7129 = vmatpush.msra.mxu0 %v5356_v62  ;;  %7152 = vmatpush.msra.mxu1 %v5357_v45 }
 0x442   :  { %7175 = vmatpush.msra.mxu2 %v13941_v15  ;;  %7198 = vmatpush.msra.mxu3 %v13943_v49 }
 0x443   :  { %7130 = vmatpush.msra.mxu0 %v13867_v8  ;;  %7153 = vmatpush.msra.mxu1 %v5447_v19  ;;  %v13950_v24 = vpop.f32.mrf.mxu2  ;;  %v13952_v29 = vpop.f32.mrf.mxu3 }
 0x444   :  { %15320 = vst [vmem:[#allocation28_spill] sm:$0xff] %v13950_v24  ;;  %7176 = vmatpush.msra.mxu2 %v5448_v43  ;;  %7199 = vmatpush.msra.mxu3 %v13933_v2 }
 0x445   :  { %7131 = vmatpush.msra.mxu0 %v13875_v50  ;;  %7154 = vmatpush.msra.mxu1 %v5356_v62 }
 0x446   :  { %7177 = vmatpush.msra.mxu2 %v5357_v45  ;;  %7200 = vmatpush.msra.mxu3 %v13941_v15  ;;  %v13957_v42 = vpop.f32.mrf.mxu0  ;;  %v13959_v1 = vpop.f32.mrf.mxu1 }
 0x447   :  { %15321 = vst [vmem:[#allocation49_spill] sm:$0xff] %v13957_v42  ;;  %8790 = vmatmul.msk.f32.gmra.mxu0 %vm3183_vm2, %v13483_v25  ;;  %8792 = vmatmul.msk.f32.gmra.mxu1 %vm3183_vm2, %v13483_v25 }
 0x448   :  { %15322 = vst [vmem:[#allocation50_spill] sm:$0xff] %v13959_v1  ;;  %8794 = vmatmul.msk.f32.gmra.mxu2 %vm3183_vm2, %v13483_v25  ;;  %8796 = vmatmul.msk.f32.gmra.mxu3 %vm3183_vm2, %v13483_v25 }
 0x449   :  { %7132 = vmatpush.msra.mxu0 %v13865_v16  ;;  %7155 = vmatpush.msra.mxu1 %v13867_v8  ;;  %v5051_v16 = vadd.f32 %v15326_v23, %v12613_v40  ;;  %v15327_v8 = vld [vmem:[#allocation36_spill] sm:$0xff] }
 0x44a   :  { %7178 = vmatpush.msra.mxu2 %v5447_v19  ;;  %7201 = vmatpush.msra.mxu3 %v5448_v43  ;;  %v4979_v19 = vadd.f32 %v15327_v8, %v12643_v26  ;;  %v15328_v43 = vld [vmem:[#allocation38_spill] sm:$0xff]  ;;  %v14001_v8 = vmax.f32 %v5028_v53, 0.0 }
 0x44b   :  { %7133 = vmatpush.msra.mxu0 %v13873_v47  ;;  %7156 = vmatpush.msra.mxu1 %v13875_v50  ;;  %v5002_v14 = vadd.f32 %v15328_v43, %v12643_v26  ;;  %v15329_v47 = vld [vmem:[#allocation43_spill] sm:$0xff]  ;;  %v14003_v43 = vmax.f32 %v5051_v16, 0.0 }
 0x44c   :  { %7179 = vmatpush.msra.mxu2 %v5356_v62  ;;  %7202 = vmatpush.msra.mxu3 %v5357_v45  ;;  %v5025_v50 = vadd.f32 %v15329_v47, %v12643_v26  ;;  %v5451_v62 = vmax.f32 %v4982_v27, 0.0  ;;  %v5452_v45 = vmax.f32 %v5005_v57, 0.0  ;;  %v5360_v47 = vmax.f32 %v4979_v19, 0.0 }
 0x44d   :  { %v13985_v42 = vpop.f32.mrf.mxu2  ;;  %v13987_v39 = vpop.f32.mrf.mxu3  ;;  %v5361_v17 = vmax.f32 %v5002_v14, 0.0  ;;  %v14011_v27 = vmax.f32 %v5048_v41, 0.0  ;;  %v7759_v14 = vld [vmem:[%s14878_s8 + $0x8] sm:$0xff] }
 0x44e   :  { %v13993_v3 = vpop.f32.mrf.mxu0  ;;  %v13995_v23 = vpop.f32.mrf.mxu1  ;;  %v14009_v57 = vmax.f32 %v5025_v50, 0.0  ;;  %v15335_v50 = vld [vmem:[#allocation55_spill] sm:$0xff]  ;;  %7769 = vperm.xlu2 %8850, %v7759_v14  }
 0x44f   :  { %15331 = vst [vmem:[#allocation37_spill] sm:$0xff] %v13995_v23  ;;  %8797 = vmatmul.msk.f32.vlgmr.msrb.gmra.mxu0 %vm3183_vm2, %v13446_v58  ;;  %8799 = vmatmul.msk.f32.vlgmr.msrb.gmra.mxu1 %vm3183_vm2, %v13446_v58  ;;  %v5074_v23 = vadd.f32 %v15335_v50, %v12613_v40  ;;  %v15340_v50 = vld [vmem:[#allocation52_spill] sm:$0xff] }
 0x450   :  { %8801 = vmatmul.msk.f32.vlgmr.msrb.gmra.mxu2 %vm3183_vm2, %v13446_v58  ;;  %8803 = vmatmul.msk.f32.vlgmr.msrb.gmra.mxu3 %vm3183_vm2, %v13446_v58  ;;  %v5094_v55 = vadd.f32 %v15340_v50, %v12643_v26 }
 0x451   :  { %7220 = vmatpush.msrb.mxu0 %v5451_v62  ;;  %7243 = vmatpush.msrb.mxu1 %v5452_v45 }
 0x452   :  { %7266 = vmatpush.msrb.mxu2 %v14001_v8  ;;  %7289 = vmatpush.msrb.mxu3 %v14003_v43 }
 0x453   :  { %7221 = vmatpush.msrb.mxu0 %v5360_v47  ;;  %7244 = vmatpush.msrb.mxu1 %v5361_v17 }
 0x454   :  { %7267 = vmatpush.msrb.mxu2 %v14009_v57  ;;  %7290 = vmatpush.msrb.mxu3 %v14011_v27 }
 0x455   :  { %7222 = vmatpush.msrb.mxu0 %v13935_v5  ;;  %7245 = vmatpush.msrb.mxu1 %v5451_v62  ;;  %v14018_v53 = vpop.f32.mrf.mxu2  ;;  %v14020_v16 = vpop.f32.mrf.mxu3 }
 0x456   :  { %15332 = vst [vmem:[#allocation45_spill] sm:$0xff] %v14018_v53  ;;  %7268 = vmatpush.msrb.mxu2 %v5452_v45  ;;  %7291 = vmatpush.msrb.mxu3 %v14001_v8 }
 0x457   :  { %15333 = vst [vmem:[#allocation46_spill] sm:$0xff] %v14020_v16  ;;  %7223 = vmatpush.msrb.mxu0 %v13943_v49  ;;  %7246 = vmatpush.msrb.mxu1 %v5360_v47 }
 0x458   :  { %7269 = vmatpush.msrb.mxu2 %v5361_v17  ;;  %7292 = vmatpush.msrb.mxu3 %v14009_v57  ;;  %v14025_v41 = vpop.f32.mrf.mxu0  ;;  %v14027_v19 = vpop.f32.mrf.mxu1 }
 0x459   :  { %15334 = vst [vmem:[#allocation51_spill] sm:$0xff] %v14027_v19  ;;  %8798 = vmatmul.msk.f32.gmra.mxu0 %vm3183_vm2, %v13483_v25  ;;  %8800 = vmatmul.msk.f32.gmra.mxu1 %vm3183_vm2, %v13483_v25  ;;  %v15336_v19 = vld [vmem:[#allocation62_spill] sm:$0xff] }
 0x45a   :  { %8802 = vmatmul.msk.f32.gmra.mxu2 %vm3183_vm2, %v13483_v25  ;;  %8804 = vmatmul.msk.f32.gmra.mxu3 %vm3183_vm2, %v13483_v25  ;;  %v5097_v53 = vadd.f32 %v15336_v19, %v12613_v40 }
 0x45b   :  { %7224 = vmatpush.msrb.mxu0 %v13933_v2  ;;  %7247 = vmatpush.msrb.mxu1 %v13935_v5  ;;  %v15337_v2 = vld [vmem:[#allocation66_spill] sm:$0xff] }
 0x45c   :  { %7270 = vmatpush.msrb.mxu2 %v5451_v62  ;;  %7293 = vmatpush.msrb.mxu3 %v5452_v45  ;;  %v5120_v16 = vadd.f32 %v15337_v2, %v12613_v40  ;;  %v15338_v5 = vld [vmem:[#allocation54_spill] sm:$0xff]  ;;  %v15339_v45 = vld [vmem:[#allocation44_spill] sm:$0xff]  ;;  %v15344_v2 = vld [vmem:[#allocation59_spill] sm:$0xff] }
 0x45d   :  { %7225 = vmatpush.msrb.mxu0 %v13941_v15  ;;  %7248 = vmatpush.msrb.mxu1 %v13943_v49  ;;  %v5143_v62 = vadd.f32 %v15338_v5, %v12613_v40  ;;  %v5071_v1 = vadd.f32 %v15339_v45, %v12643_v26  ;;  %v15343_v15 = vld [vmem:[#allocation53_spill] sm:$0xff]  ;;  %v5140_v34 = vadd.f32 %v15344_v2, %v12643_v26  ;;  %v5456_v45 = vmax.f32 %v5097_v53, 0.0 }
 0x45e   :  { %7271 = vmatpush.msrb.mxu2 %v5360_v47  ;;  %7294 = vmatpush.msrb.mxu3 %v5361_v17  ;;  %v5117_v49 = vadd.f32 %v15343_v15, %v12643_v26  ;;  %v5455_v17 = vmax.f32 %v5074_v23, 0.0  ;;  %v14072_v50 = vmax.f32 %v5120_v16, 0.0  ;;  %v5365_v2 = vmax.f32 %v5094_v55, 0.0  ;;  %v8150_v16 = vld [vmem:[%s14881_s10 + $0x8] sm:$0x3] }
 0x45f   :  { %v14056_v24 = vpop.f32.mrf.mxu2  ;;  %v14058_v19 = vpop.f32.mrf.mxu3  ;;  %v14074_v14 = vmax.f32 %v5143_v62, 0.0  ;;  %v5364_v15 = vmax.f32 %v5071_v1, 0.0  ;;  %v14082_v53 = vmax.f32 %v5140_v34, 0.0  ;;  %v15350_v62 = vld [vmem:[#allocation56_spill] sm:$0xff]  ;;  %8158 = vperm.xlu2 %8850, %v8150_v16   ;;  %v14142_v16 = vld [vmem:[%s14882_s5] sm:$0xff] }
 0x460   :  { %15341 = vst [vmem:[#allocation36_spill] sm:$0xff] %v14056_v24  ;;  %v14064_v5 = vpop.f32.mrf.mxu0  ;;  %v14066_v47 = vpop.f32.mrf.mxu1  ;;  %v14080_v23 = vmax.f32 %v5117_v49, 0.0  ;;  %v5166_v49 = vadd.f32 %v15350_v62, %v12613_v40  ;;  %v15351_v24 = vld [vmem:[#allocation4_spill] sm:$0xff]  ;;  %v15354_v62 = vld [vmem:[#allocation57_spill] sm:$0xff] }
 0x461   :  { %15342 = vst [vmem:[#allocation38_spill] sm:$0xff] %v14058_v19  ;;  %8805 = vmatmul.msk.f32.vlgmr.msra.gmra.mxu0 %vm3183_vm2, %v13446_v58  ;;  %8807 = vmatmul.msk.f32.vlgmr.msra.gmra.mxu1 %vm3183_vm2, %v13446_v58  ;;  %v5189_v19 = vadd.f32 %v15351_v24, %v12613_v40 }
 0x462   :  { %15345 = vst [vmem:[#allocation43_spill] sm:$0xff] %v14064_v5  ;;  %8809 = vmatmul.msk.f32.vlgmr.msra.gmra.mxu2 %vm3183_vm2, %v13446_v58  ;;  %8811 = vmatmul.msk.f32.vlgmr.msra.gmra.mxu3 %vm3183_vm2, %v13446_v58  ;;  %v5186_v5 = vadd.f32 %v15354_v62, %v12643_v26 }
 0x463   :  { %15346 = vst [vmem:[#allocation48_spill] sm:$0xff] %v14066_v47  ;;  %7312 = vmatpush.msra.mxu0 %v5455_v17  ;;  %7335 = vmatpush.msra.mxu1 %v5456_v45 }
 0x464   :  { %7358 = vmatpush.msra.mxu2 %v14072_v50  ;;  %7381 = vmatpush.msra.mxu3 %v14074_v14 }
 0x465   :  { %7313 = vmatpush.msra.mxu0 %v5364_v15  ;;  %7336 = vmatpush.msra.mxu1 %v5365_v2 }
 0x466   :  { %7359 = vmatpush.msra.mxu2 %v14080_v23  ;;  %7382 = vmatpush.msra.mxu3 %v14082_v53 }
 0x467   :  { %7314 = vmatpush.msra.mxu0 %v14003_v43  ;;  %7337 = vmatpush.msra.mxu1 %v5455_v17  ;;  %v14089_v58 = vpop.f32.mrf.mxu2  ;;  %v14091_v55 = vpop.f32.mrf.mxu3 }
 0x468   :  { %15347 = vst [vmem:[#allocation55_spill] sm:$0xff] %v14089_v58  ;;  %7360 = vmatpush.msra.mxu2 %v5456_v45  ;;  %7383 = vmatpush.msra.mxu3 %v14072_v50 }
 0x469   :  { %7315 = vmatpush.msra.mxu0 %v14011_v27  ;;  %7338 = vmatpush.msra.mxu1 %v5364_v15 }
 0x46a   :  { %7361 = vmatpush.msra.mxu2 %v5365_v2  ;;  %7384 = vmatpush.msra.mxu3 %v14080_v23  ;;  %v14096_v34 = vpop.f32.mrf.mxu0  ;;  %v14098_v1 = vpop.f32.mrf.mxu1 }
 0x46b   :  { %15348 = vst [vmem:[#allocation62_spill] sm:$0xff] %v14096_v34  ;;  %8806 = vmatmul.msk.f32.gmra.mxu0 %vm3183_vm2, %v13483_v25  ;;  %8808 = vmatmul.msk.f32.gmra.mxu1 %vm3183_vm2, %v13483_v25 }
 0x46c   :  { %15349 = vst [vmem:[#allocation66_spill] sm:$0xff] %v14098_v1  ;;  %8810 = vmatmul.msk.f32.gmra.mxu2 %vm3183_vm2, %v13483_v25  ;;  %8812 = vmatmul.msk.f32.gmra.mxu3 %vm3183_vm2, %v13483_v25  ;;  %v15352_v25 = vld [vmem:[#allocation71_spill] sm:$0xff] }
 0x46d   :  { %7316 = vmatpush.msra.mxu0 %v14001_v8  ;;  %7339 = vmatpush.msra.mxu1 %v14003_v43  ;;  %v5212_v8 = vadd.f32 %v15352_v25, %v12613_v40  ;;  %v5235_v43 = vadd.f32 %v13295_v38, %v12613_v40  ;;  %v15357_v25 = vld [vmem:[#allocation2_spill] sm:$0xff] }
 0x46e   :  { %7362 = vmatpush.msra.mxu2 %v5455_v17  ;;  %7385 = vmatpush.msra.mxu3 %v5456_v45  ;;  %v15353_v17 = vld [vmem:[#allocation61_spill] sm:$0xff]  ;;  %v5232_v47 = vadd.f32 %v15357_v25, %v12643_v26 }
 0x46f   :  { %7317 = vmatpush.msra.mxu0 %v14009_v57  ;;  %7340 = vmatpush.msra.mxu1 %v14011_v27  ;;  %v5163_v45 = vadd.f32 %v15353_v17, %v12643_v26  ;;  %v15356_v27 = vld [vmem:[#allocation58_spill] sm:$0xff]  ;;  %v5460_v17 = vmax.f32 %v5189_v19, 0.0  ;;  %v14148_v62 = vmax.f32 %v5212_v8, 0.0  ;;  %v14162_v8 = vpop.permute.xlu2 %5476 }
 0x470   :  { %7363 = vmatpush.msra.mxu2 %v5364_v15  ;;  %7386 = vmatpush.msra.mxu3 %v5365_v2  ;;  %v5209_v34 = vadd.f32 %v15356_v27, %v12643_v26  ;;  %v5459_v2 = vmax.f32 %v5166_v49, 0.0  ;;  %v14150_v27 = vmax.f32 %v5235_v43, 0.0  ;;  %v5369_v49 = vmax.f32 %v5186_v5, 0.0 }
 0x471   :  { %v14127_v24 = vpop.f32.mrf.mxu2  ;;  %v14129_v57 = vpop.f32.mrf.mxu3  ;;  %v5368_v19 = vmax.f32 %v5163_v45, 0.0  ;;  %v14181_v45 = vld [vmem:[%s14882_s5 + $0x8] sm:$0xff] }
 0x472   :  { %15355 = vst [vmem:[#allocation54_spill] sm:$0xff] %v14127_v24  ;;  %v14135_v38 = vpop.f32.mrf.mxu0  ;;  %v14137_v15 = vpop.f32.mrf.mxu1  ;;  %v14156_v25 = vmax.f32 %v5209_v34, 0.0  ;;  %v5667_v24 = vadd.f32 %v13476_v46, %v14162_v8 }
 0x473   :  { %15358 = vst [vmem:[#allocation44_spill] sm:$0xff] %v14137_v15  ;;  %8813 = vmatmul.msk.f32.vlgmr.msrb.gmra.mxu0 %vm3183_vm2, %v14142_v16  ;;  %8815 = vmatmul.msk.f32.vlgmr.msrb.gmra.mxu1 %vm3183_vm2, %v14142_v16  ;;  %v14158_v15 = vmax.f32 %v5232_v47, 0.0 }
 0x474   :  { %8817 = vmatmul.msk.f32.vlgmr.msrb.gmra.mxu2 %vm3183_vm2, %v14142_v16  ;;  %8819 = vmatmul.msk.f32.vlgmr.msrb.gmra.mxu3 %vm3183_vm2, %v14142_v16 }
 0x475   :  { %7404 = vmatpush.msrb.mxu0 %v5459_v2  ;;  %7427 = vmatpush.msrb.mxu1 %v5460_v17 }
 0x476   :  { %7450 = vmatpush.msrb.mxu2 %v14148_v62  ;;  %7473 = vmatpush.msrb.mxu3 %v14150_v27 }
 0x477   :  { %7405 = vmatpush.msrb.mxu0 %v5368_v19  ;;  %7428 = vmatpush.msrb.mxu1 %v5369_v49  ;;  %v14199_v58 = vpop.permute.xlu2 %5471 }
 0x478   :  { %7451 = vmatpush.msrb.mxu2 %v14156_v25  ;;  %7474 = vmatpush.msrb.mxu3 %v14158_v15  ;;  %v5848_v46 = vadd.f32 %v13585_v51, %v14199_v58 }
 0x479   :  { %7406 = vmatpush.msrb.mxu0 %v14074_v14  ;;  %7429 = vmatpush.msrb.mxu1 %v5459_v2  ;;  %v14167_v5 = vpop.f32.mrf.mxu2  ;;  %v14169_v34 = vpop.f32.mrf.mxu3 }
 0x47a   :  { %15359 = vst [vmem:[#allocation52_spill] sm:$0xff] %v14167_v5  ;;  %7452 = vmatpush.msrb.mxu2 %v5460_v17  ;;  %7475 = vmatpush.msrb.mxu3 %v14148_v62 }
 0x47b   :  { %15360 = vst [vmem:[#allocation53_spill] sm:$0xff] %v14169_v34  ;;  %7407 = vmatpush.msrb.mxu0 %v14082_v53  ;;  %7430 = vmatpush.msrb.mxu1 %v5368_v19  ;;  %v15363_v34 = vld [vmem:[#allocation69_spill] sm:$0xff] }
 0x47c   :  { %7453 = vmatpush.msrb.mxu2 %v5369_v49  ;;  %7476 = vmatpush.msrb.mxu3 %v14156_v25  ;;  %v14174_v47 = vpop.f32.mrf.mxu0  ;;  %v14176_v43 = vpop.f32.mrf.mxu1  ;;  %v5281_v1 = vadd.f32 %v15363_v34, %v12613_v40 }
 0x47d   :  { %15361 = vst [vmem:[#allocation59_spill] sm:$0xff] %v14176_v43  ;;  %8814 = vmatmul.msk.f32.gmra.mxu0 %vm3183_vm2, %v14181_v45  ;;  %8816 = vmatmul.msk.f32.gmra.mxu1 %vm3183_vm2, %v14181_v45  ;;  %v15362_v43 = vld [vmem:[#allocation60_spill] sm:$0xff] }
 0x47e   :  { %8818 = vmatmul.msk.f32.gmra.mxu2 %vm3183_vm2, %v14181_v45  ;;  %8820 = vmatmul.msk.f32.gmra.mxu3 %vm3183_vm2, %v14181_v45  ;;  %v5258_v5 = vadd.f32 %v15362_v43, %v12613_v40 }
 0x47f   :  { %7408 = vmatpush.msrb.mxu0 %v14072_v50  ;;  %7431 = vmatpush.msrb.mxu1 %v14074_v14  ;;  %v5851_v50 = vadd.f32 %v13617_v63, %v14162_v8  ;;  %v15364_v14 = vld [vmem:[#allocation65_spill] sm:$0xff] }
 0x480   :  { %7454 = vmatpush.msrb.mxu2 %v5459_v2  ;;  %7477 = vmatpush.msrb.mxu3 %v5460_v17  ;;  %v5255_v2 = vadd.f32 %v15364_v14, %v12643_v26  ;;  %v15365_v17 = vld [vmem:[#allocation3_spill] sm:$0xff]  ;;  %v7628_v14 = vmax.f32 %v5667_v24, 0.0  ;;  %v7547_v24 = vmax.f32 %v5848_v46, 0.0 }
 0x481   :  { %7409 = vmatpush.msrb.mxu0 %v14080_v23  ;;  %7432 = vmatpush.msrb.mxu1 %v14082_v53  ;;  %v5278_v40 = vadd.f32 %v15365_v17, %v12643_v26  ;;  %v5664_v53 = vadd.f32 %v13439_v20, %v14199_v58  ;;  %v5644_v26 = vadd.f32 %v13433_v21, %v14162_v8  ;;  %v7636_v51 = vmax.f32 %v5851_v50, 0.0  ;;  %v15368_v17 = vld [vmem:[#allocation16_spill] sm:$0xff] }
 0x482   :  { %7455 = vmatpush.msrb.mxu2 %v5368_v19  ;;  %7478 = vmatpush.msrb.mxu3 %v5369_v49  ;;  %v5463_v19 = vmax.f32 %v5258_v5, 0.0  ;;  %v5464_v49 = vmax.f32 %v5281_v1, 0.0  ;;  %v5828_v20 = vadd.f32 %v13579_v44, %v14162_v8  ;;  %v5372_v1 = vmax.f32 %v5255_v2, 0.0 }
 0x483   :  { %v14209_v34 = vpop.f32.mrf.mxu2  ;;  %v14211_v23 = vpop.f32.mrf.mxu3  ;;  %v5373_v5 = vmax.f32 %v5278_v40, 0.0  ;;  %v5825_v21 = vadd.f32 %v13544_v10, %v14199_v58  ;;  %v7627_v44 = vmax.f32 %v5644_v26, 0.0  ;;  %v5802_v26 = vadd.f32 %v13542_v4, %v14199_v58 }
 0x484   :  { %15366 = vst [vmem:[#allocation56_spill] sm:$0xff] %v14209_v34  ;;  %v14217_v43 = vpop.f32.mrf.mxu0  ;;  %v14219_v63 = vpop.f32.mrf.mxu1  ;;  %v5641_v34 = vadd.f32 %v15368_v17, %v14199_v58  ;;  %v7635_v50 = vmax.f32 %v5828_v20, 0.0 }
 0x485   :  { %15367 = vst [vmem:[#allocation4_spill] sm:$0xff] %v14211_v23  ;;  %8821 = vmatmul.msk.f32.vlgmr.msra.gmra.mxu0 %vm3183_vm2, %v14142_v16  ;;  %8823 = vmatmul.msk.f32.vlgmr.msra.gmra.mxu1 %vm3183_vm2, %v14142_v16  ;;  %v7539_v23 = vmax.f32 %v5664_v53, 0.0  ;;  %v7546_v46 = vmax.f32 %v5825_v21, 0.0  ;;  %v15373_v21 = vld [vmem:[#allocation7_spill] sm:$0xff] }
 0x486   :  { %8825 = vmatmul.msk.f32.vlgmr.msra.gmra.mxu2 %vm3183_vm2, %v14142_v16  ;;  %8827 = vmatmul.msk.f32.vlgmr.msra.gmra.mxu3 %vm3183_vm2, %v14142_v16  ;;  %v7538_v53 = vmax.f32 %v5641_v34, 0.0 }
 0x487   :  { %7496 = vmatpush.msra.mxu0 %v5463_v19  ;;  %7519 = vmatpush.msra.mxu1 %v5464_v49  ;;  %v15369_v49 = vld [vmem:[#allocation68_spill] sm:$0xff] }
 0x488   :  { %7795 = vmatpush.msra.mxu2 %v7628_v14  ;;  %7824 = vmatpush.msra.mxu3 %v7636_v51  ;;  %v5621_v10 = vadd.f32 %v15369_v49, %v14162_v8  ;;  %v5805_v14 = vadd.f32 %v13577_v35, %v14162_v8  ;;  %v15371_v35 = vld [vmem:[#allocation18_spill] sm:$0xff]  ;;  %v7545_v49 = vmax.f32 %v5802_v26, 0.0  ;;  %v6219_v26 = vadd.f32 %v13889_v30, %v14162_v8 }
 0x489   :  { %7497 = vmatpush.msra.mxu0 %v5372_v1  ;;  %7520 = vmatpush.msra.mxu1 %v5373_v5  ;;  %v5598_v51 = vadd.f32 %v15371_v35, %v14162_v8  ;;  %v15372_v5 = vld [vmem:[#allocation22_spill] sm:$0xff]  ;;  %v6032_v30 = vadd.f32 %v13721_v59, %v14199_v58  ;;  %v6012_v59 = vadd.f32 %v13715_v7, %v14162_v8  ;;  %v15382_v7 = vld [vmem:[#allocation8_spill] sm:$0xff] }
 0x48a   :  { %7796 = vmatpush.msra.mxu2 %v7539_v23  ;;  %7825 = vmatpush.msra.mxu3 %v7547_v24  ;;  %v15370_v23 = vld [vmem:[#allocation67_spill] sm:$0xff]  ;;  %v5782_v17 = vadd.f32 %v15372_v5, %v14162_v8  ;;  %v7634_v4 = vmax.f32 %v5805_v14, 0.0  ;;  %v5595_v24 = vadd.f32 %v15373_v21, %v14199_v58  ;;  %v15378_v5 = vld [vmem:[#allocation5_spill] sm:$0xff] }
 0x48b   :  { %7498 = vmatpush.msra.mxu0 %v14150_v27  ;;  %7521 = vmatpush.msra.mxu1 %v5463_v19  ;;  %v14238_v2 = vpop.f32.mrf.mxu2  ;;  %v14240_v40 = vpop.f32.mrf.mxu3  ;;  %v5618_v19 = vadd.f32 %v15370_v23, %v14199_v58 }
 0x48c   :  { %7797 = vmatpush.msra.mxu2 %v7627_v44  ;;  %7826 = vmatpush.msra.mxu3 %v7635_v50  ;;  %v15374_v50 = vld [vmem:[#allocation24_spill] sm:$0xff]  ;;  %v7633_v23 = vmax.f32 %v5782_v17, 0.0 }
 0x48d   :  { %7499 = vmatpush.msra.mxu0 %v14158_v15  ;;  %7522 = vmatpush.msra.mxu1 %v5372_v1  ;;  %v7626_v1 = vmax.f32 %v5621_v10, 0.0  ;;  %v7537_v44 = vmax.f32 %v5618_v19, 0.0  ;;  %v15375_v10 = vld [vmem:[#allocation6_spill] sm:$0xff]  ;;  %v6035_v19 = vadd.f32 %v13753_v6, %v14162_v8 }
 0x48e   :  { %7798 = vmatpush.msra.mxu2 %v7538_v53  ;;  %7827 = vmatpush.msra.mxu3 %v7546_v46  ;;  %v14251_v34 = vpop.f32.mrf.mxu0  ;;  %v14253_v20 = vpop.f32.mrf.mxu1  ;;  %v5779_v53 = vadd.f32 %v15374_v50, %v14199_v58  ;;  %v5575_v46 = vadd.f32 %v15375_v10, %v14162_v8 }
 0x48f   :  { %8822 = vmatmul.msk.f32.gmra.mxu0 %vm3183_vm2, %v14181_v45  ;;  %8824 = vmatmul.msk.f32.gmra.mxu1 %vm3183_vm2, %v14181_v45 }
 0x490   :  { %8826 = vmatmul.msk.f32.gmra.mxu2 %vm3183_vm2, %v14181_v45  ;;  %8828 = vmatmul.msk.f32.gmra.mxu3 %vm3183_vm2, %v14181_v45  ;;  %v7544_v17 = vmax.f32 %v5779_v53, 0.0  ;;  %v7624_v53 = vmax.f32 %v5575_v46, 0.0 }
 0x491   :  { %7500 = vmatpush.msra.mxu0 %v14148_v62  ;;  %7523 = vmatpush.msra.mxu1 %v14150_v27  ;;  %v7625_v62 = vmax.f32 %v5598_v51, 0.0  ;;  %v15376_v27 = vld [vmem:[#allocation25_spill] sm:$0xff]  ;;  %v7536_v51 = vmax.f32 %v5595_v24, 0.0  ;;  %v15379_v24 = vld [vmem:[#allocation64_spill] sm:$0xff] }
 0x492   :  { %7799 = vmatpush.msra.mxu2 %v7626_v1  ;;  %7828 = vmatpush.msra.mxu3 %v7634_v4  ;;  %v5759_v14 = vadd.f32 %v15376_v27, %v14162_v8  ;;  %v5756_v4 = vadd.f32 %v15378_v5, %v14199_v58  ;;  %v5552_v50 = vadd.f32 %v15379_v24, %v14162_v8 }
 0x493   :  { %7501 = vmatpush.msra.mxu0 %v14156_v25  ;;  %7524 = vmatpush.msra.mxu1 %v14158_v15  ;;  %v15377_v15 = vld [vmem:[#allocation9_spill] sm:$0xff]  ;;  %v6196_v27 = vadd.f32 %v13851_v32, %v14162_v8  ;;  %v6009_v32 = vadd.f32 %v13680_v56, %v14199_v58  ;;  %v6193_v5 = vadd.f32 %v13816_v22, %v14199_v58  ;;  %v15383_v56 = vld [vmem:[#allocation11_spill] sm:$0xff]  ;;  %v15384_v22 = vld [vmem:[#allocation12_spill] sm:$0xff] }
 0x494   :  { %7800 = vmatpush.msra.mxu2 %v7537_v44  ;;  %7829 = vmatpush.msra.mxu3 %v7545_v49  ;;  %v5572_v1 = vadd.f32 %v15377_v15, %v14199_v58  ;;  %v6216_v44 = vadd.f32 %v13857_v36, %v14199_v58  ;;  %v15380_v49 = vld [vmem:[#allocation13_spill] sm:$0xff]  ;;  %v7644_v36 = vmax.f32 %v6035_v19, 0.0  ;;  %v15381_v15 = vld [vmem:[#allocation15_spill] sm:$0xff]  ;;  %v5549_v19 = vadd.f32 %v15382_v7, %v14199_v58 }
 0x495   :  { %v14283_v35 = vpop.f32.mrf.mxu2  ;;  %v14285_v25 = vpop.f32.mrf.mxu3  ;;  %v5736_v10 = vadd.f32 %v15380_v49, %v14162_v8 }
 0x496   :  { %7801 = vmatpush.msra.mxu2 %v7625_v62  ;;  %7830 = vmatpush.msra.mxu3 %v7633_v23  ;;  %v14291_v21 = vpop.f32.mrf.mxu0  ;;  %v14293_v6 = vpop.f32.mrf.mxu1  ;;  %v7632_v62 = vmax.f32 %v5759_v14, 0.0  ;;  %v7652_v23 = vmax.f32 %v6219_v26, 0.0  ;;  %v7535_v46 = vmax.f32 %v5572_v1, 0.0  ;;  %v5733_v14 = vadd.f32 %v15381_v15, %v14199_v58 }
 0x497   :  { %8829 = vmatmul.msk.f32.vlgmr.msrb.gmra.mxu0 %vm3183_vm2, %v14142_v16  ;;  %8831 = vmatmul.msk.f32.vlgmr.msrb.gmra.mxu1 %vm3183_vm2, %v14142_v16  ;;  %v7555_v26 = vmax.f32 %v6032_v30, 0.0  ;;  %v7623_v1 = vmax.f32 %v5552_v50, 0.0  ;;  %v7631_v24 = vmax.f32 %v5736_v10, 0.0  ;;  %v5529_v30 = vadd.f32 %v15383_v56, %v14162_v8  ;;  %v15389_v56 = vld [vmem:[#allocation17_spill] sm:$0xff] }
 0x498   :  { %7802 = vmatpush.msra.mxu2 %v7536_v51  ;;  %7831 = vmatpush.msra.mxu3 %v7544_v17  ;;  %v7543_v51 = vmax.f32 %v5756_v4, 0.0  ;;  %v7563_v17 = vmax.f32 %v6216_v44, 0.0  ;;  %v7643_v4 = vmax.f32 %v6012_v59, 0.0  ;;  %v7542_v15 = vmax.f32 %v5733_v14, 0.0  ;;  %v15386_v14 = vld [vmem:[#allocation63_spill] sm:$0xff] }
 0x499   :  { %8833 = vmatmul.msk.f32.vlgmr.msrb.gmra.mxu2 %vm3183_vm2, %v14142_v16  ;;  %8835 = vmatmul.msk.f32.vlgmr.msrb.gmra.mxu3 %vm3183_vm2, %v14142_v16  ;;  %v5713_v44 = vadd.f32 %v15384_v22, %v14162_v8  ;;  %v7534_v50 = vmax.f32 %v5549_v19, 0.0  ;;  %v7554_v10 = vmax.f32 %v6009_v32, 0.0  ;;  %v5989_v59 = vadd.f32 %v13713_v28, %v14162_v8  ;;  %v15387_v32 = vld [vmem:[#allocation10_spill] sm:$0xff] }
 0x49a   :  { %7803 = vmatpush.msra.mxu2 %v7624_v53  ;;  %7832 = vmatpush.msra.mxu3 %v7632_v62  ;;  %v7651_v53 = vmax.f32 %v6196_v27, 0.0  ;;  %v6173_v27 = vadd.f32 %v13849_v11, %v14162_v8  ;;  %v5986_v28 = vadd.f32 %v13678_v60, %v14199_v58  ;;  %v6170_v11 = vadd.f32 %v13814_v0, %v14199_v58 }
 0x49b   :  { %7853 = vmatpush.msrb.mxu0 %v7644_v36  ;;  %7882 = vmatpush.msrb.mxu1 %v7652_v23  ;;  %v7562_v36 = vmax.f32 %v6193_v5, 0.0  ;;  %v15385_v23 = vld [vmem:[#allocation14_spill] sm:$0xff]  ;;  %v7622_v5 = vmax.f32 %v5529_v30, 0.0  ;;  %v5966_v60 = vadd.f32 %v13687_v48, %v14162_v8  ;;  %v7642_v0 = vmax.f32 %v5989_v59, 0.0 }
 0x49c   :  { %7804 = vmatpush.msra.mxu2 %v7535_v46  ;;  %7833 = vmatpush.msra.mxu3 %v7543_v51  ;;  %v5710_v46 = vadd.f32 %v15385_v23, %v14199_v58  ;;  %v5526_v51 = vadd.f32 %v15386_v14, %v14199_v58  ;;  %v5687_v30 = vadd.f32 %v15389_v56, %v14199_v58  ;;  %v15390_v48 = vld [vmem:[#allocation70_spill] sm:$0xff]  ;;  %v7561_v59 = vmax.f32 %v6170_v11, 0.0 }
 0x49d   :  { %7854 = vmatpush.msrb.mxu0 %v7555_v26  ;;  %7883 = vmatpush.msrb.mxu1 %v7563_v17  ;;  %v14323_v49 = vpop.f32.mrf.mxu2  ;;  %v14325_v62 = vpop.f32.mrf.mxu3  ;;  %v5506_v26 = vadd.f32 %v15387_v32, %v14162_v8  ;;  %v15388_v17 = vld [vmem:[#allocation19_spill] sm:$0xff]  ;;  %v6403_v23 = vadd.f32 %v14025_v41, %v14162_v8  ;;  %v7641_v14 = vmax.f32 %v5966_v60, 0.0  ;;  %v5943_v11 = vadd.f32 %v13685_v33, %v14162_v8 }
 0x49e   :  { %7805 = vmatpush.msra.mxu2 %v7623_v1  ;;  %7834 = vmatpush.msra.mxu3 %v7631_v24  ;;  %v5690_v1 = vadd.f32 %v15388_v17, %v14162_v8  ;;  %v7630_v24 = vmax.f32 %v5713_v44, 0.0  ;;  %v7533_v22 = vmax.f32 %v5526_v51, 0.0  ;;  %v5503_v44 = vadd.f32 %v15390_v48, %v14199_v58 }
 0x49f   :  { %7855 = vmatpush.msrb.mxu0 %v7643_v4  ;;  %7884 = vmatpush.msrb.mxu1 %v7651_v53  ;;  %v6150_v4 = vadd.f32 %v13823_v54, %v14162_v8  ;;  %v7650_v53 = vmax.f32 %v6173_v27, 0.0  ;;  %v5963_v54 = vadd.f32 %v13655_v12, %v14199_v58  ;;  %v6127_v17 = vadd.f32 %v13821_v9, %v14162_v8 }
 0x4a0   :  { %7806 = vmatpush.msra.mxu2 %v7534_v50  ;;  %7835 = vmatpush.msra.mxu3 %v7542_v15  ;;  %v14339_v7 = vpop.f32.mrf.mxu0  ;;  %v14341_v19 = vpop.f32.mrf.mxu1  ;;  %v7541_v15 = vmax.f32 %v5710_v46, 0.0  ;;  %v7553_v50 = vmax.f32 %v5986_v28, 0.0  ;;  %v7629_v27 = vmax.f32 %v5690_v1, 0.0  ;;  %v6587_v46 = vadd.f32 %v14174_v47, %v14162_v8 }
 0x4a1   :  { %7856 = vmatpush.msrb.mxu0 %v7554_v10  ;;  %7885 = vmatpush.msrb.mxu1 %v7562_v36  ;;  %v6147_v10 = vadd.f32 %v13791_v31, %v14199_v58  ;;  %v7621_v36 = vmax.f32 %v5506_v26, 0.0  ;;  %v7649_v51 = vmax.f32 %v6150_v4, 0.0  ;;  %v7540_v28 = vmax.f32 %v5687_v30, 0.0 }
 0x4a2   :  { %8830 = vmatmul.msk.f32.gmra.mxu0 %vm3183_vm2, %v14181_v45  ;;  %8832 = vmatmul.msk.f32.gmra.mxu1 %vm3183_vm2, %v14181_v45  ;;  %v7532_v41 = vmax.f32 %v5503_v44, 0.0  ;;  %v7552_v26 = vmax.f32 %v5963_v54, 0.0  ;;  %v6400_v1 = vadd.f32 %v13993_v3, %v14199_v58  ;;  %v5940_v33 = vadd.f32 %v13653_v61, %v14199_v58  ;;  %v7710_v3 = vld [vmem:[%s14884_s7] sm:$0xff] }
 0x4a3   :  { %8834 = vmatmul.msk.f32.gmra.mxu2 %vm3183_vm2, %v14181_v45  ;;  %8836 = vmatmul.msk.f32.gmra.mxu3 %vm3183_vm2, %v14181_v45  ;;  %v6584_v60 = vadd.f32 %v14135_v38, %v14199_v58  ;;  %v6124_v4 = vadd.f32 %v13789_v37, %v14199_v58  ;;  %v7640_v9 = vmax.f32 %v5943_v11, 0.0  ;;  %v6380_v61 = vadd.f32 %v13987_v39, %v14162_v8 }
 0x4a4   :  { %7807 = vmatpush.msra.mxu2 %v7622_v5  ;;  %7836 = vmatpush.msra.mxu3 %v7630_v24  ;;  %v7560_v5 = vmax.f32 %v6147_v10, 0.0  ;;  %v7660_v24 = vmax.f32 %v6403_v23, 0.0  ;;  %v5920_v38 = vadd.f32 %v13647_v13, %v14162_v8  ;;  %v6104_v37 = vadd.f32 %v13783_v18, %v14162_v8  ;;  %v7711_v13 = vld [vmem:[%s14884_s7 + $0x8] sm:$0xff]  ;;  %v15392_v10 = vld [vmem:[#allocation54_spill] sm:$0xff] }
 0x4a5   :  { %7857 = vmatpush.msrb.mxu0 %v7642_v0  ;;  %7886 = vmatpush.msrb.mxu1 %v7650_v53  ;;  %v7668_v0 = vmax.f32 %v6587_v46, 0.0  ;;  %v6564_v53 = vadd.f32 %v14129_v57, %v14162_v8  ;;  %v7648_v56 = vmax.f32 %v6127_v17, 0.0  ;;  %v7571_v30 = vmax.f32 %v6400_v1, 0.0  ;;  %v15391_v18 = vld [vmem:[#allocation23_spill] sm:$0xff]  ;;  %v15395_v17 = vld [vmem:[#allocation28_spill] sm:$0xff] }
 0x4a6   :  { %7808 = vmatpush.msra.mxu2 %v7533_v22  ;;  %7837 = vmatpush.msra.mxu3 %v7541_v15  ;;  %v7551_v39 = vmax.f32 %v5940_v33, 0.0  ;;  %v6377_v57 = vadd.f32 %v13952_v29, %v14199_v58  ;;  %v6561_v15 = vadd.f32 %v14091_v55, %v14199_v58  ;;  %v7579_v22 = vmax.f32 %v6584_v60, 0.0  ;;  %v15396_v33 = vld [vmem:[#allocation31_spill] sm:$0xff] }
 0x4a7   :  { %7858 = vmatpush.msrb.mxu0 %v7553_v50  ;;  %7887 = vmatpush.msrb.mxu1 %v7561_v59  ;;  %v14375_v12 = vpop.f32.mrf.mxu2  ;;  %v14377_v31 = vpop.f32.mrf.mxu3  ;;  %v5917_v48 = vadd.f32 %v15391_v18, %v14199_v58  ;;  %v7559_v44 = vmax.f32 %v6124_v4, 0.0  ;;  %v6357_v55 = vadd.f32 %v13985_v42, %v14162_v8  ;;  %v7659_v50 = vmax.f32 %v6380_v61, 0.0 }
 0x4a8   :  { %7809 = vmatpush.msra.mxu2 %v7621_v36  ;;  %7838 = vmatpush.msra.mxu3 %v7629_v27  ;;  %v14381_v32 = vpop.f32.mrf.mxu0  ;;  %v14383_v47 = vpop.f32.mrf.mxu1  ;;  %v6541_v59 = vadd.f32 %v15392_v10, %v14162_v8  ;;  %v7667_v36 = vmax.f32 %v6564_v53, 0.0  ;;  %v7639_v27 = vmax.f32 %v5920_v38, 0.0  ;;  %v7647_v23 = vmax.f32 %v6104_v37, 0.0  ;;  %v7722_v53 = vld [vmem:[%s14884_s7 + $0x60] sm:$0xff] }
 0x4a9   :  { %7859 = vmatpush.msrb.mxu0 %v7641_v14  ;;  %7888 = vmatpush.msrb.mxu1 %v7649_v51  ;;  %v7570_v14 = vmax.f32 %v6377_v57, 0.0  ;;  %v7578_v51 = vmax.f32 %v6561_v15, 0.0  ;;  %v7550_v11 = vmax.f32 %v5917_v48, 0.0  ;;  %v6354_v1 = vadd.f32 %v15395_v17, %v14199_v58  ;;  %v15399_v37 = vld [vmem:[#allocation50_spill] sm:$0xff] }
 0x4aa   :  { %7810 = vmatpush.msra.mxu2 %v7532_v41  ;;  %7839 = vmatpush.msra.mxu3 %v7540_v28  ;;  %v7658_v60 = vmax.f32 %v6357_v55, 0.0  ;;  %v15401_v57 = vld [vmem:[#allocation26_spill] sm:$0xff] }
 0x4ab   :  { %7860 = vmatpush.msrb.mxu0 %v7552_v26  ;;  %7889 = vmatpush.msrb.mxu1 %v7560_v5  ;;  %v15394_v26 = vld [vmem:[#allocation20_spill] sm:$0xff]  ;;  %v5874_v15 = vadd.f32 %v15401_v57, %v14162_v8  ;;  %v7569_v48 = vmax.f32 %v6354_v1, 0.0 }
 0x4ac   :  { %7911 = vmatpush.msrb.mxu2 %v7660_v24  ;;  %7940 = vmatpush.msrb.mxu3 %v7668_v0  ;;  %v6081_v5 = vadd.f32 %v15394_v26, %v14162_v8  ;;  %v5894_v24 = vadd.f32 %v15396_v33, %v14199_v58  ;;  %v15397_v0 = vld [vmem:[#allocation55_spill] sm:$0xff] }
 0x4ad   :  { %8837 = vmatmul.msk.f32.vlgmr.msra.gmra.mxu0 %vm3183_vm2, %v14142_v16  ;;  %8839 = vmatmul.msk.f32.vlgmr.msra.gmra.mxu1 %vm3183_vm2, %v14142_v16  ;;  %v6101_v16 = vadd.f32 %v13748_v52, %v14199_v58  ;;  %v15393_v52 = vld [vmem:[#allocation27_spill] sm:$0xff]  ;;  %v6538_v4 = vadd.f32 %v15397_v0, %v14199_v58 }
 0x4ae   :  { %7811 = vmatmul.f32.vlgmr.msra.gmra.mxu2 %v7710_v3  ;;  %7861 = vmatpush.msrb.mxu0 %v7640_v9  ;;  %v5897_v46 = vadd.f32 %v15393_v52, %v14162_v8  ;;  %v7666_v3 = vmax.f32 %v6541_v59, 0.0  ;;  %v15398_v9 = vld [vmem:[#allocation39_spill] sm:$0xff]  ;;  %v7646_v18 = vmax.f32 %v6081_v5, 0.0  ;;  %v15406_v52 = vld [vmem:[#allocation32_spill] sm:$0xff]  ;;  %v15408_v5 = vld [vmem:[#allocation62_spill] sm:$0xff] }
 0x4af   :  { %7890 = vmatpush.msrb.mxu1 %v7648_v56  ;;  %7912 = vmatpush.msrb.mxu2 %v7571_v30  ;;  %v14421_v29 = vpop.f32.mrf.mxu2  ;;  %v14423_v54 = vpop.f32.mrf.mxu3  ;;  %v7558_v41 = vmax.f32 %v6101_v16, 0.0  ;;  %v6078_v61 = vadd.f32 %v15398_v9, %v14199_v58  ;;  %v6334_v56 = vadd.f32 %v15399_v37, %v14162_v8  ;;  %v15400_v30 = vld [vmem:[#allocation66_spill] sm:$0xff]  ;;  %v7549_v16 = vmax.f32 %v5894_v24, 0.0 }
 0x4b0   :  { %7941 = vmatpush.msrb.mxu3 %v7579_v22  ;;  %7862 = vmatpush.msrb.mxu0 %v7551_v39  ;;  %v7638_v38 = vmax.f32 %v5897_v46, 0.0  ;;  %v6518_v39 = vadd.f32 %v15400_v30, %v14162_v8  ;;  %v15402_v22 = vld [vmem:[#allocation33_spill] sm:$0xff]  ;;  %v7577_v59 = vmax.f32 %v6538_v4, 0.0  ;;  %v6495_v17 = vadd.f32 %v15408_v5, %v14162_v8 }
 0x4b1   :  { %7840 = vmatmul.f32.vlgmr.msra.gmra.mxu3 %v7711_v13  ;;  %7891 = vmatpush.msrb.mxu1 %v7559_v44  ;;  %v6058_v13 = vadd.f32 %v15402_v22, %v14162_v8  ;;  %v15403_v44 = vld [vmem:[#allocation29_spill] sm:$0xff]  ;;  %v7557_v46 = vmax.f32 %v6078_v61, 0.0  ;;  %v7657_v26 = vmax.f32 %v6334_v56, 0.0  ;;  %v6771_v4 = vadd.f32 %v14339_v7, %v14162_v8  ;;  %v15410_v56 = vld [vmem:[#allocation43_spill] sm:$0xff] }
 0x4b2   :  { %7913 = vmatpush.msrb.mxu2 %v7659_v50  ;;  %7942 = vmatpush.msrb.mxu3 %v7667_v36  ;;  %v14431_v28 = vpop.f32.mrf.mxu0  ;;  %v14433_v42 = vpop.f32.mrf.mxu1  ;;  %v6331_v55 = vadd.f32 %v15403_v44, %v14199_v58  ;;  %v15404_v50 = vld [vmem:[#allocation48_spill] sm:$0xff]  ;;  %v7723_v36 = vld [vmem:[%s14884_s7 + $0x68] sm:$0xff]  ;;  %v7665_v1 = vmax.f32 %v6518_v39, 0.0  ;;  %v6492_v30 = vadd.f32 %v15410_v56, %v14199_v58  ;;  %v6768_v39 = vadd.f32 %v14291_v21, %v14199_v58 }
 0x4b3   :  { %7863 = vmatpush.msrb.mxu0 %v7639_v27  ;;  %7892 = vmatpush.msrb.mxu1 %v7647_v23  ;;  %v6515_v10 = vadd.f32 %v15404_v50, %v14199_v58  ;;  %v15405_v27 = vld [vmem:[#allocation30_spill] sm:$0xff]  ;;  %v7645_v0 = vmax.f32 %v6058_v13, 0.0  ;;  %v7664_v57 = vmax.f32 %v6495_v17, 0.0  ;;  %v15411_v22 = vld [vmem:[#allocation47_spill] sm:$0xff]  ;;  %v7712_v21 = vld [vmem:[%s14884_s7 + $0x10] sm:$0xff] }
 0x4b4   :  { %7914 = vmatpush.msrb.mxu2 %v7570_v14  ;;  %7943 = vmatpush.msrb.mxu3 %v7578_v51  ;;  %v5871_v23 = vadd.f32 %v15405_v27, %v14199_v58  ;;  %v7568_v61 = vmax.f32 %v6331_v55, 0.0  ;;  %v6288_v13 = vadd.f32 %v15411_v22, %v14162_v8  ;;  %v6748_v55 = vadd.f32 %v14285_v25, %v14162_v8  ;;  %v15413_v50 = vld [vmem:[#allocation40_spill] sm:$0xff]  ;;  %v7713_v25 = vld [vmem:[%s14884_s7 + $0x18] sm:$0xff]  ;;  %v15419_v22 = vld [vmem:[#allocation35_spill] sm:$0xff] }
 0x4b5   :  { %7864 = vmatpush.msrb.mxu0 %v7550_v11  ;;  %7893 = vmatpush.msrb.mxu1 %v7558_v41  ;;  %v15407_v11 = vld [vmem:[#allocation49_spill] sm:$0xff]  ;;  %v7575_v27 = vmax.f32 %v6492_v30, 0.0  ;;  %v15416_v17 = vld [vmem:[#allocation36_spill] sm:$0xff]  ;;  %v6722_v30 = vadd.f32 %v14238_v2, %v14199_v58 }
 0x4b6   :  { %7915 = vmatpush.msrb.mxu2 %v7658_v60  ;;  %7944 = vmatpush.msrb.mxu3 %v7666_v3  ;;  %v6311_v41 = vadd.f32 %v15407_v11, %v14162_v8  ;;  %v7637_v60 = vmax.f32 %v5874_v15, 0.0  ;;  %v15409_v3 = vld [vmem:[#allocation41_spill] sm:$0xff]  ;;  %v7734_v15 = vld [vmem:[%s14884_s7 + $0xc0] sm:$0xff]  ;;  %v6745_v11 = vadd.f32 %v14240_v40, %v14199_v58  ;;  %v7655_v5 = vmax.f32 %v6288_v13, 0.0  ;;  %v7724_v2 = vld [vmem:[%s14884_s7 + $0x70] sm:$0xff] }
 0x4b7   :  { %8838 = vmatmul.msk.f32.gmra.mxu0 %vm3183_vm2, %v14181_v45  ;;  %8840 = vmatmul.msk.f32.gmra.mxu1 %vm3183_vm2, %v14181_v45  ;;  %v6055_v45 = vadd.f32 %v15406_v52, %v14199_v58  ;;  %v6308_v9 = vadd.f32 %v15409_v3, %v14199_v58  ;;  %v7735_v52 = vld [vmem:[%s14884_s7 + $0xc8] sm:$0xff]  ;;  %v6242_v13 = vadd.f32 %v15419_v22, %v14162_v8 }
 0x4b8   :  { %7814 = vmatmul.f32.gmra.mxu2 %v7722_v53  ;;  %7865 = vmatpush.msrb.mxu0 %v7638_v38  ;;  %v7576_v53 = vmax.f32 %v6515_v10, 0.0  ;;  %v7548_v38 = vmax.f32 %v5871_v23, 0.0  ;;  %v7656_v7 = vmax.f32 %v6311_v41, 0.0  ;;  %v6285_v10 = vadd.f32 %v15413_v50, %v14199_v58  ;;  %v15415_v41 = vld [vmem:[#allocation42_spill] sm:$0xff] }
 0x4b9   :  { %7894 = vmatpush.msrb.mxu1 %v7646_v18  ;;  %7916 = vmatpush.msrb.mxu2 %v7569_v48  ;;  %v14471_v14 = vpop.f32.mrf.mxu2  ;;  %v14473_v51 = vpop.f32.mrf.mxu3  ;;  %v7556_v37 = vmax.f32 %v6055_v45, 0.0  ;;  %v15412_v18 = vld [vmem:[#allocation38_spill] sm:$0xff]  ;;  %v7567_v44 = vmax.f32 %v6308_v9, 0.0  ;;  %v7587_v23 = vmax.f32 %v6768_v39, 0.0 }
 0x4ba   :  { %7945 = vmatpush.msrb.mxu3 %v7577_v59  ;;  %7866 = vmatpush.msrb.mxu0 %v7549_v16  ;;  %v14479_v33 = vpop.f32.mrf.mxu0  ;;  %v14481_v24 = vpop.f32.mrf.mxu1  ;;  %v6472_v48 = vadd.f32 %v15412_v18, %v14162_v8  ;;  %v7676_v16 = vmax.f32 %v6771_v4, 0.0  ;;  %v15414_v59 = vld [vmem:[#allocation46_spill] sm:$0xff]  ;;  %v7675_v4 = vmax.f32 %v6748_v55, 0.0  ;;  %v15420_v18 = vld [vmem:[#allocation51_spill] sm:$0xff]  ;;  %v15421_v55 = vld [vmem:[#allocation21_spill] sm:$0xff] }
 0x4bb   :  { %7843 = vmatmul.f32.gmra.mxu3 %v7723_v36  ;;  %7895 = vmatpush.msrb.mxu1 %v7557_v46  ;;  %v6469_v36 = vadd.f32 %v15414_v59, %v14199_v58  ;;  %v15417_v9 = vld [vmem:[#allocation34_spill] sm:$0xff]  ;;  %v6239_v50 = vadd.f32 %v15421_v55, %v14199_v58 }
 0x4bc   :  { %7917 = vmatpush.msrb.mxu2 %v7657_v26  ;;  %7946 = vmatpush.msrb.mxu3 %v7665_v1  ;;  %v6265_v26 = vadd.f32 %v15415_v41, %v14162_v8  ;;  %v6449_v1 = vadd.f32 %v15416_v17, %v14162_v8  ;;  %v7653_v17 = vmax.f32 %v6242_v13, 0.0  ;;  %v6906_v13 = vadd.f32 %v14421_v29, %v14199_v58  ;;  %v15426_v29 = vld [vmem:[#allocation52_spill] sm:$0xff] }
 0x4bd   :  { %7867 = vmatpush.msrb.mxu0 %v7637_v60  ;;  %7896 = vmatpush.msrb.mxu1 %v7645_v0  ;;  %v7663_v60 = vmax.f32 %v6472_v48, 0.0  ;;  %v6725_v0 = vadd.f32 %v14283_v35, %v14162_v8  ;;  %v7586_v35 = vmax.f32 %v6745_v11, 0.0  ;;  %v6426_v48 = vadd.f32 %v15420_v18, %v14162_v8 }
 0x4be   :  { %7918 = vmatpush.msrb.mxu2 %v7568_v61  ;;  %7947 = vmatpush.msrb.mxu3 %v7576_v53  ;;  %v6262_v61 = vadd.f32 %v15417_v9, %v14199_v58  ;;  %v7566_v53 = vmax.f32 %v6285_v10, 0.0  ;;  %v7654_v39 = vmax.f32 %v6265_v26, 0.0  ;;  %v15422_v10 = vld [vmem:[#allocation37_spill] sm:$0xff]  ;;  %v6952_v11 = vadd.f32 %v14479_v33, %v14199_v58 }
 0x4bf   :  { %7868 = vmatpush.msrb.mxu0 %v7548_v38  ;;  %7897 = vmatpush.msrb.mxu1 %v7556_v37  ;;  %v7574_v38 = vmax.f32 %v6469_v36, 0.0  ;;  %v15418_v37 = vld [vmem:[#allocation45_spill] sm:$0xff]  ;;  %v6423_v59 = vadd.f32 %v15422_v10, %v14199_v58  ;;  %v7564_v33 = vmax.f32 %v6239_v50, 0.0  ;;  %v6630_v10 = vadd.f32 %v15426_v29, %v14199_v58 }
 0x4c0   :  { %7919 = vmatpush.msrb.mxu2 %v7656_v7  ;;  %7948 = vmatpush.msrb.mxu3 %v7664_v57  ;;  %v6446_v56 = vadd.f32 %v15418_v37, %v14199_v58  ;;  %v7662_v7 = vmax.f32 %v6449_v1, 0.0  ;;  %v7746_v57 = vld [vmem:[%s14884_s7 + $0x120] sm:$0xff]  ;;  %v7661_v1 = vmax.f32 %v6426_v48, 0.0  ;;  %v6909_v37 = vadd.f32 %v14471_v14, %v14162_v8 }
 0x4c1   :  { %7969 = vmatpush.msra.mxu0 %v7676_v16  ;;  %7817 = vmatmul.f32.gmra.mxu2 %v7734_v15  ;;  %v14513_v45 = vpop.f32.mrf.mxu2  ;;  %v14515_v46 = vpop.f32.mrf.mxu3  ;;  %v7674_v16 = vmax.f32 %v6725_v0, 0.0  ;;  %v6679_v0 = vadd.f32 %v14251_v34, %v14162_v8  ;;  %v6929_v34 = vadd.f32 %v14423_v54, %v14199_v58  ;;  %v7737_v54 = vld [vmem:[%s14884_s7 + $0xd8] sm:$0xff]  ;;  %v6886_v48 = vadd.f32 %v14433_v42, %v14162_v8  ;;  %v7726_v42 = vld [vmem:[%s14884_s7 + $0x80] sm:$0xff] }
 0x4c2   :  { %7869 = vmatmul.f32.vlgmr.msrb.gmra.mxu0 %v7712_v21  ;;  %7920 = vmatpush.msrb.mxu2 %v7567_v44  ;;  %v7565_v21 = vmax.f32 %v6262_v61, 0.0  ;;  %v6702_v44 = vadd.f32 %v14253_v20, %v14162_v8  ;;  %v7573_v36 = vmax.f32 %v6446_v56, 0.0  ;;  %v7725_v20 = vld [vmem:[%s14884_s7 + $0x78] sm:$0xff]  ;;  %v15423_v56 = vld [vmem:[#allocation4_spill] sm:$0xff] }
 0x4c3   :  { %7949 = vmatpush.msrb.mxu3 %v7575_v27  ;;  %7970 = vmatpush.msra.mxu0 %v7587_v23  ;;  %v7585_v27 = vmax.f32 %v6722_v30, 0.0  ;;  %v7747_v23 = vld [vmem:[%s14884_s7 + $0x128] sm:$0xff]  ;;  %v7672_v30 = vmax.f32 %v6679_v0, 0.0  ;;  %v7594_v18 = vmax.f32 %v6929_v34, 0.0  ;;  %v7581_v0 = vmax.f32 %v6630_v10, 0.0 }
 0x4c4   :  { %7846 = vmatmul.f32.gmra.mxu3 %v7735_v52  ;;  %7898 = vmatmul.f32.vlgmr.msrb.gmra.mxu1 %v7713_v25  ;;  %v6954_v3 = vpop.f32.mrf.mxu0  ;;  %v14525_v40 = vpop.f32.mrf.mxu1  ;;  %v6699_v52 = vadd.f32 %v14219_v63, %v14199_v58  ;;  %v6932_v25 = vadd.f32 %v14473_v51, %v14162_v8  ;;  %v7673_v51 = vmax.f32 %v6702_v44, 0.0 }
 0x4c5   :  { %7921 = vmatpush.msrb.mxu2 %v7655_v5  ;;  %7950 = vmatpush.msrb.mxu3 %v7663_v60  ;;  %v6955_v15 = vadd.f32 %v6954_v3, %v14162_v8  ;;  %v6676_v3 = vadd.f32 %v14217_v43, %v14199_v58  ;;  %v6656_v43 = vadd.f32 %v15423_v56, %v14162_v8 }
 0x4c6   :  { %7971 = vmatpush.msra.mxu0 %v7675_v4  ;;  %v7572_v4 = vmax.f32 %v6423_v59, 0.0  ;;  %v7584_v9 = vmax.f32 %v6699_v52, 0.0  ;;  %v7683_v61 = vmax.f32 %v6932_v25, 0.0  ;;  %v6837_v56 = vadd.f32 %v14325_v62, %v14199_v58 }
 0x4c7   :  { %7922 = vmatpush.msrb.mxu2 %v7566_v53  ;;  %7951 = vmatpush.msrb.mxu3 %v7574_v38  ;;  %v7684_v41 = vmax.f32 %v6955_v15, 0.0  ;;  %v7595_v53 = vmax.f32 %v6952_v11, 0.0  ;;  %v7714_v38 = vld [vmem:[%s14884_s7 + $0x20] sm:$0xff]  ;;  %v7671_v44 = vmax.f32 %v6656_v43, 0.0  ;;  %v7748_v11 = vld [vmem:[%s14884_s7 + $0x130] sm:$0xff]  ;;  %v6814_v62 = vadd.f32 %v14323_v49, %v14199_v58 }
 0x4c8   :  { %7972 = vmatpush.msra.mxu0 %v7586_v35  ;;  %v7736_v35 = vld [vmem:[%s14884_s7 + $0xd0] sm:$0xff]  ;;  %v6791_v49 = vadd.f32 %v14293_v6, %v14199_v58  ;;  %v7751_v6 = vld [vmem:[%s14884_s7 + $0x148] sm:$0xff] }
 0x4c9   :  { %7923 = vmatpush.msrb.mxu2 %v7654_v39  ;;  %7952 = vmatpush.msrb.mxu3 %v7662_v7  ;;  %v15424_v39 = vld [vmem:[#allocation53_spill] sm:$0xff]  ;;  %v7583_v7 = vmax.f32 %v6676_v3, 0.0 }
 0x4ca   :  { %7973 = vmatpush.msra.mxu0 %v7674_v16  ;;  %7820 = vmatmul.f32.gmra.mxu2 %v7746_v57  ;;  %v6653_v14 = vadd.f32 %v15424_v39, %v14199_v58  ;;  %v7715_v57 = vld [vmem:[%s14884_s7 + $0x28] sm:$0xff]  ;;  %v7682_v16 = vmax.f32 %v6909_v37, 0.0  ;;  %v7590_v39 = vmax.f32 %v6837_v56, 0.0 }
 0x4cb   :  { %7872 = vmatmul.f32.gmra.mxu0 %v7724_v2  ;;  %7924 = vmatpush.msrb.mxu2 %v7565_v21  ;;  %v14562_v26 = vpop.f32.mrf.mxu2  ;;  %v14564_v5 = vpop.f32.mrf.mxu3  ;;  %v15425_v2 = vld [vmem:[#allocation56_spill] sm:$0xff] }
 0x4cc   :  { %7953 = vmatpush.msrb.mxu3 %v7573_v36  ;;  %7974 = vmatpush.msra.mxu0 %v7585_v27  ;;  %v14566_v60 = vpop.f32.mrf.mxu0  ;;  %v14568_v63 = vpop.f32.mrf.mxu1  ;;  %v6633_v21 = vadd.f32 %v15425_v2, %v14162_v8  ;;  %v7582_v59 = vmax.f32 %v6653_v14, 0.0  ;;  %v6883_v36 = vadd.f32 %v14383_v47, %v14199_v58  ;;  %v7593_v27 = vmax.f32 %v6906_v13, 0.0  ;;  %v7749_v47 = vld [vmem:[%s14884_s7 + $0x138] sm:$0xff] }
 0x4cd   :  { %7849 = vmatmul.f32.gmra.mxu3 %v7747_v23  ;;  %7901 = vmatmul.f32.gmra.mxu1 %v7725_v20  ;;  %v7681_v23 = vmax.f32 %v6886_v48, 0.0  ;;  %v15427_v20 = vld [vmem:[#allocation59_spill] sm:$0xff] }
 0x4ce   :  { %7925 = vmatpush.msrb.mxu2 %v7653_v17  ;;  %7954 = vmatpush.msrb.mxu3 %v7661_v1  ;;  %v6610_v52 = vadd.f32 %v15427_v20, %v14162_v8  ;;  %v7670_v25 = vmax.f32 %v6633_v21, 0.0  ;;  %v15428_v17 = vld [vmem:[#allocation44_spill] sm:$0xff] }
 0x4cf   :  { %7975 = vmatpush.msra.mxu0 %v7673_v51  ;;  %7998 = vmatpush.msra.mxu1 %v7684_v41  ;;  %v6863_v41 = vadd.f32 %v14431_v28, %v14162_v8  ;;  %v6607_v1 = vadd.f32 %v15428_v17, %v14199_v58  ;;  %v7727_v51 = vld [vmem:[%s14884_s7 + $0x88] sm:$0xff] }
 0x4d0   :  { %7926 = vmatpush.msrb.mxu2 %v7564_v33  ;;  %7955 = vmatpush.msrb.mxu3 %v7572_v4  ;;  %v6860_v33 = vadd.f32 %v14381_v32, %v14199_v58  ;;  %v7592_v4 = vmax.f32 %v6883_v36, 0.0  ;;  %v7669_v28 = vmax.f32 %v6610_v52, 0.0  ;;  %v7738_v32 = vld [vmem:[%s14884_s7 + $0xe0] sm:$0xff] }
 0x4d1   :  { %7976 = vmatpush.msra.mxu0 %v7584_v9  ;;  %7999 = vmatpush.msra.mxu1 %v7595_v53  ;;  %v7680_v53 = vmax.f32 %v6863_v41, 0.0  ;;  %v7580_v37 = vmax.f32 %v6607_v1, 0.0 }
 0x4d2   :  { %7927 = vmatmul.f32.vlgmr.msrb.gmra.mxu2 %v7714_v38  ;;  %v7591_v43 = vmax.f32 %v6860_v33, 0.0 }
 0x4d3   :  { %7977 = vmatpush.msra.mxu0 %v7672_v30  ;;  %8000 = vmatpush.msra.mxu1 %v7683_v61  ;;  %v14594_v15 = vpop.f32.mrf.mxu2  ;;  %v14596_v22 = vpop.f32.mrf.mxu3  ;;  %v6840_v61 = vadd.f32 %v14377_v31, %v14162_v8  ;;  %v7716_v31 = vld [vmem:[%s14884_s7 + $0x30] sm:$0xff]  ;;  %v6817_v30 = vadd.f32 %v14375_v12, %v14162_v8  ;;  %v7750_v12 = vld [vmem:[%s14884_s7 + $0x140] sm:$0xff] }
 0x4d4   :  { %7875 = vmatmul.f32.gmra.mxu0 %v7736_v35  ;;  %v7113_v36 = vadd.f32 %v14596_v22, %v14199_v58  ;;  %v7090_v41 = vadd.f32 %v14594_v15, %v14199_v58  ;;  %v7740_v22 = vld [vmem:[%s14884_s7 + $0xf0] sm:$0xff]  ;;  %v7067_v15 = vadd.f32 %v14568_v63, %v14199_v58 }
 0x4d5   :  { %7978 = vmatpush.msra.mxu0 %v7583_v7  ;;  %7904 = vmatmul.f32.gmra.mxu1 %v7737_v54  ;;  %v7679_v35 = vmax.f32 %v6840_v61, 0.0  ;;  %v7739_v54 = vld [vmem:[%s14884_s7 + $0xe8] sm:$0xff]  ;;  %v6794_v7 = vadd.f32 %v14341_v19, %v14162_v8  ;;  %v7728_v19 = vld [vmem:[%s14884_s7 + $0x90] sm:$0xff] }
 0x4d6   :  { %7956 = vmatmul.f32.vlgmr.msrb.gmra.mxu3 %v7715_v57  ;;  %8001 = vmatpush.msra.mxu1 %v7594_v18  ;;  %v14604_v55 = vpop.f32.mrf.mxu0  ;;  %v14606_v50 = vpop.f32.mrf.mxu1  ;;  %v7678_v57 = vmax.f32 %v6817_v30, 0.0  ;;  %v7589_v18 = vmax.f32 %v6814_v62, 0.0  ;;  %v7601_v33 = vmax.f32 %v7090_v41, 0.0  ;;  %v7752_v61 = vld [vmem:[%s14884_s7 + $0x150] sm:$0xff] }
 0x4d7   :  { %7979 = vmatpush.msra.mxu0 %v7671_v44  ;;  %v7677_v44 = vmax.f32 %v6794_v7, 0.0  ;;  %v7070_v1 = vadd.f32 %v14606_v50, %v14162_v8  ;;  %v7044_v50 = vadd.f32 %v14566_v60, %v14199_v58  ;;  %v7741_v60 = vld [vmem:[%s14884_s7 + $0xf8] sm:$0xff]  ;;  %v6975_v7 = vadd.f32 %v14481_v24, %v14199_v58 }
 0x4d8   :  { %8002 = vmatpush.msra.mxu1 %v7682_v16 }
 0x4d9   :  { %7980 = vmatpush.msra.mxu0 %v7582_v59  ;;  %v7588_v59 = vmax.f32 %v6791_v49, 0.0  ;;  %v7599_v56 = vmax.f32 %v7044_v50, 0.0  ;;  %v7596_v49 = vmax.f32 %v6975_v7, 0.0 }
 0x4da   :  { %7930 = vmatmul.f32.gmra.mxu2 %v7726_v42  ;;  %8003 = vmatpush.msra.mxu1 %v7593_v27  ;;  %v7717_v42 = vld [vmem:[%s14884_s7 + $0x38] sm:$0xff] }
 0x4db   :  { %7981 = vmatpush.msra.mxu0 %v7670_v25 }
 0x4dc   :  { %7878 = vmatmul.f32.gmra.mxu0 %v7748_v11  ;;  %8004 = vmatpush.msra.mxu1 %v7681_v23 }
 0x4dd   :  { %7982 = vmatpush.msra.mxu0 %v7581_v0  ;;  %7907 = vmatmul.f32.gmra.mxu1 %v7749_v47  ;;  %v7092_v3 = vpop.f32.mrf.mxu2  ;;  %v7115_v9 = vpop.f32.mrf.mxu3  ;;  %v7602_v47 = vmax.f32 %v7113_v36, 0.0 }
 0x4de   :  { %7959 = vmatmul.f32.gmra.mxu3 %v7727_v51  ;;  %8005 = vmatpush.msra.mxu1 %v7592_v4  ;;  %v7135_v38 = vpop.f32.mrf.mxu0  ;;  %v14634_v34 = vpop.f32.mrf.mxu1  ;;  %v7116_v29 = vadd.f32 %v7115_v9, %v14162_v8  ;;  %v7093_v23 = vadd.f32 %v7092_v3, %v14162_v8  ;;  %v7729_v51 = vld [vmem:[%s14884_s7 + $0x98] sm:$0xff]  ;;  %v7047_v4 = vadd.f32 %v14604_v55, %v14162_v8  ;;  %v7600_v9 = vmax.f32 %v7067_v15, 0.0 }
 0x4df   :  { %7983 = vmatpush.msra.mxu0 %v7669_v28  ;;  %v7136_v2 = vadd.f32 %v7135_v38, %v14199_v58  ;;  %v7689_v28 = vmax.f32 %v7070_v1, 0.0  ;;  %v7024_v38 = vadd.f32 %v14564_v5, %v14162_v8  ;;  %v6998_v5 = vadd.f32 %v14513_v45, %v14199_v58 }
 0x4e0   :  { %8006 = vmatpush.msra.mxu1 %v7680_v53  ;;  %v7691_v20 = vmax.f32 %v7116_v29, 0.0  ;;  %v7690_v0 = vmax.f32 %v7093_v23, 0.0  ;;  %v7688_v55 = vmax.f32 %v7047_v4, 0.0 }
 0x4e1   :  { %7984 = vmatpush.msra.mxu0 %v7580_v37  ;;  %v7603_v27 = vmax.f32 %v7136_v2, 0.0 }
 0x4e2   :  { %7933 = vmatmul.f32.gmra.mxu2 %v7738_v32  ;;  %8007 = vmatpush.msra.mxu1 %v7591_v43  ;;  %v7021_v32 = vadd.f32 %v14515_v46, %v14199_v58  ;;  %v7001_v43 = vadd.f32 %v14562_v26, %v14162_v8  ;;  %v6978_v46 = vadd.f32 %v14525_v40, %v14162_v8  ;;  %v7753_v26 = vld [vmem:[%s14884_s7 + $0x158] sm:$0xff]  ;;  %v7718_v40 = vld [vmem:[%s14884_s7 + $0x40] sm:$0xff] }
 0x4e4   :  { %7985 = vmatmul.f32.vlgmr.msra.gmra.mxu0 %v7716_v31  ;;  %8008 = vmatpush.msra.mxu1 %v7679_v35  ;;  %v7687_v31 = vmax.f32 %v7024_v38, 0.0  ;;  %v7598_v30 = vmax.f32 %v7021_v32, 0.0 }
 0x4e5   :  { %v14651_v14 = vpop.f32.mrf.mxu2  ;;  %v14658_v13 = vpop.f32.mrf.mxu3 }
 0x4e6   :  { %7962 = vmatmul.f32.gmra.mxu3 %v7739_v54  ;;  %8009 = vmatpush.msra.mxu1 %v7590_v39  ;;  %v7686_v39 = vmax.f32 %v7001_v43, 0.0  ;;  %v7182_v32 = vadd.f32 %v14651_v14, %v14199_v58  ;;  %v14781_v43 = vpop.permute.xlu0 %7779 }
 0x4e8   :  { %8010 = vmatpush.msra.mxu1 %v7678_v57  ;;  %v7138_v48 = vpop.f32.mrf.mxu0  ;;  %v14662_v16 = vpop.f32.mrf.mxu1  ;;  %v7597_v57 = vmax.f32 %v6998_v5, 0.0 }
 0x4e9   :  { %v7139_v21 = vadd.f32 %v7138_v48, %v14162_v8 }
 0x4ea   :  { %7936 = vmatmul.f32.gmra.mxu2 %v7750_v12  ;;  %8011 = vmatpush.msra.mxu1 %v7589_v18  ;;  %v7685_v12 = vmax.f32 %v6978_v46, 0.0 }
 0x4eb   :  { %v7692_v10 = vmax.f32 %v7139_v21, 0.0 }
 0x4ec   :  { %7988 = vmatmul.f32.gmra.mxu0 %v7728_v19  ;;  %8012 = vmatpush.msra.mxu1 %v7677_v44 }
 0x4ed   :  { %8027 = vmatpush.msra.mxu2 %v7692_v10 }
 0x4ee   :  { %7965 = vmatmul.f32.gmra.mxu3 %v7751_v6  ;;  %8013 = vmatpush.msra.mxu1 %v7588_v59  ;;  %v7730_v59 = vld [vmem:[%s14884_s7 + $0xa0] sm:$0xff] }
 0x4ef   :  { %8014 = vmatmul.f32.vlgmr.msra.gmra.mxu1 %v7717_v42  ;;  %v14679_v52 = vpop.f32.mrf.mxu2  ;;  %8028 = vmatpush.msra.mxu2 %v7603_v27  ;;  %v14690_v17 = vpop.f32.mrf.mxu3 }
 0x4f0   :  { %v14681_v25 = vpop.f32.mrf.mxu0  ;;  %v14683_v11 = vpop.f32.mrf.mxu1 }
 0x4f1   :  { %8029 = vmatpush.msra.mxu2 %v7691_v20 }
 0x4f3   :  { %8030 = vmatpush.msra.mxu2 %v7602_v47 }
 0x4f4   :  { %7991 = vmatmul.f32.gmra.mxu0 %v7740_v22 }
 0x4f5   :  { %8031 = vmatpush.msra.mxu2 %v7690_v0  ;;  %v7251_v0 = vadd.f32 %v14683_v11, %v14199_v58  ;;  %v7208_v11 = vadd.f32 %v14690_v17, %v14162_v8 }
 0x4f7   :  { %8017 = vmatmul.f32.gmra.mxu1 %v7729_v51  ;;  %v7273_v3 = vpop.f32.mrf.mxu2  ;;  %8032 = vmatpush.msra.mxu2 %v7601_v33  ;;  %v7296_v37 = vpop.f32.mrf.mxu3  ;;  %v7742_v33 = vld [vmem:[%s14884_s7 + $0x100] sm:$0xff]  ;;  %v7608_v50 = vmax.f32 %v7251_v0, 0.0 }
 0x4f8   :  { %v7297_v29 = vadd.f32 %v7296_v37, %v14199_v58  ;;  %v7274_v23 = vadd.f32 %v7273_v3, %v14199_v58  ;;  %v7228_v3 = vadd.f32 %v14681_v25, %v14199_v58  ;;  %v7754_v25 = vld [vmem:[%s14884_s7 + $0x160] sm:$0xff]  ;;  %v7185_v37 = vadd.f32 %v14679_v52, %v14162_v8 }
 0x4f9   :  { %8033 = vmatpush.msra.mxu2 %v7689_v28  ;;  %v7159_v52 = vadd.f32 %v14634_v34, %v14199_v58 }
 0x4fa   :  { %v14706_v53 = vpop.f32.mrf.mxu0  ;;  %v7253_v63 = vpop.f32.mrf.mxu1  ;;  %v7610_v20 = vmax.f32 %v7297_v29, 0.0  ;;  %v7609_v51 = vmax.f32 %v7274_v23, 0.0 }
 0x4fb   :  { %8034 = vmatpush.msra.mxu2 %v7600_v9  ;;  %v7254_v22 = vadd.f32 %v7253_v63, %v14162_v8  ;;  %v7231_v4 = vadd.f32 %v14706_v53, %v14162_v8  ;;  %v7205_v53 = vadd.f32 %v14658_v13, %v14199_v58  ;;  %v7162_v13 = vadd.f32 %v14662_v16, %v14162_v8  ;;  %v7765_v16 = vpop.permute.xlu0 %7764  ;;  %v7770_v23 = vpop.permute.xlu2 %7769 }
 0x4fc   :  { %7994 = vmatmul.f32.gmra.mxu0 %v7752_v61  ;;  %v7604_v14 = vmax.f32 %v7159_v52, 0.0 }
 0x4fd   :  { %8035 = vmatpush.msra.mxu2 %v7688_v55  ;;  %v7697_v28 = vmax.f32 %v7254_v22, 0.0  ;;  %v7696_v61 = vmax.f32 %v7231_v4, 0.0  ;;  %v7607_v55 = vmax.f32 %v7228_v3, 0.0  ;;  %v7693_v46 = vmax.f32 %v7162_v13, 0.0  ;;  %v7743_v4 = vld [vmem:[%s14884_s7 + $0x108] sm:$0xff]  ;;  %v7721_v3 = vld [vmem:[%s14884_s7 + $0x58] sm:$0xff] }
 0x4fe   :  { %v7755_v13 = vld [vmem:[%s14884_s7 + $0x168] sm:$0xff] }
 0x4ff   :  { %8020 = vmatmul.f32.gmra.mxu1 %v7741_v60  ;;  %8036 = vmatpush.msra.mxu2 %v7599_v56  ;;  %v7695_v60 = vmax.f32 %v7208_v11, 0.0  ;;  %v7606_v56 = vmax.f32 %v7205_v53, 0.0 }
 0x501   :  { %v7276_v35 = vpop.f32.mrf.mxu2  ;;  %8037 = vmatpush.msra.mxu2 %v7687_v31  ;;  %v7299_v45 = vpop.f32.mrf.mxu3  ;;  %v7694_v31 = vmax.f32 %v7185_v37, 0.0 }
 0x502   :  { %v7319_v54 = vpop.f32.mrf.mxu0  ;;  %v14719_v62 = vpop.f32.mrf.mxu1  ;;  %v7300_v21 = vadd.f32 %v7299_v45, %v14162_v8  ;;  %v7277_v42 = vadd.f32 %v7276_v35, %v14162_v8 }
 0x503   :  { %8038 = vmatpush.msra.mxu2 %v7598_v30  ;;  %v7320_v24 = vadd.f32 %v7319_v54, %v14199_v58  ;;  %v7605_v30 = vmax.f32 %v7182_v32, 0.0 }
 0x504   :  { %v7699_v36 = vmax.f32 %v7300_v21, 0.0  ;;  %v7698_v1 = vmax.f32 %v7277_v42, 0.0 }
 0x505   :  { %8039 = vmatpush.msra.mxu2 %v7686_v39  ;;  %v7611_v10 = vmax.f32 %v7320_v24, 0.0 }
 0x507   :  { %8023 = vmatmul.f32.gmra.mxu1 %v7753_v26  ;;  %8040 = vmatpush.msra.mxu2 %v7597_v57  ;;  %v7719_v26 = vld [vmem:[%s14884_s7 + $0x48] sm:$0xff] }
 0x509   :  { %v14728_v18 = vpop.f32.mrf.mxu2  ;;  %8041 = vmatpush.msra.mxu2 %v7685_v12  ;;  %v14738_v44 = vpop.f32.mrf.mxu3 }
 0x50b   :  { %8042 = vmatpush.msra.mxu2 %v7596_v49 }
 0x50c   :  { %v7322_v48 = vpop.f32.mrf.mxu0  ;;  %v14733_v19 = vpop.f32.mrf.mxu1  ;;  %8043 = vmatmul.f32.vlgmr.msra.gmra.mxu2 %v7718_v40 }
 0x50d   :  { %v7323_v2 = vadd.f32 %v7322_v48, %v14162_v8 }
 0x50f   :  { %v7700_v6 = vmax.f32 %v7323_v2, 0.0  ;;  %v7731_v2 = vld [vmem:[%s14884_s7 + $0xa8] sm:$0xff] }
 0x511   :  { %8056 = vmatpush.msra.mxu3 %v7700_v6 }
 0x513   :  { %v14745_v27 = vpop.f32.mrf.mxu2  ;;  %8057 = vmatpush.msra.mxu3 %v7611_v10  ;;  %v14755_v15 = vpop.f32.mrf.mxu3 }
 0x514   :  { %8046 = vmatmul.f32.gmra.mxu2 %v7730_v59  ;;  %v14748_v41 = vpop.f32.mrf.mxu0  ;;  %v14750_v47 = vpop.f32.mrf.mxu1 }
 0x515   :  { %8058 = vmatpush.msra.mxu3 %v7699_v36  ;;  %v7412_v32 = vadd.f32 %v14748_v41, %v14199_v58  ;;  %v7389_v41 = vadd.f32 %v14738_v44, %v14199_v58  ;;  %v7745_v44 = vld [vmem:[%s14884_s7 + $0x118] sm:$0xff] }
 0x517   :  { %8059 = vmatpush.msra.mxu3 %v7610_v20  ;;  %v7615_v52 = vmax.f32 %v7412_v32, 0.0 }
 0x519   :  { %8060 = vmatpush.msra.mxu3 %v7698_v1 }
 0x51b   :  { %8061 = vmatpush.msra.mxu3 %v7609_v51 }
 0x51c   :  { %8049 = vmatmul.f32.gmra.mxu2 %v7742_v33  ;;  %v14764_v9 = vpop.f32.mrf.mxu2  ;;  %v7480_v17 = vpop.f32.mrf.mxu3 }
 0x51d   :  { %8062 = vmatpush.msra.mxu3 %v7697_v28  ;;  %v7481_v59 = vadd.f32 %v7480_v17, %v14199_v58  ;;  %v7458_v51 = vadd.f32 %v14764_v9, %v14199_v58 }
 0x51f   :  { %8063 = vmatpush.msra.mxu3 %v7608_v50  ;;  %v14768_v63 = vpop.f32.mrf.mxu0  ;;  %v14770_v38 = vpop.f32.mrf.mxu1  ;;  %v7618_v33 = vmax.f32 %v7481_v59, 0.0 }
 0x520   :  { %v7438_v50 = vadd.f32 %v14770_v38, %v14162_v8  ;;  %v7415_v17 = vadd.f32 %v14768_v63, %v14162_v8 }
 0x521   :  { %8064 = vmatpush.msra.mxu3 %v7696_v61 }
 0x522   :  { %v7705_v38 = vmax.f32 %v7438_v50, 0.0 }
 0x523   :  { %8065 = vmatpush.msra.mxu3 %v7607_v55  ;;  %v7435_v55 = vadd.f32 %v14750_v47, %v14199_v58  ;;  %v7733_v47 = vld [vmem:[%s14884_s7 + $0xb8] sm:$0xff] }
 0x524   :  { %8052 = vmatmul.f32.gmra.mxu2 %v7754_v25  ;;  %v7617_v25 = vmax.f32 %v7458_v51, 0.0 }
 0x525   :  { %8066 = vmatpush.msra.mxu3 %v7695_v60 }
 0x526   :  { %v7460_v5 = vpop.f32.mrf.mxu2  ;;  %v7483_v39 = vpop.f32.mrf.mxu3 }
 0x527   :  { %8067 = vmatpush.msra.mxu3 %v7606_v56  ;;  %v7484_v6 = vadd.f32 %v7483_v39, %v14162_v8  ;;  %v7461_v20 = vadd.f32 %v7460_v5, %v14162_v8  ;;  %v7616_v56 = vmax.f32 %v7435_v55, 0.0  ;;  %v7704_v5 = vmax.f32 %v7415_v17, 0.0 }
 0x528   :  { %v7614_v39 = vmax.f32 %v7389_v41, 0.0 }
 0x529   :  { %8068 = vmatpush.msra.mxu3 %v7694_v31  ;;  %v7707_v22 = vmax.f32 %v7484_v6, 0.0  ;;  %v7706_v11 = vmax.f32 %v7461_v20, 0.0  ;;  %v7392_v31 = vadd.f32 %v14755_v15, %v14162_v8  ;;  %v7366_v15 = vadd.f32 %v14728_v18, %v14199_v58  ;;  %v7757_v18 = vld [vmem:[%s14884_s7 + $0x178] sm:$0xff] }
 0x52a   :  { %v7503_v35 = vpop.f32.mrf.mxu0  ;;  %v7526_v54 = vpop.f32.mrf.mxu1 }
 0x52b   :  { %8069 = vmatpush.msra.mxu3 %v7605_v30  ;;  %v7504_v12 = vadd.f32 %v7503_v35, %v14199_v58  ;;  %v7527_v49 = vadd.f32 %v7526_v54, %v14199_v58  ;;  %v7369_v54 = vadd.f32 %v14745_v27, %v14162_v8  ;;  %v7343_v27 = vadd.f32 %v14719_v62, %v14199_v58  ;;  %v7732_v58 = vld [vmem:[%s14884_s7 + $0xb0] sm:$0xff] }
 0x52c   :  { %v7744_v62 = vld [vmem:[%s14884_s7 + $0x110] sm:$0xff] }
 0x52d   :  { %8070 = vmatpush.msra.mxu3 %v7693_v46  ;;  %v7619_v42 = vmax.f32 %v7504_v12, 0.0  ;;  %v7620_v36 = vmax.f32 %v7527_v49, 0.0  ;;  %v7703_v46 = vmax.f32 %v7392_v31, 0.0 }
 0x52f   :  { %8071 = vmatpush.msra.mxu3 %v7604_v14 }
 0x530   :  { %8072 = vmatmul.f32.vlgmr.msra.gmra.mxu3 %v7719_v26  ;;  %v7346_v26 = vadd.f32 %v14733_v19, %v14162_v8  ;;  %v7756_v19 = vld [vmem:[%s14884_s7 + $0x170] sm:$0xff] }
 0x531   :  { %v7812_v7 = vpop.f32.mrf.mxu2 }
 0x532   :  { %v7813_v57 = vadd.f32 %v7812_v7, %v7765_v16  ;;  %v7702_v16 = vmax.f32 %v7369_v54, 0.0  ;;  %v7613_v7 = vmax.f32 %v7366_v15, 0.0 }
 0x534   :  { %v7506_v45 = vpop.f32.mrf.mxu0  ;;  %v7529_v34 = vpop.f32.mrf.mxu1 }
 0x535   :  { %v7507_v40 = vadd.f32 %v7506_v45, %v14162_v8  ;;  %v7530_v48 = vadd.f32 %v7529_v34, %v14162_v8  ;;  %v7841_v24 = vpop.f32.mrf.mxu3  ;;  %v7612_v45 = vmax.f32 %v7343_v27, 0.0  ;;  %v7720_v8 = vld [vmem:[%s14884_s7 + $0x50] sm:$0xff] }
 0x536   :  { %v7842_v21 = vadd.f32 %v7841_v24, %v7813_v57  ;;  %v7701_v57 = vmax.f32 %v7346_v26, 0.0 }
 0x537   :  { %v7708_v29 = vmax.f32 %v7507_v40, 0.0  ;;  %v7709_v10 = vmax.f32 %v7530_v48, 0.0 }
 0x538   :  { %8075 = vmatmul.f32.gmra.mxu3 %v7731_v2 }
 0x539   :  { %8085 = vmatpush.msrb.mxu0 %v7708_v29  ;;  %8128 = vmatpush.msrb.mxu1 %v7709_v10 }
 0x53b   :  { %v7815_v1 = vpop.f32.mrf.mxu2  ;;  %8086 = vmatpush.msrb.mxu0 %v7619_v42  ;;  %8129 = vmatpush.msrb.mxu1 %v7620_v36 }
 0x53c   :  { %v7816_v0 = vadd.f32 %v7815_v1, %v7770_v23  ;;  %8841 = vmatmul.msk.f32.vlgmr.msrb.gmra.mxu1 %vm7782_vm3, %v7721_v3 }
 0x53d   :  { %8087 = vmatpush.msrb.mxu0 %v7707_v22 }
 0x53e   :  { %v7844_v28 = vpop.f32.mrf.mxu3 }
 0x53f   :  { %v7845_v61 = vadd.f32 %v7844_v28, %v7816_v0  ;;  %v7870_v53 = vpop.f32.mrf.mxu0  ;;  %8088 = vmatpush.msrb.mxu0 %v7618_v33 }
 0x540   :  { %v7871_v9 = vadd.f32 %v7870_v53, %v7842_v21  ;;  %8078 = vmatmul.f32.gmra.mxu3 %v7743_v4  ;;  %v7775_v53 = vpop.permute.xlu1 %7774 }
 0x541   :  { %v7899_v37 = vpop.f32.mrf.mxu1  ;;  %8089 = vmatpush.msrb.mxu0 %v7706_v11 }
 0x542   :  { %v14813_v60 = vadd.f32 %v7899_v37, %v7871_v9 }
 0x543   :  { %8090 = vmatpush.msrb.mxu0 %v7617_v25 }
 0x544   :  { %8842 = vmatmul.msk.f32.gmra.mxu1 %vm7782_vm3, %v7733_v47  ;;  %v7818_v34 = vpop.f32.mrf.mxu2 }
 0x545   :  { %8091 = vmatpush.msrb.mxu0 %v7705_v38  ;;  %v7819_v9 = vadd.f32 %v7818_v34, %v7775_v53 }
 0x547   :  { %8092 = vmatpush.msrb.mxu0 %v7616_v56  ;;  %v7847_v12 = vpop.f32.mrf.mxu3 }
 0x548   :  { %v7873_v63 = vpop.f32.mrf.mxu0  ;;  %8081 = vmatmul.f32.gmra.mxu3 %v7755_v13  ;;  %v7848_v38 = vadd.f32 %v7847_v12, %v7819_v9 }
 0x549   :  { %v7874_v30 = vadd.f32 %v7873_v63, %v7845_v61  ;;  %8093 = vmatpush.msrb.mxu0 %v7704_v5 }
 0x54a   :  { %v7902_v35 = vpop.f32.mrf.mxu1 }
 0x54b   :  { %v14832_v14 = vadd.f32 %v7902_v35, %v7874_v30  ;;  %8094 = vmatpush.msrb.mxu0 %v7615_v52 }
 0x54c   :  { %8843 = vmatmul.msk.f32.gmra.mxu1 %vm7782_vm3, %v7745_v44 }
 0x54d   :  { %8095 = vmatpush.msrb.mxu0 %v7703_v46  ;;  %v7821_v40 = vpop.f32.mrf.mxu2 }
 0x54e   :  { %v7822_v25 = vadd.f32 %v7821_v40, %v14781_v43 }
 0x54f   :  { %8096 = vmatpush.msrb.mxu0 %v7614_v39 }
 0x550   :  { %v7850_v48 = vpop.f32.mrf.mxu3 }
 0x551   :  { %8097 = vmatpush.msrb.mxu0 %v7702_v16  ;;  %v7876_v24 = vpop.f32.mrf.mxu0  ;;  %v7851_v32 = vadd.f32 %v7850_v48, %v7822_v25 }
 0x552   :  { %v7905_v49 = vpop.f32.mrf.mxu1  ;;  %v7877_v56 = vadd.f32 %v7876_v24, %v7848_v38 }
 0x553   :  { %8098 = vmatpush.msrb.mxu0 %v7613_v7 }
 0x554   :  { %8844 = vmatmul.msk.f32.gmra.mxu1 %vm7782_vm3, %v7757_v18  ;;  %v7906_v31 = vadd.f32 %v7905_v49, %v7877_v56 }
 0x555   :  { %8099 = vmatpush.msrb.mxu0 %v7701_v57  ;;  %v7928_v21 = vpop.f32.mrf.mxu2 }
 0x556   :  { %v7929_v46 = vadd.f32 %v7928_v21, %v14813_v60 }
 0x557   :  { %8100 = vmatpush.msrb.mxu0 %v7612_v45 }
 0x558   :  { %8101 = vmatmul.f32.vlgmr.msrb.gmra.mxu0 %v7720_v8 }
 0x559   :  { %v7879_v6 = vpop.f32.mrf.mxu0  ;;  %v7957_v29 = vpop.f32.mrf.mxu3 }
 0x55a   :  { %v7908_v2 = vpop.f32.mrf.mxu1  ;;  %v7880_v47 = vadd.f32 %v7879_v6, %v7851_v32  ;;  %v7958_v27 = vadd.f32 %v7957_v29, %v7929_v46 }
 0x55c   :  { %v7909_v41 = vadd.f32 %v7908_v2, %v7880_v47 }
 0x55d   :  { %v7931_v59 = vpop.f32.mrf.mxu2 }
 0x55e   :  { %v7932_v35 = vadd.f32 %v7931_v59, %v14832_v14 }
 0x560   :  { %8104 = vmatmul.f32.gmra.mxu0 %v7732_v58 }
 0x561   :  { %v7960_v42 = vpop.f32.mrf.mxu3  ;;  %v7986_v36 = vpop.f32.mrf.mxu0 }
 0x562   :  { %v7961_v39 = vadd.f32 %v7960_v42, %v7932_v35  ;;  %v7987_v8 = vadd.f32 %v7986_v36, %v7958_v27 }
 0x565   :  { %v7934_v20 = vpop.f32.mrf.mxu2 }
 0x566   :  { %v7935_v52 = vadd.f32 %v7934_v20, %v7906_v31 }
 0x568   :  { %8107 = vmatmul.f32.gmra.mxu0 %v7744_v62 }
 0x569   :  { %v7963_v22 = vpop.f32.mrf.mxu3  ;;  %v7989_v1 = vpop.f32.mrf.mxu0 }
 0x56a   :  { %v7964_v15 = vadd.f32 %v7963_v22, %v7935_v52  ;;  %v7990_v7 = vadd.f32 %v7989_v1, %v7961_v39 }
 0x56c   :  { %v8015_v10 = vpop.f32.mrf.mxu1 }
 0x56d   :  { %v7937_v51 = vpop.f32.mrf.mxu2  ;;  %v8016_v14 = vadd.f32 %v8015_v10, %v7987_v8 }
 0x56e   :  { %v7938_v54 = vadd.f32 %v7937_v51, %v7909_v41 }
 0x570   :  { %8110 = vmatmul.f32.gmra.mxu0 %v7756_v19 }
 0x571   :  { %v7966_v33 = vpop.f32.mrf.mxu3  ;;  %v7992_v4 = vpop.f32.mrf.mxu0 }
 0x572   :  { %v7967_v44 = vadd.f32 %v7966_v33, %v7938_v54  ;;  %v7993_v26 = vadd.f32 %v7992_v4, %v7964_v15  ;;  %v8147_v4 = vld [vmem:[%s14885_s9] sm:$0xff] }
 0x574   :  { %v8018_v23 = vpop.f32.mrf.mxu1 }
 0x575   :  { %v8019_v58 = vadd.f32 %v8018_v23, %v7990_v7 }
 0x579   :  { %v7995_v11 = vpop.f32.mrf.mxu0 }
 0x57a   :  { %v7996_v57 = vadd.f32 %v7995_v11, %v7967_v44 }
 0x57c   :  { %v8021_v0 = vpop.f32.mrf.mxu1 }
 0x57d   :  { %v8022_v18 = vadd.f32 %v8021_v0, %v7993_v26 }
 0x584   :  { %v8024_v28 = vpop.f32.mrf.mxu1 }
 0x585   :  { %v8025_v62 = vadd.f32 %v8024_v28, %v7996_v57  ;;  %v8148_v28 = vld [vmem:[%s14885_s9 + $0x8] sm:$0x3] }
 0x58f   :  { %v8044_v3 = vpop.f32.mrf.mxu2 }
 0x590   :  { %v8045_v40 = vadd.f32 %v8044_v3, %v8016_v14  ;;  %v8154_v3 = vpop.permute.xlu1 %8153 }
 0x597   :  { %v8047_v55 = vpop.f32.mrf.mxu2 }
 0x598   :  { %v8048_v12 = vadd.f32 %v8047_v55, %v8019_v58 }
 0x59f   :  { %v8050_v5 = vpop.f32.mrf.mxu2 }
 0x5a0   :  { %v8051_v19 = vadd.f32 %v8050_v5, %v8022_v18 }
 0x5a7   :  { %v8053_v45 = vpop.f32.mrf.mxu2 }
 0x5a8   :  { %v8054_v49 = vadd.f32 %v8053_v45, %v8025_v62 }
 0x5b3   :  { %v8073_v50 = vpop.f32.mrf.mxu3 }
 0x5b4   :  { %v8074_v29 = vadd.f32 %v8073_v50, %v8045_v40 }
 0x5b9   :  { %v8131_v61 = vpop.f32.mrf.mxu1 }
 0x5bb   :  { %v8076_v37 = vpop.f32.mrf.mxu3 }
 0x5bc   :  { %v8077_v48 = vadd.f32 %v8076_v37, %v8048_v12 }
 0x5c1   :  { %v8134_v13 = vpop.f32.mrf.mxu1 }
 0x5c3   :  { %v8079_v30 = vpop.f32.mrf.mxu3 }
 0x5c4   :  { %v8080_v60 = vadd.f32 %v8079_v30, %v8051_v19 }
 0x5c9   :  { %v8137_v43 = vpop.f32.mrf.mxu1 }
 0x5cb   :  { %v8082_v34 = vpop.f32.mrf.mxu3 }
 0x5cc   :  { %v8083_v24 = vadd.f32 %v8082_v34, %v8054_v49 }
 0x5d1   :  { %v8140_v6 = vpop.f32.mrf.mxu1 }
 0x5d5   :  { %v8102_v17 = vpop.f32.mrf.mxu0 }
 0x5d6   :  { %v8103_v20 = vadd.f32 %v8102_v17, %v8074_v29 }
 0x5d8   :  { %v8132_v0 = vadd.f32 %v8131_v61, %v8103_v20  ;;  %v8159_v61 = vpop.permute.xlu2 %8158 }
 0x5da   :  { %v8143_v33 = vmax.f32 %v8132_v0, 0.0 }
 0x5dd   :  { %v8105_v63 = vpop.f32.mrf.mxu0 }
 0x5de   :  { %v8106_v59 = vadd.f32 %v8105_v63, %v8077_v48 }
 0x5e0   :  { %v8135_v23 = vadd.f32 %v8134_v13, %v8106_v59 }
 0x5e2   :  { %v8144_v10 = vmax.f32 %v8135_v23, 0.0 }
 0x5e5   :  { %v8108_v16 = vpop.f32.mrf.mxu0 }
 0x5e6   :  { %v8109_v2 = vadd.f32 %v8108_v16, %v8080_v60 }
 0x5e8   :  { %v8138_v22 = vadd.f32 %v8137_v43, %v8109_v2 }
 0x5ea   :  { %v8145_v51 = vmax.f32 %v8138_v22, 0.0 }
 0x5ed   :  { %v8111_v21 = vpop.f32.mrf.mxu0 }
 0x5ee   :  { %v8112_v42 = vadd.f32 %v8111_v21, %v8083_v24 }
 0x5f0   :  { %v8141_v36 = vadd.f32 %v8140_v6, %v8112_v42 }
 0x5f2   :  { %v8146_v1 = vmax.f32 %v8141_v36, 0.0 }
 0x5f4   :  { %8180 = vmatpush.msrb.mxu2 %v8146_v1 }
 0x5f6   :  { %8181 = vmatpush.msrb.mxu2 %v8145_v51 }
 0x5f8   :  { %8182 = vmatpush.msrb.mxu2 %v8144_v10 }
 0x5fa   :  { %8183 = vmatpush.msrb.mxu2 %v8143_v33 }
 0x5fb   :  { %8845 = vmatmul.msk.f32.vlgmr.msrb.gmra.mxu2 %vm8161_vm4, %v8147_v4 }
 0x603   :  { %8846 = vmatmul.msk.f32.gmra.mxu2 %vm8161_vm4, %v8148_v28 }
 0x67e   :  { %v8185_v50 = vpop.f32.mrf.mxu2 }
 0x67f   :  { %v8186_v11 = vadd.f32 %v8185_v50, %v8154_v3 }
 0x681   :  { %8191 = vst [vmem:[%s14886_s11] sm:$0xff] %v8186_v11 }
 0x686   :  { %v8188_v53 = vpop.f32.mrf.mxu2 }
 0x687   :  { %v8189_v9 = vadd.f32 %v8188_v53, %v8159_v61 }
 0x689   :  { %8192 = vst [vmem:[%s14886_s11 + $0x8] sm:$0x3] %v8189_v9 }

</bundles_post_ra>
